<compile_context>
chip_gen: v7x
topology: tpu7x:2x2x1
jax: 0.10.0
libtpu: 0.0.40
codegen_flags: <defaults>
</compile_context>

<pallas_src>
import functools

import jax
import jax.numpy as jnp
from jax.experimental import pallas as pl
from jax.experimental.pallas import tpu as pltpu


def _round_up(x, m):
    return (x + m - 1) // m * m


def VMEM_SPEC():
    return pl.BlockSpec(memory_space=pltpu.MemorySpace.VMEM)


# --------------------------------------------------------------------------
# Pallas kernels
# --------------------------------------------------------------------------

def _softplus(x):
    # numerically stable softplus: max(x,0) + log(1 + exp(-|x|))
    return jnp.maximum(x, 0.0) + jnp.log(1.0 + jnp.exp(-jnp.abs(x)))


def _matmul_kernel(x_ref, w_ref, b_ref, o_ref, *, act):
    # Single-K-step matmul (K fits in one block): no scratch accumulator needed.
    r = jnp.dot(x_ref[...], w_ref[...], preferred_element_type=jnp.float32) + b_ref[...]
    if act == 'relu':
        r = jnp.maximum(r, 0.0)
    elif act == 'softplus':
        r = _softplus(r)
    o_ref[...] = r


def _matmul_acc_kernel(x_ref, w_ref, b_ref, o_ref, acc_ref, *, act):
    # General tiled matmul with f32 accumulator (used only when the K grid > 1).
    @pl.when(pl.program_id(2) == 0)
    def _():
        acc_ref[...] = jnp.zeros_like(acc_ref)

    acc_ref[...] += jnp.dot(x_ref[...], w_ref[...], preferred_element_type=jnp.float32)

    @pl.when(pl.program_id(2) == pl.num_programs(2) - 1)
    def _():
        r = acc_ref[...] + b_ref[...]
        if act == 'relu':
            r = jnp.maximum(r, 0.0)
        elif act == 'softplus':
            r = _softplus(r)
        o_ref[...] = r


def _norm_matmul_kernel(x_ref, nw_ref, nb_ref, w_ref, b_ref, o_ref, *, kind, act):
    # Fused LayerNorm/RMSNorm (over full K, in f32) + matmul (bf16 on MXU) + bias
    # + optional activation epilogue.  x: (tm, K) f32, w: (K, tn) bf16.
    x = x_ref[...]
    if kind == 'layer':
        mu = jnp.mean(x, axis=-1, keepdims=True)
        xc = x - mu
        var = jnp.mean(xc * xc, axis=-1, keepdims=True)
        xn = xc * jax.lax.rsqrt(var + 1e-5) * nw_ref[...] + nb_ref[...]
    else:  # 'rms' - reference RMSNorm uses eps=1e-5
        ms = jnp.mean(x * x, axis=-1, keepdims=True)
        xn = x * jax.lax.rsqrt(ms + 1e-5) * nw_ref[...]
    r = jnp.dot(xn.astype(jnp.bfloat16), w_ref[...],
                preferred_element_type=jnp.float32) + b_ref[...]
    if act == 'relu':
        r = jnp.maximum(r, 0.0)
    o_ref[...] = r


def _dwconv_silu_kernel(xp_ref, w_ref, b_ref, o_ref):
    # Depthwise conv1d + SiLU, TIME-MAJOR: the tap shift is a contiguous
    # leading-axis slice of the loaded value (no minor-dim relayouts).
    #   xp: (L+K-1, b, d) padded, w: (K, d), b: (1, d), o: (L, b, d)
    L = o_ref.shape[0]
    K = w_ref.shape[0]
    xp = xp_ref[...]                                   # load once
    acc = jnp.zeros(o_ref.shape, jnp.float32)
    for k in range(K):                                 # static unrolled taps (K=4)
        acc = acc + xp[k:k + L] * w_ref[k:k + 1, :][None]
    acc = acc + b_ref[...][None]
    o_ref[...] = acc * jax.nn.sigmoid(acc)             # SiLU
    # TODO(synk): for long L, grid over (parallel batch, L-chunks with a K-1 halo).


def _ssm_proj_kernel(xi_ref, wx_ref, wdt_ref, bdt_ref, delta_ref, bc_ref, *, dt_rank):
    # Fused x_proj + dt_proj + softplus (shares one xi load, one kernel launch).
    #   xi: (M, d_in) f32, wx: (d_in, dt_rank + 2n) bf16,
    #   wdt: (dt_rank, d_in) f32, bdt: (1, d_in) f32.
    x_dbl = jnp.dot(xi_ref[...].astype(jnp.bfloat16), wx_ref[...],
                    preferred_element_type=jnp.float32)            # (M, dt_rank + 2n)
    # dt_proj in f32 on the VPU: dt_rank is tiny (2), avoids a 64x-padded MXU matmul
    # and keeps the softplus -> exp(dt*A) path accurate.
    dt = bdt_ref[...]
    for r in range(dt_rank):
        dt = dt + x_dbl[:, r:r + 1] * wdt_ref[r:r + 1, :]
    delta_ref[...] = _softplus(dt)
    bc_ref[...] = x_dbl[:, dt_rank:]


def _gated_matmul_kernel(y_ref, r_ref, w_ref, b_ref, o_ref):
    # Fused y * silu(res) gate + out_proj matmul.
    res = r_ref[...]
    g = y_ref[...] * (res * jax.nn.sigmoid(res))
    o_ref[...] = jnp.dot(g.astype(jnp.bfloat16), w_ref[...],
                         preferred_element_type=jnp.float32) + b_ref[...]


def _seq_mlp_kernel(x_ref, nw_ref, nb_ref, w1_ref, b1_ref, w2_ref, b2_ref, o_ref, *, kind):
    # Fused per-layer seq-MLP:
    #   out = transpose(Linear(ReLU(Linear(Norm(transpose(x))))) ) + x
    # x is TIME-MAJOR (l, b, d); the two (0,2,1) host transposes of the reference
    # are done in-kernel as cheap 2-D transposes, and the residual add is fused.
    x = x_ref[...]                                     # (l, b, d)
    l, b, d = x.shape
    xt = x.reshape(l, b * d).T                         # (b*d, l): rows over seq
    if kind == 'layer':
        mu = jnp.mean(xt, axis=-1, keepdims=True)
        xc = xt - mu
        var = jnp.mean(xc * xc, axis=-1, keepdims=True)
        xn = xc * jax.lax.rsqrt(var + 1e-5) * nw_ref[...] + nb_ref[...]
    else:  # rms
        ms = jnp.mean(xt * xt, axis=-1, keepdims=True)
        xn = xt * jax.lax.rsqrt(ms + 1e-5) * nw_ref[...]
    h = jnp.dot(xn.astype(jnp.bfloat16), w1_ref[...],
                preferred_element_type=jnp.float32) + b1_ref[...]
    h = jnp.maximum(h, 0.0)
    yt = jnp.dot(h.astype(jnp.bfloat16), w2_ref[...],
                 preferred_element_type=jnp.float32) + b2_ref[...]   # (b*d, l)
    o_ref[...] = yt.T.reshape(l, b, d) + x


def _scan_kernel(u_ref, dt_ref, B_ref, C_ref, A_ref, D_ref, Rd_ref, Rn_ref, G_ref,
                 o_ref, state_ref, dA_ref, dBu_ref, CC_ref, prods_ref, *, reverse):
    # One TIME-MAJOR time-chunk of the selective scan.  Grid axis = chunk index
    # (sequential, MUST stay "arbitrary": the SSM state persists in VMEM scratch).
    #   u/dt: (T, b, d)   B/C: (T, b, n)   A: (1, d*n)   D: (1, d)
    #   Rd: (d, d*n) with Rd[d', f] = (f//n == d')   Rn: (n, d*n) with Rn[s, f] = (f%n == s)
    #   G = Rd.T : (d*n, d)
    #   scratch: state (b, d*n); dA/dBu/CC/prods (T*b, d*n) time-major staging.
    @pl.when(pl.program_id(0) == 0)
    def _():
        state_ref[...] = jnp.zeros_like(state_ref)

    T, b, d = u_ref.shape
    n = B_ref.shape[-1]

    u2 = u_ref[...].reshape(T * b, d)                  # time-major row order (free)
    dt2 = dt_ref[...].reshape(T * b, d)
    B2 = B_ref[...].reshape(T * b, n)
    C2 = C_ref[...].reshape(T * b, n)

    # Lane-dense (T*b, d*n) expansions via 0/1 selection-matrix matmuls (MXU, exact),
    # staged straight into time-major VMEM scratch (bounds vreg liveness).
    dt_rep = jnp.dot(dt2, Rd_ref[...], preferred_element_type=jnp.float32)
    du_rep = jnp.dot(dt2 * u2, Rd_ref[...], preferred_element_type=jnp.float32)
    B_rep = jnp.dot(B2, Rn_ref[...], preferred_element_type=jnp.float32)
    C_rep = jnp.dot(C2, Rn_ref[...], preferred_element_type=jnp.float32)
    dA_ref[...] = jnp.exp(dt_rep * A_ref[...])
    dBu_ref[...] = du_rep * B_rep
    CC_ref[...] = C_rep

    st = state_ref[...]                                # (b, d*n)
    steps = range(T - 1, -1, -1) if reverse else range(T)
    for t in steps:                                    # contiguous leading-axis slices
        lo, hi = t * b, (t + 1) * b
        st = dA_ref[lo:hi, :] * st + dBu_ref[lo:hi, :]
        prods_ref[lo:hi, :] = st * CC_ref[lo:hi, :]
    state_ref[...] = st

    # y[t,b,d'] = sum_s st[t,b,d'*n+s] * C[t,b,s]  -> one MXU matmul per chunk.
    y = jnp.dot(prods_ref[...], G_ref[...], preferred_element_type=jnp.float32)  # (T*b, d)
    y = y + u2 * D_ref[...]
    o_ref[...] = y.reshape(T, b, d)


# --------------------------------------------------------------------------
# Kernel wrappers
# --------------------------------------------------------------------------

def matmul_2d(x, w, b=None, act=None):
    """x: (M, K), w: (K, N) (both cast to bf16), b: (N,)|None -> (M, N) f32."""
    M, K = x.shape
    N = w.shape[1]
    # NOTE: tile caps are conservative (~2-3 MB double-buffered) so they fit the
    # default scoped VMEM on v5e/v6e/v7x; for real-width shapes derive from
    # pltpu.get_tpu_info().vmem_capacity_bytes.
    tm = min(_round_up(M, 8), 256)
    tn = min(_round_up(N, 128), 256)     # lane-dense (>=128) output tiles
    tk = min(_round_up(K, 128), 512)
    Mp, Kp, Np = _round_up(M, tm), _round_up(K, tk), _round_up(N, tn)

    xp = x.astype(jnp.bfloat16)          # bf16 activations: half the HBM bytes
    wp = w.astype(jnp.bfloat16)
    if (Mp, Kp) != (M, K):
        xp = jnp.pad(xp, ((0, Mp - M), (0, Kp - K)))
    if (Kp, Np) != (K, N):
        wp = jnp.pad(wp, ((0, Kp - K), (0, Np - N)))
    bb = (jnp.zeros((N,), jnp.float32) if b is None else b.astype(jnp.float32)).reshape(1, N)
    if Np != N:
        bb = jnp.pad(bb, ((0, 0), (0, Np - N)))

    if Kp // tk == 1:
        # every matmul in this model hits this path: no scratch, no pl.when gating
        out = pl.pallas_call(
            functools.partial(_matmul_kernel, act=act),
            out_shape=jax.ShapeDtypeStruct((Mp, Np), jnp.float32),
            grid=(Mp // tm, Np // tn),
            in_specs=[pl.BlockSpec((tm, Kp), lambda i, j: (i, 0)),
                      pl.BlockSpec((Kp, tn), lambda i, j: (0, j)),
                      pl.BlockSpec((1, tn), lambda i, j: (0, j))],
            out_specs=pl.BlockSpec((tm, tn), lambda i, j: (i, j)),
            compiler_params=pltpu.CompilerParams(
                dimension_semantics=("parallel", "parallel")),
        )(xp, wp, bb)
    else:
        out = pl.pallas_call(
            functools.partial(_matmul_acc_kernel, act=act),
            out_shape=jax.ShapeDtypeStruct((Mp, Np), jnp.float32),
            grid=(Mp // tm, Np // tn, Kp // tk),
            in_specs=[pl.BlockSpec((tm, tk), lambda i, j, k: (i, k)),
                      pl.BlockSpec((tk, tn), lambda i, j, k: (k, j)),
                      pl.BlockSpec((1, tn), lambda i, j, k: (0, j))],
            out_specs=pl.BlockSpec((tm, tn), lambda i, j, k: (i, j)),
            scratch_shapes=[pltpu.VMEM((tm, tn), jnp.float32)],
            compiler_params=pltpu.CompilerParams(
                dimension_semantics=("parallel", "parallel", "arbitrary")),
        )(xp, wp, bb)
    if (Mp, Np) != (M, N):
        out = out[:M, :N]
    return out


def linear(x, w, b=None, act=None):
    """PyTorch-style Linear with weights stored pre-transposed as (in, out)."""
    lead = x.shape[:-1]
    K = x.shape[-1]
    N = w.shape[1]
    out = matmul_2d(x.reshape(-1, K), w, b, act)
    return out.reshape(*lead, N)


def norm_linear(x, nw, nb, w, b=None, kind='layer', act=None):
    """Fused LayerNorm/RMSNorm (over the last dim) + Linear (+ optional ReLU)."""
    lead = x.shape[:-1]
    K = x.shape[-1]
    N = w.shape[1]
    x2 = x.reshape(-1, K).astype(jnp.float32)
    M = x2.shape[0]
    tm = min(_round_up(M, 8), 256)
    tn = min(_round_up(N, 128), 256)
    Mp, Np = _round_up(M, tm), _round_up(N, tn)
    if Mp != M:
        x2 = jnp.pad(x2, ((0, Mp - M), (0, 0)))
    wp = w.astype(jnp.bfloat16)
    if Np != N:
        wp = jnp.pad(wp, ((0, 0), (0, Np - N)))
    bb = (jnp.zeros((N,), jnp.float32) if b is None else b.astype(jnp.float32)).reshape(1, N)
    if Np != N:
        bb = jnp.pad(bb, ((0, 0), (0, Np - N)))
    nwr = nw.astype(jnp.float32).reshape(1, K)
    nbr = (jnp.zeros((K,), jnp.float32) if nb is None else nb.astype(jnp.float32)).reshape(1, K)

    out = pl.pallas_call(
        functools.partial(_norm_matmul_kernel, kind=kind, act=act),
        out_shape=jax.ShapeDtypeStruct((Mp, Np), jnp.float32),
        grid=(Mp // tm, Np // tn),
        in_specs=[pl.BlockSpec((tm, K), lambda i, j: (i, 0)),
                  pl.BlockSpec((1, K), lambda i, j: (0, 0)),
                  pl.BlockSpec((1, K), lambda i, j: (0, 0)),
                  pl.BlockSpec((K, tn), lambda i, j: (0, j)),
                  pl.BlockSpec((1, tn), lambda i, j: (0, j))],
        out_specs=pl.BlockSpec((tm, tn), lambda i, j: (i, j)),
        compiler_params=pltpu.CompilerParams(
            dimension_semantics=("parallel", "parallel")),
    )(x2, nwr, nbr, wp, bb)
    if (Mp, Np) != (M, N):
        out = out[:M, :N]
    return out.reshape(*lead, N)


def causal_dwconv_silu(x, w_kd, bias, reverse=False):
    """Depthwise conv1d + SiLU, TIME-MAJOR x: (L, B, D); w_kd: (K, D); bias: (D,).
    reverse=True implements flip(conv_causal(flip(x))) (the backward branch):
    right padding + reversed taps, no materialized flips."""
    l, b, d = x.shape
    K = w_kd.shape[0]
    if reverse:
        xp = jnp.pad(x, ((0, K - 1), (0, 0), (0, 0)))
        w_eff = w_kd[::-1]
    else:
        xp = jnp.pad(x, ((K - 1, 0), (0, 0), (0, 0)))
        w_eff = w_kd
    return pl.pallas_call(
        _dwconv_silu_kernel,
        out_shape=jax.ShapeDtypeStruct((l, b, d), jnp.float32),
        in_specs=[VMEM_SPEC(), VMEM_SPEC(), VMEM_SPEC()],
        out_specs=VMEM_SPEC(),
    )(xp, w_eff, bias.reshape(1, d))


def ssm_proj(xi, wx, wdt, bdt, dt_rank):
    """Fused x_proj + dt_proj + softplus.  xi: (L, B, d_in) time-major ->
    delta: (L, B, d_in), bc: (L, B, 2n)."""
    l, b, d_in = xi.shape
    M = l * b
    n2 = wx.shape[1] - dt_rank
    delta, bc = pl.pallas_call(
        functools.partial(_ssm_proj_kernel, dt_rank=dt_rank),
        out_shape=(jax.ShapeDtypeStruct((M, d_in), jnp.float32),
                   jax.ShapeDtypeStruct((M, n2), jnp.float32)),
        in_specs=[VMEM_SPEC(), VMEM_SPEC(), VMEM_SPEC(), VMEM_SPEC()],
        out_specs=(VMEM_SPEC(), VMEM_SPEC()),
    )(xi.reshape(M, d_in), wx, wdt.astype(jnp.float32), bdt.astype(jnp.float32).reshape(1, d_in))
    return delta.reshape(l, b, d_in), bc.reshape(l, b, n2)


def gated_linear(y, res, w, b=None):
    """Fused (y * silu(res)) @ w + b.  y/res: (..., K), w: (K, N)."""
    lead = y.shape[:-1]
    K = y.shape[-1]
    N = w.shape[1]
    y2 = y.reshape(-1, K)
    r2 = res.reshape(-1, K)
    M = y2.shape[0]
    tm = min(_round_up(M, 8), 256)
    tn = min(_round_up(N, 128), 256)
    Mp, Np = _round_up(M, tm), _round_up(N, tn)
    if Mp != M:
        y2 = jnp.pad(y2, ((0, Mp - M), (0, 0)))
        r2 = jnp.pad(r2, ((0, Mp - M), (0, 0)))
    wp = w.astype(jnp.bfloat16)
    if Np != N:
        wp = jnp.pad(wp, ((0, 0), (0, Np - N)))
    bb = (jnp.zeros((N,), jnp.float32) if b is None else b.astype(jnp.float32)).reshape(1, N)
    if Np != N:
        bb = jnp.pad(bb, ((0, 0), (0, Np - N)))
    out = pl.pallas_call(
        _gated_matmul_kernel,
        out_shape=jax.ShapeDtypeStruct((Mp, Np), jnp.float32),
        grid=(Mp // tm, Np // tn),
        in_specs=[pl.BlockSpec((tm, K), lambda i, j: (i, 0)),
                  pl.BlockSpec((tm, K), lambda i, j: (i, 0)),
                  pl.BlockSpec((K, tn), lambda i, j: (0, j)),
                  pl.BlockSpec((1, tn), lambda i, j: (0, j))],
        out_specs=pl.BlockSpec((tm, tn), lambda i, j: (i, j)),
        compiler_params=pltpu.CompilerParams(
            dimension_semantics=("parallel", "parallel")),
    )(y2, r2, wp, bb)
    if (Mp, Np) != (M, N):
        out = out[:M, :N]
    return out.reshape(*lead, N)


def seq_mlp_residual(x, lp, kind):
    """Fused Norm(seq) + Linear + ReLU + Linear over the seq axis, with the two
    permutes and the residual add folded in.  x: (L, B, d_model) time-major."""
    l, b, d = x.shape
    nw = lp['n_w'].astype(jnp.float32).reshape(1, l)
    nb = lp['n_b'].astype(jnp.float32).reshape(1, l)
    return pl.pallas_call(
        functools.partial(_seq_mlp_kernel, kind=kind),
        out_shape=jax.ShapeDtypeStruct((l, b, d), jnp.float32),
        in_specs=[VMEM_SPEC()] * 7,
        out_specs=VMEM_SPEC(),
    )(x, nw, nb, lp['w1'], lp['b1'].reshape(1, -1), lp['w2'], lp['b2'].reshape(1, -1))


def selective_scan(u, delta, A, Bm, Cm, D, reverse=False):
    """TIME-MAJOR selective scan.  u/delta: (L, B, Din), A: (Din, N),
    Bm/Cm: (L, B, N), D: (Din,).  reverse=True computes flip(scan(flip(.)))
    without materializing flips (reversed chunk index_map + reversed in-chunk loop)."""
    l, b, d_in = u.shape
    n = A.shape[1]
    dn = d_in * n

    # small time chunks (8-16) bound per-chunk intermediates; pad L with zeros
    # (delta=0 on padded steps => dA=1, dBu=0 => state untouched; outputs sliced off).
    ch = min(16, _round_up(l, 8))
    lp = _round_up(l, ch)
    if lp != l:
        pad = ((0, lp - l), (0, 0), (0, 0))
        u, delta, Bm, Cm = (jnp.pad(t, pad) for t in (u, delta, Bm, Cm))
    nchunks = lp // ch

    A_flat = A.reshape(1, dn).astype(jnp.float32)
    D2 = D.reshape(1, d_in).astype(jnp.float32)
    # TODO(synk): at real Mamba widths (d_inner >= 1024) tile the scan over d_inner
    # blocks (keeps Rd/G at O(d_blk^2*n) and adds a "parallel" axis for v7x's 2 TCs).
    Rd = jnp.repeat(jnp.eye(d_in, dtype=jnp.float32), n, axis=1)   # (d, d*n)
    Rn = jnp.tile(jnp.eye(n, dtype=jnp.float32), (1, d_in))        # (n, d*n)
    G = jnp.transpose(Rd)                                          # (d*n, d)

    if reverse:
        cmap = lambda c: (nchunks - 1 - c, 0, 0)
    else:
        cmap = lambda c: (c, 0, 0)

    out = pl.pallas_call(
        functools.partial(_scan_kernel, reverse=reverse),
        out_shape=jax.ShapeDtypeStruct((lp, b, d_in), jnp.float32),
        grid=(nchunks,),
        in_specs=[
            pl.BlockSpec((ch, b, d_in), cmap),
            pl.BlockSpec((ch, b, d_in), cmap),
            pl.BlockSpec((ch, b, n), cmap),
            pl.BlockSpec((ch, b, n), cmap),
            pl.BlockSpec((1, dn), lambda c: (0, 0)),
            pl.BlockSpec((1, d_in), lambda c: (0, 0)),
            pl.BlockSpec((d_in, dn), lambda c: (0, 0)),
            pl.BlockSpec((n, dn), lambda c: (0, 0)),
            pl.BlockSpec((dn, d_in), lambda c: (0, 0)),
        ],
        out_specs=pl.BlockSpec((ch, b, d_in), cmap),
        scratch_shapes=[pltpu.VMEM((b, dn), jnp.float32),       # state
                        pltpu.VMEM((ch * b, dn), jnp.float32),  # dA (time-major)
                        pltpu.VMEM((ch * b, dn), jnp.float32),  # dBu
                        pltpu.VMEM((ch * b, dn), jnp.float32),  # C expanded
                        pltpu.VMEM((ch * b, dn), jnp.float32)], # prods
        # chunk axis is a sequential scan (state carried in VMEM) -> "arbitrary".
        # TODO(synk): add a leading "parallel" batch axis for v7x once b is larger.
        compiler_params=pltpu.CompilerParams(dimension_semantics=("arbitrary",)),
    )(u, delta, Bm, Cm, A_flat, D2, Rd, Rn, G)
    return out[:l] if lp != l else out


# --------------------------------------------------------------------------
# Model forward (glue in plain JAX, hot paths in the kernels above).
# The residual stream is kept time-major (l, b, d) across the whole network.
# --------------------------------------------------------------------------

def mamba_block(p, x, ln_w, ln_b, cfg, reverse):
    n = cfg['d_state']
    # fused LayerNorm + in_proj (ResidualBlock.norm folded into the first matmul)
    x_and_res = norm_linear(x, ln_w, ln_b, p['in_proj_w'], None, kind='layer')
    xi, res = jnp.split(x_and_res, 2, axis=-1)                 # (l, b, d_inner) each
    xi = causal_dwconv_silu(xi, p['conv_w'], p['conv_b'], reverse=reverse)
    # fused x_proj + dt_proj + softplus (one kernel, shares the xi load)
    delta, bc = ssm_proj(xi, p['x_proj_w'], p['dt_proj_w'], p['dt_proj_b'], cfg['dt_rank'])
    Bm, Cm = bc[..., :n], bc[..., n:]
    A = -jnp.exp(p['A_log'])
    y = selective_scan(xi, delta, A, Bm, Cm, p['D'], reverse=reverse)
    # fused y * silu(res) gate + out_proj
    return gated_linear(y, res, p['out_proj_w'], None)


def residual_block(p, x, cfg, reverse=False):
    # NOTE: the reference ResidualBlock.forward does NOT add the residual.
    # reverse=True == flip(block(flip(x))): flips are folded into the conv/scan.
    return mamba_block(p['mixer'], x, p['ln_w'], p['ln_b'], cfg, reverse)


def mamba_forward(p, input_ids, cfg):
    # one transpose at entry; everything below runs time-major (l, b, d)
    ids_t = jnp.transpose(input_ids, (1, 0, 2))
    x = linear(ids_t, p['emb_w'], p['emb_b'])                  # (l, b, d_model)
    x1 = x
    x2 = x
    for i in range(cfg['n_layer']):
        x1 = residual_block(p['layers'][i], x1, cfg, reverse=False)
        x2r = residual_block(p['layers2'][i], x2, cfg, reverse=True)
        x = x1 + x2r + x
        kind = 'layer' if i == 0 else 'rms'
        x = seq_mlp_residual(x, p['lin'][i], kind)             # fused MLP-over-seq + residual
        x1 = x
        x2 = x
    # fused final LayerNorm + lm_head
    logits_t = norm_linear(x, p['normf_w'], p['normf_b'],
                           p['lm_head_w'], p['lm_head_b'], kind='layer')
    return jnp.transpose(logits_t, (1, 0, 2))                  # (b, l, vocab)


def samba_forward(params, input_ids, cfg):
    xx = mamba_forward(params['mam1'], input_ids, cfg)         # (b, l, V)
    b, L, V = xx.shape

    # gaussian_kernel_graph (x_mean / x_time are computed but unused in the reference)
    E_A = params['adj']                                        # (V, embed)
    diff = E_A[:, None, :] - E_A[None, :, :]
    dist = jnp.sum(diff * diff, axis=-1)                       # (V, V)
    A = jnp.exp(-params['gamma'] * dist)
    ADJ = jax.nn.softmax(A, axis=1)
    # TODO(synk): nn.Dropout(0.35) inside gaussian_kernel_graph treated as identity (inference).

    I = jnp.eye(V, dtype=jnp.float32)
    supports = [I, ADJ]
    for _ in range(2, cfg['cheb_k']):
        supports.append(2.0 * ADJ @ supports[-1] - supports[-2])
    supports = jnp.stack(supports, axis=0)                     # (K, V, V)

    embed = cfg['embed']
    K, inp, O = cfg['cheb_k'], cfg['seq_in'], cfg['out']
    wp_flat = params['weights_pool'].reshape(embed, K * inp * O)
    weights = linear(E_A, wp_flat).reshape(V, K, inp, O)       # einsum('nd,dkio->nkio')
    bias = linear(E_A, params['bias_pool'])                    # (V, O)

    # gconv + proj fusion: supports / weights / bias are parameter-only, so the
    # whole graph path folds into one effective (L*V, O) matrix and a single
    # lane-dense-K Pallas matmul over the batch (small parameter-side einsum in XLA).
    pw = params['proj_w'][:, 0].astype(jnp.float32)            # (V,)
    Meff = jnp.einsum('knm,nkio,n->imo', supports, weights, pw).reshape(inp * V, O)
    beff = jnp.einsum('no,n->o', bias, pw) + params['proj_b'][0]
    out = matmul_2d(xx.reshape(b, L * V), Meff, beff)          # (b, O)
    return out.reshape(b, O, 1)


# --------------------------------------------------------------------------
# Deterministic parameter initialization (synthetic, torch-like uniform init).
# Linear weights are stored pre-transposed as (in, out) and in bf16 (MXU operands);
# biases, norm params, conv, dt_proj, A_log, D stay f32.
# --------------------------------------------------------------------------

def _linear_params(key, fan_in, fan_out, bias=True, w_dtype=jnp.bfloat16):
    k1, k2 = jax.random.split(key)
    s = 1.0 / jnp.sqrt(jnp.float32(fan_in))
    W = jax.random.uniform(k1, (fan_in, fan_out), jnp.float32, -s, s).astype(w_dtype)
    if bias:
        b = jax.random.uniform(k2, (fan_out,), jnp.float32, -s, s)
        return W, b
    return W, None


def init_mamba_block(key, cfg):
    keys = jax.random.split(key, 8)
    p = {}
    p['in_proj_w'], _ = _linear_params(keys[0], cfg['d_model'], 2 * cfg['d_inner'], bias=False)
    s = 1.0 / jnp.sqrt(jnp.float32(cfg['d_conv']))
    p['conv_w'] = jax.random.uniform(keys[1], (cfg['d_conv'], cfg['d_inner']), jnp.float32, -s, s)
    p['conv_b'] = jax.random.uniform(keys[2], (cfg['d_inner'],), jnp.float32, -s, s)
    p['x_proj_w'], _ = _linear_params(keys[3], cfg['d_inner'],
                                      cfg['dt_rank'] + 2 * cfg['d_state'], bias=False)
    p['dt_proj_w'], p['dt_proj_b'] = _linear_params(keys[4], cfg['dt_rank'], cfg['d_inner'],
                                                    w_dtype=jnp.float32)
    A = jnp.tile(jnp.arange(1, cfg['d_state'] + 1, dtype=jnp.float32), (cfg['d_inner'], 1))
    p['A_log'] = jnp.log(A)
    p['D'] = jnp.ones((cfg['d_inner'],), jnp.float32)
    p['out_proj_w'], _ = _linear_params(keys[5], cfg['d_inner'], cfg['d_model'], bias=False)
    return p


def init_residual(key, cfg):
    return {'ln_w': jnp.ones((cfg['d_model'],), jnp.float32),
            'ln_b': jnp.zeros((cfg['d_model'],), jnp.float32),
            'mixer': init_mamba_block(key, cfg)}


def init_mamba(key, cfg):
    keys = jax.random.split(key, 16)
    p = {}
    p['emb_w'], p['emb_b'] = _linear_params(keys[0], cfg['vocab'], cfg['d_model'])
    p['layers'] = [init_residual(keys[1 + i], cfg) for i in range(cfg['n_layer'])]
    p['layers2'] = [init_residual(keys[1 + cfg['n_layer'] + i], cfg)
                    for i in range(cfg['n_layer'])]
    lin = []
    for i in range(cfg['n_layer']):
        ka, kb = jax.random.split(keys[1 + 2 * cfg['n_layer'] + i])
        w1, b1 = _linear_params(ka, cfg['seq_in'], cfg['hidden'])
        w2, b2 = _linear_params(kb, cfg['hidden'], cfg['seq_in'])
        lin.append({'n_w': jnp.ones((cfg['seq_in'],), jnp.float32),
                    'n_b': jnp.zeros((cfg['seq_in'],), jnp.float32),
                    'w1': w1, 'b1': b1, 'w2': w2, 'b2': b2})
    p['lin'] = lin
    p['normf_w'] = jnp.ones((cfg['d_model'],), jnp.float32)
    p['normf_b'] = jnp.zeros((cfg['d_model'],), jnp.float32)
    p['lm_head_w'], p['lm_head_b'] = _linear_params(keys[14], cfg['d_model'], cfg['vocab'])
    return p


def init_samba(key, cfg):
    keys = jax.random.split(key, 8)
    p = {'mam1': init_mamba(keys[0], cfg)}
    p['gamma'] = jnp.array(1.0, jnp.float32)
    p['adj'] = jax.random.normal(keys[1], (cfg['vocab'], cfg['embed']), jnp.float32)
    # weights_pool / bias_pool are uninitialized FloatTensors in the reference;
    # use deterministic small normals here.
    p['weights_pool'] = 0.1 * jax.random.normal(
        keys[2], (cfg['embed'], cfg['cheb_k'], cfg['seq_in'], cfg['out']), jnp.float32)
    p['bias_pool'] = 0.1 * jax.random.normal(keys[3], (cfg['embed'], cfg['out']), jnp.float32)
    p['proj_w'], p['proj_b'] = _linear_params(keys[4], cfg['vocab'], 1)
    return p


# --------------------------------------------------------------------------

if __name__ == "__main__":
    cfg = dict(
        b=2, seq_in=8, vocab=16, d_model=32, d_inner=64, d_state=16,
        dt_rank=2, d_conv=4, n_layer=2, hidden=32, embed=8, cheb_k=3, out=4,
    )
    key = jax.random.PRNGKey(0)
    kp, kx = jax.random.split(key)
    params = init_samba(kp, cfg)
    # input_ids: float tensor (b, seq_in, vocab) — Mamba.embedding is a Linear on vocab.
    input_ids = jax.random.normal(kx, (cfg['b'], cfg['seq_in'], cfg['vocab']), jnp.float32)

    fwd = jax.jit(functools.partial(samba_forward, cfg=cfg))
    out = fwd(params, input_ids)
    jax.block_until_ready(out)
    assert out.shape == (cfg['b'], cfg['out'], 1), out.shape
    assert bool(jnp.all(jnp.isfinite(out)))
    print("KERNEL_OK")
</pallas_src>

<mosaic_0001>
module attributes {stable_mosaic.version = 11 : i64} {
  func.func @_matmul_kernel(%arg0: i32, %arg1: i32, %arg2: memref<16x128xbf16, #tpu.memory_space<vmem>>, %arg3: memref<128x128xbf16, #tpu.memory_space<vmem>>, %arg4: memref<1x128xf32, #tpu.memory_space<vmem>>, %arg5: memref<16x128xf32, #tpu.memory_space<vmem>>) attributes {dimension_semantics = [#tpu.dimension_semantics<parallel>, #tpu.dimension_semantics<parallel>], iteration_bounds = array<i64: 1, 1>, scalar_prefetch = 0 : i64, scratch_operands = 0 : i64, tpu.core_type = #tpu.core_type<tc>, window_params = [{transform_indices = @transform_0, window_bounds = array<i64: 16, 128>}, {transform_indices = @transform_1, window_bounds = array<i64: 128, 128>}, {transform_indices = @transform_2, window_bounds = array<i64: 1, 128>}, {transform_indices = @transform_3, window_bounds = array<i64: 16, 128>}]} {
    %c0 = arith.constant 0 : index
    %c0_0 = arith.constant 0 : index
    %0 = vector.load %arg2[%c0, %c0_0] : memref<16x128xbf16, #tpu.memory_space<vmem>>, vector<16x128xbf16>
    %c0_1 = arith.constant 0 : index
    %c0_2 = arith.constant 0 : index
    %1 = vector.load %arg3[%c0_1, %c0_2] : memref<128x128xbf16, #tpu.memory_space<vmem>>, vector<128x128xbf16>
    %cst = arith.constant dense<0.000000e+00> : vector<16x128xf32>
    %2 = tpu.matmul %0, %1, %cst {dimension_numbers = #tpu.dot_dimension_numbers<[1], [0], [0], [1], [0, 0, 1, 1], [], []>} : vector<16x128xbf16>, vector<128x128xbf16>, vector<16x128xf32> -> vector<16x128xf32>
    %c0_3 = arith.constant 0 : index
    %c0_4 = arith.constant 0 : index
    %3 = vector.load %arg4[%c0_3, %c0_4] : memref<1x128xf32, #tpu.memory_space<vmem>>, vector<1x128xf32>
    %4 = vector.broadcast %3 : vector<1x128xf32> to vector<16x128xf32>
    %5 = arith.addf %2, %4 : vector<16x128xf32>
    %c0_5 = arith.constant 0 : index
    %c0_6 = arith.constant 0 : index
    %6 = vector.load %arg5[%c0_5, %c0_6] : memref<16x128xf32, #tpu.memory_space<vmem>>, vector<16x128xf32>
    tpu.vector_store %arg5[%c0_5, %c0_6], %5 {strides = array<i32>} : memref<16x128xf32, #tpu.memory_space<vmem>>, vector<16x128xf32>,
    return
  }
  func.func @transform_0(%arg0: i32, %arg1: i32) -> (i32, i32) {
    %c0_i32 = arith.constant 0 : i32
    %c0_i32_0 = arith.constant 0 : i32
    return %arg0, %c0_i32 : i32, i32
  }
  func.func @transform_1(%arg0: i32, %arg1: i32) -> (i32, i32) {
    %c0_i32 = arith.constant 0 : i32
    %c0_i32_0 = arith.constant 0 : i32
    return %c0_i32, %arg1 : i32, i32
  }
  func.func @transform_2(%arg0: i32, %arg1: i32) -> (i32, i32) {
    %c0_i32 = arith.constant 0 : i32
    %c0_i32_0 = arith.constant 0 : i32
    return %c0_i32, %arg1 : i32, i32
  }
  func.func @transform_3(%arg0: i32, %arg1: i32) -> (i32, i32) {
    %c0_i32 = arith.constant 0 : i32
    return %arg0, %arg1 : i32, i32
  }
}

module attributes {stable_mosaic.version = 11 : i64} {
  func.func @_norm_matmul_kernel(%arg0: i32, %arg1: i32, %arg2: memref<16x32xf32, #tpu.memory_space<vmem>>, %arg3: memref<1x32xf32, #tpu.memory_space<vmem>>, %arg4: memref<1x32xf32, #tpu.memory_space<vmem>>, %arg5: memref<32x128xbf16, #tpu.memory_space<vmem>>, %arg6: memref<1x128xf32, #tpu.memory_space<vmem>>, %arg7: memref<16x128xf32, #tpu.memory_space<vmem>>) attributes {dimension_semantics = [#tpu.dimension_semantics<parallel>, #tpu.dimension_semantics<parallel>], iteration_bounds = array<i64: 1, 1>, scalar_prefetch = 0 : i64, scratch_operands = 0 : i64, tpu.core_type = #tpu.core_type<tc>, window_params = [{transform_indices = @transform_0, window_bounds = array<i64: 16, 32>}, {pipeline_mode = #tpu.pipeline_mode<synchronous>, transform_indices = @transform_1, window_bounds = array<i64: 1, 32>}, {pipeline_mode = #tpu.pipeline_mode<synchronous>, transform_indices = @transform_2, window_bounds = array<i64: 1, 32>}, {transform_indices = @transform_3, window_bounds = array<i64: 32, 128>}, {transform_indices = @transform_4, window_bounds = array<i64: 1, 128>}, {transform_indices = @transform_5, window_bounds = array<i64: 16, 128>}]} {
    %c0 = arith.constant 0 : index
    %c0_0 = arith.constant 0 : index
    %0 = vector.load %arg2[%c0, %c0_0] : memref<16x32xf32, #tpu.memory_space<vmem>>, vector<16x32xf32>
    %cst = arith.constant dense<0.000000e+00> : vector<16xf32>
    %1 = vector.multi_reduction <add>, %0, %cst [1] : vector<16x32xf32> to vector<16xf32>
    %2 = vector.shape_cast %1 : vector<16xf32> to vector<16x1xf32>
    %cst_1 = arith.constant 3.200000e+01 : f32
    %3 = vector.broadcast %cst_1 : f32 to vector<16x1xf32>
    %4 = arith.divf %2, %3 : vector<16x1xf32>
    %5 = vector.broadcast %4 : vector<16x1xf32> to vector<16x32xf32>
    %6 = arith.subf %0, %5 : vector<16x32xf32>
    %7 = arith.mulf %6, %6 : vector<16x32xf32>
    %cst_2 = arith.constant dense<0.000000e+00> : vector<16xf32>
    %8 = vector.multi_reduction <add>, %7, %cst_2 [1] : vector<16x32xf32> to vector<16xf32>
    %9 = vector.shape_cast %8 : vector<16xf32> to vector<16x1xf32>
    %cst_3 = arith.constant 3.200000e+01 : f32
    %10 = vector.broadcast %cst_3 : f32 to vector<16x1xf32>
    %11 = arith.divf %9, %10 : vector<16x1xf32>
    %cst_4 = arith.constant 9.99999974E-6 : f32
    %12 = vector.broadcast %cst_4 : f32 to vector<16x1xf32>
    %13 = arith.addf %11, %12 : vector<16x1xf32>
    %14 = math.rsqrt %13 : vector<16x1xf32>
    %15 = vector.broadcast %14 : vector<16x1xf32> to vector<16x32xf32>
    %16 = arith.mulf %6, %15 : vector<16x32xf32>
    %c0_5 = arith.constant 0 : index
    %c0_6 = arith.constant 0 : index
    %17 = vector.load %arg3[%c0_5, %c0_6] : memref<1x32xf32, #tpu.memory_space<vmem>>, vector<1x32xf32>
    %18 = vector.broadcast %17 : vector<1x32xf32> to vector<16x32xf32>
    %19 = arith.mulf %16, %18 : vector<16x32xf32>
    %c0_7 = arith.constant 0 : index
    %c0_8 = arith.constant 0 : index
    %20 = vector.load %arg4[%c0_7, %c0_8] : memref<1x32xf32, #tpu.memory_space<vmem>>, vector<1x32xf32>
    %21 = vector.broadcast %20 : vector<1x32xf32> to vector<16x32xf32>
    %22 = arith.addf %19, %21 : vector<16x32xf32>
    %23 = arith.truncf %22 : vector<16x32xf32> to vector<16x32xbf16>
    %c0_9 = arith.constant 0 : index
    %c0_10 = arith.constant 0 : index
    %24 = vector.load %arg5[%c0_9, %c0_10] : memref<32x128xbf16, #tpu.memory_space<vmem>>, vector<32x128xbf16>
    %cst_11 = arith.constant dense<0.000000e+00> : vector<16x128xf32>
    %25 = tpu.matmul %23, %24, %cst_11 {dimension_numbers = #tpu.dot_dimension_numbers<[1], [0], [0], [1], [0, 0, 1, 1], [], []>} : vector<16x32xbf16>, vector<32x128xbf16>, vector<16x128xf32> -> vector<16x128xf32>
    %c0_12 = arith.constant 0 : index
    %c0_13 = arith.constant 0 : index
    %26 = vector.load %arg6[%c0_12, %c0_13] : memref<1x128xf32, #tpu.memory_space<vmem>>, vector<1x128xf32>
    %27 = vector.broadcast %26 : vector<1x128xf32> to vector<16x128xf32>
    %28 = arith.addf %25, %27 : vector<16x128xf32>
    %c0_14 = arith.constant 0 : index
    %c0_15 = arith.constant 0 : index
    %29 = vector.load %arg7[%c0_14, %c0_15] : memref<16x128xf32, #tpu.memory_space<vmem>>, vector<16x128xf32>
    tpu.vector_store %arg7[%c0_14, %c0_15], %28 {strides = array<i32>} : memref<16x128xf32, #tpu.memory_space<vmem>>, vector<16x128xf32>,
    return
  }
  func.func @transform_0(%arg0: i32, %arg1: i32) -> (i32, i32) {
    %c0_i32 = arith.constant 0 : i32
    %c0_i32_0 = arith.constant 0 : i32
    return %arg0, %c0_i32 : i32, i32
  }
  func.func @transform_1(%arg0: i32, %arg1: i32) -> (i32, i32) {
    %c0_i32 = arith.constant 0 : i32
    %c0_i32_0 = arith.constant 0 : i32
    %c0_i32_1 = arith.constant 0 : i32
    return %c0_i32, %c0_i32_0 : i32, i32
  }
  func.func @transform_2(%arg0: i32, %arg1: i32) -> (i32, i32) {
    %c0_i32 = arith.constant 0 : i32
    %c0_i32_0 = arith.constant 0 : i32
    %c0_i32_1 = arith.constant 0 : i32
    return %c0_i32, %c0_i32_0 : i32, i32
  }
  func.func @transform_3(%arg0: i32, %arg1: i32) -> (i32, i32) {
    %c0_i32 = arith.constant 0 : i32
    %c0_i32_0 = arith.constant 0 : i32
    return %c0_i32, %arg1 : i32, i32
  }
  func.func @transform_4(%arg0: i32, %arg1: i32) -> (i32, i32) {
    %c0_i32 = arith.constant 0 : i32
    %c0_i32_0 = arith.constant 0 : i32
    return %c0_i32, %arg1 : i32, i32
  }
  func.func @transform_5(%arg0: i32, %arg1: i32) -> (i32, i32) {
    %c0_i32 = arith.constant 0 : i32
    return %arg0, %arg1 : i32, i32
  }
}

module attributes {stable_mosaic.version = 11 : i64} {
  func.func @_dwconv_silu_kernel(%arg0: memref<11x2x64xf32, #tpu.memory_space<vmem>>, %arg1: memref<4x64xf32, #tpu.memory_space<vmem>>, %arg2: memref<1x64xf32, #tpu.memory_space<vmem>>, %arg3: memref<8x2x64xf32, #tpu.memory_space<vmem>>) attributes {dimension_semantics = [], scalar_prefetch = 0 : i64, scratch_operands = 0 : i64, tpu.core_type = #tpu.core_type<tc>} {
    %c0 = arith.constant 0 : index
    %c0_0 = arith.constant 0 : index
    %c0_1 = arith.constant 0 : index
    %0 = vector.load %arg0[%c0, %c0_0, %c0_1] : memref<11x2x64xf32, #tpu.memory_space<vmem>>, vector<11x2x64xf32>
    %cst = arith.constant 0.000000e+00 : f32
    %1 = vector.broadcast %cst : f32 to vector<8x2x64xf32>
    %2 = vector.extract_strided_slice %0 {offsets = [0, 0, 0], sizes = [8, 2, 64], strides = [1, 1, 1]} : vector<11x2x64xf32> to vector<8x2x64xf32>
    %c0_2 = arith.constant 0 : index
    %c0_3 = arith.constant 0 : index
    %3 = vector.load %arg1[%c0_2, %c0_3] : memref<4x64xf32, #tpu.memory_space<vmem>>, vector<1x64xf32>
    %4 = vector.shape_cast %3 : vector<1x64xf32> to vector<1x1x64xf32>
    %5 = vector.broadcast %4 : vector<1x1x64xf32> to vector<8x2x64xf32>
    %6 = arith.mulf %2, %5 : vector<8x2x64xf32>
    %7 = arith.addf %1, %6 : vector<8x2x64xf32>
    %8 = vector.extract_strided_slice %0 {offsets = [1, 0, 0], sizes = [8, 2, 64], strides = [1, 1, 1]} : vector<11x2x64xf32> to vector<8x2x64xf32>
    %c1 = arith.constant 1 : index
    %c0_4 = arith.constant 0 : index
    %9 = vector.load %arg1[%c1, %c0_4] : memref<4x64xf32, #tpu.memory_space<vmem>>, vector<1x64xf32>
    %10 = vector.shape_cast %9 : vector<1x64xf32> to vector<1x1x64xf32>
    %11 = vector.broadcast %10 : vector<1x1x64xf32> to vector<8x2x64xf32>
    %12 = arith.mulf %8, %11 : vector<8x2x64xf32>
    %13 = arith.addf %7, %12 : vector<8x2x64xf32>
    %14 = vector.extract_strided_slice %0 {offsets = [2, 0, 0], sizes = [8, 2, 64], strides = [1, 1, 1]} : vector<11x2x64xf32> to vector<8x2x64xf32>
    %c2 = arith.constant 2 : index
    %c0_5 = arith.constant 0 : index
    %15 = vector.load %arg1[%c2, %c0_5] : memref<4x64xf32, #tpu.memory_space<vmem>>, vector<1x64xf32>
    %16 = vector.shape_cast %15 : vector<1x64xf32> to vector<1x1x64xf32>
    %17 = vector.broadcast %16 : vector<1x1x64xf32> to vector<8x2x64xf32>
    %18 = arith.mulf %14, %17 : vector<8x2x64xf32>
    %19 = arith.addf %13, %18 : vector<8x2x64xf32>
    %20 = vector.extract_strided_slice %0 {offsets = [3, 0, 0], sizes = [8, 2, 64], strides = [1, 1, 1]} : vector<11x2x64xf32> to vector<8x2x64xf32>
    %c3 = arith.constant 3 : index
    %c0_6 = arith.constant 0 : index
    %21 = vector.load %arg1[%c3, %c0_6] : memref<4x64xf32, #tpu.memory_space<vmem>>, vector<1x64xf32>
    %22 = vector.shape_cast %21 : vector<1x64xf32> to vector<1x1x64xf32>
    %23 = vector.broadcast %22 : vector<1x1x64xf32> to vector<8x2x64xf32>
    %24 = arith.mulf %20, %23 : vector<8x2x64xf32>
    %25 = arith.addf %19, %24 : vector<8x2x64xf32>
    %c0_7 = arith.constant 0 : index
    %c0_8 = arith.constant 0 : index
    %26 = vector.load %arg2[%c0_7, %c0_8] : memref<1x64xf32, #tpu.memory_space<vmem>>, vector<1x64xf32>
    %27 = vector.shape_cast %26 : vector<1x64xf32> to vector<1x1x64xf32>
    %28 = vector.broadcast %27 : vector<1x1x64xf32> to vector<8x2x64xf32>
    %29 = arith.addf %25, %28 : vector<8x2x64xf32>
    %30 = arith.negf %29 : vector<8x2x64xf32>
    %31 = math.exp %30 : vector<8x2x64xf32>
    %cst_9 = arith.constant 1.000000e+00 : f32
    %32 = vector.broadcast %cst_9 : f32 to vector<8x2x64xf32>
    %33 = arith.addf %32, %31 : vector<8x2x64xf32>
    %34 = arith.divf %32, %33 : vector<8x2x64xf32>
    %35 = arith.mulf %29, %34 : vector<8x2x64xf32>
    %c0_10 = arith.constant 0 : index
    %c0_11 = arith.constant 0 : index
    %c0_12 = arith.constant 0 : index
    %36 = vector.load %arg3[%c0_10, %c0_11, %c0_12] : memref<8x2x64xf32, #tpu.memory_space<vmem>>, vector<8x2x64xf32>
    tpu.vector_store %arg3[%c0_10, %c0_11, %c0_12], %35 {strides = array<i32>} : memref<8x2x64xf32, #tpu.memory_space<vmem>>, vector<8x2x64xf32>,
    return
  }
}

module attributes {stable_mosaic.version = 11 : i64} {
  func.func @_ssm_proj_kernel(%arg0: memref<16x64xf32, #tpu.memory_space<vmem>>, %arg1: memref<64x34xbf16, #tpu.memory_space<vmem>>, %arg2: memref<2x64xf32, #tpu.memory_space<vmem>>, %arg3: memref<1x64xf32, #tpu.memory_space<vmem>>, %arg4: memref<16x64xf32, #tpu.memory_space<vmem>>, %arg5: memref<16x32xf32, #tpu.memory_space<vmem>>) attributes {dimension_semantics = [], scalar_prefetch = 0 : i64, scratch_operands = 0 : i64, tpu.core_type = #tpu.core_type<tc>} {
    %c0 = arith.constant 0 : index
    %c0_0 = arith.constant 0 : index
    %0 = vector.load %arg0[%c0, %c0_0] : memref<16x64xf32, #tpu.memory_space<vmem>>, vector<16x64xf32>
    %1 = arith.truncf %0 : vector<16x64xf32> to vector<16x64xbf16>
    %c0_1 = arith.constant 0 : index
    %c0_2 = arith.constant 0 : index
    %2 = vector.load %arg1[%c0_1, %c0_2] : memref<64x34xbf16, #tpu.memory_space<vmem>>, vector<64x34xbf16>
    %cst = arith.constant dense<0.000000e+00> : vector<16x34xf32>
    %3 = tpu.matmul %1, %2, %cst {dimension_numbers = #tpu.dot_dimension_numbers<[1], [0], [0], [1], [0, 0, 1, 1], [], []>} : vector<16x64xbf16>, vector<64x34xbf16>, vector<16x34xf32> -> vector<16x34xf32>
    %c0_3 = arith.constant 0 : index
    %c0_4 = arith.constant 0 : index
    %4 = vector.load %arg3[%c0_3, %c0_4] : memref<1x64xf32, #tpu.memory_space<vmem>>, vector<1x64xf32>
    %5 = vector.extract_strided_slice %3 {offsets = [0, 0], sizes = [16, 1], strides = [1, 1]} : vector<16x34xf32> to vector<16x1xf32>
    %c0_5 = arith.constant 0 : index
    %c0_6 = arith.constant 0 : index
    %6 = vector.load %arg2[%c0_5, %c0_6] : memref<2x64xf32, #tpu.memory_space<vmem>>, vector<1x64xf32>
    %7 = vector.broadcast %5 : vector<16x1xf32> to vector<16x64xf32>
    %8 = vector.broadcast %6 : vector<1x64xf32> to vector<16x64xf32>
    %9 = arith.mulf %7, %8 : vector<16x64xf32>
    %10 = vector.broadcast %4 : vector<1x64xf32> to vector<16x64xf32>
    %11 = arith.addf %10, %9 : vector<16x64xf32>
    %12 = vector.extract_strided_slice %3 {offsets = [0, 1], sizes = [16, 1], strides = [1, 1]} : vector<16x34xf32> to vector<16x1xf32>
    %c1 = arith.constant 1 : index
    %c0_7 = arith.constant 0 : index
    %13 = vector.load %arg2[%c1, %c0_7] : memref<2x64xf32, #tpu.memory_space<vmem>>, vector<1x64xf32>
    %14 = vector.broadcast %12 : vector<16x1xf32> to vector<16x64xf32>
    %15 = vector.broadcast %13 : vector<1x64xf32> to vector<16x64xf32>
    %16 = arith.mulf %14, %15 : vector<16x64xf32>
    %17 = arith.addf %11, %16 : vector<16x64xf32>
    %cst_8 = arith.constant 0.000000e+00 : f32
    %18 = vector.broadcast %cst_8 : f32 to vector<16x64xf32>
    %19 = arith.maximumf %17, %18 : vector<16x64xf32>
    %20 = math.absf %17 : vector<16x64xf32>
    %cst_9 = arith.constant 0.000000e+00 : f32
    %21 = vector.broadcast %cst_9 : f32 to vector<16x64xf32>
    %22 = arith.subf %21, %20 : vector<16x64xf32>
    %23 = math.exp %22 : vector<16x64xf32>
    %cst_10 = arith.constant 1.000000e+00 : f32
    %24 = vector.broadcast %cst_10 : f32 to vector<16x64xf32>
    %25 = arith.addf %24, %23 : vector<16x64xf32>
    %26 = math.log %25 : vector<16x64xf32>
    %27 = arith.addf %19, %26 : vector<16x64xf32>
    %c0_11 = arith.constant 0 : index
    %c0_12 = arith.constant 0 : index
    %28 = vector.load %arg4[%c0_11, %c0_12] : memref<16x64xf32, #tpu.memory_space<vmem>>, vector<16x64xf32>
    tpu.vector_store %arg4[%c0_11, %c0_12], %27 {strides = array<i32>} : memref<16x64xf32, #tpu.memory_space<vmem>>, vector<16x64xf32>,
    %29 = vector.extract_strided_slice %3 {offsets = [0, 2], sizes = [16, 32], strides = [1, 1]} : vector<16x34xf32> to vector<16x32xf32>
    %c0_13 = arith.constant 0 : index
    %c0_14 = arith.constant 0 : index
    %30 = vector.load %arg5[%c0_13, %c0_14] : memref<16x32xf32, #tpu.memory_space<vmem>>, vector<16x32xf32>
    tpu.vector_store %arg5[%c0_13, %c0_14], %29 {strides = array<i32>} : memref<16x32xf32, #tpu.memory_space<vmem>>, vector<16x32xf32>,
    return
  }
}

module attributes {stable_mosaic.version = 11 : i64} {
  func.func @_scan_kernel(%arg0: i32, %arg1: memref<8x2x64xf32, #tpu.memory_space<vmem>>, %arg2: memref<8x2x64xf32, #tpu.memory_space<vmem>>, %arg3: memref<8x2x16xf32, #tpu.memory_space<vmem>>, %arg4: memref<8x2x16xf32, #tpu.memory_space<vmem>>, %arg5: memref<1x1024xf32, #tpu.memory_space<vmem>>, %arg6: memref<1x64xf32, #tpu.memory_space<vmem>>, %arg7: memref<64x1024xf32, #tpu.memory_space<vmem>>, %arg8: memref<16x1024xf32, #tpu.memory_space<vmem>>, %arg9: memref<1024x64xf32, #tpu.memory_space<vmem>>, %arg10: memref<8x2x64xf32, #tpu.memory_space<vmem>>, %arg11: memref<2x1024xf32, #tpu.memory_space<vmem>>, %arg12: memref<16x1024xf32, #tpu.memory_space<vmem>>, %arg13: memref<16x1024xf32, #tpu.memory_space<vmem>>, %arg14: memref<16x1024xf32, #tpu.memory_space<vmem>>, %arg15: memref<16x1024xf32, #tpu.memory_space<vmem>>) attributes {dimension_semantics = [#tpu.dimension_semantics<arbitrary>], iteration_bounds = array<i64: 1>, scalar_prefetch = 0 : i64, scratch_operands = 5 : i64, tpu.core_type = #tpu.core_type<tc>, window_params = [{transform_indices = @transform_0, window_bounds = array<i64: 8, 2, 64>}, {transform_indices = @transform_1, window_bounds = array<i64: 8, 2, 64>}, {transform_indices = @transform_2, window_bounds = array<i64: 8, 2, 16>}, {transform_indices = @transform_3, window_bounds = array<i64: 8, 2, 16>}, {pipeline_mode = #tpu.pipeline_mode<synchronous>, transform_indices = @transform_4, window_bounds = array<i64: 1, 1024>}, {pipeline_mode = #tpu.pipeline_mode<synchronous>, transform_indices = @transform_5, window_bounds = array<i64: 1, 64>}, {pipeline_mode = #tpu.pipeline_mode<synchronous>, transform_indices = @transform_6, window_bounds = array<i64: 64, 1024>}, {pipeline_mode = #tpu.pipeline_mode<synchronous>, transform_indices = @transform_7, window_bounds = array<i64: 16, 1024>}, {pipeline_mode = #tpu.pipeline_mode<synchronous>, transform_indices = @transform_8, window_bounds = array<i64: 1024, 64>}, {transform_indices = @transform_9, window_bounds = array<i64: 8, 2, 64>}]} {
    %c0_i32 = arith.constant 0 : i32
    %0 = arith.cmpi eq, %arg0, %c0_i32 : i32
    %1 = arith.extui %0 : i1 to i32
    %c0_i32_0 = arith.constant 0 : i32
    %2 = arith.cmpi ne, %1, %c0_i32_0 : i32
    scf.if %2 {
      %cst_102 = arith.constant 0.000000e+00 : f32
      %95 = vector.broadcast %cst_102 : f32 to vector<2x1024xf32>
      %c0_103 = arith.constant 0 : index
      %c0_104 = arith.constant 0 : index
      %96 = vector.load %arg11[%c0_103, %c0_104] : memref<2x1024xf32, #tpu.memory_space<vmem>>, vector<2x1024xf32>
      tpu.vector_store %arg11[%c0_103, %c0_104], %95 {strides = array<i32>} : memref<2x1024xf32, #tpu.memory_space<vmem>>, vector<2x1024xf32>,
    } else {
    }
    %c0 = arith.constant 0 : index
    %c0_1 = arith.constant 0 : index
    %c0_2 = arith.constant 0 : index
    %3 = vector.load %arg1[%c0, %c0_1, %c0_2] : memref<8x2x64xf32, #tpu.memory_space<vmem>>, vector<8x2x64xf32>
    %4 = vector.shape_cast %3 : vector<8x2x64xf32> to vector<16x64xf32>
    %c0_3 = arith.constant 0 : index
    %c0_4 = arith.constant 0 : index
    %c0_5 = arith.constant 0 : index
    %5 = vector.load %arg2[%c0_3, %c0_4, %c0_5] : memref<8x2x64xf32, #tpu.memory_space<vmem>>, vector<8x2x64xf32>
    %6 = vector.shape_cast %5 : vector<8x2x64xf32> to vector<16x64xf32>
    %c0_6 = arith.constant 0 : index
    %c0_7 = arith.constant 0 : index
    %c0_8 = arith.constant 0 : index
    %7 = vector.load %arg3[%c0_6, %c0_7, %c0_8] : memref<8x2x16xf32, #tpu.memory_space<vmem>>, vector<8x2x16xf32>
    %8 = vector.shape_cast %7 : vector<8x2x16xf32> to vector<16x16xf32>
    %c0_9 = arith.constant 0 : index
    %c0_10 = arith.constant 0 : index
    %c0_11 = arith.constant 0 : index
    %9 = vector.load %arg4[%c0_9, %c0_10, %c0_11] : memref<8x2x16xf32, #tpu.memory_space<vmem>>, vector<8x2x16xf32>
    %10 = vector.shape_cast %9 : vector<8x2x16xf32> to vector<16x16xf32>
    %c0_12 = arith.constant 0 : index
    %c0_13 = arith.constant 0 : index
    %11 = vector.load %arg7[%c0_12, %c0_13] : memref<64x1024xf32, #tpu.memory_space<vmem>>, vector<64x1024xf32>
    %cst = arith.constant dense<0.000000e+00> : vector<16x1024xf32>
    %12 = tpu.matmul %6, %11, %cst {dimension_numbers = #tpu.dot_dimension_numbers<[1], [0], [0], [1], [0, 0, 1, 1], [], []>} : vector<16x64xf32>, vector<64x1024xf32>, vector<16x1024xf32> -> vector<16x1024xf32>
    %13 = arith.mulf %6, %4 : vector<16x64xf32>
    %c0_14 = arith.constant 0 : index
    %c0_15 = arith.constant 0 : index
    %14 = vector.load %arg7[%c0_14, %c0_15] : memref<64x1024xf32, #tpu.memory_space<vmem>>, vector<64x1024xf32>
    %cst_16 = arith.constant dense<0.000000e+00> : vector<16x1024xf32>
    %15 = tpu.matmul %13, %14, %cst_16 {dimension_numbers = #tpu.dot_dimension_numbers<[1], [0], [0], [1], [0, 0, 1, 1], [], []>} : vector<16x64xf32>, vector<64x1024xf32>, vector<16x1024xf32> -> vector<16x1024xf32>
    %c0_17 = arith.constant 0 : index
    %c0_18 = arith.constant 0 : index
    %16 = vector.load %arg8[%c0_17, %c0_18] : memref<16x1024xf32, #tpu.memory_space<vmem>>, vector<16x1024xf32>
    %cst_19 = arith.constant dense<0.000000e+00> : vector<16x1024xf32>
    %17 = tpu.matmul %8, %16, %cst_19 {dimension_numbers = #tpu.dot_dimension_numbers<[1], [0], [0], [1], [0, 0, 1, 1], [], []>} : vector<16x16xf32>, vector<16x1024xf32>, vector<16x1024xf32> -> vector<16x1024xf32>
    %c0_20 = arith.constant 0 : index
    %c0_21 = arith.constant 0 : index
    %18 = vector.load %arg8[%c0_20, %c0_21] : memref<16x1024xf32, #tpu.memory_space<vmem>>, vector<16x1024xf32>
    %cst_22 = arith.constant dense<0.000000e+00> : vector<16x1024xf32>
    %19 = tpu.matmul %10, %18, %cst_22 {dimension_numbers = #tpu.dot_dimension_numbers<[1], [0], [0], [1], [0, 0, 1, 1], [], []>} : vector<16x16xf32>, vector<16x1024xf32>, vector<16x1024xf32> -> vector<16x1024xf32>
    %c0_23 = arith.constant 0 : index
    %c0_24 = arith.constant 0 : index
    %20 = vector.load %arg5[%c0_23, %c0_24] : memref<1x1024xf32, #tpu.memory_space<vmem>>, vector<1x1024xf32>
    %21 = vector.broadcast %20 : vector<1x1024xf32> to vector<16x1024xf32>
    %22 = arith.mulf %12, %21 : vector<16x1024xf32>
    %23 = math.exp %22 : vector<16x1024xf32>
    %c0_25 = arith.constant 0 : index
    %c0_26 = arith.constant 0 : index
    %24 = vector.load %arg12[%c0_25, %c0_26] : memref<16x1024xf32, #tpu.memory_space<vmem>>, vector<16x1024xf32>
    tpu.vector_store %arg12[%c0_25, %c0_26], %23 {strides = array<i32>} : memref<16x1024xf32, #tpu.memory_space<vmem>>, vector<16x1024xf32>,
    %25 = arith.mulf %15, %17 : vector<16x1024xf32>
    %c0_27 = arith.constant 0 : index
    %c0_28 = arith.constant 0 : index
    %26 = vector.load %arg13[%c0_27, %c0_28] : memref<16x1024xf32, #tpu.memory_space<vmem>>, vector<16x1024xf32>
    tpu.vector_store %arg13[%c0_27, %c0_28], %25 {strides = array<i32>} : memref<16x1024xf32, #tpu.memory_space<vmem>>, vector<16x1024xf32>,
    %c0_29 = arith.constant 0 : index
    %c0_30 = arith.constant 0 : index
    %27 = vector.load %arg14[%c0_29, %c0_30] : memref<16x1024xf32, #tpu.memory_space<vmem>>, vector<16x1024xf32>
    tpu.vector_store %arg14[%c0_29, %c0_30], %19 {strides = array<i32>} : memref<16x1024xf32, #tpu.memory_space<vmem>>, vector<16x1024xf32>,
    %c0_31 = arith.constant 0 : index
    %c0_32 = arith.constant 0 : index
    %28 = vector.load %arg11[%c0_31, %c0_32] : memref<2x1024xf32, #tpu.memory_space<vmem>>, vector<2x1024xf32>
    %c0_33 = arith.constant 0 : index
    %c0_34 = arith.constant 0 : index
    %29 = vector.load %arg12[%c0_33, %c0_34] : memref<16x1024xf32, #tpu.memory_space<vmem>>, vector<2x1024xf32>
    %30 = arith.mulf %29, %28 : vector<2x1024xf32>
    %c0_35 = arith.constant 0 : index
    %c0_36 = arith.constant 0 : index
    %31 = vector.load %arg13[%c0_35, %c0_36] : memref<16x1024xf32, #tpu.memory_space<vmem>>, vector<2x1024xf32>
    %32 = arith.addf %30, %31 : vector<2x1024xf32>
    %c0_37 = arith.constant 0 : index
    %c0_38 = arith.constant 0 : index
    %33 = vector.load %arg14[%c0_37, %c0_38] : memref<16x1024xf32, #tpu.memory_space<vmem>>, vector<2x1024xf32>
    %34 = arith.mulf %32, %33 : vector<2x1024xf32>
    %c0_39 = arith.constant 0 : index
    %c0_40 = arith.constant 0 : index
    %35 = vector.load %arg15[%c0_39, %c0_40] : memref<16x1024xf32, #tpu.memory_space<vmem>>, vector<2x1024xf32>
    tpu.vector_store %arg15[%c0_39, %c0_40], %34 {strides = array<i32>} : memref<16x1024xf32, #tpu.memory_space<vmem>>, vector<2x1024xf32>,
    %c2 = arith.constant 2 : index
    %c0_41 = arith.constant 0 : index
    %36 = vector.load %arg12[%c2, %c0_41] : memref<16x1024xf32, #tpu.memory_space<vmem>>, vector<2x1024xf32>
    %37 = arith.mulf %36, %32 : vector<2x1024xf32>
    %c2_42 = arith.constant 2 : index
    %c0_43 = arith.constant 0 : index
    %38 = vector.load %arg13[%c2_42, %c0_43] : memref<16x1024xf32, #tpu.memory_space<vmem>>, vector<2x1024xf32>
    %39 = arith.addf %37, %38 : vector<2x1024xf32>
    %c2_44 = arith.constant 2 : index
    %c0_45 = arith.constant 0 : index
    %40 = vector.load %arg14[%c2_44, %c0_45] : memref<16x1024xf32, #tpu.memory_space<vmem>>, vector<2x1024xf32>
    %41 = arith.mulf %39, %40 : vector<2x1024xf32>
    %c2_46 = arith.constant 2 : index
    %c0_47 = arith.constant 0 : index
    %42 = vector.load %arg15[%c2_46, %c0_47] : memref<16x1024xf32, #tpu.memory_space<vmem>>, vector<2x1024xf32>
    tpu.vector_store %arg15[%c2_46, %c0_47], %41 {strides = array<i32>} : memref<16x1024xf32, #tpu.memory_space<vmem>>, vector<2x1024xf32>,
    %c4 = arith.constant 4 : index
    %c0_48 = arith.constant 0 : index
    %43 = vector.load %arg12[%c4, %c0_48] : memref<16x1024xf32, #tpu.memory_space<vmem>>, vector<2x1024xf32>
    %44 = arith.mulf %43, %39 : vector<2x1024xf32>
    %c4_49 = arith.constant 4 : index
    %c0_50 = arith.constant 0 : index
    %45 = vector.load %arg13[%c4_49, %c0_50] : memref<16x1024xf32, #tpu.memory_space<vmem>>, vector<2x1024xf32>
    %46 = arith.addf %44, %45 : vector<2x1024xf32>
    %c4_51 = arith.constant 4 : index
    %c0_52 = arith.constant 0 : index
    %47 = vector.load %arg14[%c4_51, %c0_52] : memref<16x1024xf32, #tpu.memory_space<vmem>>, vector<2x1024xf32>
    %48 = arith.mulf %46, %47 : vector<2x1024xf32>
    %c4_53 = arith.constant 4 : index
    %c0_54 = arith.constant 0 : index
    %49 = vector.load %arg15[%c4_53, %c0_54] : memref<16x1024xf32, #tpu.memory_space<vmem>>, vector<2x1024xf32>
    tpu.vector_store %arg15[%c4_53, %c0_54], %48 {strides = array<i32>} : memref<16x1024xf32, #tpu.memory_space<vmem>>, vector<2x1024xf32>,
    %c6 = arith.constant 6 : index
    %c0_55 = arith.constant 0 : index
    %50 = vector.load %arg12[%c6, %c0_55] : memref<16x1024xf32, #tpu.memory_space<vmem>>, vector<2x1024xf32>
    %51 = arith.mulf %50, %46 : vector<2x1024xf32>
    %c6_56 = arith.constant 6 : index
    %c0_57 = arith.constant 0 : index
    %52 = vector.load %arg13[%c6_56, %c0_57] : memref<16x1024xf32, #tpu.memory_space<vmem>>, vector<2x1024xf32>
    %53 = arith.addf %51, %52 : vector<2x1024xf32>
    %c6_58 = arith.constant 6 : index
    %c0_59 = arith.constant 0 : index
    %54 = vector.load %arg14[%c6_58, %c0_59] : memref<16x1024xf32, #tpu.memory_space<vmem>>, vector<2x1024xf32>
    %55 = arith.mulf %53, %54 : vector<2x1024xf32>
    %c6_60 = arith.constant 6 : index
    %c0_61 = arith.constant 0 : index
    %56 = vector.load %arg15[%c6_60, %c0_61] : memref<16x1024xf32, #tpu.memory_space<vmem>>, vector<2x1024xf32>
    tpu.vector_store %arg15[%c6_60, %c0_61], %55 {strides = array<i32>} : memref<16x1024xf32, #tpu.memory_space<vmem>>, vector<2x1024xf32>,
    %c8 = arith.constant 8 : index
    %c0_62 = arith.constant 0 : index
    %57 = vector.load %arg12[%c8, %c0_62] : memref<16x1024xf32, #tpu.memory_space<vmem>>, vector<2x1024xf32>
    %58 = arith.mulf %57, %53 : vector<2x1024xf32>
    %c8_63 = arith.constant 8 : index
    %c0_64 = arith.constant 0 : index
    %59 = vector.load %arg13[%c8_63, %c0_64] : memref<16x1024xf32, #tpu.memory_space<vmem>>, vector<2x1024xf32>
    %60 = arith.addf %58, %59 : vector<2x1024xf32>
    %c8_65 = arith.constant 8 : index
    %c0_66 = arith.constant 0 : index
    %61 = vector.load %arg14[%c8_65, %c0_66] : memref<16x1024xf32, #tpu.memory_space<vmem>>, vector<2x1024xf32>
    %62 = arith.mulf %60, %61 : vector<2x1024xf32>
    %c8_67 = arith.constant 8 : index
    %c0_68 = arith.constant 0 : index
    %63 = vector.load %arg15[%c8_67, %c0_68] : memref<16x1024xf32, #tpu.memory_space<vmem>>, vector<2x1024xf32>
    tpu.vector_store %arg15[%c8_67, %c0_68], %62 {strides = array<i32>} : memref<16x1024xf32, #tpu.memory_space<vmem>>, vector<2x1024xf32>,
    %c10 = arith.constant 10 : index
    %c0_69 = arith.constant 0 : index
    %64 = vector.load %arg12[%c10, %c0_69] : memref<16x1024xf32, #tpu.memory_space<vmem>>, vector<2x1024xf32>
    %65 = arith.mulf %64, %60 : vector<2x1024xf32>
    %c10_70 = arith.constant 10 : index
    %c0_71 = arith.constant 0 : index
    %66 = vector.load %arg13[%c10_70, %c0_71] : memref<16x1024xf32, #tpu.memory_space<vmem>>, vector<2x1024xf32>
    %67 = arith.addf %65, %66 : vector<2x1024xf32>
    %c10_72 = arith.constant 10 : index
    %c0_73 = arith.constant 0 : index
    %68 = vector.load %arg14[%c10_72, %c0_73] : memref<16x1024xf32, #tpu.memory_space<vmem>>, vector<2x1024xf32>
    %69 = arith.mulf %67, %68 : vector<2x1024xf32>
    %c10_74 = arith.constant 10 : index
    %c0_75 = arith.constant 0 : index
    %70 = vector.load %arg15[%c10_74, %c0_75] : memref<16x1024xf32, #tpu.memory_space<vmem>>, vector<2x1024xf32>
    tpu.vector_store %arg15[%c10_74, %c0_75], %69 {strides = array<i32>} : memref<16x1024xf32, #tpu.memory_space<vmem>>, vector<2x1024xf32>,
    %c12 = arith.constant 12 : index
    %c0_76 = arith.constant 0 : index
    %71 = vector.load %arg12[%c12, %c0_76] : memref<16x1024xf32, #tpu.memory_space<vmem>>, vector<2x1024xf32>
    %72 = arith.mulf %71, %67 : vector<2x1024xf32>
    %c12_77 = arith.constant 12 : index
    %c0_78 = arith.constant 0 : index
    %73 = vector.load %arg13[%c12_77, %c0_78] : memref<16x1024xf32, #tpu.memory_space<vmem>>, vector<2x1024xf32>
    %74 = arith.addf %72, %73 : vector<2x1024xf32>
    %c12_79 = arith.constant 12 : index
    %c0_80 = arith.constant 0 : index
    %75 = vector.load %arg14[%c12_79, %c0_80] : memref<16x1024xf32, #tpu.memory_space<vmem>>, vector<2x1024xf32>
    %76 = arith.mulf %74, %75 : vector<2x1024xf32>
    %c12_81 = arith.constant 12 : index
    %c0_82 = arith.constant 0 : index
    %77 = vector.load %arg15[%c12_81, %c0_82] : memref<16x1024xf32, #tpu.memory_space<vmem>>, vector<2x1024xf32>
    tpu.vector_store %arg15[%c12_81, %c0_82], %76 {strides = array<i32>} : memref<16x1024xf32, #tpu.memory_space<vmem>>, vector<2x1024xf32>,
    %c14 = arith.constant 14 : index
    %c0_83 = arith.constant 0 : index
    %78 = vector.load %arg12[%c14, %c0_83] : memref<16x1024xf32, #tpu.memory_space<vmem>>, vector<2x1024xf32>
    %79 = arith.mulf %78, %74 : vector<2x1024xf32>
    %c14_84 = arith.constant 14 : index
    %c0_85 = arith.constant 0 : index
    %80 = vector.load %arg13[%c14_84, %c0_85] : memref<16x1024xf32, #tpu.memory_space<vmem>>, vector<2x1024xf32>
    %81 = arith.addf %79, %80 : vector<2x1024xf32>
    %c14_86 = arith.constant 14 : index
    %c0_87 = arith.constant 0 : index
    %82 = vector.load %arg14[%c14_86, %c0_87] : memref<16x1024xf32, #tpu.memory_space<vmem>>, vector<2x1024xf32>
    %83 = arith.mulf %81, %82 : vector<2x1024xf32>
    %c14_88 = arith.constant 14 : index
    %c0_89 = arith.constant 0 : index
    %84 = vector.load %arg15[%c14_88, %c0_89] : memref<16x1024xf32, #tpu.memory_space<vmem>>, vector<2x1024xf32>
    tpu.vector_store %arg15[%c14_88, %c0_89], %83 {strides = array<i32>} : memref<16x1024xf32, #tpu.memory_space<vmem>>, vector<2x1024xf32>,
    %c0_90 = arith.constant 0 : index
    %c0_91 = arith.constant 0 : index
    %85 = vector.load %arg11[%c0_90, %c0_91] : memref<2x1024xf32, #tpu.memory_space<vmem>>, vector<2x1024xf32>
    tpu.vector_store %arg11[%c0_90, %c0_91], %81 {strides = array<i32>} : memref<2x1024xf32, #tpu.memory_space<vmem>>, vector<2x1024xf32>,
    %c0_92 = arith.constant 0 : index
    %c0_93 = arith.constant 0 : index
    %86 = vector.load %arg15[%c0_92, %c0_93] : memref<16x1024xf32, #tpu.memory_space<vmem>>, vector<16x1024xf32>
    %c0_94 = arith.constant 0 : index
    %c0_95 = arith.constant 0 : index
    %87 = vector.load %arg9[%c0_94, %c0_95] : memref<1024x64xf32, #tpu.memory_space<vmem>>, vector<1024x64xf32>
    %cst_96 = arith.constant dense<0.000000e+00> : vector<16x64xf32>
    %88 = tpu.matmul %86, %87, %cst_96 {dimension_numbers = #tpu.dot_dimension_numbers<[1], [0], [0], [1], [0, 0, 1, 1], [], []>} : vector<16x1024xf32>, vector<1024x64xf32>, vector<16x64xf32> -> vector<16x64xf32>
    %c0_97 = arith.constant 0 : index
    %c0_98 = arith.constant 0 : index
    %89 = vector.load %arg6[%c0_97, %c0_98] : memref<1x64xf32, #tpu.memory_space<vmem>>, vector<1x64xf32>
    %90 = vector.broadcast %89 : vector<1x64xf32> to vector<16x64xf32>
    %91 = arith.mulf %4, %90 : vector<16x64xf32>
    %92 = arith.addf %88, %91 : vector<16x64xf32>
    %93 = vector.shape_cast %92 : vector<16x64xf32> to vector<8x2x64xf32>
    %c0_99 = arith.constant 0 : index
    %c0_100 = arith.constant 0 : index
    %c0_101 = arith.constant 0 : index
    %94 = vector.load %arg10[%c0_99, %c0_100, %c0_101] : memref<8x2x64xf32, #tpu.memory_space<vmem>>, vector<8x2x64xf32>
    tpu.vector_store %arg10[%c0_99, %c0_100, %c0_101], %93 {strides = array<i32>} : memref<8x2x64xf32, #tpu.memory_space<vmem>>, vector<8x2x64xf32>,
    return
  }
  func.func @transform_0(%arg0: i32) -> (i32, i32, i32) {
    %c0_i32 = arith.constant 0 : i32
    %c0_i32_0 = arith.constant 0 : i32
    %c0_i32_1 = arith.constant 0 : i32
    return %arg0, %c0_i32, %c0_i32_0 : i32, i32, i32
  }
  func.func @transform_1(%arg0: i32) -> (i32, i32, i32) {
    %c0_i32 = arith.constant 0 : i32
    %c0_i32_0 = arith.constant 0 : i32
    %c0_i32_1 = arith.constant 0 : i32
    return %arg0, %c0_i32, %c0_i32_0 : i32, i32, i32
  }
  func.func @transform_2(%arg0: i32) -> (i32, i32, i32) {
    %c0_i32 = arith.constant 0 : i32
    %c0_i32_0 = arith.constant 0 : i32
    %c0_i32_1 = arith.constant 0 : i32
    return %arg0, %c0_i32, %c0_i32_0 : i32, i32, i32
  }
  func.func @transform_3(%arg0: i32) -> (i32, i32, i32) {
    %c0_i32 = arith.constant 0 : i32
    %c0_i32_0 = arith.constant 0 : i32
    %c0_i32_1 = arith.constant 0 : i32
    return %arg0, %c0_i32, %c0_i32_0 : i32, i32, i32
  }
  func.func @transform_4(%arg0: i32) -> (i32, i32) {
    %c0_i32 = arith.constant 0 : i32
    %c0_i32_0 = arith.constant 0 : i32
    %c0_i32_1 = arith.constant 0 : i32
    return %c0_i32, %c0_i32_0 : i32, i32
  }
  func.func @transform_5(%arg0: i32) -> (i32, i32) {
    %c0_i32 = arith.constant 0 : i32
    %c0_i32_0 = arith.constant 0 : i32
    %c0_i32_1 = arith.constant 0 : i32
    return %c0_i32, %c0_i32_0 : i32, i32
  }
  func.func @transform_6(%arg0: i32) -> (i32, i32) {
    %c0_i32 = arith.constant 0 : i32
    %c0_i32_0 = arith.constant 0 : i32
    %c0_i32_1 = arith.constant 0 : i32
    return %c0_i32, %c0_i32_0 : i32, i32
  }
  func.func @transform_7(%arg0: i32) -> (i32, i32) {
    %c0_i32 = arith.constant 0 : i32
    %c0_i32_0 = arith.constant 0 : i32
    %c0_i32_1 = arith.constant 0 : i32
    return %c0_i32, %c0_i32_0 : i32, i32
  }
  func.func @transform_8(%arg0: i32) -> (i32, i32) {
    %c0_i32 = arith.constant 0 : i32
    %c0_i32_0 = arith.constant 0 : i32
    %c0_i32_1 = arith.constant 0 : i32
    return %c0_i32, %c0_i32_0 : i32, i32
  }
  func.func @transform_9(%arg0: i32) -> (i32, i32, i32) {
    %c0_i32 = arith.constant 0 : i32
    %c0_i32_0 = arith.constant 0 : i32
    %c0_i32_1 = arith.constant 0 : i32
    return %arg0, %c0_i32, %c0_i32_0 : i32, i32, i32
  }
}

module attributes {stable_mosaic.version = 11 : i64} {
  func.func @_gated_matmul_kernel(%arg0: i32, %arg1: i32, %arg2: memref<16x64xf32, #tpu.memory_space<vmem>>, %arg3: memref<16x64xf32, #tpu.memory_space<vmem>>, %arg4: memref<64x128xbf16, #tpu.memory_space<vmem>>, %arg5: memref<1x128xf32, #tpu.memory_space<vmem>>, %arg6: memref<16x128xf32, #tpu.memory_space<vmem>>) attributes {dimension_semantics = [#tpu.dimension_semantics<parallel>, #tpu.dimension_semantics<parallel>], iteration_bounds = array<i64: 1, 1>, scalar_prefetch = 0 : i64, scratch_operands = 0 : i64, tpu.core_type = #tpu.core_type<tc>, window_params = [{transform_indices = @transform_0, window_bounds = array<i64: 16, 64>}, {transform_indices = @transform_1, window_bounds = array<i64: 16, 64>}, {transform_indices = @transform_2, window_bounds = array<i64: 64, 128>}, {transform_indices = @transform_3, window_bounds = array<i64: 1, 128>}, {transform_indices = @transform_4, window_bounds = array<i64: 16, 128>}]} {
    %c0 = arith.constant 0 : index
    %c0_0 = arith.constant 0 : index
    %0 = vector.load %arg3[%c0, %c0_0] : memref<16x64xf32, #tpu.memory_space<vmem>>, vector<16x64xf32>
    %c0_1 = arith.constant 0 : index
    %c0_2 = arith.constant 0 : index
    %1 = vector.load %arg2[%c0_1, %c0_2] : memref<16x64xf32, #tpu.memory_space<vmem>>, vector<16x64xf32>
    %2 = arith.negf %0 : vector<16x64xf32>
    %3 = math.exp %2 : vector<16x64xf32>
    %cst = arith.constant 1.000000e+00 : f32
    %4 = vector.broadcast %cst : f32 to vector<16x64xf32>
    %5 = arith.addf %4, %3 : vector<16x64xf32>
    %6 = arith.divf %4, %5 : vector<16x64xf32>
    %7 = arith.mulf %0, %6 : vector<16x64xf32>
    %8 = arith.mulf %1, %7 : vector<16x64xf32>
    %9 = arith.truncf %8 : vector<16x64xf32> to vector<16x64xbf16>
    %c0_3 = arith.constant 0 : index
    %c0_4 = arith.constant 0 : index
    %10 = vector.load %arg4[%c0_3, %c0_4] : memref<64x128xbf16, #tpu.memory_space<vmem>>, vector<64x128xbf16>
    %cst_5 = arith.constant dense<0.000000e+00> : vector<16x128xf32>
    %11 = tpu.matmul %9, %10, %cst_5 {dimension_numbers = #tpu.dot_dimension_numbers<[1], [0], [0], [1], [0, 0, 1, 1], [], []>} : vector<16x64xbf16>, vector<64x128xbf16>, vector<16x128xf32> -> vector<16x128xf32>
    %c0_6 = arith.constant 0 : index
    %c0_7 = arith.constant 0 : index
    %12 = vector.load %arg5[%c0_6, %c0_7] : memref<1x128xf32, #tpu.memory_space<vmem>>, vector<1x128xf32>
    %13 = vector.broadcast %12 : vector<1x128xf32> to vector<16x128xf32>
    %14 = arith.addf %11, %13 : vector<16x128xf32>
    %c0_8 = arith.constant 0 : index
    %c0_9 = arith.constant 0 : index
    %15 = vector.load %arg6[%c0_8, %c0_9] : memref<16x128xf32, #tpu.memory_space<vmem>>, vector<16x128xf32>
    tpu.vector_store %arg6[%c0_8, %c0_9], %14 {strides = array<i32>} : memref<16x128xf32, #tpu.memory_space<vmem>>, vector<16x128xf32>,
    return
  }
  func.func @transform_0(%arg0: i32, %arg1: i32) -> (i32, i32) {
    %c0_i32 = arith.constant 0 : i32
    %c0_i32_0 = arith.constant 0 : i32
    return %arg0, %c0_i32 : i32, i32
  }
  func.func @transform_1(%arg0: i32, %arg1: i32) -> (i32, i32) {
    %c0_i32 = arith.constant 0 : i32
    %c0_i32_0 = arith.constant 0 : i32
    return %arg0, %c0_i32 : i32, i32
  }
  func.func @transform_2(%arg0: i32, %arg1: i32) -> (i32, i32) {
    %c0_i32 = arith.constant 0 : i32
    %c0_i32_0 = arith.constant 0 : i32
    return %c0_i32, %arg1 : i32, i32
  }
  func.func @transform_3(%arg0: i32, %arg1: i32) -> (i32, i32) {
    %c0_i32 = arith.constant 0 : i32
    %c0_i32_0 = arith.constant 0 : i32
    return %c0_i32, %arg1 : i32, i32
  }
  func.func @transform_4(%arg0: i32, %arg1: i32) -> (i32, i32) {
    %c0_i32 = arith.constant 0 : i32
    return %arg0, %arg1 : i32, i32
  }
}

module attributes {stable_mosaic.version = 11 : i64} {
  func.func @_scan_kernel(%arg0: i32, %arg1: memref<8x2x64xf32, #tpu.memory_space<vmem>>, %arg2: memref<8x2x64xf32, #tpu.memory_space<vmem>>, %arg3: memref<8x2x16xf32, #tpu.memory_space<vmem>>, %arg4: memref<8x2x16xf32, #tpu.memory_space<vmem>>, %arg5: memref<1x1024xf32, #tpu.memory_space<vmem>>, %arg6: memref<1x64xf32, #tpu.memory_space<vmem>>, %arg7: memref<64x1024xf32, #tpu.memory_space<vmem>>, %arg8: memref<16x1024xf32, #tpu.memory_space<vmem>>, %arg9: memref<1024x64xf32, #tpu.memory_space<vmem>>, %arg10: memref<8x2x64xf32, #tpu.memory_space<vmem>>, %arg11: memref<2x1024xf32, #tpu.memory_space<vmem>>, %arg12: memref<16x1024xf32, #tpu.memory_space<vmem>>, %arg13: memref<16x1024xf32, #tpu.memory_space<vmem>>, %arg14: memref<16x1024xf32, #tpu.memory_space<vmem>>, %arg15: memref<16x1024xf32, #tpu.memory_space<vmem>>) attributes {dimension_semantics = [#tpu.dimension_semantics<arbitrary>], iteration_bounds = array<i64: 1>, scalar_prefetch = 0 : i64, scratch_operands = 5 : i64, tpu.core_type = #tpu.core_type<tc>, window_params = [{transform_indices = @transform_0, window_bounds = array<i64: 8, 2, 64>}, {transform_indices = @transform_1, window_bounds = array<i64: 8, 2, 64>}, {transform_indices = @transform_2, window_bounds = array<i64: 8, 2, 16>}, {transform_indices = @transform_3, window_bounds = array<i64: 8, 2, 16>}, {pipeline_mode = #tpu.pipeline_mode<synchronous>, transform_indices = @transform_4, window_bounds = array<i64: 1, 1024>}, {pipeline_mode = #tpu.pipeline_mode<synchronous>, transform_indices = @transform_5, window_bounds = array<i64: 1, 64>}, {pipeline_mode = #tpu.pipeline_mode<synchronous>, transform_indices = @transform_6, window_bounds = array<i64: 64, 1024>}, {pipeline_mode = #tpu.pipeline_mode<synchronous>, transform_indices = @transform_7, window_bounds = array<i64: 16, 1024>}, {pipeline_mode = #tpu.pipeline_mode<synchronous>, transform_indices = @transform_8, window_bounds = array<i64: 1024, 64>}, {transform_indices = @transform_9, window_bounds = array<i64: 8, 2, 64>}]} {
    %c0_i32 = arith.constant 0 : i32
    %0 = arith.cmpi eq, %arg0, %c0_i32 : i32
    %1 = arith.extui %0 : i1 to i32
    %c0_i32_0 = arith.constant 0 : i32
    %2 = arith.cmpi ne, %1, %c0_i32_0 : i32
    scf.if %2 {
      %cst_102 = arith.constant 0.000000e+00 : f32
      %95 = vector.broadcast %cst_102 : f32 to vector<2x1024xf32>
      %c0_103 = arith.constant 0 : index
      %c0_104 = arith.constant 0 : index
      %96 = vector.load %arg11[%c0_103, %c0_104] : memref<2x1024xf32, #tpu.memory_space<vmem>>, vector<2x1024xf32>
      tpu.vector_store %arg11[%c0_103, %c0_104], %95 {strides = array<i32>} : memref<2x1024xf32, #tpu.memory_space<vmem>>, vector<2x1024xf32>,
    } else {
    }
    %c0 = arith.constant 0 : index
    %c0_1 = arith.constant 0 : index
    %c0_2 = arith.constant 0 : index
    %3 = vector.load %arg1[%c0, %c0_1, %c0_2] : memref<8x2x64xf32, #tpu.memory_space<vmem>>, vector<8x2x64xf32>
    %4 = vector.shape_cast %3 : vector<8x2x64xf32> to vector<16x64xf32>
    %c0_3 = arith.constant 0 : index
    %c0_4 = arith.constant 0 : index
    %c0_5 = arith.constant 0 : index
    %5 = vector.load %arg2[%c0_3, %c0_4, %c0_5] : memref<8x2x64xf32, #tpu.memory_space<vmem>>, vector<8x2x64xf32>
    %6 = vector.shape_cast %5 : vector<8x2x64xf32> to vector<16x64xf32>
    %c0_6 = arith.constant 0 : index
    %c0_7 = arith.constant 0 : index
    %c0_8 = arith.constant 0 : index
    %7 = vector.load %arg3[%c0_6, %c0_7, %c0_8] : memref<8x2x16xf32, #tpu.memory_space<vmem>>, vector<8x2x16xf32>
    %8 = vector.shape_cast %7 : vector<8x2x16xf32> to vector<16x16xf32>
    %c0_9 = arith.constant 0 : index
    %c0_10 = arith.constant 0 : index
    %c0_11 = arith.constant 0 : index
    %9 = vector.load %arg4[%c0_9, %c0_10, %c0_11] : memref<8x2x16xf32, #tpu.memory_space<vmem>>, vector<8x2x16xf32>
    %10 = vector.shape_cast %9 : vector<8x2x16xf32> to vector<16x16xf32>
    %c0_12 = arith.constant 0 : index
    %c0_13 = arith.constant 0 : index
    %11 = vector.load %arg7[%c0_12, %c0_13] : memref<64x1024xf32, #tpu.memory_space<vmem>>, vector<64x1024xf32>
    %cst = arith.constant dense<0.000000e+00> : vector<16x1024xf32>
    %12 = tpu.matmul %6, %11, %cst {dimension_numbers = #tpu.dot_dimension_numbers<[1], [0], [0], [1], [0, 0, 1, 1], [], []>} : vector<16x64xf32>, vector<64x1024xf32>, vector<16x1024xf32> -> vector<16x1024xf32>
    %13 = arith.mulf %6, %4 : vector<16x64xf32>
    %c0_14 = arith.constant 0 : index
    %c0_15 = arith.constant 0 : index
    %14 = vector.load %arg7[%c0_14, %c0_15] : memref<64x1024xf32, #tpu.memory_space<vmem>>, vector<64x1024xf32>
    %cst_16 = arith.constant dense<0.000000e+00> : vector<16x1024xf32>
    %15 = tpu.matmul %13, %14, %cst_16 {dimension_numbers = #tpu.dot_dimension_numbers<[1], [0], [0], [1], [0, 0, 1, 1], [], []>} : vector<16x64xf32>, vector<64x1024xf32>, vector<16x1024xf32> -> vector<16x1024xf32>
    %c0_17 = arith.constant 0 : index
    %c0_18 = arith.constant 0 : index
    %16 = vector.load %arg8[%c0_17, %c0_18] : memref<16x1024xf32, #tpu.memory_space<vmem>>, vector<16x1024xf32>
    %cst_19 = arith.constant dense<0.000000e+00> : vector<16x1024xf32>
    %17 = tpu.matmul %8, %16, %cst_19 {dimension_numbers = #tpu.dot_dimension_numbers<[1], [0], [0], [1], [0, 0, 1, 1], [], []>} : vector<16x16xf32>, vector<16x1024xf32>, vector<16x1024xf32> -> vector<16x1024xf32>
    %c0_20 = arith.constant 0 : index
    %c0_21 = arith.constant 0 : index
    %18 = vector.load %arg8[%c0_20, %c0_21] : memref<16x1024xf32, #tpu.memory_space<vmem>>, vector<16x1024xf32>
    %cst_22 = arith.constant dense<0.000000e+00> : vector<16x1024xf32>
    %19 = tpu.matmul %10, %18, %cst_22 {dimension_numbers = #tpu.dot_dimension_numbers<[1], [0], [0], [1], [0, 0, 1, 1], [], []>} : vector<16x16xf32>, vector<16x1024xf32>, vector<16x1024xf32> -> vector<16x1024xf32>
    %c0_23 = arith.constant 0 : index
    %c0_24 = arith.constant 0 : index
    %20 = vector.load %arg5[%c0_23, %c0_24] : memref<1x1024xf32, #tpu.memory_space<vmem>>, vector<1x1024xf32>
    %21 = vector.broadcast %20 : vector<1x1024xf32> to vector<16x1024xf32>
    %22 = arith.mulf %12, %21 : vector<16x1024xf32>
    %23 = math.exp %22 : vector<16x1024xf32>
    %c0_25 = arith.constant 0 : index
    %c0_26 = arith.constant 0 : index
    %24 = vector.load %arg12[%c0_25, %c0_26] : memref<16x1024xf32, #tpu.memory_space<vmem>>, vector<16x1024xf32>
    tpu.vector_store %arg12[%c0_25, %c0_26], %23 {strides = array<i32>} : memref<16x1024xf32, #tpu.memory_space<vmem>>, vector<16x1024xf32>,
    %25 = arith.mulf %15, %17 : vector<16x1024xf32>
    %c0_27 = arith.constant 0 : index
    %c0_28 = arith.constant 0 : index
    %26 = vector.load %arg13[%c0_27, %c0_28] : memref<16x1024xf32, #tpu.memory_space<vmem>>, vector<16x1024xf32>
    tpu.vector_store %arg13[%c0_27, %c0_28], %25 {strides = array<i32>} : memref<16x1024xf32, #tpu.memory_space<vmem>>, vector<16x1024xf32>,
    %c0_29 = arith.constant 0 : index
    %c0_30 = arith.constant 0 : index
    %27 = vector.load %arg14[%c0_29, %c0_30] : memref<16x1024xf32, #tpu.memory_space<vmem>>, vector<16x1024xf32>
    tpu.vector_store %arg14[%c0_29, %c0_30], %19 {strides = array<i32>} : memref<16x1024xf32, #tpu.memory_space<vmem>>, vector<16x1024xf32>,
    %c0_31 = arith.constant 0 : index
    %c0_32 = arith.constant 0 : index
    %28 = vector.load %arg11[%c0_31, %c0_32] : memref<2x1024xf32, #tpu.memory_space<vmem>>, vector<2x1024xf32>
    %c14 = arith.constant 14 : index
    %c0_33 = arith.constant 0 : index
    %29 = vector.load %arg12[%c14, %c0_33] : memref<16x1024xf32, #tpu.memory_space<vmem>>, vector<2x1024xf32>
    %30 = arith.mulf %29, %28 : vector<2x1024xf32>
    %c14_34 = arith.constant 14 : index
    %c0_35 = arith.constant 0 : index
    %31 = vector.load %arg13[%c14_34, %c0_35] : memref<16x1024xf32, #tpu.memory_space<vmem>>, vector<2x1024xf32>
    %32 = arith.addf %30, %31 : vector<2x1024xf32>
    %c14_36 = arith.constant 14 : index
    %c0_37 = arith.constant 0 : index
    %33 = vector.load %arg14[%c14_36, %c0_37] : memref<16x1024xf32, #tpu.memory_space<vmem>>, vector<2x1024xf32>
    %34 = arith.mulf %32, %33 : vector<2x1024xf32>
    %c14_38 = arith.constant 14 : index
    %c0_39 = arith.constant 0 : index
    %35 = vector.load %arg15[%c14_38, %c0_39] : memref<16x1024xf32, #tpu.memory_space<vmem>>, vector<2x1024xf32>
    tpu.vector_store %arg15[%c14_38, %c0_39], %34 {strides = array<i32>} : memref<16x1024xf32, #tpu.memory_space<vmem>>, vector<2x1024xf32>,
    %c12 = arith.constant 12 : index
    %c0_40 = arith.constant 0 : index
    %36 = vector.load %arg12[%c12, %c0_40] : memref<16x1024xf32, #tpu.memory_space<vmem>>, vector<2x1024xf32>
    %37 = arith.mulf %36, %32 : vector<2x1024xf32>
    %c12_41 = arith.constant 12 : index
    %c0_42 = arith.constant 0 : index
    %38 = vector.load %arg13[%c12_41, %c0_42] : memref<16x1024xf32, #tpu.memory_space<vmem>>, vector<2x1024xf32>
    %39 = arith.addf %37, %38 : vector<2x1024xf32>
    %c12_43 = arith.constant 12 : index
    %c0_44 = arith.constant 0 : index
    %40 = vector.load %arg14[%c12_43, %c0_44] : memref<16x1024xf32, #tpu.memory_space<vmem>>, vector<2x1024xf32>
    %41 = arith.mulf %39, %40 : vector<2x1024xf32>
    %c12_45 = arith.constant 12 : index
    %c0_46 = arith.constant 0 : index
    %42 = vector.load %arg15[%c12_45, %c0_46] : memref<16x1024xf32, #tpu.memory_space<vmem>>, vector<2x1024xf32>
    tpu.vector_store %arg15[%c12_45, %c0_46], %41 {strides = array<i32>} : memref<16x1024xf32, #tpu.memory_space<vmem>>, vector<2x1024xf32>,
    %c10 = arith.constant 10 : index
    %c0_47 = arith.constant 0 : index
    %43 = vector.load %arg12[%c10, %c0_47] : memref<16x1024xf32, #tpu.memory_space<vmem>>, vector<2x1024xf32>
    %44 = arith.mulf %43, %39 : vector<2x1024xf32>
    %c10_48 = arith.constant 10 : index
    %c0_49 = arith.constant 0 : index
    %45 = vector.load %arg13[%c10_48, %c0_49] : memref<16x1024xf32, #tpu.memory_space<vmem>>, vector<2x1024xf32>
    %46 = arith.addf %44, %45 : vector<2x1024xf32>
    %c10_50 = arith.constant 10 : index
    %c0_51 = arith.constant 0 : index
    %47 = vector.load %arg14[%c10_50, %c0_51] : memref<16x1024xf32, #tpu.memory_space<vmem>>, vector<2x1024xf32>
    %48 = arith.mulf %46, %47 : vector<2x1024xf32>
    %c10_52 = arith.constant 10 : index
    %c0_53 = arith.constant 0 : index
    %49 = vector.load %arg15[%c10_52, %c0_53] : memref<16x1024xf32, #tpu.memory_space<vmem>>, vector<2x1024xf32>
    tpu.vector_store %arg15[%c10_52, %c0_53], %48 {strides = array<i32>} : memref<16x1024xf32, #tpu.memory_space<vmem>>, vector<2x1024xf32>,
    %c8 = arith.constant 8 : index
    %c0_54 = arith.constant 0 : index
    %50 = vector.load %arg12[%c8, %c0_54] : memref<16x1024xf32, #tpu.memory_space<vmem>>, vector<2x1024xf32>
    %51 = arith.mulf %50, %46 : vector<2x1024xf32>
    %c8_55 = arith.constant 8 : index
    %c0_56 = arith.constant 0 : index
    %52 = vector.load %arg13[%c8_55, %c0_56] : memref<16x1024xf32, #tpu.memory_space<vmem>>, vector<2x1024xf32>
    %53 = arith.addf %51, %52 : vector<2x1024xf32>
    %c8_57 = arith.constant 8 : index
    %c0_58 = arith.constant 0 : index
    %54 = vector.load %arg14[%c8_57, %c0_58] : memref<16x1024xf32, #tpu.memory_space<vmem>>, vector<2x1024xf32>
    %55 = arith.mulf %53, %54 : vector<2x1024xf32>
    %c8_59 = arith.constant 8 : index
    %c0_60 = arith.constant 0 : index
    %56 = vector.load %arg15[%c8_59, %c0_60] : memref<16x1024xf32, #tpu.memory_space<vmem>>, vector<2x1024xf32>
    tpu.vector_store %arg15[%c8_59, %c0_60], %55 {strides = array<i32>} : memref<16x1024xf32, #tpu.memory_space<vmem>>, vector<2x1024xf32>,
    %c6 = arith.constant 6 : index
    %c0_61 = arith.constant 0 : index
    %57 = vector.load %arg12[%c6, %c0_61] : memref<16x1024xf32, #tpu.memory_space<vmem>>, vector<2x1024xf32>
    %58 = arith.mulf %57, %53 : vector<2x1024xf32>
    %c6_62 = arith.constant 6 : index
    %c0_63 = arith.constant 0 : index
    %59 = vector.load %arg13[%c6_62, %c0_63] : memref<16x1024xf32, #tpu.memory_space<vmem>>, vector<2x1024xf32>
    %60 = arith.addf %58, %59 : vector<2x1024xf32>
    %c6_64 = arith.constant 6 : index
    %c0_65 = arith.constant 0 : index
    %61 = vector.load %arg14[%c6_64, %c0_65] : memref<16x1024xf32, #tpu.memory_space<vmem>>, vector<2x1024xf32>
    %62 = arith.mulf %60, %61 : vector<2x1024xf32>
    %c6_66 = arith.constant 6 : index
    %c0_67 = arith.constant 0 : index
    %63 = vector.load %arg15[%c6_66, %c0_67] : memref<16x1024xf32, #tpu.memory_space<vmem>>, vector<2x1024xf32>
    tpu.vector_store %arg15[%c6_66, %c0_67], %62 {strides = array<i32>} : memref<16x1024xf32, #tpu.memory_space<vmem>>, vector<2x1024xf32>,
    %c4 = arith.constant 4 : index
    %c0_68 = arith.constant 0 : index
    %64 = vector.load %arg12[%c4, %c0_68] : memref<16x1024xf32, #tpu.memory_space<vmem>>, vector<2x1024xf32>
    %65 = arith.mulf %64, %60 : vector<2x1024xf32>
    %c4_69 = arith.constant 4 : index
    %c0_70 = arith.constant 0 : index
    %66 = vector.load %arg13[%c4_69, %c0_70] : memref<16x1024xf32, #tpu.memory_space<vmem>>, vector<2x1024xf32>
    %67 = arith.addf %65, %66 : vector<2x1024xf32>
    %c4_71 = arith.constant 4 : index
    %c0_72 = arith.constant 0 : index
    %68 = vector.load %arg14[%c4_71, %c0_72] : memref<16x1024xf32, #tpu.memory_space<vmem>>, vector<2x1024xf32>
    %69 = arith.mulf %67, %68 : vector<2x1024xf32>
    %c4_73 = arith.constant 4 : index
    %c0_74 = arith.constant 0 : index
    %70 = vector.load %arg15[%c4_73, %c0_74] : memref<16x1024xf32, #tpu.memory_space<vmem>>, vector<2x1024xf32>
    tpu.vector_store %arg15[%c4_73, %c0_74], %69 {strides = array<i32>} : memref<16x1024xf32, #tpu.memory_space<vmem>>, vector<2x1024xf32>,
    %c2 = arith.constant 2 : index
    %c0_75 = arith.constant 0 : index
    %71 = vector.load %arg12[%c2, %c0_75] : memref<16x1024xf32, #tpu.memory_space<vmem>>, vector<2x1024xf32>
    %72 = arith.mulf %71, %67 : vector<2x1024xf32>
    %c2_76 = arith.constant 2 : index
    %c0_77 = arith.constant 0 : index
    %73 = vector.load %arg13[%c2_76, %c0_77] : memref<16x1024xf32, #tpu.memory_space<vmem>>, vector<2x1024xf32>
    %74 = arith.addf %72, %73 : vector<2x1024xf32>
    %c2_78 = arith.constant 2 : index
    %c0_79 = arith.constant 0 : index
    %75 = vector.load %arg14[%c2_78, %c0_79] : memref<16x1024xf32, #tpu.memory_space<vmem>>, vector<2x1024xf32>
    %76 = arith.mulf %74, %75 : vector<2x1024xf32>
    %c2_80 = arith.constant 2 : index
    %c0_81 = arith.constant 0 : index
    %77 = vector.load %arg15[%c2_80, %c0_81] : memref<16x1024xf32, #tpu.memory_space<vmem>>, vector<2x1024xf32>
    tpu.vector_store %arg15[%c2_80, %c0_81], %76 {strides = array<i32>} : memref<16x1024xf32, #tpu.memory_space<vmem>>, vector<2x1024xf32>,
    %c0_82 = arith.constant 0 : index
    %c0_83 = arith.constant 0 : index
    %78 = vector.load %arg12[%c0_82, %c0_83] : memref<16x1024xf32, #tpu.memory_space<vmem>>, vector<2x1024xf32>
    %79 = arith.mulf %78, %74 : vector<2x1024xf32>
    %c0_84 = arith.constant 0 : index
    %c0_85 = arith.constant 0 : index
    %80 = vector.load %arg13[%c0_84, %c0_85] : memref<16x1024xf32, #tpu.memory_space<vmem>>, vector<2x1024xf32>
    %81 = arith.addf %79, %80 : vector<2x1024xf32>
    %c0_86 = arith.constant 0 : index
    %c0_87 = arith.constant 0 : index
    %82 = vector.load %arg14[%c0_86, %c0_87] : memref<16x1024xf32, #tpu.memory_space<vmem>>, vector<2x1024xf32>
    %83 = arith.mulf %81, %82 : vector<2x1024xf32>
    %c0_88 = arith.constant 0 : index
    %c0_89 = arith.constant 0 : index
    %84 = vector.load %arg15[%c0_88, %c0_89] : memref<16x1024xf32, #tpu.memory_space<vmem>>, vector<2x1024xf32>
    tpu.vector_store %arg15[%c0_88, %c0_89], %83 {strides = array<i32>} : memref<16x1024xf32, #tpu.memory_space<vmem>>, vector<2x1024xf32>,
    %c0_90 = arith.constant 0 : index
    %c0_91 = arith.constant 0 : index
    %85 = vector.load %arg11[%c0_90, %c0_91] : memref<2x1024xf32, #tpu.memory_space<vmem>>, vector<2x1024xf32>
    tpu.vector_store %arg11[%c0_90, %c0_91], %81 {strides = array<i32>} : memref<2x1024xf32, #tpu.memory_space<vmem>>, vector<2x1024xf32>,
    %c0_92 = arith.constant 0 : index
    %c0_93 = arith.constant 0 : index
    %86 = vector.load %arg15[%c0_92, %c0_93] : memref<16x1024xf32, #tpu.memory_space<vmem>>, vector<16x1024xf32>
    %c0_94 = arith.constant 0 : index
    %c0_95 = arith.constant 0 : index
    %87 = vector.load %arg9[%c0_94, %c0_95] : memref<1024x64xf32, #tpu.memory_space<vmem>>, vector<1024x64xf32>
    %cst_96 = arith.constant dense<0.000000e+00> : vector<16x64xf32>
    %88 = tpu.matmul %86, %87, %cst_96 {dimension_numbers = #tpu.dot_dimension_numbers<[1], [0], [0], [1], [0, 0, 1, 1], [], []>} : vector<16x1024xf32>, vector<1024x64xf32>, vector<16x64xf32> -> vector<16x64xf32>
    %c0_97 = arith.constant 0 : index
    %c0_98 = arith.constant 0 : index
    %89 = vector.load %arg6[%c0_97, %c0_98] : memref<1x64xf32, #tpu.memory_space<vmem>>, vector<1x64xf32>
    %90 = vector.broadcast %89 : vector<1x64xf32> to vector<16x64xf32>
    %91 = arith.mulf %4, %90 : vector<16x64xf32>
    %92 = arith.addf %88, %91 : vector<16x64xf32>
    %93 = vector.shape_cast %92 : vector<16x64xf32> to vector<8x2x64xf32>
    %c0_99 = arith.constant 0 : index
    %c0_100 = arith.constant 0 : index
    %c0_101 = arith.constant 0 : index
    %94 = vector.load %arg10[%c0_99, %c0_100, %c0_101] : memref<8x2x64xf32, #tpu.memory_space<vmem>>, vector<8x2x64xf32>
    tpu.vector_store %arg10[%c0_99, %c0_100, %c0_101], %93 {strides = array<i32>} : memref<8x2x64xf32, #tpu.memory_space<vmem>>, vector<8x2x64xf32>,
    return
  }
  func.func @transform_0(%arg0: i32) -> (i32, i32, i32) {
    %c0_i32 = arith.constant 0 : i32
    %0 = arith.subi %c0_i32, %arg0 : i32
    %c0_i32_0 = arith.constant 0 : i32
    %c0_i32_1 = arith.constant 0 : i32
    %c0_i32_2 = arith.constant 0 : i32
    return %0, %c0_i32_0, %c0_i32_1 : i32, i32, i32
  }
  func.func @transform_1(%arg0: i32) -> (i32, i32, i32) {
    %c0_i32 = arith.constant 0 : i32
    %0 = arith.subi %c0_i32, %arg0 : i32
    %c0_i32_0 = arith.constant 0 : i32
    %c0_i32_1 = arith.constant 0 : i32
    %c0_i32_2 = arith.constant 0 : i32
    return %0, %c0_i32_0, %c0_i32_1 : i32, i32, i32
  }
  func.func @transform_2(%arg0: i32) -> (i32, i32, i32) {
    %c0_i32 = arith.constant 0 : i32
    %0 = arith.subi %c0_i32, %arg0 : i32
    %c0_i32_0 = arith.constant 0 : i32
    %c0_i32_1 = arith.constant 0 : i32
    %c0_i32_2 = arith.constant 0 : i32
    return %0, %c0_i32_0, %c0_i32_1 : i32, i32, i32
  }
  func.func @transform_3(%arg0: i32) -> (i32, i32, i32) {
    %c0_i32 = arith.constant 0 : i32
    %0 = arith.subi %c0_i32, %arg0 : i32
    %c0_i32_0 = arith.constant 0 : i32
    %c0_i32_1 = arith.constant 0 : i32
    %c0_i32_2 = arith.constant 0 : i32
    return %0, %c0_i32_0, %c0_i32_1 : i32, i32, i32
  }
  func.func @transform_4(%arg0: i32) -> (i32, i32) {
    %c0_i32 = arith.constant 0 : i32
    %c0_i32_0 = arith.constant 0 : i32
    %c0_i32_1 = arith.constant 0 : i32
    return %c0_i32, %c0_i32_0 : i32, i32
  }
  func.func @transform_5(%arg0: i32) -> (i32, i32) {
    %c0_i32 = arith.constant 0 : i32
    %c0_i32_0 = arith.constant 0 : i32
    %c0_i32_1 = arith.constant 0 : i32
    return %c0_i32, %c0_i32_0 : i32, i32
  }
  func.func @transform_6(%arg0: i32) -> (i32, i32) {
    %c0_i32 = arith.constant 0 : i32
    %c0_i32_0 = arith.constant 0 : i32
    %c0_i32_1 = arith.constant 0 : i32
    return %c0_i32, %c0_i32_0 : i32, i32
  }
  func.func @transform_7(%arg0: i32) -> (i32, i32) {
    %c0_i32 = arith.constant 0 : i32
    %c0_i32_0 = arith.constant 0 : i32
    %c0_i32_1 = arith.constant 0 : i32
    return %c0_i32, %c0_i32_0 : i32, i32
  }
  func.func @transform_8(%arg0: i32) -> (i32, i32) {
    %c0_i32 = arith.constant 0 : i32
    %c0_i32_0 = arith.constant 0 : i32
    %c0_i32_1 = arith.constant 0 : i32
    return %c0_i32, %c0_i32_0 : i32, i32
  }
  func.func @transform_9(%arg0: i32) -> (i32, i32, i32) {
    %c0_i32 = arith.constant 0 : i32
    %0 = arith.subi %c0_i32, %arg0 : i32
    %c0_i32_0 = arith.constant 0 : i32
    %c0_i32_1 = arith.constant 0 : i32
    %c0_i32_2 = arith.constant 0 : i32
    return %0, %c0_i32_0, %c0_i32_1 : i32, i32, i32
  }
}

module attributes {stable_mosaic.version = 11 : i64} {
  func.func @_seq_mlp_kernel(%arg0: memref<8x2x32xf32, #tpu.memory_space<vmem>>, %arg1: memref<1x8xf32, #tpu.memory_space<vmem>>, %arg2: memref<1x8xf32, #tpu.memory_space<vmem>>, %arg3: memref<8x32xbf16, #tpu.memory_space<vmem>>, %arg4: memref<1x32xf32, #tpu.memory_space<vmem>>, %arg5: memref<32x8xbf16, #tpu.memory_space<vmem>>, %arg6: memref<1x8xf32, #tpu.memory_space<vmem>>, %arg7: memref<8x2x32xf32, #tpu.memory_space<vmem>>) attributes {dimension_semantics = [], scalar_prefetch = 0 : i64, scratch_operands = 0 : i64, tpu.core_type = #tpu.core_type<tc>} {
    %c0 = arith.constant 0 : index
    %c0_0 = arith.constant 0 : index
    %c0_1 = arith.constant 0 : index
    %0 = vector.load %arg0[%c0, %c0_0, %c0_1] : memref<8x2x32xf32, #tpu.memory_space<vmem>>, vector<8x2x32xf32>
    %1 = vector.shape_cast %0 : vector<8x2x32xf32> to vector<8x64xf32>
    %2 = tpu.transpose %1, [1, 0] : vector<8x64xf32> -> vector<64x8xf32>
    %cst = arith.constant dense<0.000000e+00> : vector<64xf32>
    %3 = vector.multi_reduction <add>, %2, %cst [1] : vector<64x8xf32> to vector<64xf32>
    %4 = vector.shape_cast %3 : vector<64xf32> to vector<64x1xf32>
    %cst_2 = arith.constant 8.000000e+00 : f32
    %5 = vector.broadcast %cst_2 : f32 to vector<64x1xf32>
    %6 = arith.divf %4, %5 : vector<64x1xf32>
    %7 = vector.broadcast %6 : vector<64x1xf32> to vector<64x8xf32>
    %8 = arith.subf %2, %7 : vector<64x8xf32>
    %9 = arith.mulf %8, %8 : vector<64x8xf32>
    %cst_3 = arith.constant dense<0.000000e+00> : vector<64xf32>
    %10 = vector.multi_reduction <add>, %9, %cst_3 [1] : vector<64x8xf32> to vector<64xf32>
    %11 = vector.shape_cast %10 : vector<64xf32> to vector<64x1xf32>
    %cst_4 = arith.constant 8.000000e+00 : f32
    %12 = vector.broadcast %cst_4 : f32 to vector<64x1xf32>
    %13 = arith.divf %11, %12 : vector<64x1xf32>
    %cst_5 = arith.constant 9.99999974E-6 : f32
    %14 = vector.broadcast %cst_5 : f32 to vector<64x1xf32>
    %15 = arith.addf %13, %14 : vector<64x1xf32>
    %16 = math.rsqrt %15 : vector<64x1xf32>
    %17 = vector.broadcast %16 : vector<64x1xf32> to vector<64x8xf32>
    %18 = arith.mulf %8, %17 : vector<64x8xf32>
    %c0_6 = arith.constant 0 : index
    %c0_7 = arith.constant 0 : index
    %19 = vector.load %arg1[%c0_6, %c0_7] : memref<1x8xf32, #tpu.memory_space<vmem>>, vector<1x8xf32>
    %20 = vector.broadcast %19 : vector<1x8xf32> to vector<64x8xf32>
    %21 = arith.mulf %18, %20 : vector<64x8xf32>
    %c0_8 = arith.constant 0 : index
    %c0_9 = arith.constant 0 : index
    %22 = vector.load %arg2[%c0_8, %c0_9] : memref<1x8xf32, #tpu.memory_space<vmem>>, vector<1x8xf32>
    %23 = vector.broadcast %22 : vector<1x8xf32> to vector<64x8xf32>
    %24 = arith.addf %21, %23 : vector<64x8xf32>
    %25 = arith.truncf %24 : vector<64x8xf32> to vector<64x8xbf16>
    %c0_10 = arith.constant 0 : index
    %c0_11 = arith.constant 0 : index
    %26 = vector.load %arg3[%c0_10, %c0_11] : memref<8x32xbf16, #tpu.memory_space<vmem>>, vector<8x32xbf16>
    %cst_12 = arith.constant dense<0.000000e+00> : vector<64x32xf32>
    %27 = tpu.matmul %25, %26, %cst_12 {dimension_numbers = #tpu.dot_dimension_numbers<[1], [0], [0], [1], [0, 0, 1, 1], [], []>} : vector<64x8xbf16>, vector<8x32xbf16>, vector<64x32xf32> -> vector<64x32xf32>
    %c0_13 = arith.constant 0 : index
    %c0_14 = arith.constant 0 : index
    %28 = vector.load %arg4[%c0_13, %c0_14] : memref<1x32xf32, #tpu.memory_space<vmem>>, vector<1x32xf32>
    %29 = vector.broadcast %28 : vector<1x32xf32> to vector<64x32xf32>
    %30 = arith.addf %27, %29 : vector<64x32xf32>
    %cst_15 = arith.constant 0.000000e+00 : f32
    %31 = vector.broadcast %cst_15 : f32 to vector<64x32xf32>
    %32 = arith.maximumf %30, %31 : vector<64x32xf32>
    %33 = arith.truncf %32 : vector<64x32xf32> to vector<64x32xbf16>
    %c0_16 = arith.constant 0 : index
    %c0_17 = arith.constant 0 : index
    %34 = vector.load %arg5[%c0_16, %c0_17] : memref<32x8xbf16, #tpu.memory_space<vmem>>, vector<32x8xbf16>
    %cst_18 = arith.constant dense<0.000000e+00> : vector<64x8xf32>
    %35 = tpu.matmul %33, %34, %cst_18 {dimension_numbers = #tpu.dot_dimension_numbers<[1], [0], [0], [1], [0, 0, 1, 1], [], []>} : vector<64x32xbf16>, vector<32x8xbf16>, vector<64x8xf32> -> vector<64x8xf32>
    %c0_19 = arith.constant 0 : index
    %c0_20 = arith.constant 0 : index
    %36 = vector.load %arg6[%c0_19, %c0_20] : memref<1x8xf32, #tpu.memory_space<vmem>>, vector<1x8xf32>
    %37 = vector.broadcast %36 : vector<1x8xf32> to vector<64x8xf32>
    %38 = arith.addf %35, %37 : vector<64x8xf32>
    %39 = tpu.transpose %38, [1, 0] : vector<64x8xf32> -> vector<8x64xf32>
    %40 = vector.shape_cast %39 : vector<8x64xf32> to vector<8x2x32xf32>
    %41 = arith.addf %40, %0 : vector<8x2x32xf32>
    %c0_21 = arith.constant 0 : index
    %c0_22 = arith.constant 0 : index
    %c0_23 = arith.constant 0 : index
    %42 = vector.load %arg7[%c0_21, %c0_22, %c0_23] : memref<8x2x32xf32, #tpu.memory_space<vmem>>, vector<8x2x32xf32>
    tpu.vector_store %arg7[%c0_21, %c0_22, %c0_23], %41 {strides = array<i32>} : memref<8x2x32xf32, #tpu.memory_space<vmem>>, vector<8x2x32xf32>,
    return
  }
}

module attributes {stable_mosaic.version = 11 : i64} {
  func.func @_seq_mlp_kernel(%arg0: memref<8x2x32xf32, #tpu.memory_space<vmem>>, %arg1: memref<1x8xf32, #tpu.memory_space<vmem>>, %arg2: memref<1x8xf32, #tpu.memory_space<vmem>>, %arg3: memref<8x32xbf16, #tpu.memory_space<vmem>>, %arg4: memref<1x32xf32, #tpu.memory_space<vmem>>, %arg5: memref<32x8xbf16, #tpu.memory_space<vmem>>, %arg6: memref<1x8xf32, #tpu.memory_space<vmem>>, %arg7: memref<8x2x32xf32, #tpu.memory_space<vmem>>) attributes {dimension_semantics = [], scalar_prefetch = 0 : i64, scratch_operands = 0 : i64, tpu.core_type = #tpu.core_type<tc>} {
    %c0 = arith.constant 0 : index
    %c0_0 = arith.constant 0 : index
    %c0_1 = arith.constant 0 : index
    %0 = vector.load %arg0[%c0, %c0_0, %c0_1] : memref<8x2x32xf32, #tpu.memory_space<vmem>>, vector<8x2x32xf32>
    %1 = vector.shape_cast %0 : vector<8x2x32xf32> to vector<8x64xf32>
    %2 = tpu.transpose %1, [1, 0] : vector<8x64xf32> -> vector<64x8xf32>
    %3 = arith.mulf %2, %2 : vector<64x8xf32>
    %cst = arith.constant dense<0.000000e+00> : vector<64xf32>
    %4 = vector.multi_reduction <add>, %3, %cst [1] : vector<64x8xf32> to vector<64xf32>
    %5 = vector.shape_cast %4 : vector<64xf32> to vector<64x1xf32>
    %cst_2 = arith.constant 8.000000e+00 : f32
    %6 = vector.broadcast %cst_2 : f32 to vector<64x1xf32>
    %7 = arith.divf %5, %6 : vector<64x1xf32>
    %cst_3 = arith.constant 9.99999974E-6 : f32
    %8 = vector.broadcast %cst_3 : f32 to vector<64x1xf32>
    %9 = arith.addf %7, %8 : vector<64x1xf32>
    %10 = math.rsqrt %9 : vector<64x1xf32>
    %11 = vector.broadcast %10 : vector<64x1xf32> to vector<64x8xf32>
    %12 = arith.mulf %2, %11 : vector<64x8xf32>
    %c0_4 = arith.constant 0 : index
    %c0_5 = arith.constant 0 : index
    %13 = vector.load %arg1[%c0_4, %c0_5] : memref<1x8xf32, #tpu.memory_space<vmem>>, vector<1x8xf32>
    %14 = vector.broadcast %13 : vector<1x8xf32> to vector<64x8xf32>
    %15 = arith.mulf %12, %14 : vector<64x8xf32>
    %16 = arith.truncf %15 : vector<64x8xf32> to vector<64x8xbf16>
    %c0_6 = arith.constant 0 : index
    %c0_7 = arith.constant 0 : index
    %17 = vector.load %arg3[%c0_6, %c0_7] : memref<8x32xbf16, #tpu.memory_space<vmem>>, vector<8x32xbf16>
    %cst_8 = arith.constant dense<0.000000e+00> : vector<64x32xf32>
    %18 = tpu.matmul %16, %17, %cst_8 {dimension_numbers = #tpu.dot_dimension_numbers<[1], [0], [0], [1], [0, 0, 1, 1], [], []>} : vector<64x8xbf16>, vector<8x32xbf16>, vector<64x32xf32> -> vector<64x32xf32>
    %c0_9 = arith.constant 0 : index
    %c0_10 = arith.constant 0 : index
    %19 = vector.load %arg4[%c0_9, %c0_10] : memref<1x32xf32, #tpu.memory_space<vmem>>, vector<1x32xf32>
    %20 = vector.broadcast %19 : vector<1x32xf32> to vector<64x32xf32>
    %21 = arith.addf %18, %20 : vector<64x32xf32>
    %cst_11 = arith.constant 0.000000e+00 : f32
    %22 = vector.broadcast %cst_11 : f32 to vector<64x32xf32>
    %23 = arith.maximumf %21, %22 : vector<64x32xf32>
    %24 = arith.truncf %23 : vector<64x32xf32> to vector<64x32xbf16>
    %c0_12 = arith.constant 0 : index
    %c0_13 = arith.constant 0 : index
    %25 = vector.load %arg5[%c0_12, %c0_13] : memref<32x8xbf16, #tpu.memory_space<vmem>>, vector<32x8xbf16>
    %cst_14 = arith.constant dense<0.000000e+00> : vector<64x8xf32>
    %26 = tpu.matmul %24, %25, %cst_14 {dimension_numbers = #tpu.dot_dimension_numbers<[1], [0], [0], [1], [0, 0, 1, 1], [], []>} : vector<64x32xbf16>, vector<32x8xbf16>, vector<64x8xf32> -> vector<64x8xf32>
    %c0_15 = arith.constant 0 : index
    %c0_16 = arith.constant 0 : index
    %27 = vector.load %arg6[%c0_15, %c0_16] : memref<1x8xf32, #tpu.memory_space<vmem>>, vector<1x8xf32>
    %28 = vector.broadcast %27 : vector<1x8xf32> to vector<64x8xf32>
    %29 = arith.addf %26, %28 : vector<64x8xf32>
    %30 = tpu.transpose %29, [1, 0] : vector<64x8xf32> -> vector<8x64xf32>
    %31 = vector.shape_cast %30 : vector<8x64xf32> to vector<8x2x32xf32>
    %32 = arith.addf %31, %0 : vector<8x2x32xf32>
    %c0_17 = arith.constant 0 : index
    %c0_18 = arith.constant 0 : index
    %c0_19 = arith.constant 0 : index
    %33 = vector.load %arg7[%c0_17, %c0_18, %c0_19] : memref<8x2x32xf32, #tpu.memory_space<vmem>>, vector<8x2x32xf32>
    tpu.vector_store %arg7[%c0_17, %c0_18, %c0_19], %32 {strides = array<i32>} : memref<8x2x32xf32, #tpu.memory_space<vmem>>, vector<8x2x32xf32>,
    return
  }
}

module attributes {stable_mosaic.version = 11 : i64} {
  func.func @_matmul_kernel(%arg0: i32, %arg1: i32, %arg2: memref<8x128xbf16, #tpu.memory_space<vmem>>, %arg3: memref<128x128xbf16, #tpu.memory_space<vmem>>, %arg4: memref<1x128xf32, #tpu.memory_space<vmem>>, %arg5: memref<8x128xf32, #tpu.memory_space<vmem>>) attributes {dimension_semantics = [#tpu.dimension_semantics<parallel>, #tpu.dimension_semantics<parallel>], iteration_bounds = array<i64: 1, 1>, scalar_prefetch = 0 : i64, scratch_operands = 0 : i64, tpu.core_type = #tpu.core_type<tc>, window_params = [{transform_indices = @transform_0, window_bounds = array<i64: 8, 128>}, {transform_indices = @transform_1, window_bounds = array<i64: 128, 128>}, {transform_indices = @transform_2, window_bounds = array<i64: 1, 128>}, {transform_indices = @transform_3, window_bounds = array<i64: 8, 128>}]} {
    %c0 = arith.constant 0 : index
    %c0_0 = arith.constant 0 : index
    %0 = vector.load %arg2[%c0, %c0_0] : memref<8x128xbf16, #tpu.memory_space<vmem>>, vector<8x128xbf16>
    %c0_1 = arith.constant 0 : index
    %c0_2 = arith.constant 0 : index
    %1 = vector.load %arg3[%c0_1, %c0_2] : memref<128x128xbf16, #tpu.memory_space<vmem>>, vector<128x128xbf16>
    %cst = arith.constant dense<0.000000e+00> : vector<8x128xf32>
    %2 = tpu.matmul %0, %1, %cst {dimension_numbers = #tpu.dot_dimension_numbers<[1], [0], [0], [1], [0, 0, 1, 1], [], []>} : vector<8x128xbf16>, vector<128x128xbf16>, vector<8x128xf32> -> vector<8x128xf32>
    %c0_3 = arith.constant 0 : index
    %c0_4 = arith.constant 0 : index
    %3 = vector.load %arg4[%c0_3, %c0_4] : memref<1x128xf32, #tpu.memory_space<vmem>>, vector<1x128xf32>
    %4 = vector.broadcast %3 : vector<1x128xf32> to vector<8x128xf32>
    %5 = arith.addf %2, %4 : vector<8x128xf32>
    %c0_5 = arith.constant 0 : index
    %c0_6 = arith.constant 0 : index
    %6 = vector.load %arg5[%c0_5, %c0_6] : memref<8x128xf32, #tpu.memory_space<vmem>>, vector<8x128xf32>
    tpu.vector_store %arg5[%c0_5, %c0_6], %5 {strides = array<i32>} : memref<8x128xf32, #tpu.memory_space<vmem>>, vector<8x128xf32>,
    return
  }
  func.func @transform_0(%arg0: i32, %arg1: i32) -> (i32, i32) {
    %c0_i32 = arith.constant 0 : i32
    %c0_i32_0 = arith.constant 0 : i32
    return %arg0, %c0_i32 : i32, i32
  }
  func.func @transform_1(%arg0: i32, %arg1: i32) -> (i32, i32) {
    %c0_i32 = arith.constant 0 : i32
    %c0_i32_0 = arith.constant 0 : i32
    return %c0_i32, %arg1 : i32, i32
  }
  func.func @transform_2(%arg0: i32, %arg1: i32) -> (i32, i32) {
    %c0_i32 = arith.constant 0 : i32
    %c0_i32_0 = arith.constant 0 : i32
    return %c0_i32, %arg1 : i32, i32
  }
  func.func @transform_3(%arg0: i32, %arg1: i32) -> (i32, i32) {
    %c0_i32 = arith.constant 0 : i32
    return %arg0, %arg1 : i32, i32
  }
}

</mosaic_0001>

<bundles_post_ra>
// kernel: samba_forward.27
= control target key start
LH: loop header
LB: loop body
LE: loop exit
PB: predicated region body
PF: predicated region fallthrough
CT: control target
= control target key end

     0   :  { %v191_v0 = vmov 0.0   ;;  %vm192_vm0 = vmmov 0   ;;  %s249_s1 = inlined_call_operand.vmem [shape: bf16[128,128], index: 1, kind: input, shape index: {}]   ;;  %s250_s0 = inlined_call_operand.vmem [shape: bf16[16,128], index: 0, kind: input, shape index: {}]   ;;  %s251_s2 = inlined_call_operand.vmem [shape: f32[1,128], index: 2, kind: input, shape index: {}]   ;;  %s252_s3 = inlined_call_operand.vmem [shape: f32[16,128], index: 3, kind: output, shape index: {}]  }
   0x1   :  { %160 = vmatprep.subr.bf16.mxu0 %v191_v0  ;;  %v182_v1 = vld [vmem:[%s249_s1] sm:$0xff]   ;;  %176 = vmatprep.mubr.msk.bf16.mxu0 %vm192_vm0, %v191_v0  ;;  %v183_v2 = vld [vmem:[%s249_s1 + $0x8] sm:$0xff]   ;;  %v184_v3 = vld [vmem:[%s249_s1 + $0x10] sm:$0xff]  }
   0x2   :  { %161 = vmatpush3.bf16.msra.mxu0 %v182_v1  ;;  %v185_v4 = vld [vmem:[%s249_s1 + $0x18] sm:$0xff]   ;;  %v186_v5 = vld [vmem:[%s249_s1 + $0x20] sm:$0xff]   ;;  %v187_v6 = vld [vmem:[%s249_s1 + $0x28] sm:$0xff]  }
   0x3   :  { %162 = vmatprep.subr.bf16.mxu0 %v191_v0  ;;  %v188_v7 = vld [vmem:[%s249_s1 + $0x30] sm:$0xff]   ;;  %v189_v8 = vld [vmem:[%s249_s1 + $0x38] sm:$0xff]   ;;  %v190_v9 = vld [vmem:[%s250_s0] sm:$0xff]  }
   0x4   :  { %v141_v10 = vld [vmem:[%s251_s2] ss:$0 sm:$0xff] }
   0x6   :  { %163 = vmatpush3.bf16.msra.mxu0 %v183_v2 }
   0x7   :  { %164 = vmatprep.subr.bf16.mxu0 %v191_v0 }
   0xa   :  { %165 = vmatpush3.bf16.msra.mxu0 %v184_v3 }
   0xb   :  { %166 = vmatprep.subr.bf16.mxu0 %v191_v0 }
   0xe   :  { %167 = vmatpush3.bf16.msra.mxu0 %v185_v4 }
   0xf   :  { %168 = vmatprep.subr.bf16.mxu0 %v191_v0 }
  0x12   :  { %169 = vmatpush3.bf16.msra.mxu0 %v186_v5 }
  0x13   :  { %170 = vmatprep.subr.bf16.mxu0 %v191_v0 }
  0x16   :  { %171 = vmatpush3.bf16.msra.mxu0 %v187_v6 }
  0x17   :  { %172 = vmatprep.subr.bf16.mxu0 %v191_v0 }
  0x1a   :  { %173 = vmatpush3.bf16.msra.mxu0 %v188_v7 }
  0x1b   :  { %174 = vmatprep.subr.bf16.mxu0 %v191_v0 }
  0x1e   :  { %175 = vmatpush3.bf16.msra.mxu0 %v189_v8 }
  0x21   :  { %177 = vmatmul.mubr.bf16.vlgmr.msra.gmra.mrb[0].mxu0 %v190_v9 }
  0xf4   :  { %v128_v11 = vpop.f32.mrb[0].mxu0 }
  0xf5   :  { %v129_v12 = vadd.f32 %v141_v10, %v128_v11  ;;  %v178_v13 = vpop.f32.mrb[1].mxu0 }
  0xf6   :  { %v131_v14 = vpop.f32.mrb[2].mxu0 }
  0xf7   :  { %135 = vst [vmem:[%s252_s3] sm:$0xff] %v129_v12  ;;  %v132_v15 = vadd.f32 %v141_v10, %v131_v14  ;;  %v179_v16 = vpop.f32.mrb[3].mxu0 }
  0xf9   :  { %136 = vst [vmem:[%s252_s3 + $0x8] sm:$0xff] %v132_v15 }

// kernel: samba_forward.29
= control target key start
LH: loop header
LB: loop body
LE: loop exit
PB: predicated region body
PF: predicated region fallthrough
CT: control target
= control target key end

     0   :  { %vm180_vm0 = vcmask 517120   ;;  %s408_s0 = inlined_call_operand.vmem [shape: f32[11,2,64], index: 0, kind: input, shape index: {}]   ;;  %s409_s1 = inlined_call_operand.vmem [shape: f32[4,64], index: 1, kind: input, shape index: {}]   ;;  %s410_s2 = inlined_call_operand.vmem [shape: f32[1,64], index: 2, kind: input, shape index: {}]   ;;  %s411_s3 = inlined_call_operand.vmem [shape: f32[8,2,64], index: 3, kind: output, shape index: {}]  }
   0x1   :  { %v14_v0 = vld [vmem:[%s408_s0] sm:$0x3]  ;;  %v15_v1 = vld [vmem:[%s408_s0 + $0x2] sm:$0x3]  ;;  %v16_v2 = vld [vmem:[%s408_s0 + $0x4] sm:$0x3] }
   0x2   :  { %v17_v3 = vld [vmem:[%s408_s0 + $0x6] sm:$0x3]  ;;  %v273_v4 = vld [vmem:[%s409_s1] ss:$0 sm:$0xff]  ;;  %v278_v5 = vld [vmem:[%s409_s1 + $0x1] ss:$0 sm:$0xff] }
   0x3   :  { %v30_v6 = vmul.f32 %v273_v4, %v14_v0  ;;  %v51_v7 = vmul.f32 %v278_v5, %v15_v1  ;;  %v285_v8 = vld [vmem:[%s409_s1 + $0x2] ss:$0 sm:$0xff]  ;;  %v290_v9 = vld [vmem:[%s409_s1 + $0x3] ss:$0 sm:$0xff]  ;;  %v31_v10 = vmul.f32 %v273_v4, %v15_v1  ;;  %v52_v11 = vmul.f32 %v278_v5, %v16_v2  ;;  %v18_v14 = vld [vmem:[%s408_s0 + $0x8] sm:$0x3] }
   0x4   :  { %v72_v12 = vmul.f32 %v285_v8, %v16_v2  ;;  %v93_v13 = vmul.f32 %v290_v9, %v17_v3  ;;  %v73_v15 = vmul.f32 %v285_v8, %v17_v3  ;;  %v32_v16 = vmul.f32 %v273_v4, %v16_v2  ;;  %v19_v20 = vld [vmem:[%s408_s0 + $0xa] sm:$0x3]  ;;  %v20_v29 = vld [vmem:[%s408_s0 + $0xc] sm:$0x3]  ;;  %v317_v31 = vld [vmem:[%s410_s2] ss:$0 sm:$0xff] }
   0x5   :  { %v59_v17 = vadd.f32 %v51_v7, %v30_v6  ;;  %v60_v18 = vadd.f32 %v52_v11, %v31_v10  ;;  %v94_v19 = vmul.f32 %v290_v9, %v18_v14  ;;  %v53_v21 = vmul.f32 %v278_v5, %v17_v3  ;;  %v21_v39 = vld [vmem:[%s408_s0 + $0xe] sm:$0x3]  ;;  %v22_v48 = vld [vmem:[%s408_s0 + $0x10] sm:$0x3]  ;;  %v24_v11 = vld [vmem:[%s408_s0 + $0x14] sm:$0x3] }
   0x6   :  { %v74_v22 = vmul.f32 %v285_v8, %v18_v14  ;;  %v95_v23 = vmul.f32 %v290_v9, %v19_v20  ;;  %v33_v24 = vmul.f32 %v273_v4, %v17_v3  ;;  %v54_v25 = vmul.f32 %v278_v5, %v18_v14  ;;  %v23_v3 = vld [vmem:[%s408_s0 + $0x12] sm:$0x3] }
   0x7   :  { %v80_v26 = vadd.f32 %v72_v12, %v59_v17  ;;  %v81_v27 = vadd.f32 %v73_v15, %v60_v18  ;;  %v61_v28 = vadd.f32 %v53_v21, %v32_v16  ;;  %v75_v30 = vmul.f32 %v285_v8, %v19_v20 }
   0x8   :  { %v62_v32 = vadd.f32 %v54_v25, %v33_v24  ;;  %v96_v33 = vmul.f32 %v290_v9, %v20_v29  ;;  %v34_v34 = vmul.f32 %v273_v4, %v18_v14  ;;  %v55_v35 = vmul.f32 %v278_v5, %v19_v20 }
   0x9   :  { %v101_v36 = vadd.f32 %v93_v13, %v80_v26  ;;  %v102_v37 = vadd.f32 %v94_v19, %v81_v27  ;;  %v82_v38 = vadd.f32 %v74_v22, %v61_v28  ;;  %v76_v40 = vmul.f32 %v285_v8, %v20_v29 }
   0xa   :  { %v83_v41 = vadd.f32 %v75_v30, %v62_v32  ;;  %v63_v42 = vadd.f32 %v55_v35, %v34_v34  ;;  %v97_v43 = vmul.f32 %v290_v9, %v21_v39  ;;  %v35_v44 = vmul.f32 %v273_v4, %v19_v20 }
   0xb   :  { %v329_v45 = vadd.f32 %v317_v31, %v101_v36  ;;  %v332_v46 = vadd.f32 %v317_v31, %v102_v37  ;;  %v103_v47 = vadd.f32 %v95_v23, %v82_v38  ;;  %v56_v49 = vmul.f32 %v278_v5, %v20_v29 }
   0xc   :  { %v104_v50 = vadd.f32 %v96_v33, %v83_v41  ;;  %v84_v51 = vadd.f32 %v76_v40, %v63_v42  ;;  %v77_v52 = vmul.f32 %v285_v8, %v21_v39  ;;  %v98_v53 = vmul.f32 %v290_v9, %v22_v48 }
   0xd   :  { %v198_v54 = vmul.f32 -1.442695, %v329_v45  ;;  %v199_v55 = vmul.f32 -1.442695, %v332_v46  ;;  %v343_v56 = vadd.f32 %v317_v31, %v103_v47  ;;  %v64_v57 = vadd.f32 %v56_v49, %v35_v44 }
   0xe   :  { %v346_v58 = vadd.f32 %v317_v31, %v104_v50  ;;  %v105_v59 = vadd.f32 %v97_v43, %v84_v51  ;;  %v36_v60 = vmul.f32 %v273_v4, %v20_v29  ;;  %v57_v61 = vmul.f32 %v278_v5, %v21_v39 }
   0xf   :  { %206 = vpow2.f32 %v198_v54  ;;  %v200_v62 = vmul.f32 -1.442695, %v343_v56  ;;  %v85_v63 = vadd.f32 %v77_v52, %v64_v57  ;;  %v78_v0 = vmul.f32 %v285_v8, %v22_v48 }
  0x10   :  { %208 = vpow2.f32 %v199_v55  ;;  %v201_v1 = vmul.f32 -1.442695, %v346_v58  ;;  %v354_v2 = vadd.f32 %v317_v31, %v105_v59  ;;  %v65_v6 = vadd.f32 %v57_v61, %v36_v60 }
  0x11   :  { %210 = vpow2.f32 %v200_v62  ;;  %v106_v7 = vadd.f32 %v98_v53, %v85_v63  ;;  %v99_v10 = vmul.f32 %v290_v9, %v23_v3  ;;  %v37_v12 = vmul.f32 %v273_v4, %v21_v39 }
  0x12   :  { %212 = vpow2.f32 %v201_v1  ;;  %v202_v13 = vmul.f32 -1.442695, %v354_v2  ;;  %v86_v14 = vadd.f32 %v78_v0, %v65_v6  ;;  %v58_v15 = vmul.f32 %v278_v5, %v22_v48 }
  0x13   :  { %v121_v16 = vadd.f32 %v317_v31, %v106_v7  ;;  %v79_v17 = vmul.f32 %v285_v8, %v23_v3  ;;  %v100_v20 = vmul.f32 %v290_v9, %v24_v11 }
  0x14   :  { %214 = vpow2.f32 %v202_v13  ;;  %v107_v18 = vadd.f32 %v99_v10, %v86_v14  ;;  %v66_v19 = vadd.f32 %v58_v15, %v37_v12 }
  0x15   :  { %v203_v21 = vmul.f32 -1.442695, %v121_v16 }
  0x16   :  { %v122_v22 = vadd.f32 %v317_v31, %v107_v18  ;;  %v87_v23 = vadd.f32 %v79_v17, %v66_v19 }
  0x17   :  { %216 = vpow2.f32 %v203_v21 }
  0x18   :  { %v204_v4 = vmul.f32 -1.442695, %v122_v22  ;;  %v108_v24 = vadd.f32 %v100_v20, %v87_v23 }
  0x19   :  { %v207_v25 = vpop.eup %206 }
  0x1a   :  { %v209_v26 = vpop.eup %208  ;;  %v148_v27 = vadd.f32 1.0, %v207_v25  ;;  %218 = vpow2.f32 %v204_v4  ;;  %v123_v5 = vadd.f32 %v317_v31, %v108_v24 }
  0x1b   :  { %v211_v28 = vpop.eup %210  ;;  %v149_v8 = vadd.f32 1.0, %v209_v26 }
  0x1c   :  { %v213_v29 = vpop.eup %212  ;;  %220 = vrcp.f32 %v148_v27  ;;  %v150_v30 = vadd.f32 1.0, %v211_v28  ;;  %v205_v32 = vmul.f32 -1.442695, %v123_v5 }
  0x1d   :  { %222 = vrcp.f32 %v149_v8  ;;  %v151_v9 = vadd.f32 1.0, %v213_v29 }
  0x1e   :  { %v215_v33 = vpop.eup %214  ;;  %224 = vrcp.f32 %v150_v30 }
  0x1f   :  { %226 = vrcp.f32 %v151_v9  ;;  %v152_v34 = vadd.f32 1.0, %v215_v33 }
  0x20   :  { %228 = vpow2.f32 %v205_v32 }
  0x21   :  { %v217_v35 = vpop.eup %216  ;;  %230 = vrcp.f32 %v152_v34 }
  0x22   :  { %v153_v36 = vadd.f32 1.0, %v217_v35 }
  0x24   :  { %v219_v37 = vpop.eup %218  ;;  %232 = vrcp.f32 %v153_v36 }
  0x25   :  { %v154_v38 = vadd.f32 1.0, %v219_v37 }
  0x26   :  { %v221_v31 = vpop.eup %220 }
  0x27   :  { %v223_v39 = vpop.eup %222  ;;  %v172_v40 = vmul.f32 %v221_v31, %v329_v45  ;;  %234 = vrcp.f32 %v154_v38 }
  0x28   :  { %v225_v41 = vpop.eup %224  ;;  %v173_v42 = vmul.f32 %v223_v39, %v332_v46 }
  0x29   :  { %v227_v43 = vpop.eup %226  ;;  %181 = vst.msk [vmem:[%s411_s3] sm:$0x3] %vm180_vm0, %v172_v40  ;;  %v174_v44 = vmul.f32 %v225_v41, %v343_v56 }
  0x2a   :  { %v229_v47 = vpop.eup %228  ;;  %182 = vst.msk [vmem:[%s411_s3 + $0x2] sm:$0x3] %vm180_vm0, %v173_v42  ;;  %v175_v45 = vmul.f32 %v227_v43, %v346_v58 }
  0x2b   :  { %v231_v48 = vpop.eup %230  ;;  %183 = vst.msk [vmem:[%s411_s3 + $0x4] sm:$0x3] %vm180_vm0, %v174_v44  ;;  %v155_v46 = vadd.f32 1.0, %v229_v47 }
  0x2c   :  { %184 = vst.msk [vmem:[%s411_s3 + $0x6] sm:$0x3] %vm180_vm0, %v175_v45  ;;  %v176_v49 = vmul.f32 %v231_v48, %v354_v2 }
  0x2d   :  { %236 = vrcp.f32 %v155_v46 }
  0x2e   :  { %v233_v50 = vpop.eup %232  ;;  %185 = vst.msk [vmem:[%s411_s3 + $0x8] sm:$0x3] %vm180_vm0, %v176_v49 }
  0x2f   :  { %v177_v51 = vmul.f32 %v233_v50, %v121_v16 }
  0x31   :  { %v235_v52 = vpop.eup %234  ;;  %186 = vst.msk [vmem:[%s411_s3 + $0xa] sm:$0x3] %vm180_vm0, %v177_v51 }
  0x32   :  { %v178_v53 = vmul.f32 %v235_v52, %v122_v22 }
  0x34   :  { %187 = vst.msk [vmem:[%s411_s3 + $0xc] sm:$0x3] %vm180_vm0, %v178_v53 }
  0x37   :  { %v237_v54 = vpop.eup %236 }
  0x38   :  { %v179_v55 = vmul.f32 %v237_v54, %v123_v5 }
  0x3a   :  { %188 = vst.msk [vmem:[%s411_s3 + $0xe] sm:$0x3] %vm180_vm0, %v179_v55 }

// kernel: samba_forward.28
= control target key start
LH: loop header
LB: loop body
LE: loop exit
PB: predicated region body
PF: predicated region fallthrough
CT: control target
= control target key end

     0   :  { %vm23_vm0 = vcmask 261120   ;;  %v168_v15 = vmov 0.0   ;;  %vm169_vm1 = vmmov 0   ;;  %s232_s0 = inlined_call_operand.vmem [shape: f32[16,32], index: 0, kind: input, shape index: {}]   ;;  %s233_s3 = inlined_call_operand.vmem [shape: bf16[32,128], index: 3, kind: input, shape index: {}]   ;;  %s234_s1 = inlined_call_operand.vmem [shape: f32[1,32], index: 1, kind: input, shape index: {}]   ;;  %s235_s2 = inlined_call_operand.vmem [shape: f32[1,32], index: 2, kind: input, shape index: {}]   ;;  %s236_s4 = inlined_call_operand.vmem [shape: f32[1,128], index: 4, kind: input, shape index: {}]   ;;  %s237_s5 = inlined_call_operand.vmem [shape: f32[16,128], index: 5, kind: output, shape index: {}]  }
   0x1   :  { %v21_v0 = vld [vmem:[%s232_s0] sm:$0xff]  ;;  %v22_v1 = vld [vmem:[%s232_s0 + $0x8] sm:$0xff]  ;;  %152 = vmatprep.subr.bf16.mxu0 %v168_v15  ;;  %156 = vmatprep.mubr.msk.bf16.mxu0 %vm169_vm1, %v168_v15 }
   0x2   :  { %v24_v2 = vsel %vm23_vm0, %v21_v0, 0.0  ;;  %v27_v3 = vsel %vm23_vm0, %v22_v1, 0.0  ;;  %v162_v14 = vld [vmem:[%s233_s3] sm:$0xff]   ;;  %v163_v16 = vld [vmem:[%s233_s3 + $0x8] sm:$0xff]  }
   0x3   :  { %25 = vadd.xlane.f32.xlu0 %v24_v2  ;;  %153 = vmatpush3.bf16.msra.mxu0 %v162_v14  ;;  %v143_v25 = vld [vmem:[%s234_s1] ss:$0 sm:$0xff] }
   0x4   :  { %154 = vmatprep.subr.bf16.mxu0 %v168_v15  ;;  %v144_v29 = vld [vmem:[%s235_s2] ss:$0 sm:$0xff] }
   0x5   :  { %v145_v34 = vld [vmem:[%s236_s4] ss:$0 sm:$0xff] }
   0x7   :  { %28 = vadd.xlane.f32.xlu0 %v27_v3  ;;  %155 = vmatpush3.bf16.msra.mxu0 %v163_v16 }
  0x90   :  { %v26_v4 = vpop.xlane.xlu0 %25 }
  0x91   :  { %v31_v5 = vmul.f32 0.03125, %v26_v4 }
  0x93   :  { %v33_v6 = vsub.f32 %v21_v0, %v31_v5 }
  0x94   :  { %v29_v7 = vpop.xlane.xlu0 %28 }
  0x95   :  { %v32_v8 = vmul.f32 0.03125, %v29_v7  ;;  %v35_v9 = vmul.f32 %v33_v6, %v33_v6 }
  0x97   :  { %v34_v10 = vsub.f32 %v22_v1, %v32_v8  ;;  %v37_v11 = vsel %vm23_vm0, %v35_v9, 0.0 }
  0x98   :  { %38 = vadd.xlane.f32.xlu1 %v37_v11 }
  0x99   :  { %v36_v12 = vmul.f32 %v34_v10, %v34_v10 }
  0x9b   :  { %v40_v13 = vsel %vm23_vm0, %v36_v12, 0.0 }
  0x9c   :  { %41 = vadd.xlane.f32.xlu1 %v40_v13 }
 0x125   :  { %v39_v17 = vpop.xlane.xlu1 %38 }
 0x126   :  { %v43_v18 = vmul.f32 0.03125, %v39_v17 }
 0x128   :  { %v45_v19 = vadd.f32 1e-05, %v43_v18 }
 0x129   :  { %v42_v20 = vpop.xlane.xlu1 %41 }
 0x12a   :  { %164 = vrsqrt.f32 %v45_v19  ;;  %v44_v21 = vmul.f32 0.03125, %v42_v20 }
 0x12c   :  { %v46_v22 = vadd.f32 1e-05, %v44_v21 }
 0x12e   :  { %166 = vrsqrt.f32 %v46_v22 }
 0x134   :  { %v165_v23 = vpop.eup %164 }
 0x135   :  { %v49_v24 = vmul.f32 %v165_v23, %v33_v6 }
 0x137   :  { %v58_v28 = vmul.f32 %v143_v25, %v49_v24 }
 0x138   :  { %v167_v26 = vpop.eup %166 }
 0x139   :  { %v50_v27 = vmul.f32 %v167_v26, %v34_v10  ;;  %v67_v31 = vadd.f32 %v144_v29, %v58_v28 }
 0x13b   :  { %v59_v30 = vmul.f32 %v143_v25, %v50_v27 }
 0x13d   :  { %v68_v32 = vadd.f32 %v144_v29, %v59_v30 }
 0x13f   :  { %v69_v33 = vpack.c.bf16 %v68_v32, %v67_v31 }
 0x141   :  { %157 = vmatmul.mubr.msk.bf16.vlgmr.msra.gmra.mrb[0].mxu0 %vm23_vm0, %v69_v33 }
 0x214   :  { %v130_v35 = vpop.f32.mrb[0].mxu0 }
 0x215   :  { %v131_v36 = vadd.f32 %v145_v34, %v130_v35  ;;  %v158_v37 = vpop.f32.mrb[1].mxu0 }
 0x216   :  { %v133_v38 = vpop.f32.mrb[2].mxu0 }
 0x217   :  { %137 = vst [vmem:[%s237_s5] sm:$0xff] %v131_v36  ;;  %v134_v39 = vadd.f32 %v145_v34, %v133_v38  ;;  %v159_v40 = vpop.f32.mrb[3].mxu0 }
 0x219   :  { %138 = vst [vmem:[%s237_s5 + $0x8] sm:$0xff] %v134_v39 }

// kernel: samba_forward.30
= control target key start
LH: loop header
LB: loop body
LE: loop exit
PB: predicated region body
PF: predicated region fallthrough
CT: control target
= control target key end

     0   :  { %v225_v0 = vmov 0.0   ;;  %vm226_vm0 = vmmov 0   ;;  %v227_v2 = vmov 1   ;;  %v228_v3 = vmov 0   ;;  %s302_s1 = inlined_call_operand.vmem [shape: bf16[64,34], index: 1, kind: input, shape index: {}]   ;;  %s303_s0 = inlined_call_operand.vmem [shape: f32[16,64], index: 0, kind: input, shape index: {}]   ;;  %s304_s2 = inlined_call_operand.vmem [shape: f32[2,64], index: 2, kind: input, shape index: {}]   ;;  %s305_s3 = inlined_call_operand.vmem [shape: f32[1,64], index: 3, kind: input, shape index: {}]   ;;  %s306_s5 = inlined_call_operand.vmem [shape: f32[16,32], index: 5, kind: output, shape index: {1}]   ;;  %s307_s4 = inlined_call_operand.vmem [shape: f32[16,64], index: 4, kind: output, shape index: {0}]  }
   0x1   :  { %193 = vmatprep.subr.bf16.mxu0 %v225_v0  ;;  %v213_v1 = vld [vmem:[%s302_s1] sm:$0xff]   ;;  %201 = vmatprep.mubr.msk.bf16.mxu0 %vm226_vm0, %v225_v0  ;;  %v214_v4 = vld [vmem:[%s302_s1 + $0x8] sm:$0xff]   ;;  %v215_v5 = vld [vmem:[%s302_s1 + $0x10] sm:$0xff]   ;;  %vm55_vm1 = vcmask 523264   ;;  %vm169_vm2 = vcmask 261120  }
   0x2   :  { %211 = vset.pattern.permute.xlu1 %v227_v2  ;;  %210 = vset.pattern.permute.xlu0 %v228_v3  ;;  %v216_v6 = vld [vmem:[%s302_s1 + $0x18] sm:$0xff]   ;;  %v20_v7 = vld [vmem:[%s303_s0] sm:$0xff]  ;;  %v21_v8 = vld [vmem:[%s303_s0 + $0x8] sm:$0xff]  ;;  %s229_s1 = smov 126  }
   0x3   :  { %194 = vmatpush3.bf16.msra.mxu0 %v213_v1  ;;  %v22_v9 = vpack.c.bf16 %v21_v8, %v20_v7  ;;  %v185_v14 = vld [vmem:[%s304_s2] ss:$0 sm:$0xff]  ;;  %v187_v15 = vld [vmem:[%s304_s2 + $0x1] ss:$0 sm:$0xff] }
   0x4   :  { %195 = vmatprep.subr.bf16.mxu0 %v225_v0  ;;  %v186_v17 = vld [vmem:[%s305_s3] ss:$0 sm:$0xff] }
   0x7   :  { %196 = vmatpush3.bf16.msra.mxu0 %v214_v4 }
   0x8   :  { %197 = vmatprep.subr.bf16.mxu0 %v225_v0 }
   0xb   :  { %198 = vmatpush3.bf16.msra.mxu0 %v215_v5 }
   0xc   :  { %199 = vmatprep.subr.bf16.mxu0 %v225_v0 }
   0xf   :  { %200 = vmatpush3.bf16.msra.mxu0 %v216_v6 }
  0x12   :  { %202 = vmatmul.mubr.msk.bf16.vlgmr.msra.gmra.mrb[0].mxu0 %vm55_vm1, %v22_v9 }
  0xe5   :  { %v93_v10 = vpop.f32.mrb[0].mxu0 }
  0xe6   :  { %128 = vperm.xlu1 %211, %v93_v10   ;;  %104 = vperm.xlu0 %210, %v93_v10   ;;  %v203_v11 = vpop.f32.mrb[1].mxu0 }
  0xe7   :  { %v96_v12 = vpop.f32.mrb[2].mxu0 }
  0xe8   :  { %v204_v13 = vpop.f32.mrb[3].mxu0 }
  0xea   :  { %132 = vperm.xlu1 %211, %v96_v12   ;;  %109 = vperm.xlu0 %210, %v96_v12  }
  0xee   :  { %165 = vrot.lane.b32.xlu1 %v96_v12, %s229_s1  ;;  %163 = vrot.lane.b32.xlu0 %v93_v10, %s229_s1 }
  0xef   :  { %212 = vset.pattern.permute.xlu0 %v227_v2 }
 0x165   :  { %v129_v16 = vpop.permute.xlu1 %128  ;;  %v105_v18 = vpop.permute.xlu0 %104 }
 0x166   :  { %v116_v19 = vmul.f32 %v185_v14, %v105_v18  ;;  %v139_v20 = vmul.f32 %v187_v15, %v129_v16 }
 0x168   :  { %v124_v21 = vadd.f32 %v186_v17, %v116_v19 }
 0x169   :  { %v133_v22 = vpop.permute.xlu1 %132  ;;  %v110_v23 = vpop.permute.xlu0 %109 }
 0x16a   :  { %v141_v24 = vadd.f32 %v139_v20, %v124_v21  ;;  %v117_v25 = vmul.f32 %v185_v14, %v110_v23  ;;  %v140_v27 = vmul.f32 %v187_v15, %v133_v22 }
 0x16c   :  { %v145_v26 = vand.u32 2147483647, %v141_v24  ;;  %v125_v28 = vadd.f32 %v186_v17, %v117_v25  ;;  %v143_v42 = vmax.f32 %v141_v24, 0.0 }
 0x16d   :  { %v166_v29 = vpop.permute.xlu1 %165  ;;  %v164_v30 = vpop.permute.xlu0 %163 }
 0x16e   :  { %v147_v31 = vsub.f32 0.0, %v145_v26  ;;  %v142_v32 = vadd.f32 %v140_v27, %v125_v28  ;;  %171 = vst.msk [vmem:[%s306_s5 + $0x8] sm:$0xff] %vm169_vm2, %v166_v29  ;;  %170 = vst.msk [vmem:[%s306_s5] sm:$0xff] %vm169_vm2, %v164_v30 }
 0x170   :  { %v149_v33 = vmul.f32 1.442695, %v147_v31  ;;  %v146_v34 = vand.u32 2147483647, %v142_v32  ;;  %v144_v46 = vmax.f32 %v142_v32, 0.0 }
 0x172   :  { %217 = vpow2.f32 %v149_v33  ;;  %v148_v35 = vsub.f32 0.0, %v146_v34 }
 0x174   :  { %v151_v36 = vmul.f32 1.442695, %v148_v35 }
 0x176   :  { %219 = vpow2.f32 %v151_v36 }
 0x17c   :  { %v218_v37 = vpop.eup %217 }
 0x17d   :  { %v153_v38 = vadd.f32 1.0, %v218_v37 }
 0x17f   :  { %221 = vlog2.f32 %v153_v38 }
 0x180   :  { %v220_v39 = vpop.eup %219 }
 0x181   :  { %v154_v40 = vadd.f32 1.0, %v220_v39 }
 0x183   :  { %223 = vlog2.f32 %v154_v40 }
 0x189   :  { %v222_v41 = vpop.eup %221 }
 0x18a   :  { %v156_v43 = vmul.f32 0.6931472, %v222_v41 }
 0x18c   :  { %v159_v44 = vadd.f32 %v156_v43, %v143_v42 }
 0x18d   :  { %v224_v45 = vpop.eup %223 }
 0x18e   :  { %161 = vst.msk [vmem:[%s307_s4] sm:$0xff] %vm55_vm1, %v159_v44  ;;  %v158_v47 = vmul.f32 0.6931472, %v224_v45 }
 0x190   :  { %v160_v48 = vadd.f32 %v158_v47, %v144_v46 }
 0x192   :  { %162 = vst.msk [vmem:[%s307_s4 + $0x8] sm:$0xff] %vm55_vm1, %v160_v48 }

// kernel: tile.24
= control target key start
LH: loop header
LB: loop body
LE: loop exit
PB: predicated region body
PF: predicated region fallthrough
CT: control target
= control target key end

     0   :  { %vm178_vm0 = vcmask 1041409   ;;  %vm182_vm1 = vcmask 1042434   ;;  %vm186_vm2 = vcmask 1043459   ;;  %vm190_vm3 = vcmask 1044484   ;;  %s5155_s25 = smov 112   ;;  %s5156_s24 = smov 96   ;;  %s9582_s0 = inlined_call_operand.vmem [shape: f32[16,64,16], index: 0, kind: input, shape index: {}]   ;;  %s9583_s1 = inlined_call_operand.vmem [shape: f32[16,1024], index: 1, kind: output, shape index: {}]  }
   0x1   :  { %vm194_vm4 = vcmask 1045509   ;;  %vm198_vm5 = vcmask 1046534   ;;  %v4164_v0 = vld [vmem:[%s9582_s0 + $0x207] sm:$0x1]   ;;  %vm202_vm6 = vcmask 1047559   ;;  %s5157_s2 = smov 80  }
   0x2   :  { %v4165_v1 = vld [vmem:[%s9582_s0 + $0x246] sm:$0x2]   ;;  %v4191_v52 = vld [vmem:[%s9582_s0 + $0x2f] sm:$0x1]   ;;  %s5158_s6 = smov 64   ;;  %s5159_s12 = smov 48  }
   0x3   :  { %v4166_v2 = vld [vmem:[%s9582_s0 + $0x285] sm:$0x4]   ;;  %v248_v4 = vsel %vm178_vm0, %v4165_v1, %v4164_v0  ;;  %v4192_v53 = vld [vmem:[%s9582_s0 + $0x6e] sm:$0x2]   ;;  %vm4_vm7 = vcmask 1047556   ;;  %vm6_vm8 = vcmask 130048  }
   0x4   :  { %v4167_v3 = vld [vmem:[%s9582_s0 + $0x2c4] sm:$0x8]   ;;  %v252_v7 = vsel %vm182_vm1, %v4166_v2, %v248_v4  ;;  %v353_v56 = vsel %vm178_vm0, %v4192_v53, %v4191_v52  ;;  %v4193_v57 = vld [vmem:[%s9582_s0 + $0xad] sm:$0x4]   ;;  %vm206_vm9 = vcmask 1048448   ;;  %vm765_vm10 = vcmask 917248  }
   0x5   :  { %v4168_v5 = vld [vmem:[%s9582_s0 + $0x303] sm:$0x10]   ;;  %v256_v11 = vsel %vm186_vm2, %v4167_v3, %v252_v7  ;;  %v4194_v58 = vld [vmem:[%s9582_s0 + $0xec] sm:$0x8]   ;;  %v357_v63 = vsel %vm182_vm1, %v4193_v57, %v353_v56  ;;  %v4230_v56 = vld [vmem:[%s9582_s0 + $0xf4] sm:$0x8]  }
   0x6   :  { %v4169_v6 = vld [vmem:[%s9582_s0 + $0x342] sm:$0x20]   ;;  %v260_v16 = vsel %vm190_vm3, %v4168_v5, %v256_v11  ;;  %v4195_v59 = vld [vmem:[%s9582_s0 + $0x12b] sm:$0x10]   ;;  %v361_v3 = vsel %vm186_vm2, %v4194_v58, %v357_v63  ;;  %v4231_v57 = vld [vmem:[%s9582_s0 + $0x133] sm:$0x10]  }
   0x7   :  { %v4170_v8 = vld [vmem:[%s9582_s0 + $0x381] sm:$0x40]   ;;  %v264_v21 = vsel %vm194_vm4, %v4169_v6, %v260_v16  ;;  %v4196_v0 = vld [vmem:[%s9582_s0 + $0x16a] sm:$0x20]   ;;  %v4218_v63 = vld [vmem:[%s9582_s0 + $0x17] sm:$0x1]  }
   0x8   :  { %v4147_v9 = vld [vmem:[%s9582_s0 + $0x7] sm:$0x1]   ;;  %v268_v26 = vsel %vm198_vm5, %v4170_v8, %v264_v21  ;;  %v4197_v1 = vld [vmem:[%s9582_s0 + $0x1a9] sm:$0x40]   ;;  %v365_v8 = vsel %vm190_vm3, %v4195_v59, %v361_v3  ;;  %v4220_v3 = vld [vmem:[%s9582_s0 + $0x95] sm:$0x4]  }
   0x9   :  { %v4148_v10 = vld [vmem:[%s9582_s0 + $0x46] sm:$0x2]   ;;  %v4182_v4 = vld [vmem:[%s9582_s0 + $0xf] sm:$0x1]   ;;  %vm1324_vm11 = vcmask 786048   ;;  %s5160_s4 = smov 32  }
   0xa   :  { %v179_v12 = vsel %vm178_vm0, %v4148_v10, %v4147_v9  ;;  %v4149_v13 = vld [vmem:[%s9582_s0 + $0x85] sm:$0x4]   ;;  %v4183_v5 = vld [vmem:[%s9582_s0 + $0x4e] sm:$0x2]   ;;  %vm1883_vm12 = vcmask 654848   ;;  %s5161_s11 = smov 16  }
   0xb   :  { %v4150_v14 = vld [vmem:[%s9582_s0 + $0xc4] sm:$0x8]   ;;  %v183_v18 = vsel %vm182_vm1, %v4149_v13, %v179_v12  ;;  %v4184_v6 = vld [vmem:[%s9582_s0 + $0x8d] sm:$0x4]   ;;  %v318_v10 = vsel %vm178_vm0, %v4183_v5, %v4182_v4  ;;  %v4221_v4 = vld [vmem:[%s9582_s0 + $0xd4] sm:$0x8]  }
   0xc   :  { %v4151_v15 = vld [vmem:[%s9582_s0 + $0x103] sm:$0x10]   ;;  %v187_v22 = vsel %vm186_vm2, %v4150_v14, %v183_v18  ;;  %v4198_v9 = vld [vmem:[%s9582_s0 + $0x1e8] sm:$0x80]   ;;  %v369_v14 = vsel %vm194_vm4, %v4196_v0, %v365_v8  ;;  %vm2442_vm13 = vcmask 523648   ;;  %vm3001_vm14 = vcmask 392448  }
   0xd   :  { %v4171_v17 = vld [vmem:[%s9582_s0 + $0x3c0] sm:$0x80]   ;;  %v191_v27 = vsel %vm190_vm3, %v4151_v15, %v187_v22  ;;  %v4185_v11 = vld [vmem:[%s9582_s0 + $0xcc] sm:$0x8]   ;;  %v322_v15 = vsel %vm182_vm1, %v4184_v6, %v318_v10  ;;  %v4223_v10 = vld [vmem:[%s9582_s0 + $0x152] sm:$0x20]  }
   0xe   :  { %v4152_v19 = vld [vmem:[%s9582_s0 + $0x142] sm:$0x20]   ;;  %v272_v32 = vsel %vm202_vm6, %v4171_v17, %v268_v26  ;;  %v4186_v12 = vld [vmem:[%s9582_s0 + $0x10b] sm:$0x10]   ;;  %vm3560_vm15 = vcmask 261248  }
   0xf   :  { %v4153_v20 = vld [vmem:[%s9582_s0 + $0x181] sm:$0x40]   ;;  %v195_v33 = vsel %vm194_vm4, %v4152_v19, %v191_v27  ;;  %273 = vrot.lane.b32.xlu1 %v272_v32, %s5155_s25  ;;  %v4187_v16 = vld [vmem:[%s9582_s0 + $0x14a] sm:$0x20]   ;;  %v373_v19 = vsel %vm198_vm5, %v4197_v1, %v369_v14  ;;  %v4245_v14 = vld [vmem:[%s9582_s0 + $0x237] sm:$0x1]  }
  0x10   :  { %v4173_v23 = vld [vmem:[%s9582_s0 + $0x227] sm:$0x1]   ;;  %v199_v38 = vsel %vm198_vm5, %v4153_v20, %v195_v33  ;;  %v4188_v17 = vld [vmem:[%s9582_s0 + $0x189] sm:$0x40]   ;;  %v326_v20 = vsel %vm186_vm2, %v4185_v11, %v322_v15  ;;  %v4246_v15 = vld [vmem:[%s9582_s0 + $0x276] sm:$0x2]  }
  0x11   :  { %v4174_v24 = vld [vmem:[%s9582_s0 + $0x266] sm:$0x2]   ;;  %v4209_v18 = vld [vmem:[%s9582_s0 + $0x22f] sm:$0x1]  }
  0x12   :  { %v4175_v25 = vld [vmem:[%s9582_s0 + $0x2a5] sm:$0x4]   ;;  %v283_v29 = vsel %vm178_vm0, %v4174_v24, %v4173_v23  ;;  %v4210_v21 = vld [vmem:[%s9582_s0 + $0x26e] sm:$0x2]   ;;  %v377_v24 = vsel %vm202_vm6, %v4198_v9, %v373_v19  ;;  %v4222_v9 = vld [vmem:[%s9582_s0 + $0x113] sm:$0x10]  }
  0x13   :  { %v4154_v28 = vld [vmem:[%s9582_s0 + $0x1c0] sm:$0x80]   ;;  %v287_v34 = vsel %vm182_vm1, %v4175_v25, %v283_v29  ;;  %v4211_v22 = vld [vmem:[%s9582_s0 + $0x2ad] sm:$0x4]   ;;  %v330_v25 = vsel %vm190_vm3, %v4186_v12, %v326_v20  ;;  %v423_v27 = vsel %vm178_vm0, %v4210_v21, %v4209_v18  ;;  %v563_v18 = vsel %vm178_vm0, %v4246_v15, %v4245_v14  ;;  %v4247_v19 = vld [vmem:[%s9582_s0 + $0x2b5] sm:$0x4]  }
  0x14   :  { %v4176_v30 = vld [vmem:[%s9582_s0 + $0x2e4] sm:$0x8]   ;;  %v203_v43 = vsel %vm202_vm6, %v4154_v28, %v199_v38  ;;  %v4212_v23 = vld [vmem:[%s9582_s0 + $0x2ec] sm:$0x8]   ;;  %v4248_v20 = vld [vmem:[%s9582_s0 + $0x2f4] sm:$0x8]  }
  0x15   :  { %v4177_v31 = vld [vmem:[%s9582_s0 + $0x323] sm:$0x10]   ;;  %v291_v39 = vsel %vm186_vm2, %v4176_v30, %v287_v34  ;;  %204 = vrot.lane.b32.xlu0 %v203_v43, %s5155_s25  ;;  %v4189_v26 = vld [vmem:[%s9582_s0 + $0x1c8] sm:$0x80]   ;;  %v334_v30 = vsel %vm194_vm4, %v4187_v16, %v330_v25  ;;  %v4249_v21 = vld [vmem:[%s9582_s0 + $0x333] sm:$0x10]   ;;  %v567_v25 = vsel %vm182_vm1, %v4247_v19, %v563_v18 }
  0x16   :  { %v4178_v35 = vld [vmem:[%s9582_s0 + $0x362] sm:$0x20]   ;;  %v295_v44 = vsel %vm190_vm3, %v4177_v31, %v291_v39  ;;  %v4213_v28 = vld [vmem:[%s9582_s0 + $0x32b] sm:$0x10]   ;;  %v427_v31 = vsel %vm182_vm1, %v4211_v22, %v423_v27  ;;  %v4251_v27 = vld [vmem:[%s9582_s0 + $0x3b1] sm:$0x40]  }
  0x17   :  { %v4179_v36 = vld [vmem:[%s9582_s0 + $0x3a1] sm:$0x40]   ;;  %v299_v49 = vsel %vm194_vm4, %v4178_v35, %v295_v44  ;;  %v4214_v29 = vld [vmem:[%s9582_s0 + $0x36a] sm:$0x20]   ;;  %v338_v35 = vsel %vm198_vm5, %v4188_v17, %v334_v30  ;;  %v4236_v30 = vld [vmem:[%s9582_s0 + $0x217] sm:$0x1]  }
  0x18   :  { %v4155_v37 = vld [vmem:[%s9582_s0 + $0x27] sm:$0x1]   ;;  %v303_v54 = vsel %vm198_vm5, %v4179_v36, %v299_v49  ;;  %v4215_v32 = vld [vmem:[%s9582_s0 + $0x3a9] sm:$0x40]   ;;  %v431_v36 = vsel %vm186_vm2, %v4212_v23, %v427_v31  ;;  %v4227_v49 = vld [vmem:[%s9582_s0 + $0x37] sm:$0x1]  }
  0x19   :  { %v4156_v40 = vld [vmem:[%s9582_s0 + $0x66] sm:$0x2]   ;;  %v4200_v33 = vld [vmem:[%s9582_s0 + $0x20f] sm:$0x1]   ;;  %v4237_v31 = vld [vmem:[%s9582_s0 + $0x256] sm:$0x2]  }
  0x1a   :  { %v4157_v41 = vld [vmem:[%s9582_s0 + $0xa5] sm:$0x4]   ;;  %v213_v46 = vsel %vm178_vm0, %v4156_v40, %v4155_v37  ;;  %v4201_v34 = vld [vmem:[%s9582_s0 + $0x24e] sm:$0x2]   ;;  %v4284_v18 = vld [vmem:[%s9582_s0 + $0x2fc] sm:$0x8]  }
  0x1b   :  { %v4158_v42 = vld [vmem:[%s9582_s0 + $0xe4] sm:$0x8]   ;;  %v217_v50 = vsel %vm182_vm1, %v4157_v41, %v213_v46  ;;  %v388_v37 = vsel %vm178_vm0, %v4201_v34, %v4200_v33  ;;  %v4202_v38 = vld [vmem:[%s9582_s0 + $0x28d] sm:$0x4]   ;;  %v342_v41 = vsel %vm202_vm6, %v4189_v26, %v338_v35  ;;  %v4250_v26 = vld [vmem:[%s9582_s0 + $0x372] sm:$0x20]  }
  0x1c   :  { %v4180_v45 = vld [vmem:[%s9582_s0 + $0x3e0] sm:$0x80]   ;;  %v221_v55 = vsel %vm186_vm2, %v4158_v42, %v217_v50  ;;  %v4203_v39 = vld [vmem:[%s9582_s0 + $0x2cc] sm:$0x8]   ;;  %v435_v42 = vsel %vm190_vm3, %v4213_v28, %v431_v36  ;;  %v392_v44 = vsel %vm182_vm1, %v4202_v38, %v388_v37  ;;  %v4228_v50 = vld [vmem:[%s9582_s0 + $0x76] sm:$0x2]   ;;  %v528_v36 = vsel %vm178_vm0, %v4237_v31, %v4236_v30 }
  0x1d   :  { %v4159_v47 = vld [vmem:[%s9582_s0 + $0x123] sm:$0x10]   ;;  %v307_v60 = vsel %vm202_vm6, %v4180_v45, %v303_v54  ;;  %v4204_v40 = vld [vmem:[%s9582_s0 + $0x30b] sm:$0x10]   ;;  %v4252_v35 = vld [vmem:[%s9582_s0 + $0x3f0] sm:$0x80]  }
  0x1e   :  { %v4160_v48 = vld [vmem:[%s9582_s0 + $0x162] sm:$0x20]   ;;  %v225_v61 = vsel %vm190_vm3, %v4159_v47, %v221_v55  ;;  %308 = vrot.lane.b32.xlu1 %v307_v60, %s5155_s25  ;;  %v4216_v43 = vld [vmem:[%s9582_s0 + $0x3e8] sm:$0x80]   ;;  %v439_v47 = vsel %vm194_vm4, %v4214_v29, %v435_v42  ;;  %v493_v55 = vsel %vm178_vm0, %v4228_v50, %v4227_v49  ;;  %v571_v29 = vsel %vm186_vm2, %v4248_v20, %v567_v25  ;;  %v4239_v37 = vld [vmem:[%s9582_s0 + $0x2d4] sm:$0x8]  }
  0x1f   :  { %v4161_v51 = vld [vmem:[%s9582_s0 + $0x1a1] sm:$0x40]   ;;  %v229_v2 = vsel %vm194_vm4, %v4160_v48, %v225_v61  ;;  %v4205_v45 = vld [vmem:[%s9582_s0 + $0x34a] sm:$0x20]   ;;  %v396_v48 = vsel %vm186_vm2, %v4203_v39, %v392_v44  ;;  %v443_v52 = vsel %vm198_vm5, %v4215_v32, %v439_v47  ;;  %v4232_v61 = vld [vmem:[%s9582_s0 + $0x172] sm:$0x20]   ;;  %v575_v34 = vsel %vm190_vm3, %v4249_v21, %v571_v29 }
  0x20   :  { %v4162_v62 = vld [vmem:[%s9582_s0 + $0x1e0] sm:$0x80]   ;;  %v233_v7 = vsel %vm198_vm5, %v4161_v51, %v229_v2  ;;  %v4206_v46 = vld [vmem:[%s9582_s0 + $0x389] sm:$0x40]   ;;  %v4229_v51 = vld [vmem:[%s9582_s0 + $0xb5] sm:$0x4]   ;;  %v400_v53 = vsel %vm190_vm3, %v4204_v40, %v396_v48  ;;  %v447_v58 = vsel %vm202_vm6, %v4216_v43, %v443_v52  ;;  %v579_v40 = vsel %vm194_vm4, %v4250_v26, %v575_v34 }
  0x21   :  { %v237_v13 = vsel %vm202_vm6, %v4162_v62, %v233_v7  ;;  %v4207_v54 = vld [vmem:[%s9582_s0 + $0x3c8] sm:$0x80]   ;;  %v404_v59 = vsel %vm194_vm4, %v4205_v45, %v400_v53  ;;  %v497_v60 = vsel %vm182_vm1, %v4229_v51, %v493_v55  ;;  %v4233_v62 = vld [vmem:[%s9582_s0 + $0x1b1] sm:$0x40]   ;;  %v4263_v44 = vld [vmem:[%s9582_s0 + $0x3f] sm:$0x1]   ;;  %v583_v45 = vsel %vm198_vm5, %v4251_v27, %v579_v40 }
  0x22   :  { %238 = vrot.lane.b32.xlu0 %v237_v13, %s5155_s25  ;;  %378 = vrot.lane.b32.xlu1 %v377_v24, %s5155_s25  ;;  %v408_v0 = vsel %vm198_vm5, %v4206_v46, %v404_v59  ;;  %v501_v1 = vsel %vm186_vm2, %v4230_v56, %v497_v60  ;;  %v4219_v2 = vld [vmem:[%s9582_s0 + $0x56] sm:$0x2]   ;;  %v4264_v47 = vld [vmem:[%s9582_s0 + $0x7e] sm:$0x2]   ;;  %v587_v50 = vsel %vm202_vm6, %v4252_v35, %v583_v45 }
  0x23   :  { %v412_v5 = vsel %vm202_vm6, %v4207_v54, %v408_v0  ;;  %v505_v6 = vsel %vm190_vm3, %v4231_v57, %v501_v1  ;;  %v4234_v7 = vld [vmem:[%s9582_s0 + $0x1f0] sm:$0x80]   ;;  %v458_v8 = vsel %vm178_vm0, %v4219_v2, %v4218_v63  ;;  %v4265_v48 = vld [vmem:[%s9582_s0 + $0xbd] sm:$0x4]   ;;  %v633_v53 = vsel %vm178_vm0, %v4264_v47, %v4263_v44  ;;  %v4298_v40 = vld [vmem:[%s9582_s0 + $0x26] sm:$0x1]  }
  0x24   :  { %v509_v11 = vsel %vm194_vm4, %v4232_v61, %v505_v6  ;;  %v462_v12 = vsel %vm182_vm1, %v4220_v3, %v458_v8  ;;  %v4224_v13 = vld [vmem:[%s9582_s0 + $0x191] sm:$0x40]   ;;  %v4266_v49 = vld [vmem:[%s9582_s0 + $0xfc] sm:$0x8]   ;;  %v637_v57 = vsel %vm182_vm1, %v4265_v48, %v633_v53  ;;  %v4300_v45 = vld [vmem:[%s9582_s0 + $0xa4] sm:$0x4]  }
  0x25   :  { %v513_v16 = vsel %vm198_vm5, %v4233_v62, %v509_v11  ;;  %v466_v17 = vsel %vm186_vm2, %v4221_v4, %v462_v12  ;;  %v4225_v24 = vld [vmem:[%s9582_s0 + $0x1d0] sm:$0x80]   ;;  %v4267_v54 = vld [vmem:[%s9582_s0 + $0x13b] sm:$0x10]   ;;  %v641_v62 = vsel %vm186_vm2, %v4266_v49, %v637_v57  ;;  %v4302_v47 = vld [vmem:[%s9582_s0 + $0x122] sm:$0x10]  }
  0x26   :  { %343 = vrot.lane.b32.xlu0 %v342_v41, %s5155_s25  ;;  %448 = vrot.lane.b32.xlu1 %v447_v58, %s5155_s25  ;;  %v517_v22 = vsel %vm202_vm6, %v4234_v7, %v513_v16  ;;  %v470_v23 = vsel %vm190_vm3, %v4222_v9, %v466_v17  ;;  %v4238_v32 = vld [vmem:[%s9582_s0 + $0x295] sm:$0x4]   ;;  %v4268_v55 = vld [vmem:[%s9582_s0 + $0x17a] sm:$0x20]   ;;  %v645_v4 = vsel %vm190_vm3, %v4267_v54, %v641_v62 }
  0x27   :  { %v474_v28 = vsel %vm194_vm4, %v4223_v10, %v470_v23  ;;  %v4240_v38 = vld [vmem:[%s9582_s0 + $0x313] sm:$0x10]   ;;  %v532_v41 = vsel %vm182_vm1, %v4238_v32, %v528_v36  ;;  %v4269_v58 = vld [vmem:[%s9582_s0 + $0x1b9] sm:$0x40]   ;;  %v649_v9 = vsel %vm194_vm4, %v4268_v55, %v645_v4  ;;  %v4304_v53 = vld [vmem:[%s9582_s0 + $0x1a0] sm:$0x40]  }
  0x28   :  { %v478_v33 = vsel %vm198_vm5, %v4224_v13, %v474_v28  ;;  %v4241_v42 = vld [vmem:[%s9582_s0 + $0x352] sm:$0x20]   ;;  %v536_v46 = vsel %vm186_vm2, %v4239_v37, %v532_v41  ;;  %v4254_v59 = vld [vmem:[%s9582_s0 + $0x1f] sm:$0x1]   ;;  %v653_v14 = vsel %vm198_vm5, %v4269_v58, %v649_v9  ;;  %v4299_v41 = vld [vmem:[%s9582_s0 + $0x65] sm:$0x2]  }
  0x29   :  { %v482_v39 = vsel %vm202_vm6, %v4225_v24, %v478_v33  ;;  %v4242_v43 = vld [vmem:[%s9582_s0 + $0x391] sm:$0x40]   ;;  %v540_v51 = vsel %vm190_vm3, %v4240_v38, %v536_v46  ;;  %v4255_v60 = vld [vmem:[%s9582_s0 + $0x5e] sm:$0x2]   ;;  %v772_v44 = vsel %vm178_vm0, %v4299_v41, %v4298_v40  ;;  %v4301_v46 = vld [vmem:[%s9582_s0 + $0xe3] sm:$0x8]  }
  0x2a   :  { %413 = vrot.lane.b32.xlu0 %v412_v5, %s5155_s25  ;;  %518 = vrot.lane.b32.xlu1 %v517_v22, %s5155_s25  ;;  %v4243_v52 = vld [vmem:[%s9582_s0 + $0x3d0] sm:$0x80]   ;;  %v544_v56 = vsel %vm194_vm4, %v4241_v42, %v540_v51  ;;  %v598_v63 = vsel %vm178_vm0, %v4255_v60, %v4254_v59  ;;  %v4256_v0 = vld [vmem:[%s9582_s0 + $0x9d] sm:$0x4]   ;;  %v776_v51 = vsel %vm182_vm1, %v4300_v45, %v772_v44 }
  0x2b   :  { %v548_v61 = vsel %vm198_vm5, %v4242_v43, %v544_v56  ;;  %v4257_v1 = vld [vmem:[%s9582_s0 + $0xdc] sm:$0x8]   ;;  %v602_v6 = vsel %vm182_vm1, %v4256_v0, %v598_v63  ;;  %v780_v55 = vsel %vm186_vm2, %v4301_v46, %v776_v51  ;;  %v4290_v56 = vld [vmem:[%s9582_s0 + $0x6] sm:$0x1]   ;;  %v4337_v44 = vld [vmem:[%s9582_s0 + $0xeb] sm:$0x8]  }
  0x2c   :  { %v4258_v2 = vld [vmem:[%s9582_s0 + $0x11b] sm:$0x10]   ;;  %v552_v3 = vsel %vm202_vm6, %v4243_v52, %v548_v61  ;;  %v606_v10 = vsel %vm186_vm2, %v4257_v1, %v602_v6  ;;  %v4303_v52 = vld [vmem:[%s9582_s0 + $0x161] sm:$0x20]   ;;  %v784_v60 = vsel %vm190_vm3, %v4302_v47, %v780_v55  ;;  %v4338_v45 = vld [vmem:[%s9582_s0 + $0x12a] sm:$0x10]  }
  0x2d   :  { %v4270_v5 = vld [vmem:[%s9582_s0 + $0x1f8] sm:$0x80]   ;;  %v610_v15 = vsel %vm190_vm3, %v4258_v2, %v606_v10  ;;  %v4291_v57 = vld [vmem:[%s9582_s0 + $0x45] sm:$0x2]   ;;  %v788_v2 = vsel %vm194_vm4, %v4303_v52, %v784_v60  ;;  %v4325_v51 = vld [vmem:[%s9582_s0 + $0xe] sm:$0x1]  }
  0x2e   :  { %483 = vrot.lane.b32.xlu0 %v482_v39, %s5155_s25  ;;  %588 = vrot.lane.b32.xlu1 %v587_v50, %s5155_s25  ;;  %v4259_v7 = vld [vmem:[%s9582_s0 + $0x15a] sm:$0x20]   ;;  %v657_v20 = vsel %vm202_vm6, %v4270_v5, %v653_v14  ;;  %v4292_v58 = vld [vmem:[%s9582_s0 + $0x84] sm:$0x4]   ;;  %v738_v62 = vsel %vm178_vm0, %v4291_v57, %v4290_v56 }
  0x2f   :  { %v4260_v8 = vld [vmem:[%s9582_s0 + $0x199] sm:$0x40]   ;;  %v614_v21 = vsel %vm194_vm4, %v4259_v7, %v610_v15  ;;  %v4305_v61 = vld [vmem:[%s9582_s0 + $0x1df] sm:$0x80]   ;;  %v792_v7 = vsel %vm198_vm5, %v4304_v53, %v788_v2  ;;  %v4327_v55 = vld [vmem:[%s9582_s0 + $0x8c] sm:$0x4]  }
  0x30   :  { %v4281_v11 = vld [vmem:[%s9582_s0 + $0x23f] sm:$0x1]   ;;  %v618_v26 = vsel %vm198_vm5, %v4260_v8, %v614_v21  ;;  %v4293_v63 = vld [vmem:[%s9582_s0 + $0xc3] sm:$0x8]   ;;  %v4328_v56 = vld [vmem:[%s9582_s0 + $0xcb] sm:$0x8]  }
  0x31   :  { %v4282_v12 = vld [vmem:[%s9582_s0 + $0x27e] sm:$0x2]   ;;  %v4294_v0 = vld [vmem:[%s9582_s0 + $0x102] sm:$0x10]   ;;  %v4352_v2 = vld [vmem:[%s9582_s0 + $0x22e] sm:$0x1]  }
  0x32   :  { %553 = vrot.lane.b32.xlu0 %v552_v3, %s5155_s25  ;;  %v4283_v13 = vld [vmem:[%s9582_s0 + $0x2bd] sm:$0x4]   ;;  %v703_v17 = vsel %vm178_vm0, %v4282_v12, %v4281_v11  ;;  %658 = vrot.lane.b32.xlu1 %v657_v20, %s5155_s25  ;;  %v742_v3 = vsel %vm182_vm1, %v4292_v58, %v738_v62  ;;  %v4295_v4 = vld [vmem:[%s9582_s0 + $0x141] sm:$0x20]   ;;  %v796_v12 = vsel %vm202_vm6, %v4305_v61, %v792_v7 }
  0x33   :  { %v4261_v16 = vld [vmem:[%s9582_s0 + $0x1d8] sm:$0x80]   ;;  %v707_v22 = vsel %vm182_vm1, %v4283_v13, %v703_v17  ;;  %v4296_v5 = vld [vmem:[%s9582_s0 + $0x180] sm:$0x40]   ;;  %v746_v8 = vsel %vm186_vm2, %v4293_v63, %v742_v3  ;;  %v4329_v61 = vld [vmem:[%s9582_s0 + $0x10a] sm:$0x10]  }
  0x34   :  { %v4285_v19 = vld [vmem:[%s9582_s0 + $0x33b] sm:$0x10]   ;;  %v711_v27 = vsel %vm186_vm2, %v4284_v18, %v707_v22  ;;  %v622_v31 = vsel %vm202_vm6, %v4261_v16, %v618_v26  ;;  %v4316_v6 = vld [vmem:[%s9582_s0 + $0x226] sm:$0x1]   ;;  %v750_v13 = vsel %vm190_vm3, %v4294_v0, %v746_v8  ;;  %v4330_v62 = vld [vmem:[%s9582_s0 + $0x149] sm:$0x20]  }
  0x35   :  { %v4286_v23 = vld [vmem:[%s9582_s0 + $0x37a] sm:$0x20]   ;;  %v715_v32 = vsel %vm190_vm3, %v4285_v19, %v711_v27  ;;  %v4317_v9 = vld [vmem:[%s9582_s0 + $0x265] sm:$0x2]   ;;  %v754_v18 = vsel %vm194_vm4, %v4295_v4, %v750_v13  ;;  %v4353_v3 = vld [vmem:[%s9582_s0 + $0x26d] sm:$0x2]  }
  0x36   :  { %v4287_v24 = vld [vmem:[%s9582_s0 + $0x3b9] sm:$0x40]   ;;  %623 = vrot.lane.b32.xlu0 %v622_v31, %s5155_s25  ;;  %v719_v37 = vsel %vm194_vm4, %v4286_v23, %v715_v32  ;;  %v4318_v10 = vld [vmem:[%s9582_s0 + $0x2a4] sm:$0x4]   ;;  %v842_v15 = vsel %vm178_vm0, %v4317_v9, %v4316_v6  ;;  %v758_v23 = vsel %vm198_vm5, %v4296_v5, %v754_v18  ;;  %v982_v6 = vsel %vm178_vm0, %v4353_v3, %v4352_v2  ;;  %v4354_v7 = vld [vmem:[%s9582_s0 + $0x2ac] sm:$0x4]  }
  0x37   :  { %v4272_v25 = vld [vmem:[%s9582_s0 + $0x21f] sm:$0x1]   ;;  %v723_v42 = vsel %vm198_vm5, %v4287_v24, %v719_v37  ;;  %v4319_v11 = vld [vmem:[%s9582_s0 + $0x2e3] sm:$0x8]   ;;  %v846_v19 = vsel %vm182_vm1, %v4318_v10, %v842_v15  ;;  %v4334_v37 = vld [vmem:[%s9582_s0 + $0x2e] sm:$0x1]   ;;  %v986_v13 = vsel %vm182_vm1, %v4354_v7, %v982_v6 }
  0x38   :  { %v4273_v28 = vld [vmem:[%s9582_s0 + $0x25e] sm:$0x2]   ;;  %v4297_v14 = vld [vmem:[%s9582_s0 + $0x1bf] sm:$0x80]   ;;  %v850_v24 = vsel %vm186_vm2, %v4319_v11, %v846_v19  ;;  %v4355_v8 = vld [vmem:[%s9582_s0 + $0x2eb] sm:$0x8]  }
  0x39   :  { %v4274_v29 = vld [vmem:[%s9582_s0 + $0x29d] sm:$0x4]   ;;  %v668_v34 = vsel %vm178_vm0, %v4273_v28, %v4272_v25  ;;  %v4320_v16 = vld [vmem:[%s9582_s0 + $0x322] sm:$0x10]   ;;  %v4356_v9 = vld [vmem:[%s9582_s0 + $0x32a] sm:$0x10]  }
  0x3a   :  { %v4275_v30 = vld [vmem:[%s9582_s0 + $0x2dc] sm:$0x8]   ;;  %v672_v38 = vsel %vm182_vm1, %v4274_v29, %v668_v34  ;;  %v4321_v17 = vld [vmem:[%s9582_s0 + $0x361] sm:$0x20]   ;;  %v762_v29 = vsel %vm202_vm6, %v4297_v14, %v758_v23  ;;  %v4357_v14 = vld [vmem:[%s9582_s0 + $0x369] sm:$0x20]  }
  0x3b   :  { %v4288_v33 = vld [vmem:[%s9582_s0 + $0x3f8] sm:$0x80]   ;;  %v676_v43 = vsel %vm186_vm2, %v4275_v30, %v672_v38  ;;  %v4322_v20 = vld [vmem:[%s9582_s0 + $0x3a0] sm:$0x40]   ;;  %v854_v30 = vsel %vm190_vm3, %v4320_v16, %v850_v24  ;;  %v4335_v38 = vld [vmem:[%s9582_s0 + $0x6d] sm:$0x2]  }
  0x3c   :  { %v4276_v35 = vld [vmem:[%s9582_s0 + $0x31b] sm:$0x10]   ;;  %v727_v48 = vsel %vm202_vm6, %v4288_v33, %v723_v42  ;;  %v4307_v21 = vld [vmem:[%s9582_s0 + $0x206] sm:$0x1]   ;;  %v4358_v15 = vld [vmem:[%s9582_s0 + $0x3a8] sm:$0x40]  }
  0x3d   :  { %v4277_v36 = vld [vmem:[%s9582_s0 + $0x35a] sm:$0x20]   ;;  %v680_v49 = vsel %vm190_vm3, %v4276_v35, %v676_v43  ;;  %728 = vrot.lane.b32.xlu1 %v727_v48, %s5155_s25  ;;  %v4308_v22 = vld [vmem:[%s9582_s0 + $0x245] sm:$0x2]   ;;  %v858_v35 = vsel %vm194_vm4, %v4321_v17, %v854_v30  ;;  %v912_v43 = vsel %vm178_vm0, %v4335_v38, %v4334_v37  ;;  %v990_v17 = vsel %vm186_vm2, %v4355_v8, %v986_v13  ;;  %v4343_v18 = vld [vmem:[%s9582_s0 + $0x20e] sm:$0x1]  }
  0x3e   :  { %v4278_v39 = vld [vmem:[%s9582_s0 + $0x399] sm:$0x40]   ;;  %v684_v54 = vsel %vm194_vm4, %v4277_v36, %v680_v49  ;;  %v807_v25 = vsel %vm178_vm0, %v4308_v22, %v4307_v21  ;;  %v4309_v26 = vld [vmem:[%s9582_s0 + $0x284] sm:$0x4]   ;;  %v862_v40 = vsel %vm198_vm5, %v4322_v20, %v858_v35  ;;  %v4339_v49 = vld [vmem:[%s9582_s0 + $0x169] sm:$0x20]   ;;  %v994_v22 = vsel %vm190_vm3, %v4356_v9, %v990_v17 }
  0x3f   :  { %v4279_v50 = vld [vmem:[%s9582_s0 + $0x3d8] sm:$0x80]   ;;  %v688_v59 = vsel %vm198_vm5, %v4278_v39, %v684_v54  ;;  %v4310_v27 = vld [vmem:[%s9582_s0 + $0x2c3] sm:$0x8]   ;;  %v811_v32 = vsel %vm182_vm1, %v4309_v26, %v807_v25  ;;  %v4336_v39 = vld [vmem:[%s9582_s0 + $0xac] sm:$0x4]  }
  0x40   :  { %v692_v1 = vsel %vm202_vm6, %v4279_v50, %v688_v59  ;;  %v4311_v28 = vld [vmem:[%s9582_s0 + $0x302] sm:$0x10]   ;;  %v815_v36 = vsel %vm186_vm2, %v4310_v27, %v811_v32  ;;  %v916_v48 = vsel %vm182_vm1, %v4336_v39, %v912_v43  ;;  %v4340_v50 = vld [vmem:[%s9582_s0 + $0x1a8] sm:$0x40]   ;;  %v4370_v32 = vld [vmem:[%s9582_s0 + $0x36] sm:$0x1]  }
  0x41   :  { %693 = vrot.lane.b32.xlu0 %v692_v1, %s5155_s25  ;;  %797 = vrot.lane.b32.xlu1 %v796_v12, %s5156_s24  ;;  %v4323_v31 = vld [vmem:[%s9582_s0 + $0x3df] sm:$0x80]   ;;  %v819_v41 = vsel %vm190_vm3, %v4311_v28, %v815_v36  ;;  %v920_v53 = vsel %vm186_vm2, %v4337_v44, %v916_v48  ;;  %v4326_v54 = vld [vmem:[%s9582_s0 + $0x4d] sm:$0x2]   ;;  %v998_v28 = vsel %vm194_vm4, %v4357_v14, %v994_v22 }
  0x42   :  { %v4312_v33 = vld [vmem:[%s9582_s0 + $0x341] sm:$0x20]   ;;  %v866_v46 = vsel %vm202_vm6, %v4323_v31, %v862_v40  ;;  %v924_v58 = vsel %vm190_vm3, %v4338_v45, %v920_v53  ;;  %v4341_v59 = vld [vmem:[%s9582_s0 + $0x1e7] sm:$0x80]   ;;  %v877_v60 = vsel %vm178_vm0, %v4326_v54, %v4325_v51  ;;  %v4371_v35 = vld [vmem:[%s9582_s0 + $0x75] sm:$0x2]  }
  0x43   :  { %v4313_v34 = vld [vmem:[%s9582_s0 + $0x380] sm:$0x40]   ;;  %v823_v47 = vsel %vm194_vm4, %v4312_v33, %v819_v41  ;;  %v928_v63 = vsel %vm194_vm4, %v4339_v49, %v924_v58  ;;  %v881_v0 = vsel %vm182_vm1, %v4327_v55, %v877_v60  ;;  %v4331_v1 = vld [vmem:[%s9582_s0 + $0x188] sm:$0x40]   ;;  %v1002_v33 = vsel %vm198_vm5, %v4358_v15, %v998_v28  ;;  %v4372_v36 = vld [vmem:[%s9582_s0 + $0xb4] sm:$0x4]  }
  0x44   :  { %v4314_v42 = vld [vmem:[%s9582_s0 + $0x3bf] sm:$0x80]   ;;  %v827_v52 = vsel %vm198_vm5, %v4313_v34, %v823_v47  ;;  %v932_v4 = vsel %vm198_vm5, %v4340_v50, %v928_v63  ;;  %v885_v5 = vsel %vm186_vm2, %v4328_v56, %v881_v0  ;;  %v4332_v12 = vld [vmem:[%s9582_s0 + $0x1c7] sm:$0x80]   ;;  %v4373_v37 = vld [vmem:[%s9582_s0 + $0xf3] sm:$0x8]   ;;  %v1052_v41 = vsel %vm178_vm0, %v4371_v35, %v4370_v32 }
  0x45   :  { %763 = vrot.lane.b32.xlu0 %v762_v29, %s5156_s24  ;;  %867 = vrot.lane.b32.xlu1 %v866_v46, %s5156_s24  ;;  %v831_v57 = vsel %vm202_vm6, %v4314_v42, %v827_v52  ;;  %v936_v10 = vsel %vm202_vm6, %v4341_v59, %v932_v4  ;;  %v889_v11 = vsel %vm190_vm3, %v4329_v61, %v885_v5  ;;  %v4344_v19 = vld [vmem:[%s9582_s0 + $0x24d] sm:$0x2]   ;;  %v4374_v42 = vld [vmem:[%s9582_s0 + $0x132] sm:$0x10]  }
  0x46   :  { %v893_v16 = vsel %vm194_vm4, %v4330_v62, %v889_v11  ;;  %v4345_v20 = vld [vmem:[%s9582_s0 + $0x28c] sm:$0x4]   ;;  %v947_v24 = vsel %vm178_vm0, %v4344_v19, %v4343_v18  ;;  %v4375_v43 = vld [vmem:[%s9582_s0 + $0x171] sm:$0x20]   ;;  %v1056_v45 = vsel %vm182_vm1, %v4372_v36, %v1052_v41  ;;  %v4406_v28 = vld [vmem:[%s9582_s0 + $0x3e] sm:$0x1]  }
  0x47   :  { %v897_v21 = vsel %vm198_vm5, %v4331_v1, %v893_v16  ;;  %v4359_v23 = vld [vmem:[%s9582_s0 + $0x3e7] sm:$0x80]   ;;  %v951_v29 = vsel %vm182_vm1, %v4345_v20, %v947_v24  ;;  %v4376_v46 = vld [vmem:[%s9582_s0 + $0x1b0] sm:$0x40]   ;;  %v1060_v50 = vsel %vm186_vm2, %v4373_v37, %v1056_v45  ;;  %v4410_v35 = vld [vmem:[%s9582_s0 + $0x13a] sm:$0x10]  }
  0x48   :  { %v4346_v25 = vld [vmem:[%s9582_s0 + $0x2cb] sm:$0x8]   ;;  %v901_v27 = vsel %vm202_vm6, %v4332_v12, %v897_v21  ;;  %v1006_v38 = vsel %vm202_vm6, %v4359_v23, %v1002_v33  ;;  %v4361_v47 = vld [vmem:[%s9582_s0 + $0x16] sm:$0x1]   ;;  %v1064_v56 = vsel %vm190_vm3, %v4374_v42, %v1060_v50  ;;  %v4408_v33 = vld [vmem:[%s9582_s0 + $0xbc] sm:$0x4]  }
  0x49   :  { %832 = vrot.lane.b32.xlu0 %v831_v57, %s5156_s24  ;;  %937 = vrot.lane.b32.xlu1 %v936_v10, %s5156_s24  ;;  %v4347_v26 = vld [vmem:[%s9582_s0 + $0x30a] sm:$0x10]   ;;  %v955_v34 = vsel %vm186_vm2, %v4346_v25, %v951_v29  ;;  %v4362_v48 = vld [vmem:[%s9582_s0 + $0x55] sm:$0x2]   ;;  %v1068_v61 = vsel %vm194_vm4, %v4375_v43, %v1064_v56 }
  0x4a   :  { %v4348_v30 = vld [vmem:[%s9582_s0 + $0x349] sm:$0x20]   ;;  %v959_v39 = vsel %vm190_vm3, %v4347_v26, %v955_v34  ;;  %v1017_v51 = vsel %vm178_vm0, %v4362_v48, %v4361_v47  ;;  %v4363_v52 = vld [vmem:[%s9582_s0 + $0x94] sm:$0x4]   ;;  %v1072_v2 = vsel %vm198_vm5, %v4376_v46, %v1068_v61  ;;  %v4407_v29 = vld [vmem:[%s9582_s0 + $0x7d] sm:$0x2]  }
  0x4b   :  { %v4349_v31 = vld [vmem:[%s9582_s0 + $0x388] sm:$0x40]   ;;  %v963_v44 = vsel %vm194_vm4, %v4348_v30, %v959_v39  ;;  %v4364_v53 = vld [vmem:[%s9582_s0 + $0xd3] sm:$0x8]   ;;  %v1021_v58 = vsel %vm182_vm1, %v4363_v52, %v1017_v51  ;;  %v1192_v32 = vsel %vm178_vm0, %v4407_v29, %v4406_v28  ;;  %v4409_v34 = vld [vmem:[%s9582_s0 + $0xfb] sm:$0x8]  }
  0x4c   :  { %v4350_v40 = vld [vmem:[%s9582_s0 + $0x3c7] sm:$0x80]   ;;  %v967_v49 = vsel %vm198_vm5, %v4349_v31, %v963_v44  ;;  %v4365_v54 = vld [vmem:[%s9582_s0 + $0x112] sm:$0x10]   ;;  %v1025_v62 = vsel %vm186_vm2, %v4364_v53, %v1021_v58  ;;  %v1196_v39 = vsel %vm182_vm1, %v4408_v33, %v1192_v32  ;;  %v4412_v41 = vld [vmem:[%s9582_s0 + $0x1b8] sm:$0x40]  }
  0x4d   :  { %902 = vrot.lane.b32.xlu0 %v901_v27, %s5156_s24  ;;  %1007 = vrot.lane.b32.xlu1 %v1006_v38, %s5156_s24  ;;  %v971_v55 = vsel %vm202_vm6, %v4350_v40, %v967_v49  ;;  %v4377_v57 = vld [vmem:[%s9582_s0 + $0x1ef] sm:$0x80]   ;;  %v1029_v3 = vsel %vm190_vm3, %v4365_v54, %v1025_v62  ;;  %v4411_v40 = vld [vmem:[%s9582_s0 + $0x179] sm:$0x20]   ;;  %v1200_v43 = vsel %vm186_vm2, %v4409_v34, %v1196_v39 }
  0x4e   :  { %v4366_v59 = vld [vmem:[%s9582_s0 + $0x151] sm:$0x20]   ;;  %v1076_v8 = vsel %vm202_vm6, %v4377_v57, %v1072_v2  ;;  %v4397_v44 = vld [vmem:[%s9582_s0 + $0x1e] sm:$0x1]   ;;  %v1204_v48 = vsel %vm190_vm3, %v4410_v35, %v1200_v43  ;;  %v4444_v32 = vld [vmem:[%s9582_s0 + $0xe2] sm:$0x8]  }
  0x4f   :  { %v4367_v60 = vld [vmem:[%s9582_s0 + $0x190] sm:$0x40]   ;;  %v1033_v9 = vsel %vm194_vm4, %v4366_v59, %v1029_v3  ;;  %v4398_v45 = vld [vmem:[%s9582_s0 + $0x5d] sm:$0x2]   ;;  %v1208_v54 = vsel %vm194_vm4, %v4411_v40, %v1204_v48  ;;  %v4445_v33 = vld [vmem:[%s9582_s0 + $0x121] sm:$0x10]  }
  0x50   :  { %v4388_v63 = vld [vmem:[%s9582_s0 + $0x236] sm:$0x1]   ;;  %v1037_v14 = vsel %vm198_vm5, %v4367_v60, %v1033_v9  ;;  %v4399_v46 = vld [vmem:[%s9582_s0 + $0x9c] sm:$0x4]   ;;  %v1157_v50 = vsel %vm178_vm0, %v4398_v45, %v4397_v44  ;;  %v1212_v59 = vsel %vm198_vm5, %v4412_v41, %v1208_v54  ;;  %v4433_v39 = vld [vmem:[%s9582_s0 + $0x5] sm:$0x1]  }
  0x51   :  { %972 = vrot.lane.b32.xlu0 %v971_v55, %s5156_s24  ;;  %v4389_v0 = vld [vmem:[%s9582_s0 + $0x275] sm:$0x2]   ;;  %1077 = vrot.lane.b32.xlu1 %v1076_v8, %s5156_s24  ;;  %v4413_v49 = vld [vmem:[%s9582_s0 + $0x1f7] sm:$0x80]   ;;  %v1161_v55 = vsel %vm182_vm1, %v4399_v46, %v1157_v50 }
  0x52   :  { %v4390_v1 = vld [vmem:[%s9582_s0 + $0x2b4] sm:$0x4]   ;;  %v1122_v5 = vsel %vm178_vm0, %v4389_v0, %v4388_v63  ;;  %v4400_v51 = vld [vmem:[%s9582_s0 + $0xdb] sm:$0x8]   ;;  %v1216_v0 = vsel %vm202_vm6, %v4413_v49, %v1212_v59  ;;  %v4435_v43 = vld [vmem:[%s9582_s0 + $0x83] sm:$0x4]  }
  0x53   :  { %v4368_v4 = vld [vmem:[%s9582_s0 + $0x1cf] sm:$0x80]   ;;  %v1126_v10 = vsel %vm182_vm1, %v4390_v1, %v1122_v5  ;;  %v4401_v52 = vld [vmem:[%s9582_s0 + $0x11a] sm:$0x10]   ;;  %v1165_v60 = vsel %vm186_vm2, %v4400_v51, %v1161_v55  ;;  %v4436_v44 = vld [vmem:[%s9582_s0 + $0xc2] sm:$0x8]  }
  0x54   :  { %v4391_v6 = vld [vmem:[%s9582_s0 + $0x2f3] sm:$0x8]   ;;  %v1041_v19 = vsel %vm202_vm6, %v4368_v4, %v1037_v14  ;;  %v4402_v56 = vld [vmem:[%s9582_s0 + $0x159] sm:$0x20]   ;;  %v1169_v1 = vsel %vm190_vm3, %v4401_v52, %v1165_v60  ;;  %v4437_v49 = vld [vmem:[%s9582_s0 + $0x101] sm:$0x10]  }
  0x55   :  { %v4392_v7 = vld [vmem:[%s9582_s0 + $0x332] sm:$0x10]   ;;  %v1130_v15 = vsel %vm186_vm2, %v4391_v6, %v1126_v10  ;;  %1042 = vrot.lane.b32.xlu0 %v1041_v19, %s5156_s24  ;;  %v4403_v57 = vld [vmem:[%s9582_s0 + $0x198] sm:$0x40]   ;;  %v1173_v6 = vsel %vm194_vm4, %v4402_v56, %v1169_v1  ;;  %v4438_v50 = vld [vmem:[%s9582_s0 + $0x140] sm:$0x20]  }
  0x56   :  { %v4393_v11 = vld [vmem:[%s9582_s0 + $0x371] sm:$0x20]   ;;  %v1134_v20 = vsel %vm190_vm3, %v4392_v7, %v1130_v15  ;;  %v4424_v58 = vld [vmem:[%s9582_s0 + $0x23e] sm:$0x1]   ;;  %v4459_v54 = vld [vmem:[%s9582_s0 + $0x225] sm:$0x1]  }
  0x57   :  { %v4394_v12 = vld [vmem:[%s9582_s0 + $0x3b0] sm:$0x40]   ;;  %v1138_v25 = vsel %vm194_vm4, %v4393_v11, %v1134_v20  ;;  %v4425_v61 = vld [vmem:[%s9582_s0 + $0x27d] sm:$0x2]   ;;  %v1177_v11 = vsel %vm198_vm5, %v4403_v57, %v1173_v6  ;;  %v4460_v55 = vld [vmem:[%s9582_s0 + $0x264] sm:$0x2]  }
  0x58   :  { %v4379_v13 = vld [vmem:[%s9582_s0 + $0x216] sm:$0x1]   ;;  %v1142_v30 = vsel %vm198_vm5, %v4394_v12, %v1138_v25  ;;  %v4426_v62 = vld [vmem:[%s9582_s0 + $0x2bc] sm:$0x4]   ;;  %v1262_v3 = vsel %vm178_vm0, %v4425_v61, %v4424_v58  ;;  %v4441_v25 = vld [vmem:[%s9582_s0 + $0x25] sm:$0x1]   ;;  %v1401_v58 = vsel %vm178_vm0, %v4460_v55, %v4459_v54 }
  0x59   :  { %v4380_v16 = vld [vmem:[%s9582_s0 + $0x255] sm:$0x2]   ;;  %v4427_v63 = vld [vmem:[%s9582_s0 + $0x2fb] sm:$0x8]   ;;  %v1266_v7 = vsel %vm182_vm1, %v4426_v62, %v1262_v3  ;;  %v4461_v59 = vld [vmem:[%s9582_s0 + $0x2a3] sm:$0x4]  }
  0x5a   :  { %v4381_v17 = vld [vmem:[%s9582_s0 + $0x294] sm:$0x4]   ;;  %v1087_v22 = vsel %vm178_vm0, %v4380_v16, %v4379_v13  ;;  %v4404_v2 = vld [vmem:[%s9582_s0 + $0x1d7] sm:$0x80]   ;;  %v1270_v12 = vsel %vm186_vm2, %v4427_v63, %v1266_v7  ;;  %v4462_v60 = vld [vmem:[%s9582_s0 + $0x2e2] sm:$0x8]   ;;  %v1405_v1 = vsel %vm182_vm1, %v4461_v59, %v1401_v58 }
  0x5b   :  { %v4382_v18 = vld [vmem:[%s9582_s0 + $0x2d3] sm:$0x8]   ;;  %v1091_v26 = vsel %vm182_vm1, %v4381_v17, %v1087_v22  ;;  %v4428_v4 = vld [vmem:[%s9582_s0 + $0x33a] sm:$0x10]   ;;  %v1181_v17 = vsel %vm202_vm6, %v4404_v2, %v1177_v11  ;;  %v4463_v61 = vld [vmem:[%s9582_s0 + $0x321] sm:$0x10]  }
  0x5c   :  { %v4395_v21 = vld [vmem:[%s9582_s0 + $0x3ef] sm:$0x80]   ;;  %v1095_v31 = vsel %vm186_vm2, %v4382_v18, %v1091_v26  ;;  %v4429_v5 = vld [vmem:[%s9582_s0 + $0x379] sm:$0x20]   ;;  %v1274_v18 = vsel %vm190_vm3, %v4428_v4, %v1270_v12  ;;  %v4442_v26 = vld [vmem:[%s9582_s0 + $0x64] sm:$0x2]  }
  0x5d   :  { %v4383_v23 = vld [vmem:[%s9582_s0 + $0x312] sm:$0x10]   ;;  %v1146_v36 = vsel %vm202_vm6, %v4395_v21, %v1142_v30  ;;  %v4430_v8 = vld [vmem:[%s9582_s0 + $0x3b8] sm:$0x40]   ;;  %v4464_v2 = vld [vmem:[%s9582_s0 + $0x360] sm:$0x20]  }
  0x5e   :  { %v4384_v24 = vld [vmem:[%s9582_s0 + $0x351] sm:$0x20]   ;;  %v1099_v37 = vsel %vm190_vm3, %v4383_v23, %v1095_v31  ;;  %1147 = vrot.lane.b32.xlu1 %v1146_v36, %s5156_s24  ;;  %v4415_v9 = vld [vmem:[%s9582_s0 + $0x21e] sm:$0x1]   ;;  %v1278_v23 = vsel %vm194_vm4, %v4429_v5, %v1274_v18  ;;  %v1331_v31 = vsel %vm178_vm0, %v4442_v26, %v4441_v25  ;;  %v4465_v3 = vld [vmem:[%s9582_s0 + $0x39f] sm:$0x40]   ;;  %v1409_v5 = vsel %vm186_vm2, %v4462_v60, %v1405_v1 }
  0x5f   :  { %v4385_v27 = vld [vmem:[%s9582_s0 + $0x390] sm:$0x40]   ;;  %v1103_v42 = vsel %vm194_vm4, %v4384_v24, %v1099_v37  ;;  %v4416_v10 = vld [vmem:[%s9582_s0 + $0x25d] sm:$0x2]   ;;  %v1282_v28 = vsel %vm198_vm5, %v4430_v8, %v1278_v23  ;;  %v4446_v37 = vld [vmem:[%s9582_s0 + $0x160] sm:$0x20]  }
  0x60   :  { %v4386_v38 = vld [vmem:[%s9582_s0 + $0x3cf] sm:$0x80]   ;;  %v1107_v47 = vsel %vm198_vm5, %v4385_v27, %v1103_v42  ;;  %v1227_v13 = vsel %vm178_vm0, %v4416_v10, %v4415_v9  ;;  %v4417_v14 = vld [vmem:[%s9582_s0 + $0x29c] sm:$0x4]   ;;  %v4443_v27 = vld [vmem:[%s9582_s0 + $0xa3] sm:$0x4]   ;;  %v1413_v10 = vsel %vm190_vm3, %v4463_v61, %v1409_v5 }
  0x61   :  { %v1111_v53 = vsel %vm202_vm6, %v4386_v38, %v1107_v47  ;;  %v4418_v15 = vld [vmem:[%s9582_s0 + $0x2db] sm:$0x8]   ;;  %v1231_v20 = vsel %vm182_vm1, %v4417_v14, %v1227_v13  ;;  %v1335_v36 = vsel %vm182_vm1, %v4443_v27, %v1331_v31  ;;  %v4447_v38 = vld [vmem:[%s9582_s0 + $0x19f] sm:$0x40]   ;;  %v4478_v23 = vld [vmem:[%s9582_s0 + $0x6c] sm:$0x2]  }
  0x62   :  { %1112 = vrot.lane.b32.xlu0 %v1111_v53, %s5156_s24  ;;  %1217 = vrot.lane.b32.xlu1 %v1216_v0, %s5156_s24  ;;  %v4419_v16 = vld [vmem:[%s9582_s0 + $0x31a] sm:$0x10]   ;;  %v1235_v24 = vsel %vm186_vm2, %v4418_v15, %v1231_v20  ;;  %v1339_v41 = vsel %vm186_vm2, %v4444_v32, %v1335_v36  ;;  %v4434_v42 = vld [vmem:[%s9582_s0 + $0x44] sm:$0x2]  }
  0x63   :  { %v4431_v19 = vld [vmem:[%s9582_s0 + $0x3f7] sm:$0x80]   ;;  %v1239_v29 = vsel %vm190_vm3, %v4419_v16, %v1235_v24  ;;  %v1343_v46 = vsel %vm190_vm3, %v4445_v33, %v1339_v41  ;;  %v4448_v47 = vld [vmem:[%s9582_s0 + $0x1de] sm:$0x80]   ;;  %v1297_v48 = vsel %vm178_vm0, %v4434_v42, %v4433_v39  ;;  %v1417_v16 = vsel %vm194_vm4, %v4464_v2, %v1413_v10  ;;  %v4477_v20 = vld [vmem:[%s9582_s0 + $0x2d] sm:$0x1]  }
  0x64   :  { %v4420_v21 = vld [vmem:[%s9582_s0 + $0x359] sm:$0x20]   ;;  %v1286_v34 = vsel %vm202_vm6, %v4431_v19, %v1282_v28  ;;  %v1347_v51 = vsel %vm194_vm4, %v4446_v37, %v1343_v46  ;;  %v1301_v52 = vsel %vm182_vm1, %v4435_v43, %v1297_v48  ;;  %v4439_v53 = vld [vmem:[%s9582_s0 + $0x17f] sm:$0x40]   ;;  %v4479_v24 = vld [vmem:[%s9582_s0 + $0xab] sm:$0x4]  }
  0x65   :  { %v4421_v22 = vld [vmem:[%s9582_s0 + $0x398] sm:$0x40]   ;;  %v1243_v35 = vsel %vm194_vm4, %v4420_v21, %v1239_v29  ;;  %v1351_v56 = vsel %vm198_vm5, %v4447_v38, %v1347_v51  ;;  %v1305_v57 = vsel %vm186_vm2, %v4436_v44, %v1301_v52  ;;  %v4440_v0 = vld [vmem:[%s9582_s0 + $0x1be] sm:$0x80]   ;;  %v1421_v21 = vsel %vm198_vm5, %v4465_v3, %v1417_v16  ;;  %v4480_v25 = vld [vmem:[%s9582_s0 + $0xea] sm:$0x8]  }
  0x66   :  { %1182 = vrot.lane.b32.xlu0 %v1181_v17, %s5156_s24  ;;  %v4422_v30 = vld [vmem:[%s9582_s0 + $0x3d7] sm:$0x80]   ;;  %1287 = vrot.lane.b32.xlu1 %v1286_v34, %s5156_s24  ;;  %v1247_v40 = vsel %vm198_vm5, %v4421_v22, %v1243_v35  ;;  %v1355_v62 = vsel %vm202_vm6, %v4448_v47, %v1351_v56  ;;  %v1309_v63 = vsel %vm190_vm3, %v4437_v49, %v1305_v57  ;;  %v4450_v6 = vld [vmem:[%s9582_s0 + $0x205] sm:$0x1]  }
  0x67   :  { %v1251_v45 = vsel %vm202_vm6, %v4422_v30, %v1247_v40  ;;  %v1313_v4 = vsel %vm194_vm4, %v4438_v50, %v1309_v63  ;;  %v4451_v7 = vld [vmem:[%s9582_s0 + $0x244] sm:$0x2]   ;;  %v1471_v29 = vsel %vm178_vm0, %v4478_v23, %v4477_v20  ;;  %v4481_v30 = vld [vmem:[%s9582_s0 + $0x129] sm:$0x10]   ;;  %v4513_v16 = vld [vmem:[%s9582_s0 + $0x35] sm:$0x1]  }
  0x68   :  { %v4452_v8 = vld [vmem:[%s9582_s0 + $0x283] sm:$0x4]   ;;  %v1317_v9 = vsel %vm198_vm5, %v4439_v53, %v1313_v4  ;;  %v1366_v12 = vsel %vm178_vm0, %v4451_v7, %v4450_v6  ;;  %v4482_v31 = vld [vmem:[%s9582_s0 + $0x168] sm:$0x20]   ;;  %v1475_v33 = vsel %vm182_vm1, %v4479_v24, %v1471_v29  ;;  %v4517_v23 = vld [vmem:[%s9582_s0 + $0x131] sm:$0x10]  }
  0x69   :  { %v4466_v11 = vld [vmem:[%s9582_s0 + $0x3de] sm:$0x80]   ;;  %v1321_v15 = vsel %vm202_vm6, %v4440_v0, %v1317_v9  ;;  %v1370_v17 = vsel %vm182_vm1, %v4452_v8, %v1366_v12  ;;  %v4483_v34 = vld [vmem:[%s9582_s0 + $0x1a7] sm:$0x40]   ;;  %v1479_v38 = vsel %vm186_vm2, %v4480_v25, %v1475_v33  ;;  %v4519_v29 = vld [vmem:[%s9582_s0 + $0x1af] sm:$0x40]  }
  0x6a   :  { %1252 = vrot.lane.b32.xlu0 %v1251_v45, %s5156_s24  ;;  %1356 = vrot.lane.b32.xlu1 %v1355_v62, %s5157_s2  ;;  %v4453_v13 = vld [vmem:[%s9582_s0 + $0x2c2] sm:$0x8]   ;;  %v1425_v26 = vsel %vm202_vm6, %v4466_v11, %v1421_v21  ;;  %v4468_v35 = vld [vmem:[%s9582_s0 + $0xd] sm:$0x1]   ;;  %v1483_v44 = vsel %vm190_vm3, %v4481_v30, %v1479_v38 }
  0x6b   :  { %v4454_v14 = vld [vmem:[%s9582_s0 + $0x301] sm:$0x10]   ;;  %v1374_v22 = vsel %vm186_vm2, %v4453_v13, %v1370_v17  ;;  %v4469_v36 = vld [vmem:[%s9582_s0 + $0x4c] sm:$0x2]   ;;  %v1487_v49 = vsel %vm194_vm4, %v4482_v31, %v1483_v44  ;;  %v4514_v17 = vld [vmem:[%s9582_s0 + $0x74] sm:$0x2]  }
  0x6c   :  { %v4455_v18 = vld [vmem:[%s9582_s0 + $0x340] sm:$0x20]   ;;  %v1378_v27 = vsel %vm190_vm3, %v4454_v14, %v1374_v22  ;;  %v1436_v39 = vsel %vm178_vm0, %v4469_v36, %v4468_v35  ;;  %v4470_v40 = vld [vmem:[%s9582_s0 + $0x8b] sm:$0x4]   ;;  %v1491_v54 = vsel %vm198_vm5, %v4483_v34, %v1487_v49  ;;  %v1611_v20 = vsel %vm178_vm0, %v4514_v17, %v4513_v16  ;;  %v4515_v21 = vld [vmem:[%s9582_s0 + $0xb3] sm:$0x4]  }
  0x6d   :  { %v4456_v19 = vld [vmem:[%s9582_s0 + $0x37f] sm:$0x40]   ;;  %v1382_v32 = vsel %vm194_vm4, %v4455_v18, %v1378_v27  ;;  %v4471_v41 = vld [vmem:[%s9582_s0 + $0xca] sm:$0x8]   ;;  %v1440_v46 = vsel %vm182_vm1, %v4470_v40, %v1436_v39  ;;  %v4516_v22 = vld [vmem:[%s9582_s0 + $0xf2] sm:$0x8]   ;;  %v1615_v27 = vsel %vm182_vm1, %v4515_v21, %v1611_v20 }
  0x6e   :  { %1322 = vrot.lane.b32.xlu0 %v1321_v15, %s5157_s2  ;;  %v4457_v28 = vld [vmem:[%s9582_s0 + $0x3be] sm:$0x80]   ;;  %1426 = vrot.lane.b32.xlu1 %v1425_v26, %s5157_s2  ;;  %v1386_v37 = vsel %vm198_vm5, %v4456_v19, %v1382_v32  ;;  %v4472_v42 = vld [vmem:[%s9582_s0 + $0x109] sm:$0x10]   ;;  %v1444_v50 = vsel %vm186_vm2, %v4471_v41, %v1440_v46  ;;  %v1619_v31 = vsel %vm186_vm2, %v4516_v22, %v1615_v27 }
  0x6f   :  { %v1390_v43 = vsel %vm202_vm6, %v4457_v28, %v1386_v37  ;;  %v4484_v45 = vld [vmem:[%s9582_s0 + $0x1e6] sm:$0x80]   ;;  %v1448_v55 = vsel %vm190_vm3, %v4472_v42, %v1444_v50  ;;  %v4518_v28 = vld [vmem:[%s9582_s0 + $0x170] sm:$0x20]   ;;  %v1623_v36 = vsel %vm190_vm3, %v4517_v23, %v1619_v31  ;;  %v4552_v20 = vld [vmem:[%s9582_s0 + $0xfa] sm:$0x8]  }
  0x70   :  { %v4473_v47 = vld [vmem:[%s9582_s0 + $0x148] sm:$0x20]   ;;  %v1495_v60 = vsel %vm202_vm6, %v4484_v45, %v1491_v54  ;;  %v4504_v32 = vld [vmem:[%s9582_s0 + $0x15] sm:$0x1]   ;;  %v1627_v42 = vsel %vm194_vm4, %v4518_v28, %v1623_v36  ;;  %v4553_v21 = vld [vmem:[%s9582_s0 + $0x139] sm:$0x10]  }
  0x71   :  { %v4474_v48 = vld [vmem:[%s9582_s0 + $0x187] sm:$0x40]   ;;  %v1452_v61 = vsel %vm194_vm4, %v4473_v47, %v1448_v55  ;;  %v4505_v33 = vld [vmem:[%s9582_s0 + $0x54] sm:$0x2]   ;;  %v1631_v47 = vsel %vm198_vm5, %v4519_v29, %v1627_v42  ;;  %v4540_v27 = vld [vmem:[%s9582_s0 + $0x1d] sm:$0x1]  }
  0x72   :  { %1391 = vrot.lane.b32.xlu0 %v1390_v43, %s5157_s2  ;;  %v4495_v51 = vld [vmem:[%s9582_s0 + $0x22d] sm:$0x1]   ;;  %1496 = vrot.lane.b32.xlu1 %v1495_v60, %s5157_s2  ;;  %v1456_v2 = vsel %vm198_vm5, %v4474_v48, %v1452_v61  ;;  %v4506_v34 = vld [vmem:[%s9582_s0 + $0x93] sm:$0x4]   ;;  %v1576_v38 = vsel %vm178_vm0, %v4505_v33, %v4504_v32 }
  0x73   :  { %v4496_v52 = vld [vmem:[%s9582_s0 + $0x26c] sm:$0x2]   ;;  %v4520_v37 = vld [vmem:[%s9582_s0 + $0x1ee] sm:$0x80]   ;;  %v1580_v43 = vsel %vm182_vm1, %v4506_v34, %v1576_v38  ;;  %v4542_v31 = vld [vmem:[%s9582_s0 + $0x9b] sm:$0x4]  }
  0x74   :  { %v4497_v53 = vld [vmem:[%s9582_s0 + $0x2ab] sm:$0x4]   ;;  %v1541_v57 = vsel %vm178_vm0, %v4496_v52, %v4495_v51  ;;  %v4507_v39 = vld [vmem:[%s9582_s0 + $0xd2] sm:$0x8]   ;;  %v1635_v52 = vsel %vm202_vm6, %v4520_v37, %v1631_v47  ;;  %v4543_v32 = vld [vmem:[%s9582_s0 + $0xda] sm:$0x8]  }
  0x75   :  { %v4475_v56 = vld [vmem:[%s9582_s0 + $0x1c6] sm:$0x80]   ;;  %v1545_v62 = vsel %vm182_vm1, %v4497_v53, %v1541_v57  ;;  %v4508_v40 = vld [vmem:[%s9582_s0 + $0x111] sm:$0x10]   ;;  %v1584_v48 = vsel %vm186_vm2, %v4507_v39, %v1580_v43  ;;  %v4544_v37 = vld [vmem:[%s9582_s0 + $0x119] sm:$0x10]  }
  0x76   :  { %v4498_v58 = vld [vmem:[%s9582_s0 + $0x2ea] sm:$0x8]   ;;  %v1460_v7 = vsel %vm202_vm6, %v4475_v56, %v1456_v2  ;;  %v4509_v44 = vld [vmem:[%s9582_s0 + $0x150] sm:$0x20]   ;;  %v1588_v53 = vsel %vm190_vm3, %v4508_v40, %v1584_v48  ;;  %v4545_v38 = vld [vmem:[%s9582_s0 + $0x158] sm:$0x20]  }
  0x77   :  { %v4499_v59 = vld [vmem:[%s9582_s0 + $0x329] sm:$0x10]   ;;  %v1549_v3 = vsel %vm186_vm2, %v4498_v58, %v1545_v62  ;;  %1461 = vrot.lane.b32.xlu0 %v1460_v7, %s5157_s2  ;;  %v4510_v45 = vld [vmem:[%s9582_s0 + $0x18f] sm:$0x40]   ;;  %v1592_v58 = vsel %vm194_vm4, %v4509_v44, %v1588_v53  ;;  %v4567_v42 = vld [vmem:[%s9582_s0 + $0x23d] sm:$0x1]  }
  0x78   :  { %v4500_v63 = vld [vmem:[%s9582_s0 + $0x368] sm:$0x20]   ;;  %v1553_v8 = vsel %vm190_vm3, %v4499_v59, %v1549_v3  ;;  %v4531_v46 = vld [vmem:[%s9582_s0 + $0x235] sm:$0x1]   ;;  %v4568_v43 = vld [vmem:[%s9582_s0 + $0x27c] sm:$0x2]  }
  0x79   :  { %v4501_v0 = vld [vmem:[%s9582_s0 + $0x3a7] sm:$0x40]   ;;  %v1557_v13 = vsel %vm194_vm4, %v4500_v63, %v1553_v8  ;;  %v4532_v49 = vld [vmem:[%s9582_s0 + $0x274] sm:$0x2]   ;;  %v1596_v63 = vsel %vm198_vm5, %v4510_v45, %v1592_v58  ;;  %v1821_v47 = vsel %vm178_vm0, %v4568_v43, %v4567_v42  ;;  %v4569_v48 = vld [vmem:[%s9582_s0 + $0x2bb] sm:$0x4]  }
  0x7a   :  { %v4486_v1 = vld [vmem:[%s9582_s0 + $0x20d] sm:$0x1]   ;;  %v1561_v18 = vsel %vm198_vm5, %v4501_v0, %v1557_v13  ;;  %v4533_v50 = vld [vmem:[%s9582_s0 + $0x2b3] sm:$0x4]   ;;  %v1681_v55 = vsel %vm178_vm0, %v4532_v49, %v4531_v46  ;;  %v4549_v13 = vld [vmem:[%s9582_s0 + $0x3d] sm:$0x1]  }
  0x7b   :  { %v4487_v4 = vld [vmem:[%s9582_s0 + $0x24c] sm:$0x2]   ;;  %v4534_v51 = vld [vmem:[%s9582_s0 + $0x2f2] sm:$0x8]   ;;  %v1685_v59 = vsel %vm182_vm1, %v4533_v50, %v1681_v55  ;;  %v4570_v49 = vld [vmem:[%s9582_s0 + $0x2fa] sm:$0x8]  }
  0x7c   :  { %v4488_v5 = vld [vmem:[%s9582_s0 + $0x28b] sm:$0x4]   ;;  %v1506_v10 = vsel %vm178_vm0, %v4487_v4, %v4486_v1  ;;  %v4511_v54 = vld [vmem:[%s9582_s0 + $0x1ce] sm:$0x80]   ;;  %v1689_v0 = vsel %vm186_vm2, %v4534_v51, %v1685_v59  ;;  %v4571_v50 = vld [vmem:[%s9582_s0 + $0x339] sm:$0x10]  }
  0x7d   :  { %v4489_v6 = vld [vmem:[%s9582_s0 + $0x2ca] sm:$0x8]   ;;  %v1510_v14 = vsel %vm182_vm1, %v4488_v5, %v1506_v10  ;;  %v4535_v56 = vld [vmem:[%s9582_s0 + $0x331] sm:$0x10]   ;;  %v1600_v5 = vsel %vm202_vm6, %v4511_v54, %v1596_v63  ;;  %v4547_v53 = vld [vmem:[%s9582_s0 + $0x1d6] sm:$0x80]   ;;  %v1825_v54 = vsel %vm182_vm1, %v4569_v48, %v1821_v47 }
  0x7e   :  { %v4502_v9 = vld [vmem:[%s9582_s0 + $0x3e6] sm:$0x80]   ;;  %v1514_v19 = vsel %vm186_vm2, %v4489_v6, %v1510_v14  ;;  %v4536_v57 = vld [vmem:[%s9582_s0 + $0x370] sm:$0x20]   ;;  %v1693_v6 = vsel %vm190_vm3, %v4535_v56, %v1689_v0  ;;  %v4550_v14 = vld [vmem:[%s9582_s0 + $0x7c] sm:$0x2]   ;;  %v1829_v59 = vsel %vm186_vm2, %v4570_v49, %v1825_v54 }
  0x7f   :  { %v4490_v11 = vld [vmem:[%s9582_s0 + $0x309] sm:$0x10]   ;;  %v1565_v24 = vsel %vm202_vm6, %v4502_v9, %v1561_v18  ;;  %v4537_v60 = vld [vmem:[%s9582_s0 + $0x3af] sm:$0x40]   ;;  %v4572_v55 = vld [vmem:[%s9582_s0 + $0x378] sm:$0x20]   ;;  %v1833_v0 = vsel %vm190_vm3, %v4571_v50, %v1829_v59 }
  0x80   :  { %v4491_v12 = vld [vmem:[%s9582_s0 + $0x348] sm:$0x20]   ;;  %v1518_v25 = vsel %vm190_vm3, %v4490_v11, %v1514_v19  ;;  %1566 = vrot.lane.b32.xlu1 %v1565_v24, %s5157_s2  ;;  %v4522_v61 = vld [vmem:[%s9582_s0 + $0x215] sm:$0x1]   ;;  %v1697_v11 = vsel %vm194_vm4, %v4536_v57, %v1693_v6  ;;  %v1751_v19 = vsel %vm178_vm0, %v4550_v14, %v4549_v13  ;;  %v4573_v56 = vld [vmem:[%s9582_s0 + $0x3b7] sm:$0x40]   ;;  %v1837_v6 = vsel %vm194_vm4, %v4572_v55, %v1833_v0 }
  0x81   :  { %v4492_v15 = vld [vmem:[%s9582_s0 + $0x387] sm:$0x40]   ;;  %v1522_v30 = vsel %vm194_vm4, %v4491_v12, %v1518_v25  ;;  %v4523_v62 = vld [vmem:[%s9582_s0 + $0x254] sm:$0x2]   ;;  %v1701_v16 = vsel %vm198_vm5, %v4537_v60, %v1697_v11  ;;  %v4554_v25 = vld [vmem:[%s9582_s0 + $0x178] sm:$0x20]   ;;  %v6638_v44 = vpop.permute.xlu1 %273  }
  0x82   :  { %v4493_v26 = vld [vmem:[%s9582_s0 + $0x3c6] sm:$0x80]   ;;  %v1526_v35 = vsel %vm198_vm5, %v4492_v15, %v1522_v30  ;;  %v1646_v1 = vsel %vm178_vm0, %v4523_v62, %v4522_v61  ;;  %v4524_v2 = vld [vmem:[%s9582_s0 + $0x293] sm:$0x4]   ;;  %v4551_v15 = vld [vmem:[%s9582_s0 + $0xbb] sm:$0x4]  }
  0x83   :  { %v1530_v41 = vsel %vm202_vm6, %v4493_v26, %v1526_v35  ;;  %v4525_v3 = vld [vmem:[%s9582_s0 + $0x2d2] sm:$0x8]   ;;  %v1650_v8 = vsel %vm182_vm1, %v4524_v2, %v1646_v1  ;;  %v1755_v24 = vsel %vm182_vm1, %v4551_v15, %v1751_v19  ;;  %v4555_v26 = vld [vmem:[%s9582_s0 + $0x1b7] sm:$0x40]   ;;  %v4584_v14 = vld [vmem:[%s9582_s0 + $0x24] sm:$0x1]  }
  0x84   :  { %1531 = vrot.lane.b32.xlu0 %v1530_v41, %s5157_s2  ;;  %1636 = vrot.lane.b32.xlu1 %v1635_v52, %s5157_s2  ;;  %v4526_v4 = vld [vmem:[%s9582_s0 + $0x311] sm:$0x10]   ;;  %v1654_v12 = vsel %vm186_vm2, %v4525_v3, %v1650_v8  ;;  %v1759_v29 = vsel %vm186_vm2, %v4552_v20, %v1755_v24  ;;  %v4541_v30 = vld [vmem:[%s9582_s0 + $0x5c] sm:$0x2]  }
  0x85   :  { %v4538_v7 = vld [vmem:[%s9582_s0 + $0x3ee] sm:$0x80]   ;;  %v1658_v17 = vsel %vm190_vm3, %v4526_v4, %v1654_v12  ;;  %v1763_v34 = vsel %vm190_vm3, %v4553_v21, %v1759_v29  ;;  %v4556_v35 = vld [vmem:[%s9582_s0 + $0x1f6] sm:$0x80]   ;;  %v1716_v36 = vsel %vm178_vm0, %v4541_v30, %v4540_v27  ;;  %v1841_v12 = vsel %vm198_vm5, %v4573_v56, %v1837_v6  ;;  %v4585_v15 = vld [vmem:[%s9582_s0 + $0x63] sm:$0x2]  }
  0x86   :  { %v4527_v9 = vld [vmem:[%s9582_s0 + $0x350] sm:$0x20]   ;;  %v1705_v22 = vsel %vm202_vm6, %v4538_v7, %v1701_v16  ;;  %v1767_v39 = vsel %vm194_vm4, %v4554_v25, %v1763_v34  ;;  %v1720_v40 = vsel %vm182_vm1, %v4542_v31, %v1716_v36  ;;  %v4546_v41 = vld [vmem:[%s9582_s0 + $0x197] sm:$0x40]   ;;  %v4586_v16 = vld [vmem:[%s9582_s0 + $0xa2] sm:$0x4]   ;;  %v1890_v19 = vsel %vm178_vm0, %v4585_v15, %v4584_v14 }
  0x87   :  { %v4528_v10 = vld [vmem:[%s9582_s0 + $0x38f] sm:$0x40]   ;;  %v1662_v23 = vsel %vm194_vm4, %v4527_v9, %v1658_v17  ;;  %v1771_v45 = vsel %vm198_vm5, %v4555_v26, %v1767_v39  ;;  %v1724_v46 = vsel %vm186_vm2, %v4543_v32, %v1720_v40  ;;  %v6664_v57 = vpop.permute.xlu0 %204   ;;  %v4558_v60 = vld [vmem:[%s9582_s0 + $0x21d] sm:$0x1]   ;;  %v4587_v20 = vld [vmem:[%s9582_s0 + $0xe1] sm:$0x8]  }
  0x88   :  { %1601 = vrot.lane.b32.xlu0 %v1600_v5, %s5157_s2  ;;  %v4529_v18 = vld [vmem:[%s9582_s0 + $0x3ce] sm:$0x80]   ;;  %1706 = vrot.lane.b32.xlu1 %v1705_v22, %s5157_s2  ;;  %v1666_v28 = vsel %vm198_vm5, %v4528_v10, %v1662_v23  ;;  %v1775_v51 = vsel %vm202_vm6, %v4556_v35, %v1771_v45  ;;  %v1728_v52 = vsel %vm190_vm3, %v4544_v37, %v1724_v46  ;;  %v4559_v61 = vld [vmem:[%s9582_s0 + $0x25c] sm:$0x2]  }
  0x89   :  { %v1670_v33 = vsel %vm202_vm6, %v4529_v18, %v1666_v28  ;;  %v1732_v58 = vsel %vm194_vm4, %v4545_v38, %v1728_v52  ;;  %v4560_v62 = vld [vmem:[%s9582_s0 + $0x29b] sm:$0x4]   ;;  %v1786_v2 = vsel %vm178_vm0, %v4559_v61, %v4558_v60  ;;  %v4588_v21 = vld [vmem:[%s9582_s0 + $0x120] sm:$0x10]   ;;  %v1894_v23 = vsel %vm182_vm1, %v4586_v16, %v1890_v19  ;;  %v4623_v19 = vld [vmem:[%s9582_s0 + $0xe9] sm:$0x8]  }
  0x8a   :  { %v1736_v63 = vsel %vm198_vm5, %v4546_v41, %v1732_v58  ;;  %v4574_v1 = vld [vmem:[%s9582_s0 + $0x3f6] sm:$0x80]   ;;  %v1790_v7 = vsel %vm182_vm1, %v4560_v62, %v1786_v2  ;;  %v4589_v24 = vld [vmem:[%s9582_s0 + $0x15f] sm:$0x20]   ;;  %v1898_v29 = vsel %vm186_vm2, %v4587_v20, %v1894_v23 }
  0x8b   :  { %v4561_v3 = vld [vmem:[%s9582_s0 + $0x2da] sm:$0x8]   ;;  %v1740_v5 = vsel %vm202_vm6, %v4547_v53, %v1736_v63  ;;  %v1845_v17 = vsel %vm202_vm6, %v4574_v1, %v1841_v12  ;;  %v4590_v25 = vld [vmem:[%s9582_s0 + $0x19e] sm:$0x40]   ;;  %v1902_v34 = vsel %vm190_vm3, %v4588_v21, %v1898_v29 }
  0x8c   :  { %1671 = vrot.lane.b32.xlu0 %v1670_v33, %s5157_s2  ;;  %1776 = vrot.lane.b32.xlu1 %v1775_v51, %s5157_s2  ;;  %v4562_v4 = vld [vmem:[%s9582_s0 + $0x319] sm:$0x10]   ;;  %v1794_v13 = vsel %vm186_vm2, %v4561_v3, %v1790_v7  ;;  %v4576_v26 = vld [vmem:[%s9582_s0 + $0x4] sm:$0x1]   ;;  %v1906_v40 = vsel %vm194_vm4, %v4589_v24, %v1902_v34 }
  0x8d   :  { %v4563_v8 = vld [vmem:[%s9582_s0 + $0x358] sm:$0x20]   ;;  %v1798_v18 = vsel %vm190_vm3, %v4562_v4, %v1794_v13  ;;  %v4577_v30 = vld [vmem:[%s9582_s0 + $0x43] sm:$0x2]   ;;  %v1910_v46 = vsel %vm198_vm5, %v4590_v25, %v1906_v40  ;;  %v4620_v13 = vld [vmem:[%s9582_s0 + $0x2c] sm:$0x1]  }
  0x8e   :  { %v4564_v9 = vld [vmem:[%s9582_s0 + $0x397] sm:$0x40]   ;;  %v1802_v22 = vsel %vm194_vm4, %v4563_v8, %v1798_v18  ;;  %v4578_v31 = vld [vmem:[%s9582_s0 + $0x82] sm:$0x4]   ;;  %v1856_v36 = vsel %vm178_vm0, %v4577_v30, %v4576_v26  ;;  %v4622_v18 = vld [vmem:[%s9582_s0 + $0xaa] sm:$0x4]  }
  0x8f   :  { %v4565_v10 = vld [vmem:[%s9582_s0 + $0x3d6] sm:$0x80]   ;;  %v1806_v28 = vsel %vm198_vm5, %v4564_v9, %v1802_v22  ;;  %v4579_v32 = vld [vmem:[%s9582_s0 + $0xc1] sm:$0x8]   ;;  %v1860_v41 = vsel %vm182_vm1, %v4578_v31, %v1856_v36  ;;  %v4624_v24 = vld [vmem:[%s9582_s0 + $0x128] sm:$0x10]  }
  0x90   :  { %v6702_v11 = vpop.permute.xlu1 %308   ;;  %1741 = vrot.lane.b32.xlu0 %v1740_v5, %s5157_s2  ;;  %1846 = vrot.lane.b32.xlu1 %v1845_v17, %s5157_s2  ;;  %v1810_v33 = vsel %vm202_vm6, %v4565_v10, %v1806_v28  ;;  %v4591_v35 = vld [vmem:[%s9582_s0 + $0x1dd] sm:$0x80]   ;;  %v1864_v47 = vsel %vm186_vm2, %v4579_v32, %v1860_v41  ;;  %v4621_v17 = vld [vmem:[%s9582_s0 + $0x6b] sm:$0x2]  }
  0x91   :  { %v4580_v37 = vld [vmem:[%s9582_s0 + $0x100] sm:$0x10]   ;;  %v1914_v52 = vsel %vm202_vm6, %v4591_v35, %v1910_v46  ;;  %v2030_v23 = vsel %vm178_vm0, %v4621_v17, %v4620_v13  ;;  %v4625_v25 = vld [vmem:[%s9582_s0 + $0x167] sm:$0x20]  }
  0x92   :  { %v4581_v38 = vld [vmem:[%s9582_s0 + $0x13f] sm:$0x20]   ;;  %v1868_v53 = vsel %vm190_vm3, %v4580_v37, %v1864_v47  ;;  %v2034_v29 = vsel %vm182_vm1, %v4622_v18, %v2030_v23  ;;  %v4626_v30 = vld [vmem:[%s9582_s0 + $0x1a6] sm:$0x40]  }
  0x93   :  { %v4582_v42 = vld [vmem:[%s9582_s0 + $0x17e] sm:$0x40]   ;;  %v1872_v60 = vsel %vm194_vm4, %v4581_v38, %v1868_v53  ;;  %v4611_v31 = vld [vmem:[%s9582_s0 + $0xc] sm:$0x1]   ;;  %v2038_v34 = vsel %vm186_vm2, %v4623_v19, %v2034_v29  ;;  %v4659_v29 = vld [vmem:[%s9582_s0 + $0xf1] sm:$0x8]  }
  0x94   :  { %v6737_v27 = vpop.permute.xlu0 %238   ;;  %v6762_v39 = vpop.permute.xlu1 %378   ;;  %1811 = vrot.lane.b32.xlu0 %v1810_v33, %s5157_s2  ;;  %v4602_v43 = vld [vmem:[%s9582_s0 + $0x224] sm:$0x1]   ;;  %1915 = vrot.lane.b32.xlu1 %v1914_v52, %s5158_s6  ;;  %v1876_v1 = vsel %vm198_vm5, %v4582_v42, %v1872_v60  ;;  %v4612_v32 = vld [vmem:[%s9582_s0 + $0x4b] sm:$0x2]   ;;  %v2042_v41 = vsel %vm190_vm3, %v4624_v24, %v2038_v34 }
  0x95   :  { %v4603_v45 = vld [vmem:[%s9582_s0 + $0x263] sm:$0x2]   ;;  %v1995_v35 = vsel %vm178_vm0, %v4612_v32, %v4611_v31  ;;  %v4613_v36 = vld [vmem:[%s9582_s0 + $0x8a] sm:$0x4]  }
  0x96   :  { %v1960_v48 = vsel %vm178_vm0, %v4603_v45, %v4602_v43  ;;  %v4604_v49 = vld [vmem:[%s9582_s0 + $0x2a2] sm:$0x4]   ;;  %v4614_v37 = vld [vmem:[%s9582_s0 + $0xc9] sm:$0x8]   ;;  %v1999_v43 = vsel %vm182_vm1, %v4613_v36, %v1995_v35  ;;  %v4661_v35 = vld [vmem:[%s9582_s0 + $0x16f] sm:$0x20]  }
  0x97   :  { %v4605_v50 = vld [vmem:[%s9582_s0 + $0x2e1] sm:$0x8]   ;;  %v1964_v55 = vsel %vm182_vm1, %v4604_v49, %v1960_v48  ;;  %v4615_v38 = vld [vmem:[%s9582_s0 + $0x108] sm:$0x10]   ;;  %v2046_v48 = vsel %vm194_vm4, %v4625_v25, %v2042_v41  ;;  %v2003_v49 = vsel %vm186_vm2, %v4614_v37, %v1999_v43  ;;  %v4662_v36 = vld [vmem:[%s9582_s0 + $0x1ae] sm:$0x40]  }
  0x98   :  { %v4606_v51 = vld [vmem:[%s9582_s0 + $0x320] sm:$0x10]   ;;  %v6800_v59 = vpop.permute.xlu0 %343   ;;  %v1968_v61 = vsel %vm186_vm2, %v4605_v50, %v1964_v55  ;;  %v6838_v14 = vpop.permute.xlu1 %448   ;;  %v4627_v42 = vld [vmem:[%s9582_s0 + $0x1e5] sm:$0x80]   ;;  %v2050_v53 = vsel %vm198_vm5, %v4626_v30, %v2046_v48  ;;  %v4660_v30 = vld [vmem:[%s9582_s0 + $0x130] sm:$0x10]  }
  0x99   :  { %v4583_v54 = vld [vmem:[%s9582_s0 + $0x1bd] sm:$0x80]   ;;  %v1972_v2 = vsel %vm190_vm3, %v4606_v51, %v1968_v61  ;;  %v4616_v45 = vld [vmem:[%s9582_s0 + $0x147] sm:$0x20]   ;;  %v2054_v61 = vsel %vm202_vm6, %v4627_v42, %v2050_v53  ;;  %v4647_v41 = vld [vmem:[%s9582_s0 + $0x14] sm:$0x1]  }
  0x9a   :  { %v4607_v56 = vld [vmem:[%s9582_s0 + $0x35f] sm:$0x20]   ;;  %v1880_v7 = vsel %vm202_vm6, %v4583_v54, %v1876_v1  ;;  %v4617_v46 = vld [vmem:[%s9582_s0 + $0x186] sm:$0x40]   ;;  %v2007_v54 = vsel %vm190_vm3, %v4615_v38, %v2003_v49  ;;  %v4648_v42 = vld [vmem:[%s9582_s0 + $0x53] sm:$0x2]  }
  0x9b   :  { %v4608_v58 = vld [vmem:[%s9582_s0 + $0x39e] sm:$0x40]   ;;  %v1976_v8 = vsel %vm194_vm4, %v4607_v56, %v1972_v2  ;;  %1881 = vrot.lane.b32.xlu0 %v1880_v7, %s5158_s6  ;;  %v4638_v50 = vld [vmem:[%s9582_s0 + $0x22c] sm:$0x1]   ;;  %v4649_v43 = vld [vmem:[%s9582_s0 + $0x92] sm:$0x4]   ;;  %v2135_v49 = vsel %vm178_vm0, %v4648_v42, %v4647_v41 }
  0x9c   :  { %v4593_v62 = vld [vmem:[%s9582_s0 + $0x204] sm:$0x1]   ;;  %v1980_v15 = vsel %vm198_vm5, %v4608_v58, %v1976_v8  ;;  %v6864_v26 = vpop.permute.xlu0 %413   ;;  %v6902_v47 = vpop.permute.xlu1 %518   ;;  %v4639_v51 = vld [vmem:[%s9582_s0 + $0x26b] sm:$0x2]   ;;  %v4663_v48 = vld [vmem:[%s9582_s0 + $0x1ed] sm:$0x80]  }
  0x9d   :  { %v4594_v63 = vld [vmem:[%s9582_s0 + $0x243] sm:$0x2]   ;;  %v4640_v52 = vld [vmem:[%s9582_s0 + $0x2aa] sm:$0x4]   ;;  %v2100_v56 = vsel %vm178_vm0, %v4639_v51, %v4638_v50  ;;  %v4650_v50 = vld [vmem:[%s9582_s0 + $0xd1] sm:$0x8]  }
  0x9e   :  { %v4595_v0 = vld [vmem:[%s9582_s0 + $0x282] sm:$0x4]   ;;  %v1925_v4 = vsel %vm178_vm0, %v4594_v63, %v4593_v62  ;;  %v4618_v55 = vld [vmem:[%s9582_s0 + $0x1c5] sm:$0x80]   ;;  %v2011_v62 = vsel %vm194_vm4, %v4616_v45, %v2007_v54  ;;  %v2104_v63 = vsel %vm182_vm1, %v4640_v52, %v2100_v56  ;;  %v4651_v51 = vld [vmem:[%s9582_s0 + $0x110] sm:$0x10]   ;;  %v2139_v54 = vsel %vm182_vm1, %v4649_v43, %v2135_v49 }
  0x9f   :  { %v4609_v3 = vld [vmem:[%s9582_s0 + $0x3dd] sm:$0x80]   ;;  %v1929_v9 = vsel %vm182_vm1, %v4595_v0, %v1925_v4  ;;  %v4641_v58 = vld [vmem:[%s9582_s0 + $0x2e9] sm:$0x8]   ;;  %v2015_v4 = vsel %vm198_vm5, %v4617_v46, %v2011_v62  ;;  %v4653_v56 = vld [vmem:[%s9582_s0 + $0x18e] sm:$0x40]   ;;  %v2143_v62 = vsel %vm186_vm2, %v4650_v50, %v2139_v54 }
  0xa0   :  { %v4596_v5 = vld [vmem:[%s9582_s0 + $0x2c1] sm:$0x8]   ;;  %v1984_v20 = vsel %vm202_vm6, %v4609_v3, %v1980_v15  ;;  %v4642_v60 = vld [vmem:[%s9582_s0 + $0x328] sm:$0x10]   ;;  %v6940_v3 = vpop.permute.xlu0 %483   ;;  %v6966_v17 = vpop.permute.xlu1 %588   ;;  %v4672_v42 = vld [vmem:[%s9582_s0 + $0x3cd] sm:$0x80]  }
  0xa1   :  { %v4597_v6 = vld [vmem:[%s9582_s0 + $0x300] sm:$0x10]   ;;  %v1933_v16 = vsel %vm186_vm2, %v4596_v5, %v1929_v9  ;;  %1985 = vrot.lane.b32.xlu1 %v1984_v20, %s5158_s6  ;;  %v4643_v0 = vld [vmem:[%s9582_s0 + $0x367] sm:$0x20]   ;;  %v2108_v5 = vsel %vm186_vm2, %v4641_v58, %v2104_v63  ;;  %v2019_v9 = vsel %vm202_vm6, %v4618_v55, %v2015_v4  ;;  %v4652_v55 = vld [vmem:[%s9582_s0 + $0x14f] sm:$0x20]   ;;  %v2147_v4 = vsel %vm190_vm3, %v4651_v51, %v2143_v62 }
  0xa2   :  { %v4598_v10 = vld [vmem:[%s9582_s0 + $0x33f] sm:$0x20]   ;;  %v1937_v21 = vsel %vm190_vm3, %v4597_v6, %v1933_v16  ;;  %v4644_v1 = vld [vmem:[%s9582_s0 + $0x3a6] sm:$0x40]   ;;  %v4674_v58 = vld [vmem:[%s9582_s0 + $0x234] sm:$0x1]  }
  0xa3   :  { %v4599_v12 = vld [vmem:[%s9582_s0 + $0x37e] sm:$0x40]   ;;  %v1941_v28 = vsel %vm194_vm4, %v4598_v10, %v1937_v21  ;;  %v4629_v2 = vld [vmem:[%s9582_s0 + $0x20c] sm:$0x1]   ;;  %v2112_v10 = vsel %vm190_vm3, %v4642_v60, %v2108_v5  ;;  %v4656_v21 = vld [vmem:[%s9582_s0 + $0x34] sm:$0x1]  }
  0xa4   :  { %v4600_v22 = vld [vmem:[%s9582_s0 + $0x3bd] sm:$0x80]   ;;  %v1945_v33 = vsel %vm198_vm5, %v4599_v12, %v1941_v28  ;;  %v4630_v6 = vld [vmem:[%s9582_s0 + $0x24b] sm:$0x2]   ;;  %v2116_v18 = vsel %vm194_vm4, %v4643_v0, %v2112_v10  ;;  %v4658_v28 = vld [vmem:[%s9582_s0 + $0xb2] sm:$0x4]   ;;  %v7004_v37 = vpop.permute.xlu0 %553   ;;  %v7042_v60 = vpop.permute.xlu1 %658   ;;  %v2151_v10 = vsel %vm194_vm4, %v4652_v55, %v2147_v4 }
  0xa5   :  { %v1949_v40 = vsel %vm202_vm6, %v4600_v22, %v1945_v33  ;;  %2055 = vrot.lane.b32.xlu1 %v2054_v61, %s5158_s6  ;;  %v4631_v7 = vld [vmem:[%s9582_s0 + $0x28a] sm:$0x4]   ;;  %v2065_v13 = vsel %vm178_vm0, %v4630_v6, %v4629_v2  ;;  %v4657_v22 = vld [vmem:[%s9582_s0 + $0x73] sm:$0x2]   ;;  %v2120_v23 = vsel %vm198_vm5, %v4644_v1, %v2116_v18  ;;  %v2155_v18 = vsel %vm198_vm5, %v4653_v56, %v2151_v10  ;;  %v4697_v51 = vld [vmem:[%s9582_s0 + $0x177] sm:$0x20]  }
  0xa6   :  { %1950 = vrot.lane.b32.xlu0 %v1949_v40, %s5158_s6  ;;  %v4632_v8 = vld [vmem:[%s9582_s0 + $0x2c9] sm:$0x8]   ;;  %v2069_v19 = vsel %vm182_vm1, %v4631_v7, %v2065_v13  ;;  %v2170_v25 = vsel %vm178_vm0, %v4657_v22, %v4656_v21  ;;  %v4675_v63 = vld [vmem:[%s9582_s0 + $0x273] sm:$0x2]   ;;  %v4686_v62 = vld [vmem:[%s9582_s0 + $0xd9] sm:$0x8]  }
  0xa7   :  { %v4645_v12 = vld [vmem:[%s9582_s0 + $0x3e5] sm:$0x80]   ;;  %v2073_v24 = vsel %vm186_vm2, %v4632_v8, %v2069_v19  ;;  %v2174_v34 = vsel %vm182_vm1, %v4658_v28, %v2170_v25  ;;  %v4676_v0 = vld [vmem:[%s9582_s0 + $0x2b2] sm:$0x4]   ;;  %v2240_v6 = vsel %vm178_vm0, %v4675_v63, %v4674_v58  ;;  %v4684_v58 = vld [vmem:[%s9582_s0 + $0x5b] sm:$0x2]  }
  0xa8   :  { %v4633_v15 = vld [vmem:[%s9582_s0 + $0x308] sm:$0x10]   ;;  %v2124_v31 = vsel %vm202_vm6, %v4645_v12, %v2120_v23  ;;  %v2178_v40 = vsel %vm186_vm2, %v4659_v29, %v2174_v34  ;;  %v4677_v1 = vld [vmem:[%s9582_s0 + $0x2f1] sm:$0x8]   ;;  %v2244_v12 = vsel %vm182_vm1, %v4676_v0, %v2240_v6  ;;  %v4687_v4 = vld [vmem:[%s9582_s0 + $0x118] sm:$0x10]  }
  0xa9   :  { %v4634_v16 = vld [vmem:[%s9582_s0 + $0x347] sm:$0x20]   ;;  %v2077_v32 = vsel %vm190_vm3, %v4633_v15, %v2073_v24  ;;  %2125 = vrot.lane.b32.xlu1 %v2124_v31, %s5158_s6  ;;  %v2182_v46 = vsel %vm190_vm3, %v4660_v30, %v2178_v40  ;;  %v4654_v5 = vld [vmem:[%s9582_s0 + $0x1cd] sm:$0x80]   ;;  %v2248_v19 = vsel %vm186_vm2, %v4677_v1, %v2244_v12  ;;  %v4699_v1 = vld [vmem:[%s9582_s0 + $0x1f5] sm:$0x80]  }
  0xaa   :  { %2020 = vrot.lane.b32.xlu0 %v2019_v9, %s5158_s6  ;;  %v4635_v20 = vld [vmem:[%s9582_s0 + $0x386] sm:$0x40]   ;;  %v2081_v38 = vsel %vm194_vm4, %v4634_v16, %v2077_v32  ;;  %v2186_v53 = vsel %vm194_vm4, %v4661_v35, %v2182_v46  ;;  %v4678_v7 = vld [vmem:[%s9582_s0 + $0x330] sm:$0x10]   ;;  %v7068_v9 = vpop.permute.xlu0 %623   ;;  %v2159_v24 = vsel %vm202_vm6, %v4654_v5, %v2155_v18  ;;  %v4692_v35 = vld [vmem:[%s9582_s0 + $0x3c] sm:$0x1]  }
  0xab   :  { %v4636_v33 = vld [vmem:[%s9582_s0 + $0x3c5] sm:$0x80]   ;;  %v2085_v45 = vsel %vm198_vm5, %v4635_v20, %v2081_v38  ;;  %v2190_v61 = vsel %vm198_vm5, %v4662_v36, %v2186_v53  ;;  %v4679_v8 = vld [vmem:[%s9582_s0 + $0x36f] sm:$0x20]   ;;  %v2252_v25 = vsel %vm190_vm3, %v4678_v7, %v2248_v19  ;;  %v4693_v36 = vld [vmem:[%s9582_s0 + $0x7b] sm:$0x2]  }
  0xac   :  { %v2089_v52 = vsel %vm202_vm6, %v4636_v33, %v2085_v45  ;;  %v2194_v2 = vsel %vm202_vm6, %v4663_v48, %v2190_v61  ;;  %v4680_v13 = vld [vmem:[%s9582_s0 + $0x3ae] sm:$0x40]   ;;  %v2256_v33 = vsel %vm194_vm4, %v4679_v8, %v2252_v25  ;;  %v4694_v38 = vld [vmem:[%s9582_s0 + $0xba] sm:$0x4]   ;;  %v2310_v43 = vsel %vm178_vm0, %v4693_v36, %v4692_v35 }
  0xad   :  { %2195 = vrot.lane.b32.xlu1 %v2194_v2, %s5158_s6  ;;  %v4665_v15 = vld [vmem:[%s9582_s0 + $0x214] sm:$0x1]   ;;  %v2260_v40 = vsel %vm198_vm5, %v4680_v13, %v2256_v33  ;;  %v4695_v45 = vld [vmem:[%s9582_s0 + $0xf9] sm:$0x8]   ;;  %v2314_v50 = vsel %vm182_vm1, %v4694_v38, %v2310_v43 }
  0xae   :  { %2090 = vrot.lane.b32.xlu0 %v2089_v52, %s5158_s6  ;;  %v4666_v16 = vld [vmem:[%s9582_s0 + $0x253] sm:$0x2]   ;;  %v4696_v46 = vld [vmem:[%s9582_s0 + $0x138] sm:$0x10]   ;;  %v2318_v56 = vsel %vm186_vm2, %v4695_v45, %v2314_v50 }
  0xaf   :  { %v2205_v20 = vsel %vm178_vm0, %v4666_v16, %v4665_v15  ;;  %v4667_v21 = vld [vmem:[%s9582_s0 + $0x292] sm:$0x4]   ;;  %v7106_v32 = vpop.permute.xlu1 %728   ;;  %v4698_v52 = vld [vmem:[%s9582_s0 + $0x1b6] sm:$0x40]   ;;  %v2322_v0 = vsel %vm190_vm3, %v4696_v46, %v2318_v56 }
  0xb0   :  { %v4668_v22 = vld [vmem:[%s9582_s0 + $0x2d1] sm:$0x8]   ;;  %v2209_v29 = vsel %vm182_vm1, %v4667_v21, %v2205_v20  ;;  %v4683_v53 = vld [vmem:[%s9582_s0 + $0x1c] sm:$0x1]   ;;  %v2326_v7 = vsel %vm194_vm4, %v4697_v51, %v2322_v0 }
  0xb1   :  { %v4669_v23 = vld [vmem:[%s9582_s0 + $0x310] sm:$0x10]   ;;  %v2213_v34 = vsel %vm186_vm2, %v4668_v22, %v2209_v29  ;;  %v4685_v61 = vld [vmem:[%s9582_s0 + $0x9a] sm:$0x4]   ;;  %v2275_v2 = vsel %vm178_vm0, %v4684_v58, %v4683_v53  ;;  %v2330_v15 = vsel %vm198_vm5, %v4698_v52, %v2326_v7  ;;  %v4727_v52 = vld [vmem:[%s9582_s0 + $0x23] sm:$0x1]  }
  0xb2   :  { %v4681_v28 = vld [vmem:[%s9582_s0 + $0x3ed] sm:$0x80]   ;;  %2160 = vrot.lane.b32.xlu0 %v2159_v24, %s5158_s6  ;;  %v2217_v41 = vsel %vm190_vm3, %v4669_v23, %v2213_v34  ;;  %v4688_v5 = vld [vmem:[%s9582_s0 + $0x157] sm:$0x20]   ;;  %v2279_v8 = vsel %vm182_vm1, %v4685_v61, %v2275_v2  ;;  %v2334_v22 = vsel %vm202_vm6, %v4699_v1, %v2330_v15  ;;  %v4728_v58 = vld [vmem:[%s9582_s0 + $0x62] sm:$0x2]  }
  0xb3   :  { %v4670_v30 = vld [vmem:[%s9582_s0 + $0x34f] sm:$0x20]   ;;  %v2264_v48 = vsel %vm202_vm6, %v4681_v28, %v2260_v40  ;;  %v7144_v54 = vpop.permute.xlu0 %693   ;;  %v7170_v6 = vpop.permute.xlu1 %797   ;;  %v4689_v10 = vld [vmem:[%s9582_s0 + $0x196] sm:$0x40]   ;;  %v2283_v16 = vsel %vm186_vm2, %v4686_v62, %v2279_v8  ;;  %v4729_v61 = vld [vmem:[%s9582_s0 + $0xa1] sm:$0x4]   ;;  %v2449_v2 = vsel %vm178_vm0, %v4728_v58, %v4727_v52 }
  0xb4   :  { %v4671_v31 = vld [vmem:[%s9582_s0 + $0x38e] sm:$0x40]   ;;  %v2221_v49 = vsel %vm194_vm4, %v4670_v30, %v2217_v41  ;;  %2265 = vrot.lane.b32.xlu1 %v2264_v48, %s5158_s6  ;;  %v4710_v12 = vld [vmem:[%s9582_s0 + $0x23c] sm:$0x1]   ;;  %v2287_v23 = vsel %vm190_vm3, %v4687_v4, %v2283_v16  ;;  %v4730_v62 = vld [vmem:[%s9582_s0 + $0xe0] sm:$0x8]  }
  0xb5   :  { %v2225_v55 = vsel %vm198_vm5, %v4671_v31, %v2221_v49  ;;  %v4711_v13 = vld [vmem:[%s9582_s0 + $0x27b] sm:$0x2]   ;;  %v2291_v31 = vsel %vm194_vm4, %v4688_v5, %v2287_v23  ;;  %v4731_v4 = vld [vmem:[%s9582_s0 + $0x11f] sm:$0x10]  }
  0xb6   :  { %v2229_v63 = vsel %vm202_vm6, %v4672_v42, %v2225_v55  ;;  %v2380_v18 = vsel %vm178_vm0, %v4711_v13, %v4710_v12  ;;  %v4712_v19 = vld [vmem:[%s9582_s0 + $0x2ba] sm:$0x4]   ;;  %v2295_v38 = vsel %vm198_vm5, %v4689_v10, %v2291_v31  ;;  %v4732_v5 = vld [vmem:[%s9582_s0 + $0x15e] sm:$0x20]   ;;  %v2453_v10 = vsel %vm182_vm1, %v4729_v61, %v2449_v2 }
  0xb7   :  { %2230 = vrot.lane.b32.xlu0 %v2229_v63, %s5158_s6  ;;  %v4713_v20 = vld [vmem:[%s9582_s0 + $0x2f9] sm:$0x8]   ;;  %v2384_v25 = vsel %vm182_vm1, %v4712_v19, %v2380_v18  ;;  %v7208_v30 = vpop.permute.xlu0 %763   ;;  %v7246_v53 = vpop.permute.xlu1 %867   ;;  %v4733_v12 = vld [vmem:[%s9582_s0 + $0x19d] sm:$0x40]   ;;  %v2457_v18 = vsel %vm186_vm2, %v4730_v62, %v2453_v10 }
  0xb8   :  { %v4714_v21 = vld [vmem:[%s9582_s0 + $0x338] sm:$0x10]   ;;  %2335 = vrot.lane.b32.xlu1 %v2334_v22, %s5158_s6  ;;  %v2388_v33 = vsel %vm186_vm2, %v4713_v20, %v2384_v25  ;;  %v4719_v13 = vld [vmem:[%s9582_s0 + $0x3] sm:$0x1]  }
  0xb9   :  { %v4690_v24 = vld [vmem:[%s9582_s0 + $0x1d5] sm:$0x80]   ;;  %v2392_v40 = vsel %vm190_vm3, %v4714_v21, %v2388_v33  ;;  %v4720_v15 = vld [vmem:[%s9582_s0 + $0x42] sm:$0x2]  }
  0xba   :  { %v4715_v28 = vld [vmem:[%s9582_s0 + $0x377] sm:$0x20]   ;;  %v2299_v46 = vsel %vm202_vm6, %v4690_v24, %v2295_v38  ;;  %v2415_v19 = vsel %vm178_vm0, %v4720_v15, %v4719_v13  ;;  %v4721_v20 = vld [vmem:[%s9582_s0 + $0x81] sm:$0x4]   ;;  %v2461_v24 = vsel %vm190_vm3, %v4731_v4, %v2457_v18 }
  0xbb   :  { %v4716_v29 = vld [vmem:[%s9582_s0 + $0x3b6] sm:$0x40]   ;;  %v2396_v48 = vsel %vm194_vm4, %v4715_v28, %v2392_v40  ;;  %2300 = vrot.lane.b32.xlu0 %v2299_v46, %s5158_s6  ;;  %v7272_v7 = vpop.permute.xlu0 %832   ;;  %v4722_v21 = vld [vmem:[%s9582_s0 + $0xc0] sm:$0x8]   ;;  %v2419_v28 = vsel %vm182_vm1, %v4721_v20, %v2415_v19  ;;  %v7310_v33 = vpop.permute.xlu1 %937   ;;  %v4763_v19 = vld [vmem:[%s9582_s0 + $0x2b] sm:$0x1]  }
  0xbc   :  { %v4701_v34 = vld [vmem:[%s9582_s0 + $0x21c] sm:$0x1]   ;;  %v2400_v55 = vsel %vm198_vm5, %v4716_v29, %v2396_v48  ;;  %v4723_v22 = vld [vmem:[%s9582_s0 + $0xff] sm:$0x10]   ;;  %v4764_v20 = vld [vmem:[%s9582_s0 + $0x6a] sm:$0x2]  }
  0xbd   :  { %v4702_v35 = vld [vmem:[%s9582_s0 + $0x25b] sm:$0x2]   ;;  %v4734_v25 = vld [vmem:[%s9582_s0 + $0x1dc] sm:$0x80]  }
  0xbe   :  { %v4703_v36 = vld [vmem:[%s9582_s0 + $0x29a] sm:$0x4]   ;;  %v2345_v42 = vsel %vm178_vm0, %v4702_v35, %v4701_v34  ;;  %v4724_v29 = vld [vmem:[%s9582_s0 + $0x13e] sm:$0x20]   ;;  %v2465_v34 = vsel %vm194_vm4, %v4732_v5, %v2461_v24  ;;  %v2423_v35 = vsel %vm186_vm2, %v4722_v21, %v2419_v28  ;;  %v4765_v24 = vld [vmem:[%s9582_s0 + $0xa9] sm:$0x4]  }
  0xbf   :  { %v4717_v41 = vld [vmem:[%s9582_s0 + $0x3f5] sm:$0x80]   ;;  %v2349_v49 = vsel %vm182_vm1, %v4703_v36, %v2345_v42  ;;  %v4725_v31 = vld [vmem:[%s9582_s0 + $0x17d] sm:$0x40]   ;;  %v2427_v42 = vsel %vm190_vm3, %v4723_v22, %v2423_v35  ;;  %v7348_v58 = vpop.permute.xlu0 %902   ;;  %v7374_v13 = vpop.permute.xlu1 %1007   ;;  %v4767_v28 = vld [vmem:[%s9582_s0 + $0x127] sm:$0x10]  }
  0xc0   :  { %v4704_v43 = vld [vmem:[%s9582_s0 + $0x2d9] sm:$0x8]   ;;  %v2404_v63 = vsel %vm202_vm6, %v4717_v41, %v2400_v55  ;;  %v4745_v36 = vld [vmem:[%s9582_s0 + $0x223] sm:$0x1]   ;;  %v2469_v41 = vsel %vm198_vm5, %v4733_v12, %v2465_v34 }
  0xc1   :  { %v4705_v45 = vld [vmem:[%s9582_s0 + $0x318] sm:$0x10]   ;;  %v2353_v56 = vsel %vm186_vm2, %v4704_v43, %v2349_v49  ;;  %2405 = vrot.lane.b32.xlu1 %v2404_v63, %s5158_s6  ;;  %v4746_v38 = vld [vmem:[%s9582_s0 + $0x262] sm:$0x2]   ;;  %v2473_v49 = vsel %vm202_vm6, %v4734_v25, %v2469_v41  ;;  %v4766_v25 = vld [vmem:[%s9582_s0 + $0xe8] sm:$0x8]  }
  0xc2   :  { %v4706_v50 = vld [vmem:[%s9582_s0 + $0x357] sm:$0x20]   ;;  %v2357_v0 = vsel %vm190_vm3, %v4705_v45, %v2353_v56  ;;  %v4747_v40 = vld [vmem:[%s9582_s0 + $0x2a1] sm:$0x4]   ;;  %v2519_v45 = vsel %vm178_vm0, %v4746_v38, %v4745_v36  ;;  %v4768_v36 = vld [vmem:[%s9582_s0 + $0x166] sm:$0x20]  }
  0xc3   :  { %v4707_v51 = vld [vmem:[%s9582_s0 + $0x396] sm:$0x40]   ;;  %v2361_v8 = vsel %vm194_vm4, %v4706_v50, %v2357_v0  ;;  %v4726_v43 = vld [vmem:[%s9582_s0 + $0x1bc] sm:$0x80]   ;;  %v2431_v50 = vsel %vm194_vm4, %v4724_v29, %v2427_v42  ;;  %v4769_v38 = vld [vmem:[%s9582_s0 + $0x1a5] sm:$0x40]  }
  0xc4   :  { %v4708_v1 = vld [vmem:[%s9582_s0 + $0x3d5] sm:$0x80]   ;;  %v2365_v16 = vsel %vm198_vm5, %v4707_v51, %v2361_v8  ;;  %v4748_v46 = vld [vmem:[%s9582_s0 + $0x2e0] sm:$0x8]   ;;  %v2523_v51 = vsel %vm182_vm1, %v4747_v40, %v2519_v45  ;;  %v2435_v61 = vsel %vm198_vm5, %v4725_v31, %v2431_v50  ;;  %v7412_v40 = vpop.permute.xlu0 %972   ;;  %v4755_v45 = vld [vmem:[%s9582_s0 + $0x4a] sm:$0x2]  }
  0xc5   :  { %v2369_v23 = vsel %vm202_vm6, %v4708_v1, %v2365_v16  ;;  %v4749_v48 = vld [vmem:[%s9582_s0 + $0x31f] sm:$0x10]   ;;  %2474 = vrot.lane.b32.xlu1 %v2473_v49, %s5159_s12  ;;  %v2527_v62 = vsel %vm186_vm2, %v4748_v46, %v2523_v51  ;;  %v2439_v2 = vsel %vm202_vm6, %v4726_v43, %v2435_v61  ;;  %v4754_v43 = vld [vmem:[%s9582_s0 + $0xb] sm:$0x1]  }
  0xc6   :  { %2370 = vrot.lane.b32.xlu0 %v2369_v23, %s5158_s6  ;;  %v4750_v52 = vld [vmem:[%s9582_s0 + $0x35e] sm:$0x20]   ;;  %v2531_v4 = vsel %vm190_vm3, %v4749_v48, %v2527_v62  ;;  %v2589_v23 = vsel %vm178_vm0, %v4764_v20, %v4763_v19  ;;  %v4756_v46 = vld [vmem:[%s9582_s0 + $0x89] sm:$0x4]   ;;  %v2554_v51 = vsel %vm178_vm0, %v4755_v45, %v4754_v43 }
  0xc7   :  { %v4751_v55 = vld [vmem:[%s9582_s0 + $0x39d] sm:$0x40]   ;;  %v2535_v15 = vsel %vm194_vm4, %v4750_v52, %v2531_v4  ;;  %v2593_v35 = vsel %vm182_vm1, %v4765_v24, %v2589_v23  ;;  %v4770_v50 = vld [vmem:[%s9582_s0 + $0x1e4] sm:$0x80]   ;;  %v2558_v62 = vsel %vm182_vm1, %v4756_v46, %v2554_v51 }
  0xc8   :  { %v4736_v56 = vld [vmem:[%s9582_s0 + $0x203] sm:$0x1]   ;;  %v2539_v21 = vsel %vm198_vm5, %v4751_v55, %v2535_v15  ;;  %v2597_v42 = vsel %vm186_vm2, %v4766_v25, %v2593_v35  ;;  %v4757_v52 = vld [vmem:[%s9582_s0 + $0xc8] sm:$0x8]  }
  0xc9   :  { %v4737_v63 = vld [vmem:[%s9582_s0 + $0x242] sm:$0x2]   ;;  %v2601_v49 = vsel %vm190_vm3, %v4767_v28, %v2597_v42  ;;  %v4758_v55 = vld [vmem:[%s9582_s0 + $0x107] sm:$0x10]  }
  0xca   :  { %v4738_v0 = vld [vmem:[%s9582_s0 + $0x281] sm:$0x4]   ;;  %v2484_v8 = vsel %vm178_vm0, %v4737_v63, %v4736_v56  ;;  %2440 = vrot.lane.b32.xlu0 %v2439_v2, %s5159_s12  ;;  %v2605_v61 = vsel %vm194_vm4, %v4768_v36, %v2601_v49  ;;  %v4759_v63 = vld [vmem:[%s9582_s0 + $0x146] sm:$0x20]   ;;  %v7450_v2 = vpop.permute.xlu1 %1077  }
  0xcb   :  { %v4739_v1 = vld [vmem:[%s9582_s0 + $0x2c0] sm:$0x8]   ;;  %v2488_v16 = vsel %vm182_vm1, %v4738_v0, %v2484_v8  ;;  %v4760_v0 = vld [vmem:[%s9582_s0 + $0x185] sm:$0x40]   ;;  %v2609_v4 = vsel %vm198_vm5, %v4769_v38, %v2605_v61  ;;  %v4801_v61 = vld [vmem:[%s9582_s0 + $0xb1] sm:$0x4]  }
  0xcc   :  { %v4752_v5 = vld [vmem:[%s9582_s0 + $0x3dc] sm:$0x80]   ;;  %v2492_v22 = vsel %vm186_vm2, %v4739_v1, %v2488_v16  ;;  %v4781_v1 = vld [vmem:[%s9582_s0 + $0x22b] sm:$0x1]   ;;  %v2613_v15 = vsel %vm202_vm6, %v4770_v50, %v2609_v4  ;;  %v4802_v4 = vld [vmem:[%s9582_s0 + $0xf0] sm:$0x8]  }
  0xcd   :  { %v4740_v10 = vld [vmem:[%s9582_s0 + $0x2ff] sm:$0x10]   ;;  %v2543_v29 = vsel %vm202_vm6, %v4752_v5, %v2539_v21  ;;  %v2562_v5 = vsel %vm186_vm2, %v4757_v52, %v2558_v62  ;;  %v4782_v8 = vld [vmem:[%s9582_s0 + $0x26a] sm:$0x2]  }
  0xce   :  { %v4741_v12 = vld [vmem:[%s9582_s0 + $0x33e] sm:$0x20]   ;;  %v2496_v31 = vsel %vm190_vm3, %v4740_v10, %v2492_v22  ;;  %2544 = vrot.lane.b32.xlu1 %v2543_v29, %s5159_s12  ;;  %v4783_v10 = vld [vmem:[%s9582_s0 + $0x2a9] sm:$0x4]   ;;  %v2566_v16 = vsel %vm190_vm3, %v4758_v55, %v2562_v5  ;;  %v2659_v19 = vsel %vm178_vm0, %v4782_v8, %v4781_v1  ;;  %v7476_v22 = vpop.permute.xlu0 %1042   ;;  %v4799_v55 = vld [vmem:[%s9582_s0 + $0x33] sm:$0x1]  }
  0xcf   :  { %v4742_v18 = vld [vmem:[%s9582_s0 + $0x37d] sm:$0x40]   ;;  %v2500_v41 = vsel %vm194_vm4, %v4741_v12, %v2496_v31  ;;  %v4784_v12 = vld [vmem:[%s9582_s0 + $0x2e8] sm:$0x8]   ;;  %v2570_v23 = vsel %vm194_vm4, %v4759_v63, %v2566_v16  ;;  %v2663_v24 = vsel %vm182_vm1, %v4783_v10, %v2659_v19  ;;  %v4803_v5 = vld [vmem:[%s9582_s0 + $0x12f] sm:$0x10]  }
  0xd0   :  { %v4743_v34 = vld [vmem:[%s9582_s0 + $0x3bc] sm:$0x80]   ;;  %v2504_v48 = vsel %vm198_vm5, %v4742_v18, %v2500_v41  ;;  %v4761_v18 = vld [vmem:[%s9582_s0 + $0x1c4] sm:$0x80]   ;;  %v2574_v31 = vsel %vm198_vm5, %v4760_v0, %v2570_v23  ;;  %v7514_v50 = vpop.permute.xlu1 %1147   ;;  %v4805_v16 = vld [vmem:[%s9582_s0 + $0x1ad] sm:$0x40]  }
  0xd1   :  { %v2508_v56 = vsel %vm202_vm6, %v4743_v34, %v2504_v48  ;;  %v4785_v20 = vld [vmem:[%s9582_s0 + $0x327] sm:$0x10]   ;;  %v2667_v34 = vsel %vm186_vm2, %v4784_v12, %v2663_v24  ;;  %v2578_v42 = vsel %vm202_vm6, %v4761_v18, %v2574_v31  ;;  %v4790_v18 = vld [vmem:[%s9582_s0 + $0x13] sm:$0x1]  }
  0xd2   :  { %2509 = vrot.lane.b32.xlu0 %v2508_v56, %s5159_s12  ;;  %v4786_v21 = vld [vmem:[%s9582_s0 + $0x366] sm:$0x20]   ;;  %2614 = vrot.lane.b32.xlu1 %v2613_v15, %s5159_s12  ;;  %v2671_v43 = vsel %vm190_vm3, %v4785_v20, %v2667_v34  ;;  %v4800_v56 = vld [vmem:[%s9582_s0 + $0x72] sm:$0x2]  }
  0xd3   :  { %v4787_v25 = vld [vmem:[%s9582_s0 + $0x3a5] sm:$0x40]   ;;  %v2675_v51 = vsel %vm194_vm4, %v4786_v21, %v2671_v43  ;;  %v2729_v1 = vsel %vm178_vm0, %v4800_v56, %v4799_v55  ;;  %v4804_v15 = vld [vmem:[%s9582_s0 + $0x16e] sm:$0x20]  }
  0xd4   :  { %v4772_v28 = vld [vmem:[%s9582_s0 + $0x20b] sm:$0x1]   ;;  %v2679_v62 = vsel %vm198_vm5, %v4787_v25, %v2675_v51  ;;  %v2733_v12 = vsel %vm182_vm1, %v4801_v61, %v2729_v1  ;;  %v7552_v19 = vpop.permute.xlu0 %1112   ;;  %v4791_v23 = vld [vmem:[%s9582_s0 + $0x52] sm:$0x2]  }
  0xd5   :  { %v4773_v29 = vld [vmem:[%s9582_s0 + $0x24a] sm:$0x2]   ;;  %v2737_v21 = vsel %vm186_vm2, %v4802_v4, %v2733_v12  ;;  %v4792_v24 = vld [vmem:[%s9582_s0 + $0x91] sm:$0x4]   ;;  %v2694_v34 = vsel %vm178_vm0, %v4791_v23, %v4790_v18 }
  0xd6   :  { %v2624_v35 = vsel %vm178_vm0, %v4773_v29, %v4772_v28  ;;  %v4774_v36 = vld [vmem:[%s9582_s0 + $0x289] sm:$0x4]   ;;  %2579 = vrot.lane.b32.xlu0 %v2578_v42, %s5159_s12  ;;  %v4793_v25 = vld [vmem:[%s9582_s0 + $0xd0] sm:$0x8]   ;;  %v2741_v29 = vsel %vm190_vm3, %v4803_v5, %v2737_v21  ;;  %v2698_v42 = vsel %vm182_vm1, %v4792_v24, %v2694_v34 }
  0xd7   :  { %v4775_v38 = vld [vmem:[%s9582_s0 + $0x2c8] sm:$0x8]   ;;  %v2628_v46 = vsel %vm182_vm1, %v4774_v36, %v2624_v35  ;;  %v4806_v31 = vld [vmem:[%s9582_s0 + $0x1ec] sm:$0x80]  }
  0xd8   :  { %v4776_v41 = vld [vmem:[%s9582_s0 + $0x307] sm:$0x10]   ;;  %v2632_v52 = vsel %vm186_vm2, %v4775_v38, %v2628_v46  ;;  %v4794_v35 = vld [vmem:[%s9582_s0 + $0x10f] sm:$0x10]   ;;  %v7578_v38 = vpop.permute.xlu1 %1217   ;;  %v7602_v61 = vpop.permute.xlu0 %1182  }
  0xd9   :  { %v4788_v45 = vld [vmem:[%s9582_s0 + $0x3e4] sm:$0x80]   ;;  %v2636_v63 = vsel %vm190_vm3, %v4776_v41, %v2632_v52  ;;  %v4795_v36 = vld [vmem:[%s9582_s0 + $0x14e] sm:$0x20]   ;;  %v2745_v41 = vsel %vm194_vm4, %v4804_v15, %v2741_v29 }
  0xda   :  { %v4777_v48 = vld [vmem:[%s9582_s0 + $0x346] sm:$0x20]   ;;  %v2683_v8 = vsel %vm202_vm6, %v4788_v45, %v2679_v62  ;;  %v4796_v43 = vld [vmem:[%s9582_s0 + $0x18d] sm:$0x40]   ;;  %v2749_v46 = vsel %vm198_vm5, %v4805_v16, %v2745_v41 }
  0xdb   :  { %v4778_v49 = vld [vmem:[%s9582_s0 + $0x385] sm:$0x40]   ;;  %v2640_v10 = vsel %vm194_vm4, %v4777_v48, %v2636_v63  ;;  %2684 = vrot.lane.b32.xlu1 %v2683_v8, %s5159_s12  ;;  %v4797_v45 = vld [vmem:[%s9582_s0 + $0x1cc] sm:$0x80]   ;;  %v2702_v48 = vsel %vm186_vm2, %v4793_v25, %v2698_v42  ;;  %v2753_v51 = vsel %vm202_vm6, %v4806_v31, %v2749_v46 }
  0xdc   :  { %v4779_v0 = vld [vmem:[%s9582_s0 + $0x3c4] sm:$0x80]   ;;  %v2644_v20 = vsel %vm198_vm5, %v4778_v49, %v2640_v10  ;;  %v2_v49 = vld [vmem:[%s9582_s0] ss:$8 sm:$0xf]   ;;  %v2706_v52 = vsel %vm190_vm3, %v4794_v35, %v2702_v48  ;;  %v7648_v21 = vpop.permute.xlu1 %1287   ;;  %v7681_v34 = vpop.permute.xlu0 %1252  }
  0xdd   :  { %v2648_v28 = vsel %vm202_vm6, %v4779_v0, %v2644_v20  ;;  %v3_v55 = vld [vmem:[%s9582_s0] ss:$8 sm:$0xf0]   ;;  %v2710_v62 = vsel %vm194_vm4, %v4795_v36, %v2706_v52  ;;  %v4817_v20 = vld [vmem:[%s9582_s0 + $0x233] sm:$0x1]  }
  0xde   :  { %2649 = vrot.lane.b32.xlu0 %v2648_v28, %s5159_s12  ;;  %v4087_v56 = vld [vmem:[%s9582_s0 + $0x40] ss:$8 sm:$0xf]   ;;  %v5_v63 = vsel %vm4_vm7, %v3_v55, %v2_v49  ;;  %v2714_v4 = vsel %vm198_vm5, %v4796_v43, %v2710_v62  ;;  %v4819_v49 = vld [vmem:[%s9582_s0 + $0x2b1] sm:$0x4]  }
  0xdf   :  { %2754 = vrot.lane.b32.xlu1 %v2753_v51, %s5159_s12  ;;  %v4088_v0 = vld [vmem:[%s9582_s0 + $0x40] ss:$8 sm:$0xf0]   ;;  %8 = vst.msk [vmem:[%s9583_s1] ss:$8 sm:$0xf0] %vm6_vm8, %v5_v63   ;;  %v2718_v12 = vsel %vm202_vm6, %v4797_v45, %v2714_v4 }
  0xe0   :  { %v4091_v1 = vld [vmem:[%s9582_s0 + $0x80] ss:$8 sm:$0xf]   ;;  %v14_v5 = vsel %vm4_vm7, %v4088_v0, %v4087_v56  ;;  %7 = vst.msk [vmem:[%s9583_s1] ss:$8 sm:$0xf] %vm6_vm8, %v5_v63   ;;  %v1357_v55 = vpop.permute.xlu1 %1356  }
  0xe1   :  { %v4092_v8 = vld [vmem:[%s9582_s0 + $0x80] ss:$8 sm:$0xf0]   ;;  %4090 = vst.msk [vmem:[%s9583_s1 + $0x1] ss:$8 sm:$0xf0] %vm6_vm8, %v14_v5  }
  0xe2   :  { %v4095_v10 = vld [vmem:[%s9582_s0 + $0xc0] ss:$8 sm:$0xf]   ;;  %v25_v15 = vsel %vm4_vm7, %v4092_v8, %v4091_v1  ;;  %4089 = vst.msk [vmem:[%s9583_s1 + $0x1] ss:$8 sm:$0xf] %vm6_vm8, %v14_v5   ;;  %2719 = vrot.lane.b32.xlu0 %v2718_v12, %s5159_s12 }
  0xe3   :  { %v4096_v16 = vld [vmem:[%s9582_s0 + $0xc0] ss:$8 sm:$0xf0]   ;;  %4094 = vst.msk [vmem:[%s9583_s1 + $0x2] ss:$8 sm:$0xf0] %vm6_vm8, %v25_v15  }
  0xe4   :  { %v4099_v18 = vld [vmem:[%s9582_s0 + $0x100] ss:$8 sm:$0xf]   ;;  %v36_v23 = vsel %vm4_vm7, %v4096_v16, %v4095_v10  ;;  %4093 = vst.msk [vmem:[%s9583_s1 + $0x2] ss:$8 sm:$0xf] %vm6_vm8, %v25_v15   ;;  %v7875_v5 = vpop.permute.xlu1 %1426  }
  0xe5   :  { %v4100_v24 = vld [vmem:[%s9582_s0 + $0x100] ss:$8 sm:$0xf0]   ;;  %4098 = vst.msk [vmem:[%s9583_s1 + $0x3] ss:$8 sm:$0xf0] %vm6_vm8, %v36_v23  }
  0xe6   :  { %v4103_v25 = vld [vmem:[%s9582_s0 + $0x140] ss:$8 sm:$0xf]   ;;  %v47_v28 = vsel %vm4_vm7, %v4100_v24, %v4099_v18  ;;  %4097 = vst.msk [vmem:[%s9583_s1 + $0x3] ss:$8 sm:$0xf] %vm6_vm8, %v36_v23  }
  0xe7   :  { %v4104_v29 = vld [vmem:[%s9582_s0 + $0x140] ss:$8 sm:$0xf0]   ;;  %4102 = vst.msk [vmem:[%s9583_s1 + $0x4] ss:$8 sm:$0xf0] %vm6_vm8, %v47_v28  }
  0xe8   :  { %v4107_v31 = vld [vmem:[%s9582_s0 + $0x180] ss:$8 sm:$0xf]   ;;  %v58_v35 = vsel %vm4_vm7, %v4104_v29, %v4103_v25  ;;  %4101 = vst.msk [vmem:[%s9583_s1 + $0x4] ss:$8 sm:$0xf] %vm6_vm8, %v47_v28  }
  0xe9   :  { %v4108_v36 = vld [vmem:[%s9582_s0 + $0x180] ss:$8 sm:$0xf0]   ;;  %4106 = vst.msk [vmem:[%s9583_s1 + $0x5] ss:$8 sm:$0xf0] %vm6_vm8, %v58_v35  }
  0xea   :  { %v4111_v41 = vld [vmem:[%s9582_s0 + $0x1c0] ss:$8 sm:$0xf]   ;;  %v69_v42 = vsel %vm4_vm7, %v4108_v36, %v4107_v31  ;;  %4105 = vst.msk [vmem:[%s9583_s1 + $0x5] ss:$8 sm:$0xf] %vm6_vm8, %v58_v35  }
  0xeb   :  { %v4112_v43 = vld [vmem:[%s9582_s0 + $0x1c0] ss:$8 sm:$0xf0]   ;;  %v4818_v45 = vld [vmem:[%s9582_s0 + $0x272] sm:$0x2]  }
  0xec   :  { %4110 = vst.msk [vmem:[%s9583_s1 + $0x6] ss:$8 sm:$0xf0] %vm6_vm8, %v69_v42   ;;  %v80_v46 = vsel %vm4_vm7, %v4112_v43, %v4111_v41  ;;  %4109 = vst.msk [vmem:[%s9583_s1 + $0x6] ss:$8 sm:$0xf] %vm6_vm8, %v69_v42   ;;  %v2799_v48 = vsel %vm178_vm0, %v4818_v45, %v4817_v20 }
  0xed   :  { %v4820_v51 = vld [vmem:[%s9582_s0 + $0x2f0] sm:$0x8]   ;;  %4114 = vst.msk [vmem:[%s9583_s1 + $0x7] ss:$8 sm:$0xf0] %vm6_vm8, %v80_v46   ;;  %v2803_v56 = vsel %vm182_vm1, %v4819_v49, %v2799_v48 }
  0xee   :  { %v4821_v52 = vld [vmem:[%s9582_s0 + $0x32f] sm:$0x10]   ;;  %4113 = vst.msk [vmem:[%s9583_s1 + $0x7] ss:$8 sm:$0xf] %vm6_vm8, %v80_v46  }
  0xef   :  { %v4822_v62 = vld [vmem:[%s9582_s0 + $0x36e] sm:$0x20]   ;;  %4163 = vst.msk [vmem:[%s9583_s1 + $0x20] sm:$0xff] %vm206_vm9, %v6737_v27   ;;  %4199 = vst.msk [vmem:[%s9583_s1 + $0x28] sm:$0xff] %vm206_vm9, %v6762_v39   ;;  %v4835_v45 = vld [vmem:[%s9582_s0 + $0x3b] sm:$0x1]  }
  0xf0   :  { %v4823_v63 = vld [vmem:[%s9582_s0 + $0x3ad] sm:$0x40]   ;;  %4235 = vst.msk [vmem:[%s9583_s1 + $0x30] sm:$0xff] %vm206_vm9, %v6902_v47   ;;  %4271 = vst.msk [vmem:[%s9583_s1 + $0x38] sm:$0xff] %vm206_vm9, %v7042_v60  }
  0xf1   :  { %207 = vst.msk [vmem:[%s9583_s1] sm:$0xff] %vm206_vm9, %v6664_v57   ;;  %4190 = vst.msk [vmem:[%s9583_s1 + $0x8] sm:$0xff] %vm206_vm9, %v6800_v59   ;;  %v2807_v57 = vsel %vm186_vm2, %v4820_v51, %v2803_v56  ;;  %v4808_v27 = vld [vmem:[%s9582_s0 + $0x213] sm:$0x1]   ;;  %v1497_v56 = vpop.permute.xlu1 %1496  }
  0xf2   :  { %4226 = vst.msk [vmem:[%s9583_s1 + $0x10] sm:$0xff] %vm206_vm9, %v6940_v3   ;;  %4262 = vst.msk [vmem:[%s9583_s1 + $0x18] sm:$0xff] %vm206_vm9, %v7068_v9   ;;  %v4809_v39 = vld [vmem:[%s9582_s0 + $0x252] sm:$0x2]   ;;  %v2811_v47 = vsel %vm190_vm3, %v4821_v52, %v2807_v57 }
  0xf3   :  { %v4810_v59 = vld [vmem:[%s9582_s0 + $0x291] sm:$0x4]   ;;  %4306 = vst.msk [vmem:[%s9583_s1 + $0x20] sm:$0xff] %vm765_vm10, %v7170_v6   ;;  %766 = vst.msk [vmem:[%s9583_s1] sm:$0xff] %vm765_vm10, %v7208_v30   ;;  %v2764_v60 = vsel %vm178_vm0, %v4809_v39, %v4808_v27  ;;  %v1323_v30 = vpop.permute.xlu0 %1322   ;;  %v4836_v39 = vld [vmem:[%s9582_s0 + $0x7a] sm:$0x2]  }
  0xf4   :  { %v4824_v3 = vld [vmem:[%s9582_s0 + $0x3ec] sm:$0x80]   ;;  %4342 = vst.msk [vmem:[%s9583_s1 + $0x28] sm:$0xff] %vm765_vm10, %v7310_v33   ;;  %4333 = vst.msk [vmem:[%s9583_s1 + $0x8] sm:$0xff] %vm765_vm10, %v7348_v58   ;;  %v2815_v33 = vsel %vm194_vm4, %v4822_v62, %v2811_v47  ;;  %v2768_v58 = vsel %vm182_vm1, %v4810_v59, %v2764_v60  ;;  %v4837_v59 = vld [vmem:[%s9582_s0 + $0xb9] sm:$0x4]   ;;  %v2869_v60 = vsel %vm178_vm0, %v4836_v39, %v4835_v45 }
  0xf5   :  { %v4811_v9 = vld [vmem:[%s9582_s0 + $0x2d0] sm:$0x8]   ;;  %4378 = vst.msk [vmem:[%s9583_s1 + $0x30] sm:$0xff] %vm765_vm10, %v7450_v2   ;;  %4369 = vst.msk [vmem:[%s9583_s1 + $0x10] sm:$0xff] %vm765_vm10, %v7476_v22   ;;  %v4838_v47 = vld [vmem:[%s9582_s0 + $0xf8] sm:$0x8]  }
  0xf6   :  { %v4812_v6 = vld [vmem:[%s9582_s0 + $0x30f] sm:$0x10]   ;;  %4414 = vst.msk [vmem:[%s9583_s1 + $0x38] sm:$0xff] %vm765_vm10, %v7578_v38   ;;  %4405 = vst.msk [vmem:[%s9583_s1 + $0x18] sm:$0xff] %vm765_vm10, %v7602_v61   ;;  %v2819_v61 = vsel %vm198_vm5, %v4823_v63, %v2815_v33  ;;  %v2772_v0 = vsel %vm186_vm2, %v4811_v9, %v2768_v58  ;;  %v4839_v9 = vld [vmem:[%s9582_s0 + $0x137] sm:$0x10]  }
  0xf7   :  { %v4813_v2 = vld [vmem:[%s9582_s0 + $0x34e] sm:$0x20]   ;;  %4449 = vst.msk [vmem:[%s9583_s1 + $0x20] sm:$0xff] %vm1324_vm11, %v1357_v55   ;;  %1325 = vst.msk [vmem:[%s9583_s1] sm:$0xff] %vm1324_vm11, %v1323_v30   ;;  %v2823_v8 = vsel %vm202_vm6, %v4824_v3, %v2819_v61  ;;  %v2776_v10 = vsel %vm190_vm3, %v4812_v6, %v2772_v0  ;;  %v7919_v35 = vpop.permute.xlu0 %1391   ;;  %v4840_v6 = vld [vmem:[%s9582_s0 + $0x176] sm:$0x20]  }
  0xf8   :  { %v4814_v22 = vld [vmem:[%s9582_s0 + $0x38d] sm:$0x40]   ;;  %v4115_v1 = vld [vmem:[%s9582_s0 + $0x200] ss:$8 sm:$0xf]   ;;  %2824 = vrot.lane.b32.xlu1 %v2823_v8, %s5159_s12  ;;  %v2780_v18 = vsel %vm194_vm4, %v4813_v2, %v2776_v10  ;;  %4485 = vst.msk [vmem:[%s9583_s1 + $0x28] sm:$0xff] %vm1324_vm11, %v1497_v56  }
  0xf9   :  { %v4815_v38 = vld [vmem:[%s9582_s0 + $0x3cc] sm:$0x80]   ;;  %v4116_v4 = vld [vmem:[%s9582_s0 + $0x200] ss:$8 sm:$0xf0]   ;;  %v2784_v25 = vsel %vm198_vm5, %v4814_v22, %v2780_v18 }
  0xfa   :  { %v91_v12 = vsel %vm4_vm7, %v4116_v4, %v4115_v1  ;;  %v4119_v15 = vld [vmem:[%s9582_s0 + $0x240] ss:$8 sm:$0xf]   ;;  %v2788_v36 = vsel %vm202_vm6, %v4815_v38, %v2784_v25  ;;  %v4841_v30 = vld [vmem:[%s9582_s0 + $0x1b5] sm:$0x40]  }
  0xfb   :  { %v4120_v16 = vld [vmem:[%s9582_s0 + $0x240] ss:$8 sm:$0xf0]   ;;  %4118 = vst.msk [vmem:[%s9583_s1 + $0x40] ss:$8 sm:$0xf0] %vm6_vm8, %v91_v12   ;;  %2789 = vrot.lane.b32.xlu0 %v2788_v36, %s5159_s12  ;;  %v1462_v3 = vpop.permute.xlu0 %1461  }
  0xfc   :  { %v102_v20 = vsel %vm4_vm7, %v4120_v16, %v4119_v15  ;;  %v4123_v23 = vld [vmem:[%s9582_s0 + $0x280] ss:$8 sm:$0xf]   ;;  %4117 = vst.msk [vmem:[%s9583_s1 + $0x40] ss:$8 sm:$0xf] %vm6_vm8, %v91_v12  }
  0xfd   :  { %v4124_v24 = vld [vmem:[%s9582_s0 + $0x280] ss:$8 sm:$0xf0]   ;;  %4122 = vst.msk [vmem:[%s9583_s1 + $0x41] ss:$8 sm:$0xf0] %vm6_vm8, %v102_v20  }
  0xfe   :  { %v113_v28 = vsel %vm4_vm7, %v4124_v24, %v4123_v23  ;;  %v4127_v29 = vld [vmem:[%s9582_s0 + $0x2c0] ss:$8 sm:$0xf]   ;;  %4121 = vst.msk [vmem:[%s9583_s1 + $0x41] ss:$8 sm:$0xf] %vm6_vm8, %v102_v20  }
  0xff   :  { %v4128_v31 = vld [vmem:[%s9582_s0 + $0x2c0] ss:$8 sm:$0xf0]   ;;  %4126 = vst.msk [vmem:[%s9583_s1 + $0x42] ss:$8 sm:$0xf0] %vm6_vm8, %v113_v28   ;;  %v1532_v8 = vpop.permute.xlu0 %1531  }
 0x100   :  { %v124_v41 = vsel %vm4_vm7, %v4128_v31, %v4127_v29  ;;  %v4131_v42 = vld [vmem:[%s9582_s0 + $0x300] ss:$8 sm:$0xf]   ;;  %4125 = vst.msk [vmem:[%s9583_s1 + $0x42] ss:$8 sm:$0xf] %vm6_vm8, %v113_v28  }
 0x101   :  { %v4132_v43 = vld [vmem:[%s9582_s0 + $0x300] ss:$8 sm:$0xf0]   ;;  %4130 = vst.msk [vmem:[%s9583_s1 + $0x43] ss:$8 sm:$0xf0] %vm6_vm8, %v124_v41  }
 0x102   :  { %v135_v46 = vsel %vm4_vm7, %v4132_v43, %v4131_v42  ;;  %v4135_v48 = vld [vmem:[%s9582_s0 + $0x340] ss:$8 sm:$0xf]   ;;  %4129 = vst.msk [vmem:[%s9583_s1 + $0x43] ss:$8 sm:$0xf] %vm6_vm8, %v124_v41  }
 0x103   :  { %v4136_v49 = vld [vmem:[%s9582_s0 + $0x340] ss:$8 sm:$0xf0]   ;;  %4134 = vst.msk [vmem:[%s9583_s1 + $0x44] ss:$8 sm:$0xf0] %vm6_vm8, %v135_v46   ;;  %v1602_v39 = vpop.permute.xlu0 %1601  }
 0x104   :  { %v146_v51 = vsel %vm4_vm7, %v4136_v49, %v4135_v48  ;;  %v4139_v52 = vld [vmem:[%s9582_s0 + $0x380] ss:$8 sm:$0xf]   ;;  %4133 = vst.msk [vmem:[%s9583_s1 + $0x44] ss:$8 sm:$0xf] %vm6_vm8, %v135_v46  }
 0x105   :  { %v4140_v55 = vld [vmem:[%s9582_s0 + $0x380] ss:$8 sm:$0xf0]   ;;  %4138 = vst.msk [vmem:[%s9583_s1 + $0x45] ss:$8 sm:$0xf0] %vm6_vm8, %v146_v51  }
 0x106   :  { %v157_v62 = vsel %vm4_vm7, %v4140_v55, %v4139_v52  ;;  %v4143_v63 = vld [vmem:[%s9582_s0 + $0x3c0] ss:$8 sm:$0xf]   ;;  %4137 = vst.msk [vmem:[%s9583_s1 + $0x45] ss:$8 sm:$0xf] %vm6_vm8, %v146_v51  }
 0x107   :  { %v4144_v57 = vld [vmem:[%s9582_s0 + $0x3c0] ss:$8 sm:$0xf0]   ;;  %4142 = vst.msk [vmem:[%s9583_s1 + $0x46] ss:$8 sm:$0xf0] %vm6_vm8, %v157_v62  }
 0x108   :  { %v168_v27 = vsel %vm4_vm7, %v4144_v57, %v4143_v63  ;;  %4141 = vst.msk [vmem:[%s9583_s1 + $0x46] ss:$8 sm:$0xf] %vm6_vm8, %v157_v62   ;;  %v4853_v58 = vld [vmem:[%s9582_s0 + $0x23b] sm:$0x1]  }
 0x109   :  { %4146 = vst.msk [vmem:[%s9583_s1 + $0x47] ss:$8 sm:$0xf0] %vm6_vm8, %v168_v27   ;;  %4145 = vst.msk [vmem:[%s9583_s1 + $0x47] ss:$8 sm:$0xf] %vm6_vm8, %v168_v27  }
 0x10a   :  { %4476 = vst.msk [vmem:[%s9583_s1 + $0x8] sm:$0xff] %vm1324_vm11, %v1462_v3   ;;  %v4854_v2 = vld [vmem:[%s9582_s0 + $0x27a] sm:$0x2]   ;;  %v4870_v51 = vld [vmem:[%s9582_s0 + $0x22] sm:$0x1]   ;;  %4512 = vst.msk [vmem:[%s9583_s1 + $0x10] sm:$0xff] %vm1324_vm11, %v1602_v39  }
 0x10b   :  { %4181 = vst.msk [vmem:[%s9583_s1 + $0x60] sm:$0xff] %vm206_vm9, %v6702_v11   ;;  %4217 = vst.msk [vmem:[%s9583_s1 + $0x68] sm:$0xff] %vm206_vm9, %v6838_v14   ;;  %v4842_v11 = vld [vmem:[%s9582_s0 + $0x1f4] sm:$0x80]   ;;  %v2939_v0 = vsel %vm178_vm0, %v4854_v2, %v4853_v58  ;;  %v4871_v52 = vld [vmem:[%s9582_s0 + $0x61] sm:$0x2]  }
 0x10c   :  { %4253 = vst.msk [vmem:[%s9583_s1 + $0x70] sm:$0xff] %vm206_vm9, %v6966_v17   ;;  %4289 = vst.msk [vmem:[%s9583_s1 + $0x78] sm:$0xff] %vm206_vm9, %v7106_v32   ;;  %v4826_v14 = vld [vmem:[%s9582_s0 + $0x1b] sm:$0x1]   ;;  %v3008_v62 = vsel %vm178_vm0, %v4871_v52, %v4870_v51  ;;  %v4872_v63 = vld [vmem:[%s9582_s0 + $0xa0] sm:$0x4]  }
 0x10d   :  { %4172 = vst.msk [vmem:[%s9583_s1 + $0x40] sm:$0xff] %vm206_vm9, %v6638_v44   ;;  %4208 = vst.msk [vmem:[%s9583_s1 + $0x48] sm:$0xff] %vm206_vm9, %v6864_v26   ;;  %v2873_v44 = vsel %vm182_vm1, %v4837_v59, %v2869_v60  ;;  %v4827_v26 = vld [vmem:[%s9582_s0 + $0x5a] sm:$0x2]   ;;  %v4873_v57 = vld [vmem:[%s9582_s0 + $0xdf] sm:$0x8]   ;;  %v3012_v3 = vsel %vm182_vm1, %v4872_v63, %v3008_v62 }
 0x10e   :  { %4244 = vst.msk [vmem:[%s9583_s1 + $0x50] sm:$0xff] %vm206_vm9, %v7004_v37   ;;  %4280 = vst.msk [vmem:[%s9583_s1 + $0x58] sm:$0xff] %vm206_vm9, %v7144_v54   ;;  %v2877_v17 = vsel %vm186_vm2, %v4838_v47, %v2873_v44  ;;  %v2834_v37 = vsel %vm178_vm0, %v4827_v26, %v4826_v14  ;;  %v4828_v32 = vld [vmem:[%s9582_s0 + $0x99] sm:$0x4]   ;;  %v4874_v27 = vld [vmem:[%s9582_s0 + $0x11e] sm:$0x10]   ;;  %v3016_v44 = vsel %vm186_vm2, %v4873_v57, %v3012_v3 }
 0x10f   :  { %4324 = vst.msk [vmem:[%s9583_s1 + $0x60] sm:$0xff] %vm765_vm10, %v7246_v53   ;;  %4315 = vst.msk [vmem:[%s9583_s1 + $0x40] sm:$0xff] %vm765_vm10, %v7272_v7   ;;  %v4829_v54 = vld [vmem:[%s9582_s0 + $0xd8] sm:$0x8]   ;;  %v1567_v7 = vpop.permute.xlu1 %1566   ;;  %v4875_v60 = vld [vmem:[%s9582_s0 + $0x15d] sm:$0x20]  }
 0x110   :  { %v4830_v53 = vld [vmem:[%s9582_s0 + $0x117] sm:$0x10]   ;;  %4360 = vst.msk [vmem:[%s9583_s1 + $0x68] sm:$0xff] %vm765_vm10, %v7374_v13   ;;  %4351 = vst.msk [vmem:[%s9583_s1 + $0x48] sm:$0xff] %vm765_vm10, %v7412_v40   ;;  %v2881_v13 = vsel %vm190_vm3, %v4839_v9, %v2877_v17  ;;  %v2838_v40 = vsel %vm182_vm1, %v4828_v32, %v2834_v37  ;;  %v4876_v9 = vld [vmem:[%s9582_s0 + $0x19c] sm:$0x40]   ;;  %v3020_v37 = vsel %vm190_vm3, %v4874_v27, %v3016_v44 }
 0x111   :  { %4396 = vst.msk [vmem:[%s9583_s1 + $0x70] sm:$0xff] %vm765_vm10, %v7514_v50   ;;  %4387 = vst.msk [vmem:[%s9583_s1 + $0x50] sm:$0xff] %vm765_vm10, %v7552_v19   ;;  %v4831_v50 = vld [vmem:[%s9582_s0 + $0x156] sm:$0x20]   ;;  %v2842_v33 = vsel %vm186_vm2, %v4829_v54, %v2838_v40  ;;  %v4863_v14 = vld [vmem:[%s9582_s0 + $0x41] sm:$0x2]  }
 0x112   :  { %4432 = vst.msk [vmem:[%s9583_s1 + $0x78] sm:$0xff] %vm765_vm10, %v7648_v21   ;;  %4423 = vst.msk [vmem:[%s9583_s1 + $0x58] sm:$0xff] %vm765_vm10, %v7681_v34   ;;  %v4832_v19 = vld [vmem:[%s9582_s0 + $0x195] sm:$0x40]   ;;  %v2885_v34 = vsel %vm194_vm4, %v4840_v6, %v2881_v13  ;;  %v2846_v61 = vsel %vm190_vm3, %v4830_v53, %v2842_v33  ;;  %v4877_v6 = vld [vmem:[%s9582_s0 + $0x1db] sm:$0x80]  }
 0x113   :  { %v4833_v21 = vld [vmem:[%s9582_s0 + $0x1d4] sm:$0x80]   ;;  %4467 = vst.msk [vmem:[%s9583_s1 + $0x60] sm:$0xff] %vm1324_vm11, %v7875_v5   ;;  %4458 = vst.msk [vmem:[%s9583_s1 + $0x40] sm:$0xff] %vm1324_vm11, %v7919_v35   ;;  %v2889_v38 = vsel %vm198_vm5, %v4841_v30, %v2885_v34  ;;  %v2850_v12 = vsel %vm194_vm4, %v4831_v50, %v2846_v61  ;;  %v1637_v31 = vpop.permute.xlu1 %1636   ;;  %v4864_v26 = vld [vmem:[%s9582_s0 + $0x80] sm:$0x4]   ;;  %v3024_v50 = vsel %vm194_vm4, %v4875_v60, %v3020_v37 }
 0x114   :  { %4503 = vst.msk [vmem:[%s9583_s1 + $0x68] sm:$0xff] %vm1324_vm11, %v1567_v7   ;;  %v4855_v22 = vld [vmem:[%s9582_s0 + $0x2b9] sm:$0x4]   ;;  %v2893_v10 = vsel %vm202_vm6, %v4842_v11, %v2889_v38  ;;  %4494 = vst.msk [vmem:[%s9583_s1 + $0x48] sm:$0xff] %vm1324_vm11, %v1532_v8   ;;  %v2854_v23 = vsel %vm198_vm5, %v4832_v19, %v2850_v12  ;;  %v4862_v11 = vld [vmem:[%s9582_s0 + $0x2] sm:$0x1]   ;;  %v3028_v58 = vsel %vm198_vm5, %v4876_v9, %v3024_v50 }
 0x115   :  { %v4856_v1 = vld [vmem:[%s9582_s0 + $0x2f8] sm:$0x8]   ;;  %v2943_v15 = vsel %vm182_vm1, %v4855_v22, %v2939_v0  ;;  %2894 = vrot.lane.b32.xlu1 %v2893_v10, %s5159_s12  ;;  %v2858_v35 = vsel %vm202_vm6, %v4833_v21, %v2854_v23  ;;  %4521 = vst.msk [vmem:[%s9583_s1 + $0x30] sm:$0xff] %vm1324_vm11, %v1637_v31   ;;  %v2974_v32 = vsel %vm178_vm0, %v4863_v14, %v4862_v11  ;;  %v4865_v54 = vld [vmem:[%s9582_s0 + $0xbf] sm:$0x8]   ;;  %v1672_v0 = vpop.permute.xlu0 %1671  }
 0x116   :  { %v4857_v4 = vld [vmem:[%s9582_s0 + $0x337] sm:$0x10]   ;;  %v2947_v24 = vsel %vm186_vm2, %v4856_v1, %v2943_v15  ;;  %2859 = vrot.lane.b32.xlu0 %v2858_v35, %s5159_s12  ;;  %v4866_v53 = vld [vmem:[%s9582_s0 + $0xfe] sm:$0x10]   ;;  %v2978_v19 = vsel %vm182_vm1, %v4864_v26, %v2974_v32  ;;  %v3032_v1 = vsel %vm202_vm6, %v4877_v6, %v3028_v58  ;;  %4530 = vst.msk [vmem:[%s9583_s1 + $0x50] sm:$0xff] %vm1324_vm11, %v1672_v0  }
 0x117   :  { %v4858_v5 = vld [vmem:[%s9582_s0 + $0x376] sm:$0x20]   ;;  %v2951_v36 = vsel %vm190_vm3, %v4857_v4, %v2947_v24  ;;  %v4867_v7 = vld [vmem:[%s9582_s0 + $0x13d] sm:$0x20]   ;;  %v1707_v13 = vpop.permute.xlu1 %1706   ;;  %v2982_v2 = vsel %vm186_vm2, %v4865_v54, %v2978_v19  ;;  %v4906_v52 = vld [vmem:[%s9582_s0 + $0x2a] sm:$0x1]  }
 0x118   :  { %v4859_v16 = vld [vmem:[%s9582_s0 + $0x3b5] sm:$0x40]   ;;  %v2955_v46 = vsel %vm194_vm4, %v4858_v5, %v2951_v36  ;;  %v4868_v21 = vld [vmem:[%s9582_s0 + $0x17c] sm:$0x40]   ;;  %4539 = vst.msk [vmem:[%s9583_s1 + $0x70] sm:$0xff] %vm1324_vm11, %v1707_v13   ;;  %v2986_v4 = vsel %vm190_vm3, %v4866_v53, %v2982_v2 }
 0x119   :  { %v4860_v18 = vld [vmem:[%s9582_s0 + $0x3f4] sm:$0x80]   ;;  %v2959_v55 = vsel %vm198_vm5, %v4859_v16, %v2955_v46  ;;  %v4869_v34 = vld [vmem:[%s9582_s0 + $0x1bb] sm:$0x80]   ;;  %v2990_v15 = vsel %vm194_vm4, %v4867_v7, %v2986_v4  ;;  %v4909_v27 = vld [vmem:[%s9582_s0 + $0xe7] sm:$0x8]  }
 0x11a   :  { %v4844_v20 = vld [vmem:[%s9582_s0 + $0x21b] sm:$0x1]   ;;  %v2963_v59 = vsel %vm202_vm6, %v4860_v18, %v2959_v55  ;;  %v4888_v33 = vld [vmem:[%s9582_s0 + $0x222] sm:$0x1]   ;;  %v2994_v24 = vsel %vm198_vm5, %v4868_v21, %v2990_v15  ;;  %v4907_v55 = vld [vmem:[%s9582_s0 + $0x69] sm:$0x2]  }
 0x11b   :  { %v4845_v25 = vld [vmem:[%s9582_s0 + $0x25a] sm:$0x2]   ;;  %2964 = vrot.lane.b32.xlu1 %v2963_v59, %s5159_s12  ;;  %v4889_v22 = vld [vmem:[%s9582_s0 + $0x261] sm:$0x2]   ;;  %v1777_v36 = vpop.permute.xlu1 %1776   ;;  %v3148_v57 = vsel %vm178_vm0, %v4907_v55, %v4906_v52  ;;  %v4910_v39 = vld [vmem:[%s9582_s0 + $0x126] sm:$0x10]  }
 0x11c   :  { %v4846_v28 = vld [vmem:[%s9582_s0 + $0x299] sm:$0x4]   ;;  %v2904_v41 = vsel %vm178_vm0, %v4845_v25, %v4844_v20  ;;  %v4890_v38 = vld [vmem:[%s9582_s0 + $0x2a0] sm:$0x4]   ;;  %v3078_v5 = vsel %vm178_vm0, %v4889_v22, %v4888_v33  ;;  %4557 = vst.msk [vmem:[%s9583_s1 + $0x38] sm:$0xff] %vm1324_vm11, %v1777_v36  }
 0x11d   :  { %v4847_v29 = vld [vmem:[%s9582_s0 + $0x2d8] sm:$0x8]   ;;  %v2908_v48 = vsel %vm182_vm1, %v4846_v28, %v2904_v41  ;;  %v4891_v61 = vld [vmem:[%s9582_s0 + $0x2df] sm:$0x8]   ;;  %v3082_v16 = vsel %vm182_vm1, %v4890_v38, %v3078_v5  ;;  %v2998_v41 = vsel %vm202_vm6, %v4869_v34, %v2994_v24  ;;  %v4911_v59 = vld [vmem:[%s9582_s0 + $0x165] sm:$0x20]  }
 0x11e   :  { %v4848_v42 = vld [vmem:[%s9582_s0 + $0x317] sm:$0x10]   ;;  %v2912_v56 = vsel %vm186_vm2, %v4847_v29, %v2908_v48  ;;  %v4892_v8 = vld [vmem:[%s9582_s0 + $0x31e] sm:$0x10]   ;;  %v3086_v25 = vsel %vm186_vm2, %v4891_v61, %v3082_v16  ;;  %v4912_v6 = vld [vmem:[%s9582_s0 + $0x1a4] sm:$0x40]  }
 0x11f   :  { %v4849_v43 = vld [vmem:[%s9582_s0 + $0x356] sm:$0x20]   ;;  %v2916_v47 = vsel %vm190_vm3, %v4848_v42, %v2912_v56  ;;  %v4893_v10 = vld [vmem:[%s9582_s0 + $0x35d] sm:$0x20]   ;;  %3033 = vrot.lane.b32.xlu1 %v3032_v1, %s5160_s4  ;;  %v3090_v42 = vsel %vm190_vm3, %v4892_v8, %v3086_v25  ;;  %v4908_v56 = vld [vmem:[%s9582_s0 + $0xa8] sm:$0x4]   ;;  %v1847_v32 = vpop.permute.xlu1 %1846  }
 0x120   :  { %v4850_v45 = vld [vmem:[%s9582_s0 + $0x395] sm:$0x40]   ;;  %v2920_v30 = vsel %vm194_vm4, %v4849_v43, %v2916_v47  ;;  %v4894_v12 = vld [vmem:[%s9582_s0 + $0x39c] sm:$0x40]   ;;  %v1742_v47 = vpop.permute.xlu0 %1741   ;;  %v3152_v9 = vsel %vm182_vm1, %v4908_v56, %v3148_v57  ;;  %v4897_v44 = vld [vmem:[%s9582_s0 + $0xa] sm:$0x1]  }
 0x121   :  { %v4851_v49 = vld [vmem:[%s9582_s0 + $0x3d4] sm:$0x80]   ;;  %v2924_v17 = vsel %vm198_vm5, %v4850_v45, %v2920_v30  ;;  %v4895_v18 = vld [vmem:[%s9582_s0 + $0x3db] sm:$0x80]   ;;  %v4913_v30 = vld [vmem:[%s9582_s0 + $0x1e3] sm:$0x80]   ;;  %v3156_v14 = vsel %vm186_vm2, %v4909_v27, %v3152_v9 }
 0x122   :  { %v2928_v40 = vsel %vm202_vm6, %v4851_v49, %v2924_v17  ;;  %v4879_v20 = vld [vmem:[%s9582_s0 + $0x202] sm:$0x1]   ;;  %v3094_v49 = vsel %vm194_vm4, %v4893_v10, %v3090_v42  ;;  %4548 = vst.msk [vmem:[%s9583_s1 + $0x18] sm:$0xff] %vm1324_vm11, %v1742_v47   ;;  %v4898_v26 = vld [vmem:[%s9582_s0 + $0x49] sm:$0x2]   ;;  %v3160_v53 = vsel %vm190_vm3, %v4910_v39, %v3156_v14  ;;  %4575 = vst.msk [vmem:[%s9583_s1 + $0x78] sm:$0xff] %vm1324_vm11, %v1847_v32  }
 0x123   :  { %2929 = vrot.lane.b32.xlu0 %v2928_v40, %s5159_s12  ;;  %v4880_v23 = vld [vmem:[%s9582_s0 + $0x241] sm:$0x2]   ;;  %v3098_v62 = vsel %vm198_vm5, %v4894_v12, %v3094_v49  ;;  %v4899_v17 = vld [vmem:[%s9582_s0 + $0x88] sm:$0x4]   ;;  %v3113_v7 = vsel %vm178_vm0, %v4898_v26, %v4897_v44  ;;  %v3164_v19 = vsel %vm194_vm4, %v4911_v59, %v3160_v53  ;;  %v8503_v42 = vpop.permute.xlu1 %1915   ;;  %v4943_v56 = vld [vmem:[%s9582_s0 + $0x71] sm:$0x2]  }
 0x124   :  { %v3043_v28 = vsel %vm178_vm0, %v4880_v23, %v4879_v20  ;;  %v4881_v29 = vld [vmem:[%s9582_s0 + $0x280] sm:$0x4]   ;;  %v3102_v3 = vsel %vm202_vm6, %v4895_v18, %v3098_v62  ;;  %v4900_v37 = vld [vmem:[%s9582_s0 + $0xc7] sm:$0x8]   ;;  %v3117_v21 = vsel %vm182_vm1, %v4899_v17, %v3113_v7  ;;  %v3168_v2 = vsel %vm198_vm5, %v4912_v6, %v3164_v19  ;;  %v1812_v4 = vpop.permute.xlu0 %1811   ;;  %v4944_v62 = vld [vmem:[%s9582_s0 + $0xb0] sm:$0x4]  }
 0x125   :  { %v4882_v31 = vld [vmem:[%s9582_s0 + $0x2bf] sm:$0x8]   ;;  %v3047_v43 = vsel %vm182_vm1, %v4881_v29, %v3043_v28  ;;  %3103 = vrot.lane.b32.xlu1 %v3102_v3, %s5160_s4  ;;  %v4901_v13 = vld [vmem:[%s9582_s0 + $0x106] sm:$0x10]   ;;  %v3121_v22 = vsel %vm186_vm2, %v4900_v37, %v3117_v21  ;;  %v3172_v5 = vsel %vm202_vm6, %v4913_v30, %v3168_v2  ;;  %4566 = vst.msk [vmem:[%s9583_s1 + $0x58] sm:$0xff] %vm1324_vm11, %v1812_v4  }
 0x126   :  { %v4883_v35 = vld [vmem:[%s9582_s0 + $0x2fe] sm:$0x10]   ;;  %v3051_v51 = vsel %vm186_vm2, %v4882_v31, %v3047_v43  ;;  %v4902_v40 = vld [vmem:[%s9582_s0 + $0x145] sm:$0x20]   ;;  %v3125_v8 = vsel %vm190_vm3, %v4901_v13, %v3121_v22  ;;  %v4946_v59 = vld [vmem:[%s9582_s0 + $0x12e] sm:$0x10]  }
 0x127   :  { %v4884_v45 = vld [vmem:[%s9582_s0 + $0x33d] sm:$0x20]   ;;  %2999 = vrot.lane.b32.xlu0 %v2998_v41, %s5160_s4  ;;  %v3055_v63 = vsel %vm190_vm3, %v4883_v35, %v3051_v51  ;;  %v4903_v50 = vld [vmem:[%s9582_s0 + $0x184] sm:$0x40]   ;;  %v3129_v18 = vsel %vm194_vm4, %v4902_v40, %v3125_v8  ;;  %v4942_v51 = vld [vmem:[%s9582_s0 + $0x32] sm:$0x1]   ;;  %v8567_v53 = vpop.permute.xlu1 %1985  }
 0x128   :  { %v4885_v46 = vld [vmem:[%s9582_s0 + $0x37c] sm:$0x40]   ;;  %v3059_v60 = vsel %vm194_vm4, %v4884_v45, %v3055_v63  ;;  %v4904_v34 = vld [vmem:[%s9582_s0 + $0x1c3] sm:$0x80]   ;;  %v3133_v28 = vsel %vm198_vm5, %v4903_v50, %v3129_v18  ;;  %v4945_v63 = vld [vmem:[%s9582_s0 + $0xef] sm:$0x8]   ;;  %v3288_v39 = vsel %vm178_vm0, %v4943_v56, %v4942_v51 }
 0x129   :  { %v4886_v48 = vld [vmem:[%s9582_s0 + $0x3bb] sm:$0x80]   ;;  %v3063_v11 = vsel %vm198_vm5, %v4885_v46, %v3059_v60  ;;  %v4924_v33 = vld [vmem:[%s9582_s0 + $0x22a] sm:$0x1]   ;;  %3173 = vrot.lane.b32.xlu1 %v3172_v5, %s5160_s4  ;;  %v3137_v43 = vsel %vm202_vm6, %v4904_v34, %v3133_v28  ;;  %v4947_v47 = vld [vmem:[%s9582_s0 + $0x16d] sm:$0x20]   ;;  %v8541_v60 = vpop.permute.xlu0 %1881   ;;  %v3292_v6 = vsel %vm182_vm1, %v4944_v62, %v3288_v39 }
 0x12a   :  { %v3067_v54 = vsel %vm202_vm6, %v4886_v48, %v3063_v11  ;;  %v4925_v58 = vld [vmem:[%s9582_s0 + $0x269] sm:$0x2]   ;;  %v4948_v3 = vld [vmem:[%s9582_s0 + $0x1ac] sm:$0x40]   ;;  %v3296_v26 = vsel %vm186_vm2, %v4945_v63, %v3292_v6  ;;  %v4982_v39 = vld [vmem:[%s9582_s0 + $0x136] sm:$0x10]  }
 0x12b   :  { %3068 = vrot.lane.b32.xlu0 %v3067_v54, %s5160_s4  ;;  %v3218_v38 = vsel %vm178_vm0, %v4925_v58, %v4924_v33  ;;  %v4926_v61 = vld [vmem:[%s9582_s0 + $0x2a8] sm:$0x4]   ;;  %v4949_v30 = vld [vmem:[%s9582_s0 + $0x1eb] sm:$0x80]   ;;  %v3300_v13 = vsel %vm190_vm3, %v4946_v59, %v3296_v26  ;;  %v4983_v6 = vld [vmem:[%s9582_s0 + $0x175] sm:$0x20]  }
 0x12c   :  { %v4927_v0 = vld [vmem:[%s9582_s0 + $0x2e7] sm:$0x8]   ;;  %v3222_v10 = vsel %vm182_vm1, %v4926_v61, %v3218_v38  ;;  %v4933_v44 = vld [vmem:[%s9582_s0 + $0x12] sm:$0x1]   ;;  %v3304_v34 = vsel %vm194_vm4, %v4947_v47, %v3300_v13  ;;  %v4969_v26 = vld [vmem:[%s9582_s0 + $0x1a] sm:$0x1]  }
 0x12d   :  { %v4928_v1 = vld [vmem:[%s9582_s0 + $0x326] sm:$0x10]   ;;  %v3226_v20 = vsel %vm186_vm2, %v4927_v0, %v3222_v10  ;;  %v4934_v11 = vld [vmem:[%s9582_s0 + $0x51] sm:$0x2]   ;;  %v3308_v38 = vsel %vm198_vm5, %v4948_v3, %v3304_v34  ;;  %v8605_v8 = vpop.permute.xlu0 %1950   ;;  %v4972_v13 = vld [vmem:[%s9582_s0 + $0xd7] sm:$0x8]  }
 0x12e   :  { %v4929_v12 = vld [vmem:[%s9582_s0 + $0x365] sm:$0x20]   ;;  %v3230_v29 = vsel %vm190_vm3, %v4928_v1, %v3226_v20  ;;  %v3253_v17 = vsel %vm178_vm0, %v4934_v11, %v4933_v44  ;;  %v4935_v37 = vld [vmem:[%s9582_s0 + $0x90] sm:$0x4]   ;;  %v3312_v10 = vsel %vm202_vm6, %v4949_v30, %v3308_v38  ;;  %v4984_v30 = vld [vmem:[%s9582_s0 + $0x1b4] sm:$0x40]  }
 0x12f   :  { %v4930_v15 = vld [vmem:[%s9582_s0 + $0x3a4] sm:$0x40]   ;;  %v3234_v45 = vsel %vm194_vm4, %v4929_v12, %v3230_v29  ;;  %3138 = vrot.lane.b32.xlu0 %v3137_v43, %s5160_s4  ;;  %v4936_v32 = vld [vmem:[%s9582_s0 + $0xcf] sm:$0x8]   ;;  %v3257_v40 = vsel %vm182_vm1, %v4935_v37, %v3253_v17  ;;  %v4985_v44 = vld [vmem:[%s9582_s0 + $0x1f3] sm:$0x80]  }
 0x130   :  { %v4931_v16 = vld [vmem:[%s9582_s0 + $0x3e3] sm:$0x80]   ;;  %v3238_v52 = vsel %vm198_vm5, %v4930_v15, %v3234_v45  ;;  %v4937_v54 = vld [vmem:[%s9582_s0 + $0x10e] sm:$0x10]   ;;  %v3261_v33 = vsel %vm186_vm2, %v4936_v32, %v3257_v40  ;;  %v4970_v17 = vld [vmem:[%s9582_s0 + $0x59] sm:$0x2]  }
 0x131   :  { %v4915_v23 = vld [vmem:[%s9582_s0 + $0x20a] sm:$0x1]   ;;  %v3242_v57 = vsel %vm202_vm6, %v4931_v16, %v3238_v52  ;;  %v4938_v50 = vld [vmem:[%s9582_s0 + $0x14d] sm:$0x20]   ;;  %v3265_v61 = vsel %vm190_vm3, %v4937_v54, %v3261_v33  ;;  %v4978_v52 = vld [vmem:[%s9582_s0 + $0x3a] sm:$0x1]   ;;  %v8669_v59 = vpop.permute.xlu0 %2020  }
 0x132   :  { %v4916_v24 = vld [vmem:[%s9582_s0 + $0x249] sm:$0x2]   ;;  %3243 = vrot.lane.b32.xlu1 %v3242_v57, %s5160_s4  ;;  %v4939_v19 = vld [vmem:[%s9582_s0 + $0x18c] sm:$0x40]   ;;  %v3269_v12 = vsel %vm194_vm4, %v4938_v50, %v3265_v61  ;;  %v4980_v57 = vld [vmem:[%s9582_s0 + $0xb8] sm:$0x4]  }
 0x133   :  { %v4917_v25 = vld [vmem:[%s9582_s0 + $0x288] sm:$0x4]   ;;  %v3183_v31 = vsel %vm178_vm0, %v4916_v24, %v4915_v23  ;;  %v4940_v21 = vld [vmem:[%s9582_s0 + $0x1cb] sm:$0x80]   ;;  %v3273_v23 = vsel %vm198_vm5, %v4939_v19, %v3269_v12  ;;  %v4971_v37 = vld [vmem:[%s9582_s0 + $0x98] sm:$0x4]  }
 0x134   :  { %v4918_v35 = vld [vmem:[%s9582_s0 + $0x2c7] sm:$0x8]   ;;  %v3187_v46 = vsel %vm182_vm1, %v4917_v25, %v3183_v31  ;;  %v4960_v58 = vld [vmem:[%s9582_s0 + $0x232] sm:$0x1]   ;;  %v3277_v31 = vsel %vm202_vm6, %v4940_v21, %v3273_v23  ;;  %v4973_v40 = vld [vmem:[%s9582_s0 + $0x116] sm:$0x10]  }
 0x135   :  { %v4919_v36 = vld [vmem:[%s9582_s0 + $0x306] sm:$0x10]   ;;  %v3191_v55 = vsel %vm186_vm2, %v4918_v35, %v3187_v46  ;;  %v4961_v2 = vld [vmem:[%s9582_s0 + $0x271] sm:$0x2]   ;;  %v8643_v46 = vpop.permute.xlu1 %2055   ;;  %v4974_v50 = vld [vmem:[%s9582_s0 + $0x155] sm:$0x20]  }
 0x136   :  { %v4920_v41 = vld [vmem:[%s9582_s0 + $0x345] sm:$0x20]   ;;  %v3195_v27 = vsel %vm190_vm3, %v4919_v36, %v3191_v55  ;;  %v4962_v22 = vld [vmem:[%s9582_s0 + $0x2b0] sm:$0x4]   ;;  %v3358_v0 = vsel %vm178_vm0, %v4961_v2, %v4960_v58  ;;  %3313 = vrot.lane.b32.xlu1 %v3312_v10, %s5160_s4  ;;  %v4979_v55 = vld [vmem:[%s9582_s0 + $0x79] sm:$0x2]  }
 0x137   :  { %v4921_v48 = vld [vmem:[%s9582_s0 + $0x384] sm:$0x40]   ;;  %v3199_v9 = vsel %vm194_vm4, %v4920_v41, %v3195_v27  ;;  %v4963_v1 = vld [vmem:[%s9582_s0 + $0x2ef] sm:$0x8]   ;;  %v3362_v15 = vsel %vm182_vm1, %v4962_v22, %v3358_v0  ;;  %v3428_v63 = vsel %vm178_vm0, %v4979_v55, %v4978_v52  ;;  %v4981_v27 = vld [vmem:[%s9582_s0 + $0xf7] sm:$0x8]  }
 0x138   :  { %v4922_v49 = vld [vmem:[%s9582_s0 + $0x3c3] sm:$0x80]   ;;  %v3203_v14 = vsel %vm198_vm5, %v4921_v48, %v3199_v9  ;;  %v4964_v4 = vld [vmem:[%s9582_s0 + $0x32e] sm:$0x10]   ;;  %v3366_v24 = vsel %vm186_vm2, %v4963_v1, %v3362_v15  ;;  %v3432_v9 = vsel %vm182_vm1, %v4980_v57, %v3428_v63  ;;  %v4975_v58 = vld [vmem:[%s9582_s0 + $0x194] sm:$0x40]  }
 0x139   :  { %v3207_v7 = vsel %vm202_vm6, %v4922_v49, %v3203_v14  ;;  %v4965_v5 = vld [vmem:[%s9582_s0 + $0x36d] sm:$0x20]   ;;  %v3370_v35 = vsel %vm190_vm3, %v4964_v4, %v3366_v24  ;;  %v3436_v14 = vsel %vm186_vm2, %v4981_v27, %v3432_v9  ;;  %v2126_v19 = vpop.permute.xlu1 %2125   ;;  %v4976_v2 = vld [vmem:[%s9582_s0 + $0x1d3] sm:$0x80]   ;;  %v5013_v27 = vld [vmem:[%s9582_s0 + $0x21] sm:$0x1]  }
 0x13a   :  { %3208 = vrot.lane.b32.xlu0 %v3207_v7, %s5160_s4  ;;  %v4966_v16 = vld [vmem:[%s9582_s0 + $0x3ac] sm:$0x40]   ;;  %v3374_v48 = vsel %vm194_vm4, %v4965_v5, %v3370_v35  ;;  %v3440_v54 = vsel %vm190_vm3, %v4982_v39, %v3436_v14  ;;  %v3393_v7 = vsel %vm178_vm0, %v4970_v17, %v4969_v26  ;;  %v4996_v22 = vld [vmem:[%s9582_s0 + $0x23a] sm:$0x1]   ;;  %v5014_v39 = vld [vmem:[%s9582_s0 + $0x60] sm:$0x2]  }
 0x13b   :  { %v4967_v18 = vld [vmem:[%s9582_s0 + $0x3eb] sm:$0x80]   ;;  %v3378_v56 = vsel %vm198_vm5, %v4966_v16, %v3374_v48  ;;  %v3444_v34 = vsel %vm194_vm4, %v4983_v6, %v3440_v54  ;;  %v3397_v33 = vsel %vm182_vm1, %v4971_v37, %v3393_v7  ;;  %v4997_v0 = vld [vmem:[%s9582_s0 + $0x279] sm:$0x2]   ;;  %v3567_v9 = vsel %vm178_vm0, %v5014_v39, %v5013_v27  ;;  %v5015_v6 = vld [vmem:[%s9582_s0 + $0x9f] sm:$0x4]  }
 0x13c   :  { %v4951_v20 = vld [vmem:[%s9582_s0 + $0x212] sm:$0x1]   ;;  %v3382_v47 = vsel %vm202_vm6, %v4967_v18, %v3378_v56  ;;  %v3448_v38 = vsel %vm198_vm5, %v4984_v30, %v3444_v34  ;;  %v3401_v61 = vsel %vm186_vm2, %v4972_v13, %v3397_v33  ;;  %v4998_v1 = vld [vmem:[%s9582_s0 + $0x2b8] sm:$0x4]   ;;  %v3498_v12 = vsel %vm178_vm0, %v4997_v0, %v4996_v22  ;;  %v5016_v30 = vld [vmem:[%s9582_s0 + $0xde] sm:$0x8]  }
 0x13d   :  { %v4952_v25 = vld [vmem:[%s9582_s0 + $0x251] sm:$0x2]   ;;  %3383 = vrot.lane.b32.xlu1 %v3382_v47, %s5160_s4  ;;  %v4999_v4 = vld [vmem:[%s9582_s0 + $0x2f7] sm:$0x8]   ;;  %v3452_v5 = vsel %vm202_vm6, %v4985_v44, %v3448_v38  ;;  %v3405_v10 = vsel %vm190_vm3, %v4973_v40, %v3401_v61  ;;  %v3502_v24 = vsel %vm182_vm1, %v4998_v1, %v3498_v12  ;;  %v2196_v48 = vpop.permute.xlu1 %2195   ;;  %v5017_v44 = vld [vmem:[%s9582_s0 + $0x11d] sm:$0x10]  }
 0x13e   :  { %v4953_v28 = vld [vmem:[%s9582_s0 + $0x290] sm:$0x4]   ;;  %v3323_v36 = vsel %vm178_vm0, %v4952_v25, %v4951_v20  ;;  %3278 = vrot.lane.b32.xlu0 %v3277_v31, %s5160_s4  ;;  %v5000_v15 = vld [vmem:[%s9582_s0 + $0x336] sm:$0x10]   ;;  %v2091_v20 = vpop.permute.xlu0 %2090   ;;  %v3409_v23 = vsel %vm194_vm4, %v4974_v50, %v3405_v10  ;;  %v3506_v35 = vsel %vm186_vm2, %v4999_v4, %v3502_v24  ;;  %4592 = vst.msk [vmem:[%s9583_s1 + $0x20] sm:$0xff] %vm1883_vm12, %v8503_v42  }
 0x13f   :  { %v4954_v29 = vld [vmem:[%s9582_s0 + $0x2cf] sm:$0x8]   ;;  %v3327_v49 = vsel %vm182_vm1, %v4953_v28, %v3323_v36  ;;  %v5001_v16 = vld [vmem:[%s9582_s0 + $0x375] sm:$0x20]   ;;  %v3413_v31 = vsel %vm198_vm5, %v4975_v58, %v3409_v23  ;;  %1884 = vst.msk [vmem:[%s9583_s1] sm:$0xff] %vm1883_vm12, %v8541_v60   ;;  %4610 = vst.msk [vmem:[%s9583_s1 + $0x60] sm:$0xff] %vm1883_vm12, %v8567_v53  }
 0x140   :  { %v4955_v41 = vld [vmem:[%s9582_s0 + $0x30e] sm:$0x10]   ;;  %v3331_v62 = vsel %vm186_vm2, %v4954_v29, %v3327_v49  ;;  %v5002_v18 = vld [vmem:[%s9582_s0 + $0x3b4] sm:$0x40]   ;;  %v3417_v49 = vsel %vm202_vm6, %v4976_v2, %v3413_v31  ;;  %4601 = vst.msk [vmem:[%s9583_s1 + $0x40] sm:$0xff] %vm1883_vm12, %v8605_v8   ;;  %4628 = vst.msk [vmem:[%s9583_s1 + $0x28] sm:$0xff] %vm1883_vm12, %v8643_v46   ;;  %v3571_v8 = vsel %vm182_vm1, %v5015_v6, %v3567_v9 }
 0x141   :  { %v4956_v43 = vld [vmem:[%s9582_s0 + $0x34d] sm:$0x20]   ;;  %v3335_v3 = vsel %vm190_vm3, %v4955_v41, %v3331_v62  ;;  %3453 = vrot.lane.b32.xlu1 %v3452_v5, %s5160_s4  ;;  %v5003_v25 = vld [vmem:[%s9582_s0 + $0x3f3] sm:$0x80]   ;;  %4619 = vst.msk [vmem:[%s9583_s1 + $0x8] sm:$0xff] %vm1883_vm12, %v8669_v59   ;;  %v3575_v14 = vsel %vm186_vm2, %v5016_v30, %v3571_v8 }
 0x142   :  { %v4957_v45 = vld [vmem:[%s9582_s0 + $0x38c] sm:$0x40]   ;;  %v3339_v11 = vsel %vm194_vm4, %v4956_v43, %v3335_v3  ;;  %v4987_v28 = vld [vmem:[%s9582_s0 + $0x21a] sm:$0x1]   ;;  %4646 = vst.msk [vmem:[%s9583_s1 + $0x68] sm:$0xff] %vm1883_vm12, %v2126_v19   ;;  %4637 = vst.msk [vmem:[%s9583_s1 + $0x48] sm:$0xff] %vm1883_vm12, %v2091_v20   ;;  %v2161_v42 = vpop.permute.xlu0 %2160   ;;  %v3579_v54 = vsel %vm190_vm3, %v5017_v44, %v3575_v14  ;;  %v2266_v19 = vpop.permute.xlu1 %2265  }
 0x143   :  { %v4958_v51 = vld [vmem:[%s9582_s0 + $0x3cb] sm:$0x80]   ;;  %v3343_v32 = vsel %vm198_vm5, %v4957_v45, %v3339_v11  ;;  %v4988_v29 = vld [vmem:[%s9582_s0 + $0x259] sm:$0x2]   ;;  %4664 = vst.msk [vmem:[%s9583_s1 + $0x30] sm:$0xff] %vm1883_vm12, %v2196_v48   ;;  %4655 = vst.msk [vmem:[%s9583_s1 + $0x10] sm:$0xff] %vm1883_vm12, %v2161_v42  }
 0x144   :  { %v3347_v21 = vsel %vm202_vm6, %v4958_v51, %v3343_v32  ;;  %v3463_v36 = vsel %vm178_vm0, %v4988_v29, %v4987_v28  ;;  %v4989_v41 = vld [vmem:[%s9582_s0 + $0x298] sm:$0x4]   ;;  %v3510_v51 = vsel %vm190_vm3, %v5000_v15, %v3506_v35  ;;  %v5018_v46 = vld [vmem:[%s9582_s0 + $0x15c] sm:$0x20]   ;;  %4682 = vst.msk [vmem:[%s9583_s1 + $0x70] sm:$0xff] %vm1883_vm12, %v2266_v19  }
 0x145   :  { %3348 = vrot.lane.b32.xlu0 %v3347_v21, %s5160_s4  ;;  %v4990_v43 = vld [vmem:[%s9582_s0 + $0x2d7] sm:$0x8]   ;;  %v3467_v52 = vsel %vm182_vm1, %v4989_v41, %v3463_v36  ;;  %v3514_v63 = vsel %vm194_vm4, %v5001_v16, %v3510_v51  ;;  %v5019_v59 = vld [vmem:[%s9582_s0 + $0x19b] sm:$0x40]   ;;  %v3583_v21 = vsel %vm194_vm4, %v5018_v46, %v3579_v54  ;;  %v5050_v27 = vld [vmem:[%s9582_s0 + $0x68] sm:$0x2]  }
 0x146   :  { %v4991_v45 = vld [vmem:[%s9582_s0 + $0x316] sm:$0x10]   ;;  %v3471_v57 = vsel %vm186_vm2, %v4990_v43, %v3467_v52  ;;  %v3518_v47 = vsel %vm198_vm5, %v5002_v18, %v3514_v63  ;;  %v5005_v26 = vld [vmem:[%s9582_s0 + $0x1] sm:$0x1]   ;;  %v3587_v22 = vsel %vm198_vm5, %v5019_v59, %v3583_v21  ;;  %v2231_v4 = vpop.permute.xlu0 %2230   ;;  %v5051_v39 = vld [vmem:[%s9582_s0 + $0xa7] sm:$0x4]  }
 0x147   :  { %v4992_v55 = vld [vmem:[%s9582_s0 + $0x355] sm:$0x20]   ;;  %v3475_v3 = vsel %vm190_vm3, %v4991_v45, %v3471_v57  ;;  %v3522_v60 = vsel %vm202_vm6, %v5003_v25, %v3518_v47  ;;  %v5006_v17 = vld [vmem:[%s9582_s0 + $0x40] sm:$0x2]   ;;  %4673 = vst.msk [vmem:[%s9583_s1 + $0x50] sm:$0xff] %vm1883_vm12, %v2231_v4   ;;  %v2336_v45 = vpop.permute.xlu1 %2335  }
 0x148   :  { %v4993_v56 = vld [vmem:[%s9582_s0 + $0x394] sm:$0x40]   ;;  %v3479_v53 = vsel %vm194_vm4, %v4992_v55, %v3475_v3  ;;  %3523 = vrot.lane.b32.xlu1 %v3522_v60, %s5160_s4  ;;  %v5007_v37 = vld [vmem:[%s9582_s0 + $0x7f] sm:$0x4]   ;;  %v3533_v13 = vsel %vm178_vm0, %v5006_v17, %v5005_v26  ;;  %4700 = vst.msk [vmem:[%s9583_s1 + $0x38] sm:$0xff] %vm1883_vm12, %v2336_v45  }
 0x149   :  { %v4994_v62 = vld [vmem:[%s9582_s0 + $0x3d3] sm:$0x80]   ;;  %3418 = vrot.lane.b32.xlu0 %v3417_v49, %s5160_s4  ;;  %v3483_v11 = vsel %vm198_vm5, %v4993_v56, %v3479_v53  ;;  %v5020_v7 = vld [vmem:[%s9582_s0 + $0x1da] sm:$0x80]   ;;  %v3537_v34 = vsel %vm182_vm1, %v5007_v37, %v3533_v13  ;;  %v5049_v57 = vld [vmem:[%s9582_s0 + $0x29] sm:$0x1]  }
 0x14a   :  { %v3487_v32 = vsel %vm202_vm6, %v4994_v62, %v3483_v11  ;;  %v5008_v40 = vld [vmem:[%s9582_s0 + $0xbe] sm:$0x8]   ;;  %v3591_v5 = vsel %vm202_vm6, %v5020_v7, %v3587_v22  ;;  %v3707_v6 = vsel %vm178_vm0, %v5050_v27, %v5049_v57  ;;  %v5052_v30 = vld [vmem:[%s9582_s0 + $0xe6] sm:$0x8]   ;;  %v2301_v42 = vpop.permute.xlu0 %2300  }
 0x14b   :  { %v5009_v50 = vld [vmem:[%s9582_s0 + $0xfd] sm:$0x10]   ;;  %v3541_v38 = vsel %vm186_vm2, %v5008_v40, %v3537_v34  ;;  %v5053_v44 = vld [vmem:[%s9582_s0 + $0x125] sm:$0x10]   ;;  %v3711_v8 = vsel %vm182_vm1, %v5051_v39, %v3707_v6  ;;  %4691 = vst.msk [vmem:[%s9583_s1 + $0x18] sm:$0xff] %vm1883_vm12, %v2301_v42   ;;  %v2406_v54 = vpop.permute.xlu1 %2405  }
 0x14c   :  { %v5010_v33 = vld [vmem:[%s9582_s0 + $0x13c] sm:$0x20]   ;;  %v3545_v10 = vsel %vm190_vm3, %v5009_v50, %v3541_v38  ;;  %3592 = vrot.lane.b32.xlu1 %v3591_v5, %s5161_s11  ;;  %v5054_v46 = vld [vmem:[%s9582_s0 + $0x164] sm:$0x20]   ;;  %v3715_v26 = vsel %vm186_vm2, %v5052_v30, %v3711_v8  ;;  %4718 = vst.msk [vmem:[%s9583_s1 + $0x78] sm:$0xff] %vm1883_vm12, %v2406_v54  }
 0x14d   :  { %3488 = vrot.lane.b32.xlu0 %v3487_v32, %s5160_s4  ;;  %v5011_v58 = vld [vmem:[%s9582_s0 + $0x17b] sm:$0x40]   ;;  %v3549_v20 = vsel %vm194_vm4, %v5010_v33, %v3545_v10  ;;  %v5055_v59 = vld [vmem:[%s9582_s0 + $0x1a3] sm:$0x40]   ;;  %v3719_v13 = vsel %vm190_vm3, %v5053_v44, %v3715_v26  ;;  %v5086_v39 = vld [vmem:[%s9582_s0 + $0x70] sm:$0x2]  }
 0x14e   :  { %v5031_v2 = vld [vmem:[%s9582_s0 + $0x221] sm:$0x1]   ;;  %v3553_v29 = vsel %vm198_vm5, %v5011_v58, %v3549_v20  ;;  %v5040_v11 = vld [vmem:[%s9582_s0 + $0x9] sm:$0x1]   ;;  %v3723_v34 = vsel %vm194_vm4, %v5054_v46, %v3719_v13  ;;  %v2371_v10 = vpop.permute.xlu0 %2370   ;;  %v5079_v54 = vld [vmem:[%s9582_s0 + $0xce] sm:$0x8]  }
 0x14f   :  { %v5032_v61 = vld [vmem:[%s9582_s0 + $0x260] sm:$0x2]   ;;  %v5041_v17 = vld [vmem:[%s9582_s0 + $0x48] sm:$0x2]   ;;  %v3727_v38 = vsel %vm198_vm5, %v5055_v59, %v3723_v34  ;;  %4709 = vst.msk [vmem:[%s9583_s1 + $0x58] sm:$0xff] %vm1883_vm12, %v2371_v10  }
 0x150   :  { %v5033_v0 = vld [vmem:[%s9582_s0 + $0x29f] sm:$0x4]   ;;  %v3637_v15 = vsel %vm178_vm0, %v5032_v61, %v5031_v2  ;;  %v5042_v37 = vld [vmem:[%s9582_s0 + $0x87] sm:$0x4]   ;;  %v3672_v50 = vsel %vm178_vm0, %v5041_v17, %v5040_v11  ;;  %v5091_v59 = vld [vmem:[%s9582_s0 + $0x1ab] sm:$0x40]  }
 0x151   :  { %v5034_v1 = vld [vmem:[%s9582_s0 + $0x2de] sm:$0x8]   ;;  %v3641_v23 = vsel %vm182_vm1, %v5033_v0, %v3637_v15  ;;  %v5043_v32 = vld [vmem:[%s9582_s0 + $0xc6] sm:$0x8]   ;;  %v3676_v33 = vsel %vm182_vm1, %v5042_v37, %v3672_v50  ;;  %v5076_v11 = vld [vmem:[%s9582_s0 + $0x11] sm:$0x1]  }
 0x152   :  { %v5012_v12 = vld [vmem:[%s9582_s0 + $0x1ba] sm:$0x80]   ;;  %v3645_v31 = vsel %vm186_vm2, %v5034_v1, %v3641_v23  ;;  %v5056_v40 = vld [vmem:[%s9582_s0 + $0x1e2] sm:$0x80]   ;;  %v3680_v61 = vsel %vm186_vm2, %v5043_v32, %v3676_v33  ;;  %v5078_v32 = vld [vmem:[%s9582_s0 + $0x8f] sm:$0x4]  }
 0x153   :  { %v5035_v16 = vld [vmem:[%s9582_s0 + $0x31d] sm:$0x10]   ;;  %v3557_v48 = vsel %vm202_vm6, %v5012_v12, %v3553_v29  ;;  %v5044_v19 = vld [vmem:[%s9582_s0 + $0x105] sm:$0x10]   ;;  %v3731_v12 = vsel %vm202_vm6, %v5056_v40, %v3727_v38  ;;  %v5081_v34 = vld [vmem:[%s9582_s0 + $0x14c] sm:$0x20]  }
 0x154   :  { %v5036_v18 = vld [vmem:[%s9582_s0 + $0x35c] sm:$0x20]   ;;  %v3649_v49 = vsel %vm190_vm3, %v5035_v16, %v3645_v31  ;;  %3558 = vrot.lane.b32.xlu0 %v3557_v48, %s5161_s11  ;;  %v5045_v21 = vld [vmem:[%s9582_s0 + $0x144] sm:$0x20]   ;;  %v3684_v15 = vsel %vm190_vm3, %v5044_v19, %v3680_v61  ;;  %v5092_v19 = vld [vmem:[%s9582_s0 + $0x1ea] sm:$0x80]  }
 0x155   :  { %v5037_v24 = vld [vmem:[%s9582_s0 + $0x39b] sm:$0x40]   ;;  %v3653_v62 = vsel %vm194_vm4, %v5036_v18, %v3649_v49  ;;  %v5046_v58 = vld [vmem:[%s9582_s0 + $0x183] sm:$0x40]   ;;  %v9094_v49 = vpop.permute.xlu1 %2474   ;;  %v5082_v33 = vld [vmem:[%s9582_s0 + $0x18b] sm:$0x40]  }
 0x156   :  { %v5022_v25 = vld [vmem:[%s9582_s0 + $0x201] sm:$0x1]   ;;  %v3657_v47 = vsel %vm198_vm5, %v5037_v24, %v3653_v62  ;;  %v5067_v2 = vld [vmem:[%s9582_s0 + $0x229] sm:$0x1]   ;;  %v3688_v24 = vsel %vm194_vm4, %v5045_v21, %v3684_v15  ;;  %v5104_v38 = vld [vmem:[%s9582_s0 + $0x270] sm:$0x2]  }
 0x157   :  { %v5023_v28 = vld [vmem:[%s9582_s0 + $0x240] sm:$0x2]   ;;  %v5068_v22 = vld [vmem:[%s9582_s0 + $0x268] sm:$0x2]   ;;  %v5105_v61 = vld [vmem:[%s9582_s0 + $0x2af] sm:$0x4]  }
 0x158   :  { %v3602_v35 = vsel %vm178_vm0, %v5023_v28, %v5022_v25  ;;  %v5024_v36 = vld [vmem:[%s9582_s0 + $0x27f] sm:$0x4]   ;;  %v3777_v0 = vsel %vm178_vm0, %v5068_v22, %v5067_v2  ;;  %v5069_v1 = vld [vmem:[%s9582_s0 + $0x2a7] sm:$0x4]   ;;  %v5103_v22 = vld [vmem:[%s9582_s0 + $0x231] sm:$0x1]  }
 0x159   :  { %v5025_v41 = vld [vmem:[%s9582_s0 + $0x2be] sm:$0x8]   ;;  %v3606_v52 = vsel %vm182_vm1, %v5024_v36, %v3602_v35  ;;  %v5070_v4 = vld [vmem:[%s9582_s0 + $0x2e6] sm:$0x8]   ;;  %v3781_v18 = vsel %vm182_vm1, %v5069_v1, %v3777_v0  ;;  %v3692_v35 = vsel %vm198_vm5, %v5046_v58, %v3688_v24  ;;  %v9158_v13 = vpop.permute.xlu1 %2544   ;;  %v5106_v10 = vld [vmem:[%s9582_s0 + $0x2ee] sm:$0x8]  }
 0x15a   :  { %v5026_v43 = vld [vmem:[%s9582_s0 + $0x2fd] sm:$0x10]   ;;  %v3610_v63 = vsel %vm186_vm2, %v5025_v41, %v3606_v52  ;;  %v5071_v5 = vld [vmem:[%s9582_s0 + $0x325] sm:$0x10]   ;;  %v3785_v25 = vsel %vm186_vm2, %v5070_v4, %v3781_v18  ;;  %v5083_v4 = vld [vmem:[%s9582_s0 + $0x1ca] sm:$0x80]  }
 0x15b   :  { %v5038_v51 = vld [vmem:[%s9582_s0 + $0x3da] sm:$0x80]   ;;  %v3614_v3 = vsel %vm190_vm3, %v5026_v43, %v3610_v63  ;;  %v5047_v16 = vld [vmem:[%s9582_s0 + $0x1c2] sm:$0x80]   ;;  %v3789_v36 = vsel %vm190_vm3, %v5071_v5, %v3785_v25  ;;  %v5085_v63 = vld [vmem:[%s9582_s0 + $0x31] sm:$0x1]   ;;  %v3917_v5 = vsel %vm178_vm0, %v5104_v38, %v5103_v22 }
 0x15c   :  { %v5027_v55 = vld [vmem:[%s9582_s0 + $0x33c] sm:$0x20]   ;;  %v3661_v60 = vsel %vm202_vm6, %v5038_v51, %v3657_v47  ;;  %v5072_v20 = vld [vmem:[%s9582_s0 + $0x364] sm:$0x20]   ;;  %v3696_v51 = vsel %vm202_vm6, %v5047_v16, %v3692_v35  ;;  %v5087_v47 = vld [vmem:[%s9582_s0 + $0xaf] sm:$0x4]   ;;  %v3847_v42 = vsel %vm178_vm0, %v5086_v39, %v5085_v63 }
 0x15d   :  { %v5028_v56 = vld [vmem:[%s9582_s0 + $0x37b] sm:$0x40]   ;;  %v3618_v53 = vsel %vm194_vm4, %v5027_v55, %v3614_v3  ;;  %3662 = vrot.lane.b32.xlu1 %v3661_v60, %s5161_s11  ;;  %v5073_v23 = vld [vmem:[%s9582_s0 + $0x3a3] sm:$0x40]   ;;  %v3793_v52 = vsel %vm194_vm4, %v5072_v20, %v3789_v36  ;;  %v5088_v3 = vld [vmem:[%s9582_s0 + $0xee] sm:$0x8]   ;;  %v3851_v46 = vsel %vm182_vm1, %v5087_v47, %v3847_v42  ;;  %v3921_v20 = vsel %vm182_vm1, %v5105_v61, %v3917_v5 }
 0x15e   :  { %v5029_v9 = vld [vmem:[%s9582_s0 + $0x3ba] sm:$0x80]   ;;  %v3622_v14 = vsel %vm198_vm5, %v5028_v56, %v3618_v53  ;;  %v5058_v28 = vld [vmem:[%s9582_s0 + $0x209] sm:$0x1]   ;;  %v3797_v57 = vsel %vm198_vm5, %v5073_v23, %v3793_v52  ;;  %v5089_v60 = vld [vmem:[%s9582_s0 + $0x12d] sm:$0x10]   ;;  %v3855_v17 = vsel %vm186_vm2, %v5088_v3, %v3851_v46 }
 0x15f   :  { %v3626_v7 = vsel %vm202_vm6, %v5029_v9, %v3622_v14  ;;  %v5059_v29 = vld [vmem:[%s9582_s0 + $0x248] sm:$0x2]   ;;  %v9120_v9 = vpop.permute.xlu0 %2440   ;;  %v5090_v53 = vld [vmem:[%s9582_s0 + $0x16c] sm:$0x20]   ;;  %v3859_v50 = vsel %vm190_vm3, %v5089_v60, %v3855_v17  ;;  %v5112_v17 = vld [vmem:[%s9582_s0 + $0x19] sm:$0x1]  }
 0x160   :  { %3627 = vrot.lane.b32.xlu0 %v3626_v7, %s5161_s11  ;;  %v5060_v31 = vld [vmem:[%s9582_s0 + $0x287] sm:$0x4]   ;;  %v3742_v43 = vsel %vm178_vm0, %v5059_v29, %v5058_v28  ;;  %v5077_v14 = vld [vmem:[%s9582_s0 + $0x50] sm:$0x2]   ;;  %v3863_v58 = vsel %vm194_vm4, %v5090_v53, %v3859_v50  ;;  %v3925_v29 = vsel %vm186_vm2, %v5106_v10, %v3921_v20  ;;  %v5117_v22 = vld [vmem:[%s9582_s0 + $0x154] sm:$0x20]  }
 0x161   :  { %3732 = vrot.lane.b32.xlu1 %v3731_v12, %s5161_s11  ;;  %v5074_v41 = vld [vmem:[%s9582_s0 + $0x3e2] sm:$0x80]   ;;  %v3746_v55 = vsel %vm182_vm1, %v5060_v31, %v3742_v43  ;;  %v3812_v37 = vsel %vm178_vm0, %v5077_v14, %v5076_v11  ;;  %v5080_v7 = vld [vmem:[%s9582_s0 + $0x10d] sm:$0x10]   ;;  %v3867_v0 = vsel %vm198_vm5, %v5091_v59, %v3863_v58  ;;  %v5126_v59 = vld [vmem:[%s9582_s0 + $0x174] sm:$0x20]  }
 0x162   :  { %v5061_v45 = vld [vmem:[%s9582_s0 + $0x2c6] sm:$0x8]   ;;  %v3801_v6 = vsel %vm202_vm6, %v5074_v41, %v3797_v57  ;;  %v3816_v21 = vsel %vm182_vm1, %v5078_v32, %v3812_v37  ;;  %v5107_v12 = vld [vmem:[%s9582_s0 + $0x32d] sm:$0x10]   ;;  %v3871_v16 = vsel %vm202_vm6, %v5092_v19, %v3867_v0  ;;  %v9222_v41 = vpop.permute.xlu1 %2614   ;;  %v5121_v57 = vld [vmem:[%s9582_s0 + $0x39] sm:$0x1]  }
 0x163   :  { %v5062_v48 = vld [vmem:[%s9582_s0 + $0x305] sm:$0x10]   ;;  %v3750_v27 = vsel %vm186_vm2, %v5061_v45, %v3746_v55  ;;  %v3820_v2 = vsel %vm186_vm2, %v5079_v54, %v3816_v21  ;;  %v9196_v15 = vpop.permute.xlu0 %2509   ;;  %v5108_v23 = vld [vmem:[%s9582_s0 + $0x36c] sm:$0x20]   ;;  %v3929_v45 = vsel %vm190_vm3, %v5107_v12, %v3925_v29  ;;  %v5127_v11 = vld [vmem:[%s9582_s0 + $0x1b3] sm:$0x40]  }
 0x164   :  { %v5063_v56 = vld [vmem:[%s9582_s0 + $0x344] sm:$0x20]   ;;  %3697 = vrot.lane.b32.xlu0 %v3696_v51, %s5161_s11  ;;  %v3754_v30 = vsel %vm190_vm3, %v5062_v48, %v3750_v27  ;;  %v3824_v1 = vsel %vm190_vm3, %v5080_v7, %v3820_v2  ;;  %v5109_v24 = vld [vmem:[%s9582_s0 + $0x3ab] sm:$0x40]   ;;  %v5122_v27 = vld [vmem:[%s9582_s0 + $0x78] sm:$0x2]  }
 0x165   :  { %v5064_v62 = vld [vmem:[%s9582_s0 + $0x383] sm:$0x40]   ;;  %3802 = vrot.lane.b32.xlu1 %v3801_v6, %s5161_s11  ;;  %v3758_v8 = vsel %vm194_vm4, %v5063_v56, %v3754_v30  ;;  %v3828_v18 = vsel %vm194_vm4, %v5081_v34, %v3824_v1  ;;  %v5094_v25 = vld [vmem:[%s9582_s0 + $0x211] sm:$0x1]   ;;  %v3933_v56 = vsel %vm194_vm4, %v5108_v23, %v3929_v45  ;;  %v3987_v3 = vsel %vm178_vm0, %v5122_v27, %v5121_v57  ;;  %v5123_v6 = vld [vmem:[%s9582_s0 + $0xb7] sm:$0x4]  }
 0x166   :  { %v5065_v44 = vld [vmem:[%s9582_s0 + $0x3c2] sm:$0x80]   ;;  %v3762_v26 = vsel %vm198_vm5, %v5064_v62, %v3758_v8  ;;  %v3832_v28 = vsel %vm198_vm5, %v5082_v33, %v3828_v18  ;;  %v5095_v31 = vld [vmem:[%s9582_s0 + $0x250] sm:$0x2]   ;;  %v3937_v39 = vsel %vm198_vm5, %v5109_v24, %v3933_v56  ;;  %v5124_v30 = vld [vmem:[%s9582_s0 + $0xf6] sm:$0x8]   ;;  %v3991_v46 = vsel %vm182_vm1, %v5123_v6, %v3987_v3  ;;  %v2685_v34 = vpop.permute.xlu1 %2684  }
 0x167   :  { %v3766_v40 = vsel %vm202_vm6, %v5065_v44, %v3762_v26  ;;  %v5096_v35 = vld [vmem:[%s9582_s0 + $0x28f] sm:$0x4]   ;;  %v3836_v43 = vsel %vm202_vm6, %v5083_v4, %v3832_v28  ;;  %v3882_v51 = vsel %vm178_vm0, %v5095_v31, %v5094_v25  ;;  %v5125_v44 = vld [vmem:[%s9582_s0 + $0x135] sm:$0x10]   ;;  %v9260_v42 = vpop.permute.xlu0 %2579   ;;  %v3995_v26 = vsel %vm186_vm2, %v5124_v30, %v3991_v46  ;;  %4735 = vst.msk [vmem:[%s9583_s1 + $0x20] sm:$0xff] %vm2442_vm13, %v9094_v49  }
 0x168   :  { %3767 = vrot.lane.b32.xlu0 %v3766_v40, %s5161_s11  ;;  %v5097_v36 = vld [vmem:[%s9582_s0 + $0x2ce] sm:$0x8]   ;;  %v3886_v62 = vsel %vm182_vm1, %v5096_v35, %v3882_v51  ;;  %v5113_v37 = vld [vmem:[%s9582_s0 + $0x58] sm:$0x2]   ;;  %v3999_v7 = vsel %vm190_vm3, %v5125_v44, %v3995_v26  ;;  %2443 = vst.msk [vmem:[%s9583_s1] sm:$0xff] %vm2442_vm13, %v9120_v9  }
 0x169   :  { %3872 = vrot.lane.b32.xlu1 %v3871_v16, %s5161_s11  ;;  %v5110_v48 = vld [vmem:[%s9582_s0 + $0x3ea] sm:$0x80]   ;;  %v3890_v47 = vsel %vm186_vm2, %v5097_v36, %v3886_v62  ;;  %v5114_v32 = vld [vmem:[%s9582_s0 + $0x97] sm:$0x4]   ;;  %v3952_v50 = vsel %vm178_vm0, %v5113_v37, %v5112_v17  ;;  %v4003_v58 = vsel %vm194_vm4, %v5126_v59, %v3999_v7  ;;  %4753 = vst.msk [vmem:[%s9583_s1 + $0x60] sm:$0xff] %vm2442_vm13, %v9158_v13  }
 0x16a   :  { %v5098_v52 = vld [vmem:[%s9582_s0 + $0x30d] sm:$0x10]   ;;  %v3941_v60 = vsel %vm202_vm6, %v5110_v48, %v3937_v39  ;;  %v5128_v40 = vld [vmem:[%s9582_s0 + $0x1f2] sm:$0x80]   ;;  %v3956_v2 = vsel %vm182_vm1, %v5114_v32, %v3952_v50  ;;  %v4007_v0 = vsel %vm198_vm5, %v5127_v11, %v4003_v58  ;;  %v2755_v56 = vpop.permute.xlu1 %2754   ;;  %4744 = vst.msk [vmem:[%s9583_s1 + $0x40] sm:$0xff] %vm2442_vm13, %v9196_v15   ;;  %4771 = vst.msk [vmem:[%s9583_s1 + $0x28] sm:$0xff] %vm2442_vm13, %v9222_v41  }
 0x16b   :  { %v5099_v55 = vld [vmem:[%s9582_s0 + $0x34c] sm:$0x20]   ;;  %v3894_v53 = vsel %vm190_vm3, %v5098_v52, %v3890_v47  ;;  %v5115_v19 = vld [vmem:[%s9582_s0 + $0xd6] sm:$0x8]   ;;  %v2650_v12 = vpop.permute.xlu0 %2649   ;;  %v4011_v16 = vsel %vm202_vm6, %v5128_v40, %v4007_v0  ;;  %4762 = vst.msk [vmem:[%s9583_s1 + $0x8] sm:$0xff] %vm2442_vm13, %v9260_v42   ;;  %4789 = vst.msk [vmem:[%s9583_s1 + $0x68] sm:$0xff] %vm2442_vm13, %v2685_v34  }
 0x16c   :  { %3837 = vrot.lane.b32.xlu0 %v3836_v43, %s5161_s11  ;;  %v5100_v63 = vld [vmem:[%s9582_s0 + $0x38b] sm:$0x40]   ;;  %v3898_v14 = vsel %vm194_vm4, %v5099_v55, %v3894_v53  ;;  %v5116_v21 = vld [vmem:[%s9582_s0 + $0x115] sm:$0x10]   ;;  %v3960_v1 = vsel %vm186_vm2, %v5115_v19, %v3956_v2  ;;  %4780 = vst.msk [vmem:[%s9583_s1 + $0x48] sm:$0xff] %vm2442_vm13, %v2650_v12  }
 0x16d   :  { %v5101_v8 = vld [vmem:[%s9582_s0 + $0x3ca] sm:$0x80]   ;;  %3942 = vrot.lane.b32.xlu1 %v3941_v60, %s5161_s11  ;;  %v3902_v54 = vsel %vm198_vm5, %v5100_v63, %v3898_v14  ;;  %v5118_v38 = vld [vmem:[%s9582_s0 + $0x193] sm:$0x40]   ;;  %v3964_v18 = vsel %vm190_vm3, %v5116_v21, %v3960_v1  ;;  %4807 = vst.msk [vmem:[%s9583_s1 + $0x30] sm:$0xff] %vm2442_vm13, %v2755_v56  }
 0x16e   :  { %v3906_v33 = vsel %vm202_vm6, %v5101_v8, %v3902_v54  ;;  %v5139_v61 = vld [vmem:[%s9582_s0 + $0x239] sm:$0x1]   ;;  %v3968_v28 = vsel %vm194_vm4, %v5117_v22, %v3964_v18  ;;  %v2825_v42 = vpop.permute.xlu1 %2824  }
 0x16f   :  { %v5140_v4 = vld [vmem:[%s9582_s0 + $0x278] sm:$0x2]   ;;  %v3972_v43 = vsel %vm198_vm5, %v5118_v38, %v3968_v28  ;;  %v2720_v49 = vpop.permute.xlu0 %2719   ;;  %4825 = vst.msk [vmem:[%s9583_s1 + $0x70] sm:$0xff] %vm2442_vm13, %v2825_v42  }
 0x170   :  { %3907 = vrot.lane.b32.xlu0 %v3906_v33, %s5161_s11  ;;  %v5141_v5 = vld [vmem:[%s9582_s0 + $0x2b7] sm:$0x4]   ;;  %v4057_v23 = vsel %vm178_vm0, %v5140_v4, %v5139_v61  ;;  %4798 = vst.msk [vmem:[%s9583_s1 + $0x10] sm:$0xff] %vm2442_vm13, %v2720_v49  }
 0x171   :  { %v5142_v10 = vld [vmem:[%s9582_s0 + $0x2f6] sm:$0x8]   ;;  %4012 = vrot.lane.b32.xlu1 %v4011_v16, %s5161_s11  ;;  %v4061_v29 = vsel %vm182_vm1, %v5141_v5, %v4057_v23 }
 0x172   :  { %v5119_v20 = vld [vmem:[%s9582_s0 + $0x1d2] sm:$0x80]   ;;  %v4065_v45 = vsel %vm186_vm2, %v5142_v10, %v4061_v29 }
 0x173   :  { %v5143_v24 = vld [vmem:[%s9582_s0 + $0x335] sm:$0x10]   ;;  %v3976_v62 = vsel %vm202_vm6, %v5119_v20, %v3972_v43  ;;  %v2790_v53 = vpop.permute.xlu0 %2789  }
 0x174   :  { %v5144_v25 = vld [vmem:[%s9582_s0 + $0x374] sm:$0x20]   ;;  %v4069_v63 = vsel %vm190_vm3, %v5143_v24, %v4065_v45  ;;  %3977 = vrot.lane.b32.xlu0 %v3976_v62, %s5161_s11  ;;  %4816 = vst.msk [vmem:[%s9583_s1 + $0x50] sm:$0xff] %vm2442_vm13, %v2790_v53  }
 0x175   :  { %v5145_v31 = vld [vmem:[%s9582_s0 + $0x3b3] sm:$0x40]   ;;  %v4073_v47 = vsel %vm194_vm4, %v5144_v25, %v4069_v63 }
 0x176   :  { %v5130_v35 = vld [vmem:[%s9582_s0 + $0x219] sm:$0x1]   ;;  %v4077_v30 = vsel %vm198_vm5, %v5145_v31, %v4073_v47 }
 0x177   :  { %v5131_v36 = vld [vmem:[%s9582_s0 + $0x258] sm:$0x2]  }
 0x178   :  { %v4022_v48 = vsel %vm178_vm0, %v5131_v36, %v5130_v35  ;;  %v5132_v51 = vld [vmem:[%s9582_s0 + $0x297] sm:$0x4]  }
 0x179   :  { %v5133_v52 = vld [vmem:[%s9582_s0 + $0x2d6] sm:$0x8]   ;;  %v4026_v27 = vsel %vm182_vm1, %v5132_v51, %v4022_v48 }
 0x17a   :  { %v5134_v55 = vld [vmem:[%s9582_s0 + $0x315] sm:$0x10]   ;;  %v4030_v3 = vsel %vm186_vm2, %v5133_v52, %v4026_v27 }
 0x17b   :  { %v5146_v57 = vld [vmem:[%s9582_s0 + $0x3f2] sm:$0x80]   ;;  %v4034_v44 = vsel %vm190_vm3, %v5134_v55, %v4030_v3 }
 0x17c   :  { %v5135_v39 = vld [vmem:[%s9582_s0 + $0x354] sm:$0x20]   ;;  %v4081_v9 = vsel %vm202_vm6, %v5146_v57, %v4077_v30 }
 0x17d   :  { %v5136_v6 = vld [vmem:[%s9582_s0 + $0x393] sm:$0x40]   ;;  %v4038_v13 = vsel %vm194_vm4, %v5135_v39, %v4034_v44  ;;  %4082 = vrot.lane.b32.xlu1 %v4081_v9, %s5161_s11 }
 0x17e   :  { %v5137_v60 = vld [vmem:[%s9582_s0 + $0x3d2] sm:$0x80]   ;;  %v4042_v15 = vsel %vm198_vm5, %v5136_v6, %v4038_v13 }
 0x17f   :  { %v4046_v41 = vsel %vm202_vm6, %v5137_v60, %v4042_v15 }
 0x180   :  { %4047 = vrot.lane.b32.xlu0 %v4046_v41, %s5161_s11 }
 0x187   :  { %v2895_v8 = vpop.permute.xlu1 %2894  }
 0x188   :  { %4843 = vst.msk [vmem:[%s9583_s1 + $0x38] sm:$0xff] %vm2442_vm13, %v2895_v8   ;;  %v2860_v46 = vpop.permute.xlu0 %2859  }
 0x189   :  { %4834 = vst.msk [vmem:[%s9583_s1 + $0x18] sm:$0xff] %vm2442_vm13, %v2860_v46  }
 0x18d   :  { %v2965_v59 = vpop.permute.xlu1 %2964  }
 0x18e   :  { %4861 = vst.msk [vmem:[%s9583_s1 + $0x78] sm:$0xff] %vm2442_vm13, %v2965_v59  }
 0x191   :  { %v3034_v14 = vpop.permute.xlu1 %3033  }
 0x192   :  { %4878 = vst.msk [vmem:[%s9583_s1 + $0x20] sm:$0xff] %vm3001_vm14, %v3034_v14  }
 0x195   :  { %v2930_v11 = vpop.permute.xlu0 %2929  }
 0x196   :  { %4852 = vst.msk [vmem:[%s9583_s1 + $0x58] sm:$0xff] %vm2442_vm13, %v2930_v11  }
 0x197   :  { %v3104_v17 = vpop.permute.xlu1 %3103  }
 0x198   :  { %4896 = vst.msk [vmem:[%s9583_s1 + $0x60] sm:$0xff] %vm3001_vm14, %v3104_v17  }
 0x199   :  { %v3000_v26 = vpop.permute.xlu0 %2999  }
 0x19a   :  { %3002 = vst.msk [vmem:[%s9583_s1] sm:$0xff] %vm3001_vm14, %v3000_v26  }
 0x19b   :  { %v3174_v32 = vpop.permute.xlu1 %3173  }
 0x19c   :  { %4914 = vst.msk [vmem:[%s9583_s1 + $0x28] sm:$0xff] %vm3001_vm14, %v3174_v32  }
 0x19d   :  { %v3069_v37 = vpop.permute.xlu0 %3068  }
 0x19e   :  { %4887 = vst.msk [vmem:[%s9583_s1 + $0x40] sm:$0xff] %vm3001_vm14, %v3069_v37  }
 0x1a1   :  { %v3139_v54 = vpop.permute.xlu0 %3138  }
 0x1a2   :  { %4905 = vst.msk [vmem:[%s9583_s1 + $0x8] sm:$0xff] %vm3001_vm14, %v3139_v54  }
 0x1a4   :  { %v3244_v7 = vpop.permute.xlu1 %3243  }
 0x1a5   :  { %4932 = vst.msk [vmem:[%s9583_s1 + $0x68] sm:$0xff] %vm3001_vm14, %v3244_v7  }
 0x1a8   :  { %v3314_v50 = vpop.permute.xlu1 %3313  }
 0x1a9   :  { %4950 = vst.msk [vmem:[%s9583_s1 + $0x30] sm:$0xff] %vm3001_vm14, %v3314_v50  }
 0x1ac   :  { %v3209_v40 = vpop.permute.xlu0 %3208  }
 0x1ad   :  { %4923 = vst.msk [vmem:[%s9583_s1 + $0x48] sm:$0xff] %vm3001_vm14, %v3209_v40  }
 0x1af   :  { %v3384_v21 = vpop.permute.xlu1 %3383  }
 0x1b0   :  { %v3279_v19 = vpop.permute.xlu0 %3278   ;;  %4968 = vst.msk [vmem:[%s9583_s1 + $0x70] sm:$0xff] %vm3001_vm14, %v3384_v21  }
 0x1b1   :  { %4941 = vst.msk [vmem:[%s9583_s1 + $0x10] sm:$0xff] %vm3001_vm14, %v3279_v19  }
 0x1b3   :  { %v3454_v33 = vpop.permute.xlu1 %3453  }
 0x1b4   :  { %4986 = vst.msk [vmem:[%s9583_s1 + $0x38] sm:$0xff] %vm3001_vm14, %v3454_v33  }
 0x1b7   :  { %v3349_v34 = vpop.permute.xlu0 %3348  }
 0x1b8   :  { %4959 = vst.msk [vmem:[%s9583_s1 + $0x50] sm:$0xff] %vm3001_vm14, %v3349_v34  }
 0x1ba   :  { %v3524_v2 = vpop.permute.xlu1 %3523  }
 0x1bb   :  { %v3419_v58 = vpop.permute.xlu0 %3418   ;;  %5004 = vst.msk [vmem:[%s9583_s1 + $0x78] sm:$0xff] %vm3001_vm14, %v3524_v2  }
 0x1bc   :  { %4977 = vst.msk [vmem:[%s9583_s1 + $0x18] sm:$0xff] %vm3001_vm14, %v3419_v58  }
 0x1be   :  { %v3593_v38 = vpop.permute.xlu1 %3592  }
 0x1bf   :  { %v3489_v22 = vpop.permute.xlu0 %3488   ;;  %5021 = vst.msk [vmem:[%s9583_s1 + $0x20] sm:$0xff] %vm3560_vm15, %v3593_v38  }
 0x1c0   :  { %4995 = vst.msk [vmem:[%s9583_s1 + $0x58] sm:$0xff] %vm3001_vm14, %v3489_v22  }
 0x1c6   :  { %v3559_v61 = vpop.permute.xlu0 %3558  }
 0x1c7   :  { %3561 = vst.msk [vmem:[%s9583_s1] sm:$0xff] %vm3560_vm15, %v3559_v61  }
 0x1cf   :  { %v3663_v0 = vpop.permute.xlu1 %3662  }
 0x1d0   :  { %5039 = vst.msk [vmem:[%s9583_s1 + $0x60] sm:$0xff] %vm3560_vm15, %v3663_v0  }
 0x1d2   :  { %v3628_v1 = vpop.permute.xlu0 %3627  }
 0x1d3   :  { %5030 = vst.msk [vmem:[%s9583_s1 + $0x40] sm:$0xff] %vm3560_vm15, %v3628_v1   ;;  %v3733_v4 = vpop.permute.xlu1 %3732  }
 0x1d4   :  { %5057 = vst.msk [vmem:[%s9583_s1 + $0x28] sm:$0xff] %vm3560_vm15, %v3733_v4  }
 0x1d6   :  { %v3698_v5 = vpop.permute.xlu0 %3697  }
 0x1d7   :  { %5048 = vst.msk [vmem:[%s9583_s1 + $0x8] sm:$0xff] %vm3560_vm15, %v3698_v5   ;;  %v3803_v10 = vpop.permute.xlu1 %3802  }
 0x1d8   :  { %5075 = vst.msk [vmem:[%s9583_s1 + $0x68] sm:$0xff] %vm3560_vm15, %v3803_v10  }
 0x1da   :  { %v3768_v12 = vpop.permute.xlu0 %3767  }
 0x1db   :  { %5066 = vst.msk [vmem:[%s9583_s1 + $0x48] sm:$0xff] %vm3560_vm15, %v3768_v12   ;;  %v3873_v16 = vpop.permute.xlu1 %3872  }
 0x1dc   :  { %5093 = vst.msk [vmem:[%s9583_s1 + $0x30] sm:$0xff] %vm3560_vm15, %v3873_v16  }
 0x1de   :  { %v3838_v18 = vpop.permute.xlu0 %3837  }
 0x1df   :  { %5084 = vst.msk [vmem:[%s9583_s1 + $0x10] sm:$0xff] %vm3560_vm15, %v3838_v18   ;;  %v3943_v20 = vpop.permute.xlu1 %3942  }
 0x1e0   :  { %5111 = vst.msk [vmem:[%s9583_s1 + $0x70] sm:$0xff] %vm3560_vm15, %v3943_v20  }
 0x1e2   :  { %v3908_v23 = vpop.permute.xlu0 %3907  }
 0x1e3   :  { %5102 = vst.msk [vmem:[%s9583_s1 + $0x50] sm:$0xff] %vm3560_vm15, %v3908_v23   ;;  %v4013_v24 = vpop.permute.xlu1 %4012  }
 0x1e4   :  { %5129 = vst.msk [vmem:[%s9583_s1 + $0x38] sm:$0xff] %vm3560_vm15, %v4013_v24  }
 0x1e6   :  { %v3978_v25 = vpop.permute.xlu0 %3977  }
 0x1e7   :  { %5120 = vst.msk [vmem:[%s9583_s1 + $0x18] sm:$0xff] %vm3560_vm15, %v3978_v25  }
 0x1ef   :  { %v4083_v28 = vpop.permute.xlu1 %4082  }
 0x1f0   :  { %5147 = vst.msk [vmem:[%s9583_s1 + $0x78] sm:$0xff] %vm3560_vm15, %v4083_v28  }
 0x1f2   :  { %v4048_v29 = vpop.permute.xlu0 %4047  }
 0x1f3   :  { %5138 = vst.msk [vmem:[%s9583_s1 + $0x58] sm:$0xff] %vm3560_vm15, %v4048_v29  }

// kernel: samba_forward.32
= control target key start
LH: loop header
LB: loop body
LE: loop exit
PB: predicated region body
PF: predicated region fallthrough
CT: control target
= control target key end

     0   :  { %v168_v0 = vmov 0.0   ;;  %vm169_vm0 = vmmov 0   ;;  %vm78_vm1 = vcmask 523264   ;;  %s228_s2 = inlined_call_operand.vmem [shape: bf16[64,128], index: 2, kind: input, shape index: {}]   ;;  %s229_s1 = inlined_call_operand.vmem [shape: f32[16,64], index: 1, kind: input, shape index: {}]   ;;  %s230_s0 = inlined_call_operand.vmem [shape: f32[16,64], index: 0, kind: input, shape index: {}]   ;;  %s231_s3 = inlined_call_operand.vmem [shape: f32[1,128], index: 3, kind: input, shape index: {}]   ;;  %s232_s4 = inlined_call_operand.vmem [shape: f32[16,128], index: 4, kind: output, shape index: {}]  }
   0x1   :  { %142 = vmatprep.subr.bf16.mxu0 %v168_v0  ;;  %v156_v1 = vld [vmem:[%s228_s2] sm:$0xff]   ;;  %150 = vmatprep.mubr.msk.bf16.mxu0 %vm169_vm0, %v168_v0  ;;  %v157_v2 = vld [vmem:[%s228_s2 + $0x8] sm:$0xff]   ;;  %v158_v7 = vld [vmem:[%s228_s2 + $0x10] sm:$0xff]  }
   0x2   :  { %143 = vmatpush3.bf16.msra.mxu0 %v156_v1  ;;  %v18_v3 = vld [vmem:[%s229_s1] sm:$0xff]  ;;  %v19_v4 = vld [vmem:[%s229_s1 + $0x8] sm:$0xff]  ;;  %v159_v8 = vld [vmem:[%s228_s2 + $0x18] sm:$0xff]  }
   0x3   :  { %144 = vmatprep.subr.bf16.mxu0 %v168_v0  ;;  %v129_v5 = vmul.f32 -1.442695, %v18_v3  ;;  %v130_v6 = vmul.f32 -1.442695, %v19_v4  ;;  %v20_v14 = vld [vmem:[%s230_s0] sm:$0xff]  ;;  %v21_v16 = vld [vmem:[%s230_s0 + $0x8] sm:$0xff] }
   0x4   :  { %v131_v22 = vld [vmem:[%s231_s3] ss:$0 sm:$0xff] }
   0x5   :  { %160 = vpow2.f32 %v129_v5 }
   0x6   :  { %145 = vmatpush3.bf16.msra.mxu0 %v157_v2  ;;  %162 = vpow2.f32 %v130_v6 }
   0x7   :  { %146 = vmatprep.subr.bf16.mxu0 %v168_v0 }
   0xa   :  { %147 = vmatpush3.bf16.msra.mxu0 %v158_v7 }
   0xb   :  { %148 = vmatprep.subr.bf16.mxu0 %v168_v0 }
   0xe   :  { %149 = vmatpush3.bf16.msra.mxu0 %v159_v8 }
   0xf   :  { %v161_v9 = vpop.eup %160 }
  0x10   :  { %v163_v10 = vpop.eup %162  ;;  %v28_v11 = vadd.f32 1.0, %v161_v9 }
  0x11   :  { %v29_v12 = vadd.f32 1.0, %v163_v10 }
  0x12   :  { %164 = vrcp.f32 %v28_v11 }
  0x13   :  { %166 = vrcp.f32 %v29_v12 }
  0x1c   :  { %v165_v13 = vpop.eup %164 }
  0x1d   :  { %v167_v15 = vpop.eup %166  ;;  %v34_v17 = vmul.f32 %v165_v13, %v18_v3 }
  0x1e   :  { %v35_v18 = vmul.f32 %v167_v15, %v19_v4 }
  0x1f   :  { %v36_v19 = vmul.f32 %v34_v17, %v20_v14 }
  0x20   :  { %v37_v20 = vmul.f32 %v35_v18, %v21_v16 }
  0x22   :  { %v38_v21 = vpack.c.bf16 %v37_v20, %v36_v19 }
  0x24   :  { %151 = vmatmul.mubr.msk.bf16.vlgmr.msra.gmra.mrb[0].mxu0 %vm78_vm1, %v38_v21 }
  0xf7   :  { %v116_v23 = vpop.f32.mrb[0].mxu0 }
  0xf8   :  { %v117_v24 = vadd.f32 %v131_v22, %v116_v23  ;;  %v152_v25 = vpop.f32.mrb[1].mxu0 }
  0xf9   :  { %v119_v26 = vpop.f32.mrb[2].mxu0 }
  0xfa   :  { %123 = vst [vmem:[%s232_s4] sm:$0xff] %v117_v24  ;;  %v120_v27 = vadd.f32 %v131_v22, %v119_v26  ;;  %v153_v28 = vpop.f32.mrb[3].mxu0 }
  0xfc   :  { %124 = vst [vmem:[%s232_s4 + $0x8] sm:$0xff] %v120_v27 }

// kernel: samba_forward.38
= control target key start
LH: loop header
LB: loop body
LE: loop exit
PB: predicated region body
PF: predicated region fallthrough
CT: control target
= control target key end

     0   :  { %v39_v0 = vlaneseq  ;;  %v662_v4 = vmov 1983009808   ;;  %v663_v6 = vmov 1934713408   ;;  %vm89_vm0 = vcmask 261120   ;;  %s899_s0 = inlined_call_operand.vmem [shape: f32[8,2,32], index: 0, kind: input, shape index: {}]   ;;  %s900_s3 = inlined_call_operand.vmem [shape: bf16[8,32], index: 3, kind: input, shape index: {}]   ;;  %s901_s1 = inlined_call_operand.vmem [shape: f32[1,8], index: 1, kind: input, shape index: {}]   ;;  %s902_s2 = inlined_call_operand.vmem [shape: f32[1,8], index: 2, kind: input, shape index: {}]   ;;  %s903_s5 = inlined_call_operand.vmem [shape: bf16[32,8], index: 5, kind: input, shape index: {}]   ;;  %s904_s4 = inlined_call_operand.vmem [shape: f32[1,32], index: 4, kind: input, shape index: {}]   ;;  %s905_s6 = inlined_call_operand.vmem [shape: f32[1,8], index: 6, kind: input, shape index: {}]   ;;  %s906_s7 = inlined_call_operand.vmem [shape: f32[8,2,32], index: 7, kind: output, shape index: {}]  }
   0x1   :  { %v710_v1 = vld [vmem:[%s899_s0] sm:$0x3]  ;;  %v715_v2 = vld [vmem:[%s899_s0 + $0x2] sm:$0x3]  ;;  %v720_v3 = vld [vmem:[%s899_s0 + $0x4] sm:$0x3]  ;;  %v37_v5 = vunpack.c.l.s4 %v662_v4  ;;  %v69_v7 = vunpack.c.l.s4 %v663_v6 }
   0x2   :  { %v725_v8 = vld [vmem:[%s899_s0 + $0x6] sm:$0x3]  ;;  %v730_v9 = vld [vmem:[%s899_s0 + $0x8] sm:$0x3]  ;;  %v735_v10 = vld [vmem:[%s899_s0 + $0xa] sm:$0x3]  ;;  %v35_v11 = vcombine.low %v710_v1, %v720_v3 }
   0x3   :  { %v742_v12 = vld [vmem:[%s899_s0 + $0xc] sm:$0x3]  ;;  %v747_v13 = vld [vmem:[%s899_s0 + $0xe] sm:$0x3]  ;;  %v38_v14 = vunpack.c.0.s8 %v37_v5  ;;  %v40_v15 = vshrl.u32 %v39_v0, 7  ;;  %v43_v16 = vcombine.low %v715_v2, %v725_v8  ;;  %v70_v17 = vunpack.c.0.s8 %v69_v7  ;;  %s664_s0 = smov 32  }
   0x4   :  { %v51_v18 = vcombine.low %v730_v9, %v742_v12  ;;  %v59_v19 = vcombine.low %v735_v10, %v747_v13  ;;  %vm123_vm1 = vcmask 64512   ;;  %vm283_vm2 = vcmask 1043456  }
   0x5   :  { %v755_v20 = vsub.s32 %v38_v14, %v40_v15  ;;  %v757_v21 = vsub.s32 %v70_v17, %v40_v15  ;;  %vm574_vm3 = vcmask 254976  }
   0x7   :  { %v42_v22 = vrot.slane %v35_v11, %v755_v20  ;;  %v50_v23 = vrot.slane %v43_v16, %v755_v20  ;;  %v58_v24 = vrot.slane %v51_v18, %v755_v20  ;;  %v66_v25 = vrot.slane %v59_v19, %v755_v20 }
   0x9   :  { %v67_v26 = vcombine.low %v42_v22, %v50_v23  ;;  %v75_v27 = vcombine.low %v58_v24, %v66_v25 }
   0xb   :  { %v74_v28 = vrot.slane %v67_v26, %v757_v21  ;;  %v82_v29 = vrot.slane %v75_v27, %v757_v21 }
   0xd   :  { %v84_v30 = vcombine.high %v74_v28, %v82_v29  ;;  %v83_v31 = vcombine.low %v74_v28, %v82_v29 }
   0xf   :  { %86 = vrot.lane.b32.xlu0 %v84_v30, %s664_s0 }
  0x81   :  { %v87_v32 = vpop.permute.xlu0 %86 }
  0x82   :  { %v90_v33 = vsel %vm89_vm0, %v83_v31, %v87_v32 }
  0x83   :  { %91 = vxpose.xlu0.b32.start.end [1/1] (short) (narrow) %v90_v33, 64 }
 0x103   :  { %v107_v34 = vpop.trf.xlu0 }
 0x104   :  { %v124_v35 = vsel %vm123_vm1, %v107_v34, 0.0 }
 0x105   :  { %125 = vadd.xlane.f32.xlu1 %v124_v35 }
 0x107   :  { %v108_v36 = vpop.trf.xlu0 }
 0x108   :  { %v127_v37 = vsel %vm123_vm1, %v108_v36, 0.0 }
 0x109   :  { %128 = vadd.xlane.f32.xlu1 %v127_v37 }
 0x10b   :  { %v109_v38 = vpop.trf.xlu0 }
 0x10c   :  { %v130_v39 = vsel %vm123_vm1, %v109_v38, 0.0 }
 0x10d   :  { %131 = vadd.xlane.f32.xlu1 %v130_v39 }
 0x10f   :  { %v110_v40 = vpop.trf.xlu0 }
 0x110   :  { %v133_v41 = vsel %vm123_vm1, %v110_v40, 0.0 }
 0x111   :  { %134 = vadd.xlane.f32.xlu1 %v133_v41 }
 0x113   :  { %v111_v42 = vpop.trf.xlu0 }
 0x114   :  { %v136_v43 = vsel %vm123_vm1, %v111_v42, 0.0 }
 0x115   :  { %137 = vadd.xlane.f32.xlu1 %v136_v43 }
 0x117   :  { %v112_v44 = vpop.trf.xlu0 }
 0x118   :  { %v139_v45 = vsel %vm123_vm1, %v112_v44, 0.0 }
 0x119   :  { %140 = vadd.xlane.f32.xlu1 %v139_v45 }
 0x11b   :  { %v113_v46 = vpop.trf.xlu0 }
 0x11c   :  { %v142_v47 = vsel %vm123_vm1, %v113_v46, 0.0 }
 0x11d   :  { %143 = vadd.xlane.f32.xlu1 %v142_v47 }
 0x11f   :  { %v114_v48 = vpop.trf.xlu0 }
 0x120   :  { %v145_v49 = vsel %vm123_vm1, %v114_v48, 0.0 }
 0x121   :  { %146 = vadd.xlane.f32.xlu1 %v145_v49 }
 0x192   :  { %v126_v50 = vpop.xlane.xlu1 %125 }
 0x193   :  { %v149_v51 = vmul.f32 0.125, %v126_v50 }
 0x195   :  { %v774_v52 = vsub.f32 %v107_v34, %v149_v51 }
 0x196   :  { %v129_v53 = vpop.xlane.xlu1 %128 }
 0x197   :  { %v150_v54 = vmul.f32 0.125, %v129_v53  ;;  %v165_v55 = vmul.f32 %v774_v52, %v774_v52 }
 0x199   :  { %v778_v56 = vsub.f32 %v108_v36, %v150_v54  ;;  %v173_v57 = vsel %vm123_vm1, %v165_v55, 0.0  ;;  %v263_v36 = vld [vmem:[%s900_s3] sm:$0xf] }
 0x19a   :  { %v132_v58 = vpop.xlane.xlu1 %131  ;;  %174 = vadd.xlane.f32.xlu1 %v173_v57  ;;  %634 = vmatprep.subr.msk.bf16.mxu0 %vm283_vm2, %v263_v36  ;;  %v285_v37 = vsel %vm283_vm2, %v263_v36, 0  ;;  %v587_v55 = vld [vmem:[%s901_s1] ss:$0 sm:$0xff] }
 0x19b   :  { %v151_v59 = vmul.f32 0.125, %v132_v58  ;;  %v166_v60 = vmul.f32 %v778_v56, %v778_v56  ;;  %613 = vmatpush3.bf16.msra.mxu0 %v285_v37 }
 0x19d   :  { %v783_v61 = vsub.f32 %v109_v38, %v151_v59  ;;  %v176_v62 = vsel %vm123_vm1, %v166_v60, 0.0 }
 0x19e   :  { %177 = vadd.xlane.f32.xlu0 %v176_v62  ;;  %v135_v63 = vpop.xlane.xlu1 %134 }
 0x19f   :  { %v152_v0 = vmul.f32 0.125, %v135_v63  ;;  %v167_v4 = vmul.f32 %v783_v61, %v783_v61 }
 0x1a1   :  { %v788_v5 = vsub.f32 %v110_v40, %v152_v0  ;;  %v179_v6 = vsel %vm123_vm1, %v167_v4, 0.0  ;;  %v588_v0 = vld [vmem:[%s902_s2] ss:$0 sm:$0xff] }
 0x1a2   :  { %v138_v7 = vpop.xlane.xlu1 %137  ;;  %180 = vadd.xlane.f32.xlu1 %v179_v6 }
 0x1a3   :  { %v153_v11 = vmul.f32 0.125, %v138_v7  ;;  %v168_v14 = vmul.f32 %v788_v5, %v788_v5 }
 0x1a5   :  { %v793_v15 = vsub.f32 %v111_v42, %v153_v11  ;;  %v182_v16 = vsel %vm123_vm1, %v168_v14, 0.0 }
 0x1a6   :  { %v141_v17 = vpop.xlane.xlu1 %140  ;;  %183 = vadd.xlane.f32.xlu1 %v182_v16 }
 0x1a7   :  { %v154_v18 = vmul.f32 0.125, %v141_v17  ;;  %v169_v19 = vmul.f32 %v793_v15, %v793_v15 }
 0x1a9   :  { %v798_v22 = vsub.f32 %v112_v44, %v154_v18  ;;  %v185_v23 = vsel %vm123_vm1, %v169_v19, 0.0 }
 0x1aa   :  { %v144_v24 = vpop.xlane.xlu1 %143  ;;  %186 = vadd.xlane.f32.xlu1 %v185_v23 }
 0x1ab   :  { %v155_v25 = vmul.f32 0.125, %v144_v24  ;;  %v170_v26 = vmul.f32 %v798_v22, %v798_v22 }
 0x1ad   :  { %v803_v27 = vsub.f32 %v113_v46, %v155_v25  ;;  %v188_v28 = vsel %vm123_vm1, %v170_v26, 0.0 }
 0x1ae   :  { %189 = vadd.xlane.f32.xlu1 %v188_v28  ;;  %v147_v29 = vpop.xlane.xlu1 %146 }
 0x1af   :  { %v156_v30 = vmul.f32 0.125, %v147_v29  ;;  %v171_v31 = vmul.f32 %v803_v27, %v803_v27 }
 0x1b1   :  { %v808_v32 = vsub.f32 %v114_v48, %v156_v30  ;;  %v191_v33 = vsel %vm123_vm1, %v171_v31, 0.0 }
 0x1b2   :  { %192 = vadd.xlane.f32.xlu1 %v191_v33 }
 0x1b3   :  { %v172_v34 = vmul.f32 %v808_v32, %v808_v32 }
 0x1b5   :  { %v194_v35 = vsel %vm123_vm1, %v172_v34, 0.0 }
 0x1b6   :  { %195 = vadd.xlane.f32.xlu1 %v194_v35 }
 0x227   :  { %v175_v38 = vpop.xlane.xlu1 %174 }
 0x228   :  { %v197_v39 = vmul.f32 0.125, %v175_v38 }
 0x22a   :  { %v205_v40 = vadd.f32 1e-05, %v197_v39 }
 0x22b   :  { %v178_v41 = vpop.xlane.xlu0 %177 }
 0x22c   :  { %646 = vrsqrt.f32 %v205_v40  ;;  %v198_v42 = vmul.f32 0.125, %v178_v41 }
 0x22e   :  { %v206_v43 = vadd.f32 1e-05, %v198_v42 }
 0x22f   :  { %v181_v44 = vpop.xlane.xlu1 %180 }
 0x230   :  { %648 = vrsqrt.f32 %v206_v43  ;;  %v199_v45 = vmul.f32 0.125, %v181_v44 }
 0x232   :  { %v207_v46 = vadd.f32 1e-05, %v199_v45 }
 0x233   :  { %v184_v47 = vpop.xlane.xlu1 %183 }
 0x234   :  { %650 = vrsqrt.f32 %v207_v46  ;;  %v200_v48 = vmul.f32 0.125, %v184_v47 }
 0x236   :  { %v647_v49 = vpop.eup %646  ;;  %v208_v50 = vadd.f32 1e-05, %v200_v48  ;;  %v644_v48 = vld [vmem:[%s903_s5] sm:$0xff]  }
 0x237   :  { %v187_v51 = vpop.xlane.xlu1 %186  ;;  %v221_v53 = vmul.f32 %v647_v49, %v774_v52  ;;  %622 = vmatprep.subr.bf16.mxu1 %v644_v48 }
 0x238   :  { %652 = vrsqrt.f32 %v208_v50  ;;  %v201_v54 = vmul.f32 0.125, %v187_v51  ;;  %623 = vmatpush3.bf16.msra.mxu1 %v644_v48 }
 0x239   :  { %v236_v62 = vmul.f32 %v587_v55, %v221_v53 }
 0x23a   :  { %v649_v57 = vpop.eup %648  ;;  %v209_v58 = vadd.f32 1e-05, %v201_v54 }
 0x23b   :  { %v190_v59 = vpop.xlane.xlu1 %189  ;;  %v222_v60 = vmul.f32 %v649_v57, %v778_v56  ;;  %v251_v14 = vadd.f32 %v588_v0, %v236_v62 }
 0x23c   :  { %654 = vrsqrt.f32 %v209_v58  ;;  %v202_v63 = vmul.f32 0.125, %v190_v59 }
 0x23d   :  { %v237_v4 = vmul.f32 %v587_v55, %v222_v60 }
 0x23e   :  { %v651_v52 = vpop.eup %650  ;;  %v210_v6 = vadd.f32 1e-05, %v202_v63 }
 0x23f   :  { %v223_v7 = vmul.f32 %v651_v52, %v783_v61  ;;  %v193_v11 = vpop.xlane.xlu1 %192  ;;  %v252_v16 = vadd.f32 %v588_v0, %v237_v4 }
 0x240   :  { %656 = vrsqrt.f32 %v210_v6  ;;  %v203_v17 = vmul.f32 0.125, %v193_v11 }
 0x241   :  { %v259_v18 = vpack.c.bf16 %v252_v16, %v251_v14  ;;  %v238_v25 = vmul.f32 %v587_v55, %v223_v7 }
 0x242   :  { %v653_v19 = vpop.eup %652  ;;  %v211_v56 = vadd.f32 1e-05, %v203_v17 }
 0x243   :  { %v224_v23 = vmul.f32 %v653_v19, %v788_v5  ;;  %v196_v24 = vpop.xlane.xlu1 %195  ;;  %614 = vmatprep.mubr.msk.bf16.mxu0 %vm123_vm1, %v259_v18  ;;  %v253_v31 = vadd.f32 %v588_v0, %v238_v25 }
 0x244   :  { %658 = vrsqrt.f32 %v211_v56  ;;  %v204_v26 = vmul.f32 0.125, %v196_v24 }
 0x245   :  { %v239_v28 = vmul.f32 %v587_v55, %v224_v23 }
 0x246   :  { %v655_v29 = vpop.eup %654  ;;  %v212_v30 = vadd.f32 1e-05, %v204_v26 }
 0x247   :  { %v225_v61 = vmul.f32 %v655_v29, %v793_v15  ;;  %v254_v33 = vadd.f32 %v588_v0, %v239_v28  ;;  %v594_v28 = vld [vmem:[%s905_s6] ss:$0 sm:$0xff]  ;;  %s665_s6 = smov 96  }
 0x248   :  { %660 = vrsqrt.f32 %v212_v30 }
 0x249   :  { %v260_v34 = vpack.c.bf16 %v254_v33, %v253_v31  ;;  %v240_v5 = vmul.f32 %v587_v55, %v225_v61 }
 0x24a   :  { %v657_v35 = vpop.eup %656 }
 0x24b   :  { %v226_v36 = vmul.f32 %v657_v35, %v798_v22  ;;  %615 = vmatmul.mubr.msk.bf16.vlgmr.msra.gmra.mrb[0].mxu0 %vm123_vm1, %v260_v34  ;;  %v255_v40 = vadd.f32 %v588_v0, %v240_v5 }
 0x24d   :  { %v241_v37 = vmul.f32 %v587_v55, %v226_v36 }
 0x24e   :  { %v659_v38 = vpop.eup %658 }
 0x24f   :  { %v227_v39 = vmul.f32 %v659_v38, %v803_v27  ;;  %v256_v41 = vadd.f32 %v588_v0, %v241_v37  ;;  %v645_v27 = vld [vmem:[%s903_s5 + $0x8] sm:$0xff]  }
 0x250   :  { %624 = vmatprep.subr.bf16.mxu1 %v645_v27 }
 0x251   :  { %v261_v42 = vpack.c.bf16 %v256_v41, %v255_v40  ;;  %v242_v44 = vmul.f32 %v587_v55, %v227_v39  ;;  %625 = vmatpush3.bf16.msra.mxu1 %v645_v27 }
 0x252   :  { %v661_v43 = vpop.eup %660 }
 0x253   :  { %v228_v15 = vmul.f32 %v661_v43, %v808_v32  ;;  %618 = vmatprep.mubr.msk.bf16.mxu0 %vm123_vm1, %v261_v42  ;;  %v257_v46 = vadd.f32 %v588_v0, %v242_v44  ;;  %v589_v32 = vld [vmem:[%s904_s4] ss:$0 sm:$0xff]  ;;  %v666_v44 = vmov 0.0  }
 0x255   :  { %v243_v45 = vmul.f32 %v587_v55, %v228_v15 }
 0x257   :  { %v258_v47 = vadd.f32 %v588_v0, %v243_v45 }
 0x259   :  { %v262_v22 = vpack.c.bf16 %v258_v47, %v257_v46 }
 0x25b   :  { %619 = vmatmul.mubr.msk.bf16.gmra.mrb[4].mxu0 %vm123_vm1, %v262_v22 }
 0x31e   :  { %v616_v49 = vpop.f32.mrb[0].mxu0 }
 0x31f   :  { %v330_v50 = vadd.f32 %v616_v49, %v589_v32  ;;  %v321_v51 = vpop.f32.mrb[1].mxu0 }
 0x320   :  { %v322_v53 = vadd.f32 %v589_v32, %v321_v51  ;;  %v617_v54 = vpop.f32.mrb[2].mxu0 }
 0x321   :  { %v333_v55 = vadd.f32 %v617_v54, %v589_v32  ;;  %v324_v57 = vpop.f32.mrb[3].mxu0  ;;  %v354_v59 = vmax.f32 %v330_v50, 0.0 }
 0x322   :  { %v325_v58 = vadd.f32 %v589_v32, %v324_v57  ;;  %v352_v62 = vmax.f32 %v322_v53, 0.0 }
 0x323   :  { %v355_v60 = vmax.f32 %v333_v55, 0.0 }
 0x324   :  { %v353_v63 = vmax.f32 %v325_v58, 0.0 }
 0x325   :  { %v361_v0 = vpack.c.bf16 %v355_v60, %v354_v59 }
 0x326   :  { %v360_v4 = vpack.c.bf16 %v353_v63, %v352_v62 }
 0x328   :  { %626 = vmatprep.mubr.msk.bf16.mxu1 %vm89_vm0, %v360_v4 }
 0x329   :  { %627 = vmatmul.mubr.msk.bf16.vlgmr.msra.gmra.mrb[0].mxu1 %vm89_vm0, %v361_v0 }
 0x32e   :  { %v620_v52 = vpop.f32.mrb[4].mxu0 }
 0x32f   :  { %v346_v6 = vadd.f32 %v620_v52, %v589_v32  ;;  %v337_v7 = vpop.f32.mrb[5].mxu0 }
 0x330   :  { %v338_v11 = vadd.f32 %v589_v32, %v337_v7  ;;  %v621_v14 = vpop.f32.mrb[6].mxu0 }
 0x331   :  { %v349_v16 = vadd.f32 %v621_v14, %v589_v32  ;;  %v340_v17 = vpop.f32.mrb[7].mxu0  ;;  %v358_v19 = vmax.f32 %v346_v6, 0.0 }
 0x332   :  { %v341_v18 = vadd.f32 %v589_v32, %v340_v17  ;;  %v356_v23 = vmax.f32 %v338_v11, 0.0 }
 0x333   :  { %v359_v56 = vmax.f32 %v349_v16, 0.0 }
 0x334   :  { %v357_v24 = vmax.f32 %v341_v18, 0.0 }
 0x335   :  { %v363_v25 = vpack.c.bf16 %v359_v56, %v358_v19 }
 0x336   :  { %v362_v26 = vpack.c.bf16 %v357_v24, %v356_v23 }
 0x338   :  { %630 = vmatprep.mubr.msk.bf16.mxu1 %vm89_vm0, %v362_v26 }
 0x339   :  { %631 = vmatmul.mubr.msk.bf16.gmra.mrb[4].mxu1 %vm89_vm0, %v363_v25 }
 0x3fc   :  { %v628_v29 = vpop.f32.mrb[0].mxu1 }
 0x3fd   :  { %v433_v30 = vpop.f32.mrb[1].mxu1  ;;  %v442_v35 = vadd.f32 %v628_v29, %v594_v28 }
 0x3fe   :  { %v434_v61 = vadd.f32 %v594_v28, %v433_v30  ;;  %v629_v31 = vpop.f32.mrb[2].mxu1 }
 0x3ff   :  { %v436_v33 = vpop.f32.mrb[3].mxu1  ;;  %v445_v36 = vadd.f32 %v629_v31, %v594_v28 }
 0x400   :  { %464 = vxpose.xlu1.b32.start [1/8] (short) (narrow) %v434_v61, 8  ;;  %v437_v34 = vadd.f32 %v594_v28, %v436_v33 }
 0x404   :  { %465 = vxpose.xlu1.b32.cont [2/8] (short) (narrow) %v437_v34, 8 }
 0x408   :  { %466 = vxpose.xlu1.b32.cont [3/8] (short) (narrow) %v442_v35, 8 }
 0x40c   :  { %v632_v5 = vpop.f32.mrb[4].mxu1  ;;  %467 = vxpose.xlu1.b32.cont [4/8] (short) (narrow) %v445_v36, 8 }
 0x40d   :  { %v449_v37 = vpop.f32.mrb[5].mxu1  ;;  %v458_v42 = vadd.f32 %v632_v5, %v594_v28 }
 0x40e   :  { %v450_v38 = vadd.f32 %v594_v28, %v449_v37  ;;  %v633_v39 = vpop.f32.mrb[6].mxu1 }
 0x40f   :  { %v452_v40 = vpop.f32.mrb[7].mxu1  ;;  %v461_v43 = vadd.f32 %v633_v39, %v594_v28 }
 0x410   :  { %468 = vxpose.xlu1.b32.cont [5/8] (short) (narrow) %v450_v38, 8  ;;  %v453_v41 = vadd.f32 %v594_v28, %v452_v40 }
 0x414   :  { %469 = vxpose.xlu1.b32.cont [6/8] (short) (narrow) %v453_v41, 8 }
 0x418   :  { %470 = vxpose.xlu1.b32.cont [7/8] (short) (narrow) %v458_v42, 8 }
 0x41c   :  { %471 = vxpose.xlu1.b32.end [8/8] (short) (narrow) %v461_v43, 8 }
 0x480   :  { %v480_v15 = vpop.trf.xlu1 }
 0x481   :  { %497 = vrot.lane.b32.xlu0 %v480_v15, %s665_s6  ;;  %v500_v45 = vcombine.high %v480_v15, %v666_v44  ;;  %v507_v47 = vrot.slane %v480_v15, %v755_v20 }
 0x483   :  { %v514_v27 = vrot.slane %v500_v45, %v755_v20 }
 0x4f3   :  { %v498_v46 = vpop.permute.xlu0 %497 }
 0x4f4   :  { %v515_v22 = vcombine.high %v498_v46, %v666_v44  ;;  %v522_v48 = vrot.slane %v498_v46, %v755_v20 }
 0x4f6   :  { %v529_v32 = vrot.slane %v515_v22, %v755_v20  ;;  %v530_v49 = vcombine.low %v507_v47, %v522_v48  ;;  %v531_v50 = vcombine.high %v507_v47, %v522_v48 }
 0x4f8   :  { %v538_v51 = vrot.slane %v530_v49, %v757_v21  ;;  %v545_v53 = vrot.slane %v531_v50, %v757_v21  ;;  %v546_v54 = vcombine.low %v514_v27, %v529_v32  ;;  %v547_v55 = vcombine.high %v514_v27, %v529_v32 }
 0x4fa   :  { %v554_v57 = vrot.slane %v546_v54, %v757_v21  ;;  %v561_v58 = vrot.slane %v547_v55, %v757_v21  ;;  %v562_v59 = vcombine.high %v538_v51, %v666_v44  ;;  %v563_v60 = vcombine.high %v545_v53, %v666_v44 }
 0x4fb   :  { %v566_v62 = vadd.f32 %v538_v51, %v710_v1  ;;  %v568_v63 = vadd.f32 %v545_v53, %v720_v3 }
 0x4fc   :  { %v564_v20 = vcombine.high %v554_v57, %v666_v44  ;;  %v565_v0 = vcombine.high %v561_v58, %v666_v44  ;;  %v567_v4 = vadd.f32 %v562_v59, %v715_v2  ;;  %v569_v52 = vadd.f32 %v563_v60, %v725_v8 }
 0x4fd   :  { %v570_v6 = vadd.f32 %v554_v57, %v730_v9  ;;  %v572_v7 = vadd.f32 %v561_v58, %v742_v12  ;;  %575 = vst.msk [vmem:[%s906_s7] sm:$0x3] %vm574_vm3, %v566_v62  ;;  %577 = vst.msk [vmem:[%s906_s7 + $0x4] sm:$0x3] %vm574_vm3, %v568_v63 }
 0x4fe   :  { %v571_v1 = vadd.f32 %v564_v20, %v735_v10  ;;  %v573_v2 = vadd.f32 %v565_v0, %v747_v13  ;;  %576 = vst.msk [vmem:[%s906_s7 + $0x2] sm:$0x3] %vm574_vm3, %v567_v4  ;;  %578 = vst.msk [vmem:[%s906_s7 + $0x6] sm:$0x3] %vm574_vm3, %v569_v52 }
 0x4ff   :  { %579 = vst.msk [vmem:[%s906_s7 + $0x8] sm:$0x3] %vm574_vm3, %v570_v6  ;;  %581 = vst.msk [vmem:[%s906_s7 + $0xc] sm:$0x3] %vm574_vm3, %v572_v7 }
 0x500   :  { %580 = vst.msk [vmem:[%s906_s7 + $0xa] sm:$0x3] %vm574_vm3, %v571_v1  ;;  %582 = vst.msk [vmem:[%s906_s7 + $0xe] sm:$0x3] %vm574_vm3, %v573_v2 }

// kernel: samba_forward.31
= control target key start
LH: loop header
LB: loop body
LE: loop exit
PB: predicated region body
PF: predicated region fallthrough
CT: control target
= control target key end

     0   :  { %v3533_v3 = vmov 0.0   ;;  %v3534_v17 = vmov 1983009808   ;;  %v147_v19 = vlaneseq  ;;  %vm176_vm0 = vcmask 523264   ;;  %s5038_s6 = inlined_call_operand.vmem [shape: f32[64,1024], index: 6, kind: input, shape index: {}]   ;;  %s5039_s1 = inlined_call_operand.vmem [shape: f32[8,2,64], index: 1, kind: input, shape index: {}]   ;;  %s5040_s0 = inlined_call_operand.vmem [shape: f32[8,2,64], index: 0, kind: input, shape index: {}]   ;;  %s5041_s7 = inlined_call_operand.vmem [shape: f32[16,1024], index: 7, kind: input, shape index: {}]   ;;  %s5042_s2 = inlined_call_operand.vmem [shape: f32[8,2,16], index: 2, kind: input, shape index: {}]   ;;  %s5043_s3 = inlined_call_operand.vmem [shape: f32[8,2,16], index: 3, kind: input, shape index: {}]   ;;  %s5044_s8 = inlined_call_operand.vmem [shape: f32[1024,64], index: 8, kind: input, shape index: {}]   ;;  %s5045_s4 = inlined_call_operand.vmem [shape: f32[1,1024], index: 4, kind: input, shape index: {}]   ;;  %s5046_s5 = inlined_call_operand.vmem [shape: f32[1,64], index: 5, kind: input, shape index: {}]   ;;  %s5047_s9 = inlined_call_operand.vmem [shape: f32[8,2,64], index: 9, kind: output, shape index: {}]  }
   0x1   :  { %v71_v0 = vld [vmem:[%s5038_s6 + $0x8] sm:$0xff]  ;;  %v73_v2 = vld [vmem:[%s5038_s6 + $0x18] sm:$0xff]  ;;  %245 = vmatprep.mubr.f32.mxu0 %v3533_v3  ;;  %322 = vmatprep.mubr.f32.mxu1 %v3533_v3  ;;  %v70_v6 = vld [vmem:[%s5038_s6] sm:$0xff]  ;;  %v145_v18 = vunpack.c.l.s4 %v3534_v17  ;;  %vm909_vm1 = vcmask 130048   ;;  %vm3005_vm2 = vcmask 517120  }
   0x2   :  { %v79_v1 = vld [vmem:[%s5038_s6 + $0x48] sm:$0xff]  ;;  %v81_v5 = vld [vmem:[%s5038_s6 + $0x58] sm:$0xff]  ;;  %v78_v7 = vld [vmem:[%s5038_s6 + $0x40] sm:$0xff]  ;;  %v3685_v39 = vshrl.u32 %v147_v19, 7 }
   0x3   :  { %v3596_v4 = vpack.c.bf16 %v79_v1, %v71_v0  ;;  %v3607_v8 = vpack.c.bf16 %v81_v5, %v73_v2  ;;  %v3609_v9 = vpack.c.bf16 %v78_v7, %v70_v6  ;;  %v72_v10 = vld [vmem:[%s5038_s6 + $0x10] sm:$0xff]  ;;  %v87_v12 = vld [vmem:[%s5038_s6 + $0x88] sm:$0xff]  ;;  %v89_v15 = vld [vmem:[%s5038_s6 + $0x98] sm:$0xff]  ;;  %v146_v38 = vunpack.c.0.s8 %v145_v18 }
   0x4   :  { %v80_v11 = vld [vmem:[%s5038_s6 + $0x50] sm:$0xff]  ;;  %v95_v14 = vld [vmem:[%s5038_s6 + $0xc8] sm:$0xff]  ;;  %v97_v16 = vld [vmem:[%s5038_s6 + $0xd8] sm:$0xff] }
   0x5   :  { %3204 = vmatprep.subr.bf16.mxu0 %v3596_v4  ;;  %v3621_v13 = vpack.c.bf16 %v80_v11, %v72_v10  ;;  %3220 = vmatprep.subr.bf16.mxu1 %v3607_v8  ;;  %v3634_v20 = vpack.c.bf16 %v95_v14, %v87_v12  ;;  %v3636_v21 = vpack.c.bf16 %v97_v16, %v89_v15  ;;  %v86_v22 = vld [vmem:[%s5038_s6 + $0x80] sm:$0xff]  ;;  %v88_v24 = vld [vmem:[%s5038_s6 + $0x90] sm:$0xff]  ;;  %v103_v27 = vld [vmem:[%s5038_s6 + $0x108] sm:$0xff] }
   0x6   :  { %3206 = vmatpush1.bf16.msra.mxu0 %v3609_v9  ;;  %v94_v23 = vld [vmem:[%s5038_s6 + $0xc0] sm:$0xff]  ;;  %v96_v26 = vld [vmem:[%s5038_s6 + $0xd0] sm:$0xff]  ;;  %v111_v28 = vld [vmem:[%s5038_s6 + $0x148] sm:$0xff]  ;;  %v3724_v52 = vsub.s32 %v146_v38, %v3685_v39 }
   0x7   :  { %3222 = vmatpush1.bf16.msra.mxu1 %v3621_v13  ;;  %v3648_v25 = vpack.c.bf16 %v94_v23, %v86_v22  ;;  %3208 = vmatprep.subr.bf16.mxu0 %v3634_v20  ;;  %v3661_v29 = vpack.c.bf16 %v96_v26, %v88_v24  ;;  %v3663_v30 = vpack.c.bf16 %v111_v28, %v103_v27  ;;  %v105_v31 = vld [vmem:[%s5038_s6 + $0x118] sm:$0xff]  ;;  %v102_v33 = vld [vmem:[%s5038_s6 + $0x100] sm:$0xff]  ;;  %v104_v36 = vld [vmem:[%s5038_s6 + $0x110] sm:$0xff] }
   0x8   :  { %3224 = vmatprep.subr.bf16.mxu1 %v3636_v21  ;;  %v113_v32 = vld [vmem:[%s5038_s6 + $0x158] sm:$0xff]  ;;  %v110_v35 = vld [vmem:[%s5038_s6 + $0x140] sm:$0xff]  ;;  %v112_v37 = vld [vmem:[%s5038_s6 + $0x150] sm:$0xff]  ;;  %5086 = vst [vmem:[#allocation7_spill] sm:$0xff] %v3724_v52 }
   0x9   :  { %v3674_v34 = vpack.c.bf16 %v113_v32, %v105_v31  ;;  %v3688_v40 = vpack.c.bf16 %v110_v35, %v102_v33  ;;  %v119_v41 = vld [vmem:[%s5038_s6 + $0x188] sm:$0xff]  ;;  %v121_v43 = vld [vmem:[%s5038_s6 + $0x198] sm:$0xff]  ;;  %v3701_v44 = vpack.c.bf16 %v112_v37, %v104_v36  ;;  %v118_v47 = vld [vmem:[%s5038_s6 + $0x180] sm:$0xff] }
   0xa   :  { %3210 = vmatpush1.bf16.msra.mxu0 %v3648_v25  ;;  %v127_v42 = vld [vmem:[%s5038_s6 + $0x1c8] sm:$0xff]  ;;  %v129_v46 = vld [vmem:[%s5038_s6 + $0x1d8] sm:$0xff]  ;;  %v126_v48 = vld [vmem:[%s5038_s6 + $0x1c0] sm:$0xff] }
   0xb   :  { %3226 = vmatpush1.bf16.msra.mxu1 %v3661_v29  ;;  %3212 = vmatprep.subr.bf16.mxu0 %v3663_v30  ;;  %v3703_v45 = vpack.c.bf16 %v127_v42, %v119_v41  ;;  %v3715_v49 = vpack.c.bf16 %v129_v46, %v121_v43  ;;  %v120_v50 = vld [vmem:[%s5038_s6 + $0x190] sm:$0xff]  ;;  %v3727_v53 = vpack.c.bf16 %v126_v48, %v118_v47  ;;  %v3732_v54 = vld [vmem:[%s5039_s1] sm:$0x3]  ;;  %v3737_v55 = vld [vmem:[%s5039_s1 + $0x2] sm:$0x3] }
   0xc   :  { %3228 = vmatprep.subr.bf16.mxu1 %v3674_v34  ;;  %v128_v51 = vld [vmem:[%s5038_s6 + $0x1d0] sm:$0xff]  ;;  %v3742_v56 = vld [vmem:[%s5039_s1 + $0x4] sm:$0x3]  ;;  %v3751_v58 = vld [vmem:[%s5039_s1 + $0x6] sm:$0x3]  ;;  %v142_v59 = vcombine.low %v3732_v54, %v3737_v55 }
   0xd   :  { %v3746_v57 = vpack.c.bf16 %v128_v51, %v120_v50  ;;  %v75_v60 = vld [vmem:[%s5038_s6 + $0x28] sm:$0xff]  ;;  %v143_v62 = vcombine.low %v3742_v56, %v3751_v58  ;;  %v77_v0 = vld [vmem:[%s5038_s6 + $0x38] sm:$0xff]  ;;  %v74_v2 = vld [vmem:[%s5038_s6 + $0x20] sm:$0xff] }
   0xe   :  { %3214 = vmatpush1.bf16.msra.mxu0 %v3688_v40  ;;  %v83_v61 = vld [vmem:[%s5038_s6 + $0x68] sm:$0xff]  ;;  %v85_v1 = vld [vmem:[%s5038_s6 + $0x78] sm:$0xff]  ;;  %v150_v5 = vrot.slane %v142_v59, %v3724_v52  ;;  %v82_v7 = vld [vmem:[%s5038_s6 + $0x60] sm:$0xff] }
   0xf   :  { %3230 = vmatpush1.bf16.msra.mxu1 %v3701_v44  ;;  %3216 = vmatprep.subr.bf16.mxu0 %v3703_v45  ;;  %v3764_v63 = vpack.c.bf16 %v83_v61, %v75_v60  ;;  %v3776_v6 = vpack.c.bf16 %v85_v1, %v77_v0  ;;  %v76_v10 = vld [vmem:[%s5038_s6 + $0x30] sm:$0xff]  ;;  %v157_v12 = vrot.slane %v143_v62, %v3724_v52  ;;  %v91_v14 = vld [vmem:[%s5038_s6 + $0xa8] sm:$0xff]  ;;  %v93_v16 = vld [vmem:[%s5038_s6 + $0xb8] sm:$0xff] }
  0x10   :  { %3232 = vmatprep.subr.bf16.mxu1 %v3715_v49  ;;  %v84_v11 = vld [vmem:[%s5038_s6 + $0x70] sm:$0xff]  ;;  %v99_v15 = vld [vmem:[%s5038_s6 + $0xe8] sm:$0xff]  ;;  %v3800_v17 = vpack.c.bf16 %v82_v7, %v74_v2  ;;  %v101_v19 = vld [vmem:[%s5038_s6 + $0xf8] sm:$0xff] }
  0x11   :  { %v3802_v18 = vpack.c.bf16 %v84_v11, %v76_v10  ;;  %v90_v22 = vld [vmem:[%s5038_s6 + $0xa0] sm:$0xff]  ;;  %v3813_v24 = vcombine.low %v150_v5, %v157_v12  ;;  %v3816_v26 = vpack.c.bf16 %v99_v15, %v91_v14  ;;  %v3818_v27 = vpack.c.bf16 %v101_v19, %v93_v16  ;;  %v92_v28 = vld [vmem:[%s5038_s6 + $0xb0] sm:$0xff]  ;;  %v107_v32 = vld [vmem:[%s5038_s6 + $0x128] sm:$0xff] }
  0x12   :  { %3218 = vmatpush1.bf16.msra.mxu0 %v3727_v53  ;;  %v98_v23 = vld [vmem:[%s5038_s6 + $0xe0] sm:$0xff]  ;;  %v100_v31 = vld [vmem:[%s5038_s6 + $0xf0] sm:$0xff]  ;;  %v115_v33 = vld [vmem:[%s5038_s6 + $0x168] sm:$0xff] }
  0x13   :  { %3234 = vmatpush1.bf16.msra.mxu1 %v3746_v57  ;;  %3236 = vmatprep.subr.bf16.mxu0 %v3764_v63  ;;  %v109_v35 = vld [vmem:[%s5038_s6 + $0x138] sm:$0xff]  ;;  %v106_v37 = vld [vmem:[%s5038_s6 + $0x120] sm:$0xff]  ;;  %v3850_v41 = vpack.c.bf16 %v98_v23, %v90_v22  ;;  %v3852_v42 = vpack.c.bf16 %v100_v31, %v92_v28  ;;  %v108_v43 = vld [vmem:[%s5038_s6 + $0x130] sm:$0xff]  ;;  %v3869_v48 = vpack.c.bf16 %v115_v33, %v107_v32 }
  0x14   :  { %3252 = vmatprep.subr.bf16.mxu1 %v3776_v6  ;;  %v117_v36 = vld [vmem:[%s5038_s6 + $0x178] sm:$0xff]  ;;  %v114_v38 = vld [vmem:[%s5038_s6 + $0x160] sm:$0xff]  ;;  %v3860_v46 = vld [vmem:[%s5039_s1 + $0x8] sm:$0x3] }
  0x15   :  { %3018 = vmatmul.mubr.msk.f32.vlgmr.msra.gmra.mrb[0].mxu0 %vm176_vm0, %v3813_v24  ;;  %v3865_v47 = vld [vmem:[%s5039_s1 + $0xa] sm:$0x3]  ;;  %v3871_v50 = vpack.c.bf16 %v117_v36, %v109_v35  ;;  %v116_v51 = vld [vmem:[%s5038_s6 + $0x170] sm:$0xff]  ;;  %v3879_v59 = vld [vmem:[%s5039_s1 + $0xc] sm:$0x3]  ;;  %v3907_v10 = vpack.c.bf16 %v114_v38, %v106_v37 }
  0x16   :  { %3020 = vmatmul.mubr.msk.f32.vlgmr.msra.gmra.mrb[0].mxu1 %vm176_vm0, %v3813_v24  ;;  %3238 = vmatpush1.bf16.msra.mxu0 %v3800_v17  ;;  %v3884_v60 = vld [vmem:[%s5039_s1 + $0xe] sm:$0x3]  ;;  %v159_v61 = vcombine.low %v3860_v46, %v3865_v47  ;;  %v125_v5 = vld [vmem:[%s5038_s6 + $0x1b8] sm:$0xff]  ;;  %v3909_v11 = vpack.c.bf16 %v116_v51, %v108_v43  ;;  %v122_v14 = vld [vmem:[%s5038_s6 + $0x1a0] sm:$0xff] }
  0x17   :  { %3254 = vmatpush1.bf16.msra.mxu1 %v3802_v18  ;;  %3240 = vmatprep.subr.bf16.mxu0 %v3816_v26  ;;  %v160_v62 = vcombine.low %v3879_v59, %v3884_v60  ;;  %v123_v0 = vld [vmem:[%s5038_s6 + $0x1a8] sm:$0xff]  ;;  %v133_v7 = vld [vmem:[%s5038_s6 + $0x1f8] sm:$0xff]  ;;  %v130_v16 = vld [vmem:[%s5038_s6 + $0x1e0] sm:$0xff] }
  0x18   :  { %3256 = vmatprep.subr.bf16.mxu1 %v3818_v27  ;;  %251 = vmatprep.mubr.f32.mxu0 %v3533_v3  ;;  %v131_v1 = vld [vmem:[%s5038_s6 + $0x1e8] sm:$0xff]  ;;  %v167_v2 = vrot.slane %v159_v61, %v3724_v52  ;;  %v124_v19 = vld [vmem:[%s5038_s6 + $0x1b0] sm:$0xff]  ;;  %v3928_v28 = vpack.c.bf16 %v133_v7, %v125_v5  ;;  %v3932_v31 = vpack.c.bf16 %v130_v16, %v122_v14  ;;  %v38_v33 = vld [vmem:[%s5040_s0] sm:$0x3] }
  0x19   :  { %328 = vmatprep.mubr.f32.mxu1 %v3533_v3  ;;  %v174_v12 = vrot.slane %v160_v62, %v3724_v52  ;;  %v3917_v15 = vpack.c.bf16 %v131_v1, %v123_v0  ;;  %v132_v22 = vld [vmem:[%s5038_s6 + $0x1f0] sm:$0xff]  ;;  %v39_v35 = vld [vmem:[%s5040_s0 + $0x2] sm:$0x3]  ;;  %v40_v36 = vld [vmem:[%s5040_s0 + $0x4] sm:$0x3]  ;;  %v489_v38 = vmul.f32 %v3732_v54, %v38_v33 }
  0x1a   :  { %3242 = vmatpush1.bf16.msra.mxu0 %v3850_v41  ;;  %v3934_v32 = vpack.c.bf16 %v132_v22, %v124_v19  ;;  %v41_v37 = vld [vmem:[%s5040_s0 + $0x6] sm:$0x3]  ;;  %v490_v43 = vmul.f32 %v3737_v55, %v39_v35  ;;  %v491_v51 = vmul.f32 %v3742_v56, %v40_v36  ;;  %v44_v54 = vld [vmem:[%s5040_s0 + $0xc] sm:$0x3]  ;;  %v45_v55 = vld [vmem:[%s5040_s0 + $0xe] sm:$0x3] }
  0x1b   :  { %3258 = vmatpush1.bf16.msra.mxu1 %v3852_v42  ;;  %3244 = vmatprep.subr.bf16.mxu0 %v3869_v48  ;;  %v175_v23 = vcombine.low %v167_v2, %v174_v12  ;;  %v492_v61 = vmul.f32 %v3751_v58, %v41_v37  ;;  %v58_v0 = vld [vmem:[%s5042_s2 + $0x8] sm:$0x3]  ;;  %v858_v1 = vld [vmem:[%s5041_s7 + $0x38] sm:$0xff]  ;;  %v59_v7 = vld [vmem:[%s5042_s2 + $0xa] sm:$0x3] }
  0x1c   :  { %3260 = vmatprep.subr.bf16.mxu1 %v3871_v50  ;;  %v505_v56 = vcombine.low %v489_v38, %v490_v43  ;;  %v866_v2 = vld [vmem:[%s5041_s7 + $0x78] sm:$0xff]  ;;  %v892_v22 = vcombine.low %v58_v0, %v59_v7  ;;  %v865_v33 = vld [vmem:[%s5041_s7 + $0x70] sm:$0xff] }
  0x1d   :  { %3019 = vmatmul.mubr.msk.f32.gmra.mrb[2].mxu0 %vm176_vm0, %v175_v23  ;;  %3021 = vmatmul.mubr.msk.f32.gmra.mrb[2].mxu1 %vm176_vm0, %v175_v23  ;;  %v3343_v16 = vpack.c.bf16 %v866_v2, %v858_v1  ;;  %v2488_v2 = vld [vmem:[%s5044_s8 + $0x110] sm:$0xff] }
  0x1e   :  { %3246 = vmatpush1.bf16.msra.mxu0 %v3907_v10  ;;  %399 = vmatprep.mubr.f32.mxu0 %v3533_v3  ;;  %v900_v36 = vrot.slane %v892_v22, %v3724_v52 }
  0x1f   :  { %3262 = vmatpush1.bf16.msra.mxu1 %v3909_v11  ;;  %3248 = vmatprep.subr.bf16.mxu0 %v3917_v15 }
  0x20   :  { %3264 = vmatprep.subr.bf16.mxu1 %v3928_v28  ;;  %476 = vmatprep.mubr.f32.mxu1 %v3533_v3 }
  0x22   :  { %3250 = vmatpush1.bf16.msra.mxu0 %v3932_v31 }
  0x23   :  { %3266 = vmatpush1.bf16.msra.mxu1 %v3934_v32  ;;  %3268 = vmatprep.subr.bf16.mxu0 %v3596_v4  ;;  %v42_v4 = vld [vmem:[%s5040_s0 + $0x8] sm:$0x3] }
  0x24   :  { %3284 = vmatprep.subr.bf16.mxu1 %v3607_v8  ;;  %v43_v8 = vld [vmem:[%s5040_s0 + $0xa] sm:$0x3] }
  0x25   :  { %3022 = vmatmul.mubr.msk.f32.vlgmr.msra.gmra.mrb[4].mxu0 %vm176_vm0, %v3813_v24  ;;  %v494_v58 = vmul.f32 %v3865_v47, %v43_v8  ;;  %v64_v8 = vld [vmem:[%s5043_s3 + $0x4] sm:$0x3] }
  0x26   :  { %3024 = vmatmul.mubr.msk.f32.vlgmr.msra.gmra.mrb[4].mxu1 %vm176_vm0, %v3813_v24  ;;  %3270 = vmatpush1.bf16.msra.mxu0 %v3609_v9  ;;  %v506_v9 = vcombine.low %v491_v51, %v492_v61  ;;  %v495_v24 = vmul.f32 %v3879_v59, %v44_v54  ;;  %v62_v61 = vld [vmem:[%s5043_s3] sm:$0x3]  ;;  %v65_v54 = vld [vmem:[%s5043_s3 + $0x6] sm:$0x3] }
  0x27   :  { %3286 = vmatpush1.bf16.msra.mxu1 %v3621_v13  ;;  %3272 = vmatprep.subr.bf16.mxu0 %v3634_v20  ;;  %v493_v13 = vmul.f32 %v3860_v46, %v42_v4  ;;  %v496_v20 = vmul.f32 %v3884_v60, %v45_v55  ;;  %v864_v60 = vld [vmem:[%s5041_s7 + $0x68] sm:$0xff]  ;;  %v63_v4 = vld [vmem:[%s5043_s3 + $0x2] sm:$0x3] }
  0x28   :  { %3288 = vmatprep.subr.bf16.mxu1 %v3636_v21  ;;  %405 = vmatprep.mubr.f32.mxu0 %v3533_v3  ;;  %v513_v21 = vrot.slane %v505_v56, %v3724_v52  ;;  %v520_v46 = vrot.slane %v506_v9, %v3724_v52  ;;  %v1230_v55 = vcombine.low %v62_v61, %v63_v4  ;;  %v66_v9 = vld [vmem:[%s5043_s3 + $0x8] sm:$0x3] }
  0x29   :  { %482 = vmatprep.mubr.f32.mxu1 %v3533_v3  ;;  %3023 = vmatmul.mubr.msk.f32.gmra.mrb[6].mxu0 %vm176_vm0, %v175_v23  ;;  %v522_v47 = vcombine.low %v493_v13, %v494_v58  ;;  %v523_v59 = vcombine.low %v495_v24, %v496_v20  ;;  %v1231_v56 = vcombine.low %v64_v8, %v65_v54  ;;  %v67_v13 = vld [vmem:[%s5043_s3 + $0xa] sm:$0x3]  ;;  %v68_v58 = vld [vmem:[%s5043_s3 + $0xc] sm:$0x3]  ;;  %v69_v24 = vld [vmem:[%s5043_s3 + $0xe] sm:$0x3] }
  0x2a   :  { %3025 = vmatmul.mubr.msk.f32.gmra.mrb[6].mxu1 %vm176_vm0, %v175_v23  ;;  %3274 = vmatpush1.bf16.msra.mxu0 %v3648_v25  ;;  %v4002_v25 = vcombine.low %v513_v21, %v520_v46  ;;  %v1247_v20 = vcombine.low %v66_v9, %v67_v13  ;;  %v1238_v21 = vrot.slane %v1230_v55, %v3724_v52  ;;  %v2492_v8 = vld [vmem:[%s5044_s8 + $0x130] sm:$0xff]  ;;  %v2493_v54 = vld [vmem:[%s5044_s8 + $0x138] sm:$0xff]  ;;  %v2479_v9 = vld [vmem:[%s5044_s8 + $0xc8] sm:$0xff] }
  0x2b   :  { %3290 = vmatpush1.bf16.msra.mxu1 %v3661_v29  ;;  %3276 = vmatprep.subr.bf16.mxu0 %v3663_v30  ;;  %v530_v29 = vrot.slane %v522_v47, %v3724_v52  ;;  %v537_v30 = vrot.slane %v523_v59, %v3724_v52  ;;  %v1245_v46 = vrot.slane %v1231_v56, %v3724_v52  ;;  %v2478_v56 = vld [vmem:[%s5044_s8 + $0xc0] sm:$0xff] }
  0x2c   :  { %3292 = vmatprep.subr.bf16.mxu1 %v3674_v34  ;;  %607 = vmatprep.mubr.f32.mxu0 %v3533_v3  ;;  %v1248_v47 = vcombine.low %v68_v58, %v69_v24  ;;  %v3409_v55 = vpack.c.bf16 %v2493_v54, %v2492_v8  ;;  %v2510_v13 = vld [vmem:[%s5044_s8 + $0x1c0] sm:$0xff]  ;;  %v1580_v58 = vsub.s32 0, %v3685_v39  ;;  %v1588_v24 = vsub.s32 2, %v3685_v39  ;;  %v2485_v8 = vld [vmem:[%s5044_s8 + $0xf8] sm:$0xff] }
  0x2d   :  { %684 = vmatprep.mubr.f32.mxu1 %v3533_v3  ;;  %v4014_v34 = vcombine.low %v530_v29, %v537_v30  ;;  %v1246_v59 = vcombine.low %v1238_v21, %v1245_v46  ;;  %v2511_v21 = vld [vmem:[%s5044_s8 + $0x1c8] sm:$0xff]  ;;  %v2462_v46 = vld [vmem:[%s5044_s8 + $0x40] sm:$0xff] }
  0x2e   :  { %3278 = vmatpush1.bf16.msra.mxu0 %v3688_v40  ;;  %v852_v40 = vld [vmem:[%s5041_s7 + $0x8] sm:$0xff]  ;;  %v1262_v29 = vrot.slane %v1248_v47, %v3724_v52 }
  0x2f   :  { %3294 = vmatpush1.bf16.msra.mxu1 %v3701_v44  ;;  %3280 = vmatprep.subr.bf16.mxu0 %v3703_v45  ;;  %v860_v44 = vld [vmem:[%s5041_s7 + $0x48] sm:$0xff]  ;;  %v854_v45 = vld [vmem:[%s5041_s7 + $0x18] sm:$0xff] }
  0x30   :  { %3296 = vmatprep.subr.bf16.mxu1 %v3715_v49  ;;  %v862_v49 = vld [vmem:[%s5041_s7 + $0x58] sm:$0xff]  ;;  %v2463_v47 = vld [vmem:[%s5044_s8 + $0x48] sm:$0xff] }
  0x32   :  { %3282 = vmatpush1.bf16.msra.mxu0 %v3727_v53  ;;  %v54_v53 = vld [vmem:[%s5042_s2] sm:$0x3] }
  0x33   :  { %3298 = vmatpush1.bf16.msra.mxu1 %v3746_v57  ;;  %3300 = vmatprep.subr.bf16.mxu0 %v3764_v63  ;;  %v55_v57 = vld [vmem:[%s5042_s2 + $0x2] sm:$0x3]  ;;  %v56_v63 = vld [vmem:[%s5042_s2 + $0x4] sm:$0x3] }
  0x34   :  { %3316 = vmatprep.subr.bf16.mxu1 %v3776_v6  ;;  %v57_v6 = vld [vmem:[%s5042_s2 + $0x6] sm:$0x3] }
  0x35   :  { %3026 = vmatmul.mubr.msk.f32.vlgmr.msra.gmra.mrb[8].mxu0 %vm176_vm0, %v4002_v25  ;;  %v876_v62 = vcombine.low %v56_v63, %v57_v6 }
  0x36   :  { %3028 = vmatmul.mubr.msk.f32.vlgmr.msra.gmra.mrb[8].mxu1 %vm176_vm0, %v4002_v25  ;;  %3302 = vmatpush1.bf16.msra.mxu0 %v3800_v17  ;;  %v3331_v17 = vpack.c.bf16 %v860_v44, %v852_v40  ;;  %v2471_v40 = vld [vmem:[%s5044_s8 + $0x88] sm:$0xff]  ;;  %v2502_v44 = vld [vmem:[%s5044_s8 + $0x180] sm:$0xff] }
  0x37   :  { %3318 = vmatpush1.bf16.msra.mxu1 %v3802_v18  ;;  %3304 = vmatprep.subr.bf16.mxu0 %v3816_v26  ;;  %v851_v18 = vld [vmem:[%s5041_s7] sm:$0xff]  ;;  %v890_v19 = vrot.slane %v876_v62, %v3724_v52  ;;  %v2457_v62 = vld [vmem:[%s5044_s8 + $0x18] sm:$0xff] }
  0x38   :  { %3320 = vmatprep.subr.bf16.mxu1 %v3818_v27  ;;  %613 = vmatprep.mubr.f32.mxu0 %v3533_v3  ;;  %v859_v26 = vld [vmem:[%s5041_s7 + $0x40] sm:$0xff]  ;;  %v3335_v27 = vpack.c.bf16 %v862_v49, %v854_v45  ;;  %v2503_v49 = vld [vmem:[%s5044_s8 + $0x188] sm:$0xff] }
  0x39   :  { %690 = vmatprep.mubr.f32.mxu1 %v3533_v3  ;;  %3027 = vmatmul.mubr.msk.f32.gmra.mrb[10].mxu0 %vm176_vm0, %v4014_v34  ;;  %v4089_v5 = vpack.c.bf16 %v859_v26, %v851_v18  ;;  %v3395_v63 = vpack.c.bf16 %v2503_v49, %v2502_v44  ;;  %v2487_v18 = vld [vmem:[%s5044_s8 + $0x108] sm:$0xff]  ;;  %v2480_v49 = vld [vmem:[%s5044_s8 + $0xd0] sm:$0xff] }
  0x3a   :  { %3029 = vmatmul.mubr.msk.f32.gmra.mrb[10].mxu1 %vm176_vm0, %v4014_v34  ;;  %3306 = vmatpush1.bf16.msra.mxu0 %v3850_v41  ;;  %v853_v41 = vld [vmem:[%s5041_s7 + $0x10] sm:$0xff]  ;;  %v2495_v44 = vld [vmem:[%s5044_s8 + $0x148] sm:$0xff] }
  0x3b   :  { %3322 = vmatpush1.bf16.msra.mxu1 %v3852_v42  ;;  %3308 = vmatprep.subr.bf16.mxu0 %v3869_v48  ;;  %v861_v42 = vld [vmem:[%s5041_s7 + $0x50] sm:$0xff]  ;;  %v875_v48 = vcombine.low %v54_v53, %v55_v57  ;;  %v2454_v53 = vld [vmem:[%s5044_s8] sm:$0xff]  ;;  %v2455_v57 = vld [vmem:[%s5044_s8 + $0x8] sm:$0xff] }
  0x3c   :  { %3324 = vmatprep.subr.bf16.mxu1 %v3871_v50  ;;  %761 = vmatprep.mubr.f32.mxu0 %v3533_v3  ;;  %v856_v50 = vld [vmem:[%s5041_s7 + $0x28] sm:$0xff]  ;;  %v3337_v12 = vpack.c.bf16 %v861_v42, %v853_v41  ;;  %v3365_v6 = vpack.c.bf16 %v2455_v57, %v2454_v53  ;;  %v2473_v41 = vld [vmem:[%s5044_s8 + $0x98] sm:$0xff]  ;;  %v2504_v42 = vld [vmem:[%s5044_s8 + $0x190] sm:$0xff] }
  0x3d   :  { %838 = vmatprep.mubr.f32.mxu1 %v3533_v3  ;;  %v883_v14 = vrot.slane %v875_v48, %v3724_v52  ;;  %v2481_v53 = vld [vmem:[%s5044_s8 + $0xd8] sm:$0xff]  ;;  %v2512_v57 = vld [vmem:[%s5044_s8 + $0x1d0] sm:$0xff] }
  0x3e   :  { %3310 = vmatpush1.bf16.msra.mxu0 %v3907_v10  ;;  %v60_v10 = vld [vmem:[%s5042_s2 + $0xc] sm:$0x3] }
  0x3f   :  { %3326 = vmatpush1.bf16.msra.mxu1 %v3909_v11  ;;  %3312 = vmatprep.subr.bf16.mxu0 %v3917_v15  ;;  %v61_v11 = vld [vmem:[%s5042_s2 + $0xe] sm:$0x3]  ;;  %v3339_v15 = vpack.c.bf16 %v864_v60, %v856_v50  ;;  %v891_v35 = vcombine.low %v883_v14, %v890_v19  ;;  %v2505_v50 = vld [vmem:[%s5044_s8 + $0x198] sm:$0xff]  ;;  %v2456_v60 = vld [vmem:[%s5044_s8 + $0x10] sm:$0xff] }
  0x40   :  { %3328 = vmatprep.subr.bf16.mxu1 %v3928_v28  ;;  %v893_v23 = vcombine.low %v60_v10, %v61_v11  ;;  %v855_v28 = vld [vmem:[%s5041_s7 + $0x20] sm:$0xff]  ;;  %v3399_v0 = vpack.c.bf16 %v2505_v50, %v2504_v42  ;;  %v3369_v1 = vpack.c.bf16 %v2457_v62, %v2456_v60  ;;  %v2475_v11 = vld [vmem:[%s5044_s8 + $0xa8] sm:$0xff]  ;;  %v2496_v60 = vld [vmem:[%s5044_s8 + $0x150] sm:$0xff] }
  0x41   :  { %v2474_v10 = vld [vmem:[%s5044_s8 + $0xa0] sm:$0xff]  ;;  %v2459_v19 = vld [vmem:[%s5044_s8 + $0x28] sm:$0xff]  ;;  %v2497_v62 = vld [vmem:[%s5044_s8 + $0x158] sm:$0xff] }
  0x42   :  { %3314 = vmatpush1.bf16.msra.mxu0 %v3932_v31  ;;  %v863_v31 = vld [vmem:[%s5041_s7 + $0x60] sm:$0xff]  ;;  %v907_v37 = vrot.slane %v893_v23, %v3724_v52  ;;  %v3371_v14 = vpack.c.bf16 %v2475_v11, %v2474_v10 }
  0x43   :  { %3330 = vmatpush1.bf16.msra.mxu1 %v3934_v32  ;;  %3332 = vmatprep.subr.bf16.mxu0 %v3331_v17  ;;  %v857_v32 = vld [vmem:[%s5041_s7 + $0x30] sm:$0xff]  ;;  %v3341_v38 = vpack.c.bf16 %v863_v31, %v855_v28  ;;  %v2490_v28 = vld [vmem:[%s5044_s8 + $0x120] sm:$0xff]  ;;  %v2491_v31 = vld [vmem:[%s5044_s8 + $0x128] sm:$0xff] }
  0x44   :  { %3336 = vmatprep.subr.bf16.mxu1 %v3335_v27  ;;  %v3345_v43 = vpack.c.bf16 %v865_v33, %v857_v32  ;;  %v908_v51 = vcombine.low %v900_v36, %v907_v37  ;;  %v3405_v32 = vpack.c.bf16 %v2491_v31, %v2490_v28  ;;  %v2476_v33 = vld [vmem:[%s5044_s8 + $0xb0] sm:$0xff]  ;;  %v2514_v10 = vld [vmem:[%s5044_s8 + $0x1e0] sm:$0xff] }
  0x45   :  { %3030 = vmatmul.mubr.msk.f32.vlgmr.msra.gmra.mrb[12].mxu0 %vm176_vm0, %v4002_v25  ;;  %v2508_v36 = vld [vmem:[%s5044_s8 + $0x1b0] sm:$0xff] }
  0x46   :  { %3032 = vmatmul.mubr.msk.f32.vlgmr.msra.gmra.mrb[12].mxu1 %vm176_vm0, %v4002_v25  ;;  %3334 = vmatpush1.bf16.msra.mxu0 %v4089_v5  ;;  %v1255_v25 = vrot.slane %v1247_v20, %v3724_v52  ;;  %v3379_v20 = vpack.c.bf16 %v2479_v9, %v2478_v56  ;;  %v2517_v56 = vld [vmem:[%s5044_s8 + $0x1f8] sm:$0xff]  ;;  %v2468_v9 = vld [vmem:[%s5044_s8 + $0x70] sm:$0xff] }
  0x47   :  { %767 = vmatprep.mubr.f32.mxu0 %v3533_v3  ;;  %844 = vmatprep.mubr.f32.mxu1 %v3533_v3 }
  0x48   :  { %3338 = vmatpush1.bf16.msra.mxu1 %v3337_v12  ;;  %3340 = vmatprep.subr.bf16.mxu0 %v3339_v15  ;;  %v1263_v30 = vcombine.low %v1255_v25, %v1262_v29  ;;  %v1584_v25 = vsub.s32 1, %v3685_v39  ;;  %v1592_v29 = vsub.s32 3, %v3685_v39 }
  0x49   :  { %3344 = vmatprep.subr.bf16.mxu1 %v3343_v16  ;;  %3031 = vmatmul.mubr.msk.f32.gmra.mrb[14].mxu0 %vm176_vm0, %v4014_v34 }
  0x4a   :  { %3033 = vmatmul.mubr.msk.f32.gmra.mrb[14].mxu1 %vm176_vm0, %v4014_v34  ;;  %978 = vmatprep.mubr.f32.mxu0 %v3533_v3  ;;  %v2470_v34 = vld [vmem:[%s5044_s8 + $0x80] sm:$0xff] }
  0x4b   :  { %1055 = vmatprep.mubr.f32.mxu1 %v3533_v3  ;;  %v3363_v45 = vpack.c.bf16 %v2471_v40, %v2470_v34  ;;  %v3381_v34 = vpack.c.bf16 %v2463_v47, %v2462_v46  ;;  %v2494_v40 = vld [vmem:[%s5044_s8 + $0x140] sm:$0xff] }
  0x4c   :  { %v2534_v47 = vld [vmem:[%s5044_s8 + $0x280] sm:$0xff] }
  0x4d   :  { %3034 = vmatmul.mubr.msk.f32.vlgmr.msra.gmra.mrb[16].mxu0 %vm909_vm1, %v891_v35 }
  0x4e   :  { %3036 = vmatmul.mubr.msk.f32.vlgmr.msra.gmra.mrb[16].mxu1 %vm909_vm1, %v891_v35  ;;  %984 = vmatprep.mubr.f32.mxu0 %v3533_v3 }
  0x4f   :  { %1061 = vmatprep.mubr.f32.mxu1 %v3533_v3  ;;  %3342 = vmatpush1.bf16.msra.mxu0 %v3341_v38 }
  0x50   :  { %3346 = vmatpush1.bf16.msra.mxu1 %v3345_v43  ;;  %3348 = vmatprep.subr.bf16.mxu0 %v3331_v17  ;;  %v2486_v17 = vld [vmem:[%s5044_s8 + $0x100] sm:$0xff] }
  0x51   :  { %3352 = vmatprep.subr.bf16.mxu1 %v3335_v27  ;;  %3035 = vmatmul.mubr.msk.f32.gmra.mrb[18].mxu0 %vm909_vm1, %v908_v51  ;;  %v3397_v26 = vpack.c.bf16 %v2487_v18, %v2486_v17  ;;  %v2472_v27 = vld [vmem:[%s5044_s8 + $0x90] sm:$0xff]  ;;  %v3383_v17 = vpack.c.bf16 %v2481_v53, %v2480_v49  ;;  %v2513_v18 = vld [vmem:[%s5044_s8 + $0x1d8] sm:$0xff]  ;;  %v1600_v49 = vsub.s32 5, %v3685_v39  ;;  %v1608_v53 = vsub.s32 7, %v3685_v39 }
  0x52   :  { %3037 = vmatmul.mubr.msk.f32.gmra.mrb[18].mxu1 %vm909_vm1, %v908_v51  ;;  %1132 = vmatprep.mubr.f32.mxu0 %v3533_v3  ;;  %v3367_v48 = vpack.c.bf16 %v2473_v41, %v2472_v27  ;;  %v2465_v27 = vld [vmem:[%s5044_s8 + $0x58] sm:$0xff] }
  0x53   :  { %1209 = vmatprep.mubr.f32.mxu1 %v3533_v3 }
  0x55   :  { %3038 = vmatmul.mubr.msk.f32.vlgmr.msra.gmra.mrb[20].mxu0 %vm909_vm1, %v891_v35 }
  0x56   :  { %3040 = vmatmul.mubr.msk.f32.vlgmr.msra.gmra.mrb[20].mxu1 %vm909_vm1, %v891_v35  ;;  %1138 = vmatprep.mubr.f32.mxu0 %v3533_v3  ;;  %v2477_v35 = vld [vmem:[%s5044_s8 + $0xb8] sm:$0xff] }
  0x57   :  { %1215 = vmatprep.mubr.f32.mxu1 %v3533_v3  ;;  %3350 = vmatpush1.bf16.msra.mxu0 %v4089_v5  ;;  %v2489_v5 = vld [vmem:[%s5044_s8 + $0x118] sm:$0xff]  ;;  %v3375_v37 = vpack.c.bf16 %v2477_v35, %v2476_v33  ;;  %v2498_v35 = vld [vmem:[%s5044_s8 + $0x160] sm:$0xff] }
  0x58   :  { %3354 = vmatpush1.bf16.msra.mxu1 %v3337_v12  ;;  %3356 = vmatprep.subr.bf16.mxu0 %v3339_v15  ;;  %v3401_v7 = vpack.c.bf16 %v2489_v5, %v2488_v2  ;;  %v2506_v12 = vld [vmem:[%s5044_s8 + $0x1a0] sm:$0xff]  ;;  %v2507_v15 = vld [vmem:[%s5044_s8 + $0x1a8] sm:$0xff] }
  0x59   :  { %3360 = vmatprep.subr.bf16.mxu1 %v3343_v16  ;;  %3039 = vmatmul.mubr.msk.f32.gmra.mrb[22].mxu0 %vm909_vm1, %v908_v51  ;;  %v2458_v16 = vld [vmem:[%s5044_s8 + $0x20] sm:$0xff]  ;;  %v3403_v22 = vpack.c.bf16 %v2507_v15, %v2506_v12 }
  0x5a   :  { %3041 = vmatmul.mubr.msk.f32.gmra.mrb[22].mxu1 %vm909_vm1, %v908_v51  ;;  %1332 = vmatprep.mubr.f32.mxu0 %v3533_v3  ;;  %v3373_v23 = vpack.c.bf16 %v2459_v19, %v2458_v16  ;;  %v2461_v51 = vld [vmem:[%s5044_s8 + $0x38] sm:$0xff]  ;;  %v2482_v5 = vld [vmem:[%s5044_s8 + $0xe0] sm:$0xff]  ;;  %v2515_v19 = vld [vmem:[%s5044_s8 + $0x1e8] sm:$0xff] }
  0x5b   :  { %1409 = vmatprep.mubr.f32.mxu1 %v3533_v3 }
  0x5d   :  { %3042 = vmatmul.mubr.msk.f32.vlgmr.msra.gmra.mrb[24].mxu0 %vm909_vm1, %v1246_v59 }
  0x5e   :  { %3044 = vmatmul.mubr.msk.f32.vlgmr.msra.gmra.mrb[24].mxu1 %vm909_vm1, %v1246_v59  ;;  %1338 = vmatprep.mubr.f32.mxu0 %v3533_v3 }
  0x5f   :  { %1415 = vmatprep.mubr.f32.mxu1 %v3533_v3  ;;  %3358 = vmatpush1.bf16.msra.mxu0 %v3341_v38  ;;  %v2509_v38 = vld [vmem:[%s5044_s8 + $0x1b8] sm:$0xff] }
  0x60   :  { %3362 = vmatpush1.bf16.msra.mxu1 %v3345_v43  ;;  %3364 = vmatprep.subr.bf16.mxu0 %v3363_v45  ;;  %v2460_v43 = vld [vmem:[%s5044_s8 + $0x30] sm:$0xff]  ;;  %v3407_v61 = vpack.c.bf16 %v2509_v38, %v2508_v36  ;;  %v3413_v45 = vpack.c.bf16 %v2495_v44, %v2494_v40  ;;  %v2499_v36 = vld [vmem:[%s5044_s8 + $0x168] sm:$0xff] }
  0x61   :  { %3043 = vmatmul.mubr.msk.f32.gmra.mrb[26].mxu0 %vm909_vm1, %v1263_v30  ;;  %3396 = vmatprep.subr.bf16.mxu1 %v3395_v63  ;;  %v3377_v4 = vpack.c.bf16 %v2461_v51, %v2460_v43  ;;  %v3421_v43 = vpack.c.bf16 %v2499_v36, %v2498_v35  ;;  %v2567_v44 = vld [vmem:[%s5044_s8 + $0x388] sm:$0xff] }
  0x62   :  { %3045 = vmatmul.mubr.msk.f32.gmra.mrb[26].mxu1 %vm909_vm1, %v1263_v30  ;;  %1486 = vmatprep.mubr.f32.mxu0 %v3533_v3 }
  0x63   :  { %1563 = vmatprep.mubr.f32.mxu1 %v3533_v3 }
  0x65   :  { %3046 = vmatmul.mubr.msk.f32.vlgmr.msra.gmra.mrb[28].mxu0 %vm909_vm1, %v1246_v59 }
  0x66   :  { %3048 = vmatmul.mubr.msk.f32.vlgmr.msra.gmra.mrb[28].mxu1 %vm909_vm1, %v1246_v59  ;;  %1492 = vmatprep.mubr.f32.mxu0 %v3533_v3  ;;  %v4307_v59 = vld [vmem:[%s5045_s4] sm:$0xff] }
  0x67   :  { %1569 = vmatprep.mubr.f32.mxu1 %v3533_v3  ;;  %3366 = vmatpush3.bf16.msra.mxu0 %v3365_v6  ;;  %v4327_v63 = vrot.slane %v4307_v59, %v1580_v58  ;;  %v4330_v6 = vrot.slane %v4307_v59, %v1588_v24  ;;  %v4342_v41 = vrot.slane %v4307_v59, %v1584_v25  ;;  %v2469_v58 = vld [vmem:[%s5044_s8 + $0x78] sm:$0xff]  ;;  %v2500_v24 = vld [vmem:[%s5044_s8 + $0x170] sm:$0xff]  ;;  %v2535_v25 = vld [vmem:[%s5044_s8 + $0x288] sm:$0xff] }
  0x68   :  { %3398 = vmatpush3.bf16.msra.mxu1 %v3397_v26  ;;  %3368 = vmatprep.subr.bf16.mxu0 %v3367_v48  ;;  %v2464_v26 = vld [vmem:[%s5044_s8 + $0x50] sm:$0xff]  ;;  %v4345_v42 = vrot.slane %v4307_v59, %v1592_v29  ;;  %v3415_v48 = vpack.c.bf16 %v2513_v18, %v2512_v57  ;;  %v2566_v29 = vld [vmem:[%s5044_s8 + $0x380] sm:$0xff]  ;;  %v3427_v40 = vpack.c.bf16 %v2535_v25, %v2534_v47 }
  0x69   :  { %3047 = vmatmul.mubr.msk.f32.gmra.mrb[30].mxu0 %vm909_vm1, %v1263_v30  ;;  %3400 = vmatprep.subr.bf16.mxu1 %v3399_v0  ;;  %v3385_v50 = vpack.c.bf16 %v2465_v27, %v2464_v26  ;;  %v3417_v0 = vpack.c.bf16 %v2497_v62, %v2496_v60  ;;  %v3459_v57 = vpack.c.bf16 %v2567_v44, %v2566_v29 }
  0x6a   :  { %3049 = vmatmul.mubr.msk.f32.gmra.mrb[30].mxu1 %vm909_vm1, %v1263_v30  ;;  %v3411_v30 = vpack.c.bf16 %v2511_v21, %v2510_v13  ;;  %v3393_v21 = vpack.c.bf16 %v2469_v58, %v2468_v9 }
  0x6b   :  { %3370 = vmatpush3.bf16.msra.mxu0 %v3369_v1 }
  0x6c   :  { %3402 = vmatpush3.bf16.msra.mxu1 %v3401_v7  ;;  %3372 = vmatprep.subr.bf16.mxu0 %v3371_v14  ;;  %v2483_v7 = vld [vmem:[%s5044_s8 + $0xe8] sm:$0xff] }
  0x6d   :  { %3404 = vmatprep.subr.bf16.mxu1 %v3403_v22  ;;  %v3387_v16 = vpack.c.bf16 %v2483_v7, %v2482_v5  ;;  %v2466_v22 = vld [vmem:[%s5044_s8 + $0x60] sm:$0xff]  ;;  %v1609_v5 = vrot.slane %v4307_v59, %v1608_v53 }
  0x6f   :  { %3374 = vmatpush3.bf16.msra.mxu0 %v3373_v23  ;;  %v2467_v23 = vld [vmem:[%s5044_s8 + $0x68] sm:$0xff] }
  0x70   :  { %3406 = vmatpush3.bf16.msra.mxu1 %v3405_v32  ;;  %3376 = vmatprep.subr.bf16.mxu0 %v3375_v37  ;;  %v3419_v32 = vpack.c.bf16 %v2515_v19, %v2514_v10  ;;  %v3389_v33 = vpack.c.bf16 %v2467_v23, %v2466_v22 }
  0x71   :  { %3408 = vmatprep.subr.bf16.mxu1 %v3407_v61 }
  0x73   :  { %3378 = vmatpush3.bf16.msra.mxu0 %v3377_v4  ;;  %v2484_v4 = vld [vmem:[%s5044_s8 + $0xf0] sm:$0xff] }
  0x74   :  { %3410 = vmatpush3.bf16.msra.mxu1 %v3409_v55  ;;  %3380 = vmatprep.subr.bf16.mxu0 %v3379_v20  ;;  %v3391_v54 = vpack.c.bf16 %v2485_v8, %v2484_v4  ;;  %v2516_v55 = vld [vmem:[%s5044_s8 + $0x1f0] sm:$0xff]  ;;  %v2501_v20 = vld [vmem:[%s5044_s8 + $0x178] sm:$0xff] }
  0x75   :  { %3412 = vmatprep.subr.bf16.mxu1 %v3411_v30  ;;  %v3423_v13 = vpack.c.bf16 %v2517_v56, %v2516_v55  ;;  %v3425_v46 = vpack.c.bf16 %v2501_v20, %v2500_v24  ;;  %v1596_v30 = vsub.s32 4, %v3685_v39 }
  0x77   :  { %3382 = vmatpush3.bf16.msra.mxu0 %v3381_v34  ;;  %v1604_v34 = vsub.s32 6, %v3685_v39 }
  0x78   :  { %3414 = vmatpush3.bf16.msra.mxu1 %v3413_v45  ;;  %3384 = vmatprep.subr.bf16.mxu0 %v3383_v17 }
  0x79   :  { %3416 = vmatprep.subr.bf16.mxu1 %v3415_v48 }
  0x7b   :  { %3386 = vmatpush3.bf16.msra.mxu0 %v3385_v50 }
  0x7c   :  { %3418 = vmatpush3.bf16.msra.mxu1 %v3417_v0  ;;  %3388 = vmatprep.subr.bf16.mxu0 %v3387_v16  ;;  %v1597_v0 = vrot.slane %v4307_v59, %v1596_v30 }
  0x7d   :  { %3420 = vmatprep.subr.bf16.mxu1 %v3419_v32 }
  0x7f   :  { %3390 = vmatpush3.bf16.msra.mxu0 %v3389_v33 }
  0x80   :  { %3422 = vmatpush3.bf16.msra.mxu1 %v3421_v43  ;;  %3392 = vmatprep.subr.bf16.mxu0 %v3391_v54 }
  0x81   :  { %3424 = vmatprep.subr.bf16.mxu1 %v3423_v13 }
  0x83   :  { %3394 = vmatpush3.bf16.msra.mxu0 %v3393_v21 }
  0x84   :  { %3426 = vmatpush3.bf16.msra.mxu1 %v3425_v46  ;;  %3428 = vmatprep.subr.bf16.mxu0 %v3427_v40 }
  0x85   :  { %3460 = vmatprep.subr.bf16.mxu1 %v3459_v57 }
  0xe8   :  { %v247_v1 = vpop.f32.mrb[0].mxu0 }
  0xe9   :  { %v324_v2 = vpop.f32.mrb[0].mxu1  ;;  %v1618_v11 = vmul.f32 %v4327_v63, %v247_v1  ;;  %v249_v12 = vpop.f32.mrb[1].mxu0  ;;  %v1605_v1 = vrot.slane %v4307_v59, %v1604_v34 }
  0xea   :  { %v1620_v14 = vmul.f32 %v4330_v6, %v324_v2  ;;  %v326_v15 = vpop.f32.mrb[1].mxu1  ;;  %v1619_v28 = vmul.f32 %v4342_v41, %v249_v12 }
  0xeb   :  { %v1621_v31 = vmul.f32 %v4345_v42, %v326_v15  ;;  %v1634_v37 = vmul.f32 1.442695, %v1618_v11 }
  0xec   :  { %v1638_v38 = vmul.f32 1.442695, %v1620_v14  ;;  %v1636_v51 = vmul.f32 1.442695, %v1619_v28 }
  0xed   :  { %v1640_v61 = vmul.f32 1.442695, %v1621_v31  ;;  %3493 = vpow2.f32 %v1634_v37 }
  0xee   :  { %3495 = vpow2.f32 %v1636_v51 }
  0xef   :  { %3497 = vpow2.f32 %v1638_v38 }
  0xf0   :  { %3499 = vpow2.f32 %v1640_v61  ;;  %v253_v45 = vpop.f32.mrb[2].mxu0  ;;  %v330_v26 = vpop.f32.mrb[2].mxu1 }
  0xf1   :  { %v1626_v17 = vmul.f32 %v4327_v63, %v253_v45  ;;  %v255_v18 = vpop.f32.mrb[3].mxu0  ;;  %v1628_v48 = vmul.f32 %v4330_v6, %v330_v26  ;;  %v332_v50 = vpop.f32.mrb[3].mxu1  ;;  %v1601_v63 = vrot.slane %v4307_v59, %v1600_v49 }
  0xf2   :  { %v1627_v27 = vmul.f32 %v4342_v41, %v255_v18  ;;  %v1629_v62 = vmul.f32 %v4345_v42, %v332_v50 }
  0xf3   :  { %v1650_v60 = vmul.f32 1.442695, %v1626_v17  ;;  %v1654_v2 = vmul.f32 1.442695, %v1628_v48 }
  0xf4   :  { %v1652_v39 = vmul.f32 1.442695, %v1627_v27  ;;  %v1656_v41 = vmul.f32 1.442695, %v1629_v62 }
  0xf5   :  { %3501 = vpow2.f32 %v1650_v60 }
  0xf6   :  { %3503 = vpow2.f32 %v1652_v39 }
  0xf7   :  { %v3494_v7 = vpop.eup %3493  ;;  %3505 = vpow2.f32 %v1654_v2 }
  0xf8   :  { %v3496_v10 = vpop.eup %3495  ;;  %1666 = vst [vmem:[#allocation3] sm:$0xff] %v3494_v7  ;;  %v401_v6 = vpop.f32.mrb[4].mxu0  ;;  %3507 = vpow2.f32 %v1656_v41 }
  0xf9   :  { %v478_v11 = vpop.f32.mrb[4].mxu1  ;;  %v3498_v12 = vpop.eup %3497  ;;  %1667 = vst [vmem:[#allocation3 + $0x8] sm:$0xff] %v3496_v10  ;;  %v1622_v42 = vmul.f32 %v1597_v0, %v401_v6 }
  0xfa   :  { %v403_v14 = vpop.f32.mrb[5].mxu0  ;;  %v1624_v15 = vmul.f32 %v1605_v1, %v478_v11  ;;  %v480_v16 = vpop.f32.mrb[5].mxu1  ;;  %1668 = vst [vmem:[#allocation3 + $0x10] sm:$0xff] %v3498_v12  ;;  %v4441_v11 = vrot.slane %v3533_v3, %v3724_v52 }
  0xfb   :  { %v3500_v19 = vpop.eup %3499  ;;  %v1623_v22 = vmul.f32 %v1601_v63, %v403_v14  ;;  %v1625_v59 = vmul.f32 %v1609_v5, %v480_v16  ;;  %v1642_v23 = vmul.f32 1.442695, %v1622_v42 }
  0xfc   :  { %1669 = vst [vmem:[#allocation3 + $0x18] sm:$0xff] %v3500_v19  ;;  %v1646_v28 = vmul.f32 1.442695, %v1624_v15  ;;  %v407_v33 = vpop.f32.mrb[6].mxu0 }
  0xfd   :  { %v1644_v31 = vmul.f32 1.442695, %v1623_v22  ;;  %v1648_v32 = vmul.f32 1.442695, %v1625_v59  ;;  %v484_v35 = vpop.f32.mrb[6].mxu1  ;;  %3509 = vpow2.f32 %v1642_v23  ;;  %v409_v36 = vpop.f32.mrb[7].mxu0  ;;  %v1630_v38 = vmul.f32 %v1597_v0, %v407_v33 }
  0xfe   :  { %v486_v37 = vpop.f32.mrb[7].mxu1  ;;  %v1631_v43 = vmul.f32 %v1601_v63, %v409_v36  ;;  %v1632_v61 = vmul.f32 %v1605_v1, %v484_v35 }
  0xff   :  { %3511 = vpow2.f32 %v1644_v31  ;;  %v3502_v51 = vpop.eup %3501  ;;  %v1633_v4 = vmul.f32 %v1609_v5, %v486_v37  ;;  %v1658_v56 = vmul.f32 1.442695, %v1630_v38  ;;  %v1742_v5 = vcombine.high %v3533_v3, %v3533_v3 }
 0x100   :  { %3513 = vpow2.f32 %v1646_v28  ;;  %v3504_v8 = vpop.eup %3503  ;;  %1674 = vst [vmem:[#allocation3 + $0x40] sm:$0xff] %v3502_v51  ;;  %v1660_v9 = vmul.f32 1.442695, %v1631_v43  ;;  %v1662_v13 = vmul.f32 1.442695, %v1632_v61  ;;  %v4448_v3 = vcombine.high %v4441_v11, %v4441_v11 }
 0x101   :  { %3515 = vpow2.f32 %v1648_v32  ;;  %v3506_v54 = vpop.eup %3505  ;;  %1675 = vst [vmem:[#allocation3 + $0x48] sm:$0xff] %v3504_v8  ;;  %v1664_v58 = vmul.f32 1.442695, %v1633_v4  ;;  %v4444_v22 = vrot.slane %v1742_v5, %v3724_v52  ;;  %v1732_v28 = vld [vmem:[#allocation3] sm:$0x3]  ;;  %v4500_v5 = vld [vmem:[%s5044_s8 + $0x298] sm:$0xff] }
 0x102   :  { %v3508_v55 = vpop.eup %3507  ;;  %1676 = vst [vmem:[#allocation3 + $0x50] sm:$0xff] %v3506_v54  ;;  %3517 = vpow2.f32 %v1658_v56  ;;  %v1734_v31 = vld [vmem:[#allocation3 + $0x10] sm:$0x3]  ;;  %v1733_v35 = vld [vmem:[#allocation3 + $0x8] sm:$0x3]  ;;  %v1784_v51 = vmul.f32 %v4441_v11, %v1732_v28  ;;  %5092 = vst [vmem:[#allocation13_spill] sm:$0xff] %v4500_v5 }
 0x103   :  { %1677 = vst [vmem:[#allocation3 + $0x58] sm:$0xff] %v3508_v55  ;;  %3519 = vpow2.f32 %v1660_v9  ;;  %v4453_v61 = vcombine.high %v4444_v22, %v4444_v22  ;;  %v1735_v54 = vld [vmem:[#allocation3 + $0x18] sm:$0x3]  ;;  %v1786_v56 = vmul.f32 %v4444_v22, %v1734_v31  ;;  %v1912_v28 = vld [vmem:[#allocation3] sm:$0x30] }
 0x104   :  { %3521 = vpow2.f32 %v1662_v13 }
 0x105   :  { %3523 = vpow2.f32 %v1664_v58  ;;  %v1785_v58 = vmul.f32 %v4448_v3, %v1733_v35 }
 0x107   :  { %v3510_v24 = vpop.eup %3509 }
 0x108   :  { %1670 = vst [vmem:[#allocation3 + $0x20] sm:$0xff] %v3510_v24  ;;  %v609_v21 = vpop.f32.mrb[8].mxu0 }
 0x109   :  { %v3512_v20 = vpop.eup %3511  ;;  %v686_v46 = vpop.f32.mrb[8].mxu1 }
 0x10a   :  { %v3514_v47 = vpop.eup %3513  ;;  %1671 = vst [vmem:[#allocation3 + $0x28] sm:$0xff] %v3512_v20  ;;  %v611_v29 = vpop.f32.mrb[9].mxu0 }
 0x10b   :  { %v3516_v25 = vpop.eup %3515  ;;  %1672 = vst [vmem:[#allocation3 + $0x30] sm:$0xff] %v3514_v47  ;;  %v688_v30 = vpop.f32.mrb[9].mxu1  ;;  %v1787_v47 = vmul.f32 %v4453_v61, %v1735_v54 }
 0x10c   :  { %1673 = vst [vmem:[#allocation3 + $0x38] sm:$0xff] %v3516_v25  ;;  %v3518_v34 = vpop.eup %3517  ;;  %v615_v49 = vpop.f32.mrb[10].mxu0 }
 0x10d   :  { %v3520_v40 = vpop.eup %3519  ;;  %1678 = vst [vmem:[#allocation3 + $0x60] sm:$0xff] %v3518_v34  ;;  %v692_v53 = vpop.f32.mrb[10].mxu1 }
 0x10e   :  { %v3522_v44 = vpop.eup %3521  ;;  %1679 = vst [vmem:[#allocation3 + $0x68] sm:$0xff] %v3520_v40  ;;  %v617_v57 = vpop.f32.mrb[11].mxu0 }
 0x10f   :  { %v3524_v45 = vpop.eup %3523  ;;  %1680 = vst [vmem:[#allocation3 + $0x70] sm:$0xff] %v3522_v44  ;;  %v694_v17 = vpop.f32.mrb[11].mxu1  ;;  %v1736_v31 = vld [vmem:[#allocation3 + $0x20] sm:$0x3] }
 0x110   :  { %1681 = vst [vmem:[#allocation3 + $0x78] sm:$0xff] %v3524_v45  ;;  %v1834_v45 = vld [vmem:[#allocation3 + $0x10] sm:$0xc] }
 0x118   :  { %v763_v18 = vpop.f32.mrb[12].mxu0 }
 0x119   :  { %v840_v26 = vpop.f32.mrb[12].mxu1  ;;  %v765_v27 = vpop.f32.mrb[13].mxu0 }
 0x11a   :  { %v842_v48 = vpop.f32.mrb[13].mxu1 }
 0x11c   :  { %v4429_v50 = vpop.f32.mrb[14].mxu0 }
 0x11d   :  { %v4431_v60 = vpop.f32.mrb[14].mxu1  ;;  %v4433_v62 = vpop.f32.mrb[15].mxu0 }
 0x11e   :  { %v4435_v0 = vpop.f32.mrb[15].mxu1 }
 0x120   :  { %v980_v1 = vpop.f32.mrb[16].mxu0 }
 0x121   :  { %v1057_v39 = vpop.f32.mrb[16].mxu1  ;;  %v1682_v2 = vmul.f32 %v980_v1, %v609_v21  ;;  %v982_v7 = vpop.f32.mrb[17].mxu0 }
 0x122   :  { %v1684_v63 = vmul.f32 %v1057_v39, %v686_v46  ;;  %v1059_v41 = vpop.f32.mrb[17].mxu1  ;;  %v1683_v10 = vmul.f32 %v982_v7, %v611_v29  ;;  %v1832_v29 = vld [vmem:[#allocation3] sm:$0xc] }
 0x123   :  { %v1685_v6 = vmul.f32 %v1059_v41, %v688_v30  ;;  %1698 = vst [vmem:[#allocation4] sm:$0xff] %v1682_v2 }
 0x124   :  { %1700 = vst [vmem:[#allocation4 + $0x10] sm:$0xff] %v1684_v63  ;;  %v986_v12 = vpop.f32.mrb[18].mxu0  ;;  %1699 = vst [vmem:[#allocation4 + $0x8] sm:$0xff] %v1683_v10  ;;  %v4495_v63 = vld [vmem:[%s5044_s8 + $0x290] sm:$0xff] }
 0x125   :  { %v1063_v42 = vpop.f32.mrb[18].mxu1  ;;  %1701 = vst [vmem:[#allocation4 + $0x18] sm:$0xff] %v1685_v6  ;;  %v1690_v14 = vmul.f32 %v986_v12, %v615_v49  ;;  %v988_v16 = vpop.f32.mrb[19].mxu0  ;;  %5091 = vst [vmem:[#allocation12_spill] sm:$0xff] %v4495_v63  ;;  %v2232_v63 = vld [vmem:[#allocation3 + $0x40] sm:$0x30] }
 0x126   :  { %v1692_v15 = vmul.f32 %v1063_v42, %v692_v53  ;;  %v1065_v19 = vpop.f32.mrb[19].mxu1  ;;  %v1691_v59 = vmul.f32 %v988_v16, %v617_v57  ;;  %v4513_v42 = vld [vmem:[%s5044_s8 + $0x398] sm:$0xff] }
 0x127   :  { %v1693_v23 = vmul.f32 %v1065_v19, %v694_v17  ;;  %1706 = vst [vmem:[#allocation4 + $0x40] sm:$0xff] %v1690_v14  ;;  %5094 = vst [vmem:[#allocation15_spill] sm:$0xff] %v4513_v42  ;;  %v4518_v14 = vld [vmem:[%s5044_s8 + $0x210] sm:$0xff] }
 0x128   :  { %1708 = vst [vmem:[#allocation4 + $0x50] sm:$0xff] %v1692_v15  ;;  %1707 = vst [vmem:[#allocation4 + $0x48] sm:$0xff] %v1691_v59  ;;  %v1134_v32 = vpop.f32.mrb[20].mxu0  ;;  %v1835_v15 = vld [vmem:[#allocation3 + $0x18] sm:$0xc] }
 0x129   :  { %1709 = vst [vmem:[#allocation4 + $0x58] sm:$0xff] %v1693_v23  ;;  %v1211_v33 = vpop.f32.mrb[20].mxu1  ;;  %v1686_v36 = vmul.f32 %v1134_v32, %v763_v18  ;;  %v1136_v38 = vpop.f32.mrb[21].mxu0  ;;  %5095 = vst [vmem:[#allocation16_spill] sm:$0xff] %v4518_v14  ;;  %v4526_v23 = vld [vmem:[%s5044_s8 + $0x218] sm:$0xff] }
 0x12a   :  { %v1688_v37 = vmul.f32 %v1211_v33, %v840_v26  ;;  %v1213_v43 = vpop.f32.mrb[21].mxu1  ;;  %v1687_v4 = vmul.f32 %v1136_v38, %v765_v27  ;;  %v1792_v55 = vld [vmem:[#allocation4] sm:$0x3]  ;;  %v4479_v27 = vld [vmem:[%s5044_s8 + $0x208] sm:$0xff]  ;;  %v1872_v1 = vld [vmem:[#allocation4] sm:$0xc] }
 0x12b   :  { %v1689_v8 = vmul.f32 %v1213_v43, %v842_v48  ;;  %1702 = vst [vmem:[#allocation4 + $0x20] sm:$0xff] %v1686_v36  ;;  %v4456_v9 = vadd.f32 %v1792_v55, %v1784_v51  ;;  %v1794_v13 = vld [vmem:[#allocation4 + $0x10] sm:$0x3]  ;;  %v1793_v20 = vld [vmem:[#allocation4 + $0x8] sm:$0x3]  ;;  %v4474_v26 = vld [vmem:[%s5044_s8 + $0x200] sm:$0xff] }
 0x12c   :  { %1704 = vst [vmem:[#allocation4 + $0x30] sm:$0xff] %v1688_v37  ;;  %1703 = vst [vmem:[#allocation4 + $0x28] sm:$0xff] %v1687_v4  ;;  %v4459_v24 = vadd.f32 %v1794_v13, %v1786_v56  ;;  %v4462_v46 = vadd.f32 %v1793_v20, %v1785_v58  ;;  %v1140_v25 = vpop.f32.mrb[22].mxu0  ;;  %v1795_v34 = vld [vmem:[#allocation4 + $0x18] sm:$0x3]  ;;  %v4484_v48 = vld [vmem:[%s5044_s8 + $0x300] sm:$0xff] }
 0x12d   :  { %1705 = vst [vmem:[#allocation4 + $0x38] sm:$0xff] %v1689_v8  ;;  %v1848_v21 = vrot.slane %v4456_v9, 6  ;;  %v1694_v40 = vmul.f32 %v1140_v25, %v4429_v50  ;;  %v1217_v44 = vpop.f32.mrb[22].mxu1  ;;  %v4468_v57 = vadd.f32 %v1795_v34, %v1787_v47  ;;  %v1142_v18 = vpop.f32.mrb[23].mxu0  ;;  %5087 = vst [vmem:[#allocation8_spill] sm:$0xff] %v4474_v26  ;;  %v4489_v50 = vld [vmem:[%s5044_s8 + $0x308] sm:$0xff] }
 0x12e   :  { %v1850_v30 = vrot.slane %v4459_v24, 6  ;;  %v1849_v53 = vrot.slane %v4462_v46, 6  ;;  %v1696_v17 = vmul.f32 %v1217_v44, %v4431_v60  ;;  %5088 = vst [vmem:[#allocation9_spill] sm:$0xff] %v4479_v27  ;;  %5089 = vst [vmem:[#allocation10_spill] sm:$0xff] %v4484_v48  ;;  %v1833_v60 = vld [vmem:[#allocation3 + $0x8] sm:$0xc]  ;;  %v1695_v2 = vmul.f32 %v1142_v18, %v4433_v62 }
 0x12f   :  { %v1864_v49 = vmul.f32 %v1848_v21, %v1832_v29  ;;  %5090 = vst [vmem:[#allocation11_spill] sm:$0xff] %v4489_v50  ;;  %1710 = vst [vmem:[#allocation4 + $0x60] sm:$0xff] %v1694_v40  ;;  %v1874_v41 = vld [vmem:[#allocation4 + $0x10] sm:$0xc]  ;;  %v1851_v6 = vrot.slane %v4468_v57, 6  ;;  %v1219_v12 = vpop.f32.mrb[23].mxu1 }
 0x130   :  { %v1866_v39 = vmul.f32 %v1850_v30, %v1834_v45  ;;  %v1865_v10 = vmul.f32 %v1849_v53, %v1833_v60  ;;  %1712 = vst [vmem:[#allocation4 + $0x70] sm:$0xff] %v1696_v17  ;;  %v4508_v62 = vld [vmem:[%s5044_s8 + $0x390] sm:$0xff]  ;;  %v1873_v19 = vld [vmem:[#allocation4 + $0x8] sm:$0xc]  ;;  %1711 = vst [vmem:[#allocation4 + $0x68] sm:$0xff] %v1695_v2  ;;  %v1697_v59 = vmul.f32 %v1219_v12, %v4435_v0  ;;  %v1334_v36 = vpop.f32.mrb[24].mxu0 }
 0x131   :  { %v4502_v7 = vadd.f32 %v1872_v1, %v1864_v49  ;;  %5093 = vst [vmem:[#allocation14_spill] sm:$0xff] %v4508_v62  ;;  %5096 = vst [vmem:[#allocation17_spill] sm:$0xff] %v4526_v23  ;;  %v1867_v35 = vmul.f32 %v1851_v6, %v1835_v15  ;;  %v4534_v37 = vld [vmem:[%s5044_s8 + $0x310] sm:$0xff]  ;;  %v4539_v0 = vld [vmem:[%s5044_s8 + $0x318] sm:$0xff]  ;;  %v1411_v54 = vpop.f32.mrb[24].mxu1  ;;  %v1336_v47 = vpop.f32.mrb[25].mxu0  ;;  %v1788_v49 = vmul.f32 %v4441_v11, %v1736_v31 }
 0x132   :  { %v4520_v16 = vadd.f32 %v1874_v41, %v1866_v39  ;;  %v4529_v33 = vadd.f32 %v1873_v19, %v1865_v10  ;;  %5097 = vst [vmem:[#allocation18_spill] sm:$0xff] %v4534_v37  ;;  %5098 = vst [vmem:[#allocation19_spill] sm:$0xff] %v4539_v0  ;;  %v4544_v38 = vld [vmem:[%s5044_s8 + $0x2a0] sm:$0xff]  ;;  %v4549_v43 = vld [vmem:[%s5044_s8 + $0x2a8] sm:$0xff]  ;;  %v1413_v10 = vpop.f32.mrb[25].mxu1 }
 0x133   :  { %v1928_v32 = vrot.slane %v4502_v7, 6  ;;  %5099 = vst [vmem:[#allocation20_spill] sm:$0xff] %v4544_v38  ;;  %5100 = vst [vmem:[#allocation21_spill] sm:$0xff] %v4549_v43  ;;  %v1738_v51 = vld [vmem:[#allocation3 + $0x30] sm:$0x3]  ;;  %v4564_v29 = vld [vmem:[%s5044_s8 + $0x3a0] sm:$0xff] }
 0x134   :  { %v1930_v4 = vrot.slane %v4520_v16, 6  ;;  %v1875_v8 = vld [vmem:[#allocation4 + $0x18] sm:$0xc]  ;;  %1713 = vst [vmem:[#allocation4 + $0x78] sm:$0xff] %v1697_v59  ;;  %1714 = vst [vmem:[#allocation5] sm:$0xff] %v1334_v36  ;;  %v1929_v20 = vrot.slane %v4529_v33, 6  ;;  %v1790_v41 = vmul.f32 %v4444_v22, %v1738_v51 }
 0x135   :  { %v1914_v13 = vld [vmem:[#allocation3 + $0x10] sm:$0x30]  ;;  %v1944_v58 = vmul.f32 %v1928_v32, %v1912_v28  ;;  %v4557_v21 = vadd.f32 %v1875_v8, %v1867_v35  ;;  %1716 = vst [vmem:[#allocation5 + $0x10] sm:$0xff] %v1411_v54  ;;  %5101 = vst [vmem:[#allocation22_spill] sm:$0xff] %v4564_v29  ;;  %v4569_v30 = vld [vmem:[%s5044_s8 + $0x3a8] sm:$0xff]  ;;  %v1417_v28 = vpop.f32.mrb[26].mxu1 }
 0x136   :  { %5102 = vst [vmem:[#allocation23_spill] sm:$0xff] %v4569_v30  ;;  %v1913_v34 = vld [vmem:[#allocation3 + $0x8] sm:$0x30]  ;;  %v1737_v40 = vld [vmem:[#allocation3 + $0x28] sm:$0x3]  ;;  %v1946_v45 = vmul.f32 %v1930_v4, %v1914_v13  ;;  %1715 = vst [vmem:[#allocation5 + $0x8] sm:$0xff] %v1336_v47 }
 0x137   :  { %v1952_v44 = vld [vmem:[#allocation4] sm:$0x30]  ;;  %v1954_v60 = vld [vmem:[#allocation4 + $0x10] sm:$0x30]  ;;  %v1945_v1 = vmul.f32 %v1929_v20, %v1913_v34  ;;  %v1931_v39 = vrot.slane %v4557_v21, 6  ;;  %1717 = vst [vmem:[#allocation5 + $0x18] sm:$0xff] %v1413_v10  ;;  %v1789_v20 = vmul.f32 %v4448_v3, %v1737_v40 }
 0x138   :  { %v4576_v18 = vadd.f32 %v1952_v44, %v1944_v58  ;;  %v1796_v2 = vld [vmem:[#allocation4 + $0x20] sm:$0x3]  ;;  %v1915_v6 = vld [vmem:[#allocation3 + $0x18] sm:$0x30]  ;;  %v4580_v12 = vadd.f32 %v1954_v60, %v1946_v45  ;;  %v1953_v11 = vld [vmem:[#allocation4 + $0x8] sm:$0x30] }
 0x139   :  { %v4582_v15 = vadd.f32 %v1796_v2, %v1788_v49  ;;  %v1798_v19 = vld [vmem:[#allocation4 + $0x30] sm:$0x3]  ;;  %v1992_v31 = vld [vmem:[#allocation3] sm:$0xc0]  ;;  %v1739_v32 = vld [vmem:[#allocation3 + $0x38] sm:$0x3]  ;;  %v4589_v22 = vadd.f32 %v1953_v11, %v1945_v1  ;;  %v1947_v36 = vmul.f32 %v1931_v39, %v1915_v6 }
 0x13a   :  { %v2008_v35 = vrot.slane %v4576_v18, 6  ;;  %v4591_v51 = vadd.f32 %v1798_v19, %v1790_v41  ;;  %v1340_v4 = vpop.f32.mrb[26].mxu0  ;;  %v1993_v8 = vld [vmem:[#allocation3 + $0x8] sm:$0xc0]  ;;  %v2010_v54 = vrot.slane %v4580_v12, 6  ;;  %v1791_v40 = vmul.f32 %v4453_v61, %v1739_v32  ;;  %1724 = vst [vmem:[#allocation5 + $0x50] sm:$0xff] %v1417_v28 }
 0x13b   :  { %v1955_v13 = vld [vmem:[#allocation4 + $0x18] sm:$0x30]  ;;  %v1852_v58 = vrot.slane %v4582_v15, 6  ;;  %v1797_v47 = vld [vmem:[#allocation4 + $0x28] sm:$0x3]  ;;  %1722 = vst [vmem:[#allocation5 + $0x40] sm:$0xff] %v1340_v4 }
 0x13c   :  { %5103 = vst [vmem:[#allocation24_spill] sm:$0xff] %v4591_v51  ;;  %v1994_v44 = vld [vmem:[#allocation3 + $0x10] sm:$0xc0]  ;;  %v1836_v45 = vld [vmem:[#allocation3 + $0x20] sm:$0xc]  ;;  %v2024_v49 = vmul.f32 %v2008_v35, %v1992_v31  ;;  %v2009_v60 = vrot.slane %v4589_v22, 6  ;;  %v4599_v1 = vadd.f32 %v1955_v13, %v1947_v36  ;;  %v4602_v3 = vadd.f32 %v1797_v47, %v1789_v20 }
 0x13d   :  { %v1854_v39 = vrot.slane %v4591_v51, 6  ;;  %v1995_v2 = vld [vmem:[#allocation3 + $0x18] sm:$0xc0]  ;;  %v1838_v41 = vld [vmem:[#allocation3 + $0x30] sm:$0xc]  ;;  %v2026_v6 = vmul.f32 %v2010_v54, %v1994_v44  ;;  %v1868_v11 = vmul.f32 %v1852_v58, %v1836_v45  ;;  %v1342_v32 = vpop.f32.mrb[27].mxu0 }
 0x13e   :  { %v2032_v10 = vld [vmem:[#allocation4] sm:$0xc0]  ;;  %5104 = vst [vmem:[#allocation25_spill] sm:$0xff] %v4602_v3  ;;  %v1799_v19 = vld [vmem:[#allocation4 + $0x38] sm:$0x3]  ;;  %v2025_v31 = vmul.f32 %v2009_v60, %v1993_v8  ;;  %v2011_v35 = vrot.slane %v4599_v1, 6 }
 0x13f   :  { %v4605_v4 = vadd.f32 %v2032_v10, %v2024_v49  ;;  %v2034_v34 = vld [vmem:[#allocation4 + $0x10] sm:$0xc0]  ;;  %v1876_v36 = vld [vmem:[#allocation4 + $0x20] sm:$0xc]  ;;  %v1870_v13 = vmul.f32 %v1854_v39, %v1838_v41  ;;  %v2072_v59 = vld [vmem:[#allocation3 + $0x40] sm:$0x3]  ;;  %v4613_v61 = vadd.f32 %v1799_v19, %v1791_v40 }
 0x140   :  { %v4608_v17 = vadd.f32 %v2034_v34, %v2026_v6  ;;  %v2033_v53 = vld [vmem:[#allocation4 + $0x8] sm:$0xc0]  ;;  %v4610_v54 = vadd.f32 %v1876_v36, %v1868_v11  ;;  %v1878_v58 = vld [vmem:[#allocation4 + $0x30] sm:$0xc]  ;;  %v1853_v20 = vrot.slane %v4602_v3, 6  ;;  %v2027_v60 = vmul.f32 %v2011_v35, %v1995_v2  ;;  %1723 = vst [vmem:[#allocation5 + $0x48] sm:$0xff] %v1342_v32 }
 0x141   :  { %5105 = vst [vmem:[#allocation26_spill] sm:$0xff] %v4613_v61  ;;  %v2074_v47 = vld [vmem:[#allocation3 + $0x50] sm:$0x3]  ;;  %v1916_v8 = vld [vmem:[#allocation3 + $0x20] sm:$0x30]  ;;  %v2088_v45 = vrot.slane %v4605_v4, 6  ;;  %v4616_v49 = vadd.f32 %v2033_v53, %v2025_v31  ;;  %v4618_v34 = vadd.f32 %v1878_v58, %v1870_v13 }
 0x142   :  { %v1837_v44 = vld [vmem:[#allocation3 + $0x28] sm:$0xc]  ;;  %v1419_v39 = vpop.f32.mrb[27].mxu1  ;;  %v2073_v41 = vld [vmem:[#allocation3 + $0x48] sm:$0x3]  ;;  %v2090_v10 = vrot.slane %v4608_v17, 6 }
 0x143   :  { %5106 = vst [vmem:[#allocation27_spill] sm:$0xff] %v4618_v34  ;;  %v2035_v6 = vld [vmem:[#allocation4 + $0x18] sm:$0xc0]  ;;  %v1932_v11 = vrot.slane %v4610_v54, 6  ;;  %v1869_v28 = vmul.f32 %v1853_v20, %v1837_v44  ;;  %v1855_v40 = vrot.slane %v4613_v61, 6  ;;  %1725 = vst [vmem:[#allocation5 + $0x58] sm:$0xff] %v1419_v39  ;;  %v2104_v2 = vmul.f32 %v2088_v45, %v2072_v59 }
 0x144   :  { %v1488_v19 = vpop.f32.mrb[28].mxu0  ;;  %v1839_v36 = vld [vmem:[#allocation3 + $0x38] sm:$0xc]  ;;  %v2089_v53 = vrot.slane %v4616_v49, 6  ;;  %v4624_v31 = vadd.f32 %v2035_v6, %v2027_v60  ;;  %v1934_v35 = vrot.slane %v4618_v34, 6  ;;  %v2106_v56 = vmul.f32 %v2090_v10, %v2074_v47  ;;  %v1565_v30 = vpop.f32.mrb[28].mxu1 }
 0x145   :  { %v1877_v13 = vld [vmem:[#allocation4 + $0x28] sm:$0xc]  ;;  %1718 = vst [vmem:[#allocation5 + $0x20] sm:$0xff] %v1488_v19  ;;  %v2075_v58 = vld [vmem:[#allocation3 + $0x58] sm:$0x3]  ;;  %v1948_v20 = vmul.f32 %v1932_v11, %v1916_v8  ;;  %v1871_v39 = vmul.f32 %v1855_v40, %v1839_v36  ;;  %1720 = vst [vmem:[#allocation5 + $0x30] sm:$0xff] %v1565_v30 }
 0x146   :  { %v1918_v32 = vld [vmem:[#allocation3 + $0x30] sm:$0x30]  ;;  %v2112_v25 = vld [vmem:[#allocation4 + $0x40] sm:$0x3]  ;;  %v2114_v55 = vld [vmem:[#allocation4 + $0x50] sm:$0x3]  ;;  %v4627_v44 = vadd.f32 %v1877_v13, %v1869_v28  ;;  %v2105_v60 = vmul.f32 %v2089_v53, %v2073_v41 }
 0x147   :  { %v2091_v52 = vrot.slane %v4624_v31, 6  ;;  %v4630_v29 = vadd.f32 %v2112_v25, %v2104_v2  ;;  %v1956_v6 = vld [vmem:[#allocation4 + $0x20] sm:$0x30]  ;;  %v1950_v59 = vmul.f32 %v1934_v35, %v1918_v32  ;;  %v1879_v45 = vld [vmem:[#allocation4 + $0x38] sm:$0xc]  ;;  %v4632_v19 = vadd.f32 %v2114_v55, %v2106_v56  ;;  %v1490_v11 = vpop.f32.mrb[29].mxu0 }
 0x148   :  { %5107 = vst [vmem:[#allocation28_spill] sm:$0xff] %v4627_v44  ;;  %v2152_v38 = vld [vmem:[#allocation3 + $0x40] sm:$0xc]  ;;  %v2113_v43 = vld [vmem:[#allocation4 + $0x48] sm:$0x3]  ;;  %v4634_v37 = vadd.f32 %v1956_v6, %v1948_v20  ;;  %v1933_v8 = vrot.slane %v4627_v44, 6  ;;  %v4637_v10 = vadd.f32 %v1879_v45, %v1871_v39 }
 0x149   :  { %v1958_v47 = vld [vmem:[#allocation4 + $0x30] sm:$0x30]  ;;  %v2154_v25 = vld [vmem:[#allocation3 + $0x50] sm:$0xc]  ;;  %v1996_v28 = vld [vmem:[#allocation3 + $0x20] sm:$0xc0]  ;;  %v4640_v36 = vadd.f32 %v2113_v43, %v2105_v60  ;;  %v2107_v53 = vmul.f32 %v2091_v52, %v2075_v58 }
 0x14a   :  { %5108 = vst [vmem:[#allocation29_spill] sm:$0xff] %v4634_v37  ;;  %5109 = vst [vmem:[#allocation30_spill] sm:$0xff] %v4637_v10  ;;  %v1917_v41 = vld [vmem:[#allocation3 + $0x28] sm:$0x30]  ;;  %v2168_v40 = vrot.slane %v4630_v29, 6  ;;  %v4642_v55 = vadd.f32 %v1958_v47, %v1950_v59  ;;  %v1567_v56 = vpop.f32.mrb[29].mxu1 }
 0x14b   :  { %1719 = vst [vmem:[#allocation5 + $0x28] sm:$0xff] %v1490_v11  ;;  %v2153_v2 = vld [vmem:[#allocation3 + $0x48] sm:$0xc]  ;;  %v2170_v35 = vrot.slane %v4632_v19, 6  ;;  %v2115_v13 = vld [vmem:[#allocation4 + $0x58] sm:$0x3]  ;;  %v1949_v30 = vmul.f32 %v1933_v8, %v1917_v41 }
 0x14c   :  { %5110 = vst [vmem:[#allocation31_spill] sm:$0xff] %v4642_v55  ;;  %v2012_v32 = vrot.slane %v4634_v37, 6  ;;  %v1935_v20 = vrot.slane %v4637_v10, 6  ;;  %1721 = vst [vmem:[#allocation5 + $0x38] sm:$0xff] %v1567_v56  ;;  %v1494_v39 = vpop.f32.mrb[30].mxu0  ;;  %v2184_v45 = vmul.f32 %v2168_v40, %v2152_v38  ;;  %v2169_v43 = vrot.slane %v4640_v36, 6 }
 0x14d   :  { %v1919_v6 = vld [vmem:[#allocation3 + $0x38] sm:$0x30]  ;;  %v4648_v52 = vadd.f32 %v2115_v13, %v2107_v53  ;;  %v2014_v58 = vrot.slane %v4642_v55, 6  ;;  %v1957_v60 = vld [vmem:[#allocation4 + $0x28] sm:$0x30]  ;;  %1726 = vst [vmem:[#allocation5 + $0x60] sm:$0xff] %v1494_v39  ;;  %v2186_v0 = vmul.f32 %v2170_v35, %v2154_v25 }
 0x14e   :  { %v2155_v59 = vld [vmem:[#allocation3 + $0x58] sm:$0xc]  ;;  %v1998_v47 = vld [vmem:[#allocation3 + $0x30] sm:$0xc0]  ;;  %v2192_v11 = vld [vmem:[#allocation4 + $0x40] sm:$0xc]  ;;  %v2028_v8 = vmul.f32 %v2012_v32, %v1996_v28  ;;  %v4651_v41 = vadd.f32 %v1957_v60, %v1949_v30  ;;  %v1951_v56 = vmul.f32 %v1935_v20, %v1919_v6  ;;  %v2185_v38 = vmul.f32 %v2169_v43, %v2153_v2 }
 0x14f   :  { %v2194_v14 = vld [vmem:[#allocation4 + $0x50] sm:$0xc]  ;;  %v4653_v23 = vadd.f32 %v2192_v11, %v2184_v45  ;;  %v2171_v40 = vrot.slane %v4648_v52, 6  ;;  %v2036_v53 = vld [vmem:[#allocation4 + $0x20] sm:$0xc0]  ;;  %v2030_v13 = vmul.f32 %v2014_v58, %v1998_v47  ;;  %v1571_v42 = vpop.f32.mrb[30].mxu1 }
 0x150   :  { %5111 = vst [vmem:[#allocation32_spill] sm:$0xff] %v4651_v41  ;;  %v1959_v62 = vld [vmem:[#allocation4 + $0x38] sm:$0x30]  ;;  %v4656_v39 = vadd.f32 %v2194_v14, %v2186_v0  ;;  %v2193_v5 = vld [vmem:[#allocation4 + $0x48] sm:$0xc]  ;;  %v4658_v48 = vadd.f32 %v2036_v53, %v2028_v8  ;;  %v2013_v28 = vrot.slane %v4651_v41, 6 }
 0x151   :  { %v2038_v25 = vld [vmem:[#allocation4 + $0x30] sm:$0xc0]  ;;  %v4661_v35 = vadd.f32 %v1959_v62, %v1951_v56  ;;  %1728 = vst [vmem:[#allocation5 + $0x70] sm:$0xff] %v1571_v42  ;;  %v1496_v32 = vpop.f32.mrb[31].mxu0  ;;  %v2234_v2 = vld [vmem:[#allocation3 + $0x50] sm:$0x30]  ;;  %v4664_v45 = vadd.f32 %v2193_v5, %v2185_v38  ;;  %v2187_v43 = vmul.f32 %v2171_v40, %v2155_v59 }
 0x152   :  { %5112 = vst [vmem:[#allocation33_spill] sm:$0xff] %v4658_v48  ;;  %v1997_v30 = vld [vmem:[#allocation3 + $0x28] sm:$0xc0]  ;;  %v1999_v20 = vld [vmem:[#allocation3 + $0x38] sm:$0xc0]  ;;  %v2248_v6 = vrot.slane %v4653_v23, 6  ;;  %v4666_v14 = vadd.f32 %v2038_v25, %v2030_v13 }
 0x153   :  { %5113 = vst [vmem:[#allocation34_spill] sm:$0xff] %v4661_v35  ;;  %1727 = vst [vmem:[#allocation5 + $0x68] sm:$0xff] %v1496_v32  ;;  %v1573_v0 = vpop.f32.mrb[31].mxu1  ;;  %v2233_v58 = vld [vmem:[#allocation3 + $0x48] sm:$0x30]  ;;  %v2250_v60 = vrot.slane %v4656_v39, 6  ;;  %v2029_v42 = vmul.f32 %v2013_v28, %v1997_v30 }
 0x154   :  { %5114 = vst [vmem:[#allocation35_spill] sm:$0xff] %v4666_v14  ;;  %v2195_v47 = vld [vmem:[#allocation4 + $0x58] sm:$0xc]  ;;  %v2092_v62 = vrot.slane %v4658_v48, 6  ;;  %v2015_v11 = vrot.slane %v4661_v35, 6  ;;  %1729 = vst [vmem:[#allocation5 + $0x78] sm:$0xff] %v1573_v0  ;;  %v2264_v56 = vmul.f32 %v2248_v6, %v2232_v63 }
 0x155   :  { %v2076_v8 = vld [vmem:[#allocation3 + $0x60] sm:$0x3]  ;;  %v2249_v5 = vrot.slane %v4664_v45, 6  ;;  %v4672_v38 = vadd.f32 %v2195_v47, %v2187_v43  ;;  %v2094_v59 = vrot.slane %v4666_v14, 6  ;;  %v2037_v40 = vld [vmem:[#allocation4 + $0x28] sm:$0xc0]  ;;  %v2266_v32 = vmul.f32 %v2250_v60, %v2234_v2 }
 0x156   :  { %v2235_v53 = vld [vmem:[#allocation3 + $0x58] sm:$0x30]  ;;  %v2078_v13 = vld [vmem:[#allocation3 + $0x70] sm:$0x3]  ;;  %v2272_v25 = vld [vmem:[#allocation4 + $0x40] sm:$0x30]  ;;  %v4675_v26 = vadd.f32 %v2037_v40, %v2029_v42  ;;  %v2031_v28 = vmul.f32 %v2015_v11, %v1999_v20  ;;  %v2108_v30 = vmul.f32 %v2092_v62, %v2076_v8 }
 0x157   :  { %v2274_v50 = vld [vmem:[#allocation4 + $0x50] sm:$0x30]  ;;  %v4677_v27 = vadd.f32 %v2272_v25, %v2264_v56  ;;  %v2265_v0 = vmul.f32 %v2249_v5, %v2233_v58  ;;  %v2251_v63 = vrot.slane %v4672_v38, 6  ;;  %v2039_v6 = vld [vmem:[#allocation4 + $0x38] sm:$0xc0]  ;;  %v2110_v47 = vmul.f32 %v2094_v59, %v2078_v13 }
 0x158   :  { %5115 = vst [vmem:[#allocation36_spill] sm:$0xff] %v4675_v26  ;;  %v2116_v43 = vld [vmem:[#allocation4 + $0x60] sm:$0x3]  ;;  %v2312_v35 = vld [vmem:[#allocation3 + $0x40] sm:$0xc0]  ;;  %v4680_v10 = vadd.f32 %v2274_v50, %v2266_v32  ;;  %v2093_v41 = vrot.slane %v4675_v26, 6  ;;  %v4683_v2 = vadd.f32 %v2039_v6, %v2031_v28 }
 0x159   :  { %v2273_v61 = vld [vmem:[#allocation4 + $0x48] sm:$0x30]  ;;  %v4685_v60 = vadd.f32 %v2116_v43, %v2108_v30  ;;  %v2118_v20 = vld [vmem:[#allocation4 + $0x70] sm:$0x3]  ;;  %v2314_v62 = vld [vmem:[#allocation3 + $0x50] sm:$0xc0]  ;;  %v2267_v5 = vmul.f32 %v2251_v63, %v2235_v53 }
 0x15a   :  { %5116 = vst [vmem:[#allocation37_spill] sm:$0xff] %v4683_v2  ;;  %v2156_v42 = vld [vmem:[#allocation3 + $0x60] sm:$0xc]  ;;  %v2077_v11 = vld [vmem:[#allocation3 + $0x68] sm:$0x3]  ;;  %v2328_v8 = vrot.slane %v4677_v27, 6  ;;  %v4688_v56 = vadd.f32 %v2273_v61, %v2265_v0  ;;  %v4690_v59 = vadd.f32 %v2118_v20, %v2110_v47 }
 0x15b   :  { %5117 = vst [vmem:[#allocation38_spill] sm:$0xff] %v4685_v60  ;;  %v2079_v58 = vld [vmem:[#allocation3 + $0x78] sm:$0x3]  ;;  %v2313_v50 = vld [vmem:[#allocation3 + $0x48] sm:$0xc0]  ;;  %v2330_v25 = vrot.slane %v4680_v10, 6  ;;  %v2109_v6 = vmul.f32 %v2093_v41, %v2077_v11 }
 0x15c   :  { %5118 = vst [vmem:[#allocation39_spill] sm:$0xff] %v4690_v59  ;;  %v2158_v40 = vld [vmem:[#allocation3 + $0x70] sm:$0xc]  ;;  %v2352_v13 = vld [vmem:[#allocation4 + $0x40] sm:$0xc0]  ;;  %v2095_v28 = vrot.slane %v4683_v2, 6  ;;  %v2344_v43 = vmul.f32 %v2328_v8, %v2312_v35 }
 0x15d   :  { %v2275_v32 = vld [vmem:[#allocation4 + $0x58] sm:$0x30]  ;;  %v2172_v30 = vrot.slane %v4685_v60, 6  ;;  %v2354_v26 = vld [vmem:[#allocation4 + $0x50] sm:$0xc0]  ;;  %v2329_v44 = vrot.slane %v4688_v56, 6  ;;  %v2346_v47 = vmul.f32 %v2330_v25, %v2314_v62 }
 0x15e   :  { %v4696_v61 = vadd.f32 %v2275_v32, %v2267_v5  ;;  %v2174_v53 = vrot.slane %v4690_v59, 6  ;;  %v2117_v0 = vld [vmem:[#allocation4 + $0x68] sm:$0x3]  ;;  %v2315_v63 = vld [vmem:[#allocation3 + $0x58] sm:$0xc0]  ;;  %v2111_v2 = vmul.f32 %v2095_v28, %v2079_v58  ;;  %v4701_v35 = vadd.f32 %v2352_v13, %v2344_v43 }
 0x15f   :  { %v2353_v20 = vld [vmem:[#allocation4 + $0x48] sm:$0xc0]  ;;  %v2188_v3 = vmul.f32 %v2172_v30, %v2156_v42  ;;  %v2196_v14 = vld [vmem:[#allocation4 + $0x60] sm:$0xc]  ;;  %v2198_v55 = vld [vmem:[#allocation4 + $0x70] sm:$0xc]  ;;  %v4699_v34 = vadd.f32 %v2117_v0, %v2109_v6  ;;  %v2345_v11 = vmul.f32 %v2329_v44, %v2313_v50  ;;  %v4704_v51 = vadd.f32 %v2354_v26, %v2346_v47 }
 0x160   :  { %v1808_v60 = vld [vmem:[#allocation5] sm:$0x3]  ;;  %v2157_v41 = vld [vmem:[#allocation3 + $0x68] sm:$0xc]  ;;  %v2331_v8 = vrot.slane %v4696_v61, 6  ;;  %v2190_v5 = vmul.f32 %v2174_v53, %v2158_v40 }
 0x161   :  { %5119 = vst [vmem:[#allocation40_spill] sm:$0xff] %v4699_v34  ;;  %v2119_v32 = vld [vmem:[#allocation4 + $0x78] sm:$0x3]  ;;  %v1888_v59 = vld [vmem:[#allocation5] sm:$0xc]  ;;  %v4706_v25 = vadd.f32 %v2196_v14, %v2188_v3  ;;  %v2173_v42 = vrot.slane %v4699_v34, 6  ;;  %v4711_v43 = vadd.f32 %v2353_v20, %v2345_v11  ;;  %v1816_v26 = vmul.f32 %v1808_v60, %v4456_v9 }
 0x162   :  { %v2355_v62 = vld [vmem:[#allocation4 + $0x58] sm:$0xc0]  ;;  %v4709_v30 = vadd.f32 %v2119_v32, %v2111_v2  ;;  %v1968_v58 = vld [vmem:[#allocation5] sm:$0x30]  ;;  %v2048_v28 = vld [vmem:[#allocation5] sm:$0xc0]  ;;  %v2347_v44 = vmul.f32 %v2331_v8, %v2315_v63  ;;  %v4713_v50 = vadd.f32 %v2198_v55, %v2190_v5  ;;  %v1896_v32 = vmul.f32 %v1888_v59, %v4502_v7 }
 0x163   :  { %5120 = vst [vmem:[#allocation41_spill] sm:$0xff] %v4706_v25  ;;  %v2236_v6 = vld [vmem:[#allocation3 + $0x60] sm:$0x30]  ;;  %v2159_v13 = vld [vmem:[#allocation3 + $0x78] sm:$0xc]  ;;  %v2252_v14 = vrot.slane %v4706_v25, 6  ;;  %v2189_v47 = vmul.f32 %v2173_v42, %v2157_v41  ;;  %v1976_v9 = vmul.f32 %v1968_v58, %v4576_v18  ;;  %v2056_v60 = vmul.f32 %v2048_v28, %v4605_v4 }
 0x164   :  { %5121 = vst [vmem:[#allocation42_spill] sm:$0xff] %v4709_v30  ;;  %5122 = vst [vmem:[#allocation43_spill] sm:$0xff] %v4713_v50  ;;  %v2197_v40 = vld [vmem:[#allocation4 + $0x68] sm:$0xc]  ;;  %v1810_v53 = vld [vmem:[#allocation5 + $0x10] sm:$0x3]  ;;  %v4719_v20 = vadd.f32 %v2355_v62, %v2347_v44 }
 0x165   :  { %v1890_v0 = vld [vmem:[#allocation5 + $0x10] sm:$0xc]  ;;  %v2238_v3 = vld [vmem:[#allocation3 + $0x70] sm:$0x30]  ;;  %v2175_v2 = vrot.slane %v4709_v30, 6  ;;  %v2254_v55 = vrot.slane %v4713_v50, 6  ;;  %v2268_v41 = vmul.f32 %v2252_v14, %v2236_v6  ;;  %v4724_v30 = vadd.f32 %v2197_v40, %v2189_v47 }
 0x166   :  { %v1970_v34 = vld [vmem:[#allocation5 + $0x10] sm:$0x30]  ;;  %v2050_v48 = vld [vmem:[#allocation5 + $0x10] sm:$0xc0]  ;;  %v2276_v63 = vld [vmem:[#allocation4 + $0x60] sm:$0x30]  ;;  %v1818_v59 = vmul.f32 %v1810_v53, %v4459_v24  ;;  %v1898_v18 = vmul.f32 %v1890_v0, %v4520_v16 }
 0x167   :  { %v2199_v11 = vld [vmem:[#allocation4 + $0x78] sm:$0xc]  ;;  %1824 = vst [vmem:[#allocation6] sm:$0x3] %v1816_v26  ;;  %v1809_v8 = vld [vmem:[#allocation5 + $0x8] sm:$0x3]  ;;  %v2191_v7 = vmul.f32 %v2175_v2, %v2159_v13  ;;  %v2270_v37 = vmul.f32 %v2254_v55, %v2238_v3  ;;  %v1978_v4 = vmul.f32 %v1970_v34, %v4580_v12  ;;  %v2058_v58 = vmul.f32 %v2050_v48, %v4608_v17 }
 0x168   :  { %v1889_v5 = vld [vmem:[#allocation5 + $0x8] sm:$0xc]  ;;  %v2278_v42 = vld [vmem:[#allocation4 + $0x70] sm:$0x30]  ;;  %1904 = vst [vmem:[#allocation6] sm:$0xc] %v1896_v32  ;;  %v4730_v13 = vadd.f32 %v2276_v63, %v2268_v41  ;;  %v1817_v53 = vmul.f32 %v1809_v8, %v4462_v46 }
 0x169   :  { %v1969_v62 = vld [vmem:[#allocation5 + $0x8] sm:$0x30]  ;;  %v2049_v44 = vld [vmem:[#allocation5 + $0x8] sm:$0xc0]  ;;  %v1811_v25 = vld [vmem:[#allocation5 + $0x18] sm:$0x3]  ;;  %v4733_v26 = vadd.f32 %v2199_v11, %v2191_v7  ;;  %v4736_v0 = vadd.f32 %v2278_v42, %v2270_v37  ;;  %v1897_v48 = vmul.f32 %v1889_v5, %v4529_v33 }
 0x16a   :  { %v2237_v50 = vld [vmem:[#allocation3 + $0x68] sm:$0x30]  ;;  %1984 = vst [vmem:[#allocation6] sm:$0x30] %v1976_v9  ;;  %2064 = vst [vmem:[#allocation6] sm:$0xc0] %v2056_v60  ;;  %v1977_v17 = vmul.f32 %v1969_v62, %v4589_v22  ;;  %v2057_v34 = vmul.f32 %v2049_v44, %v4616_v49  ;;  %v1819_v9 = vmul.f32 %v1811_v25, %v4468_v57 }
 0x16b   :  { %v1891_v28 = vld [vmem:[#allocation5 + $0x18] sm:$0xc]  ;;  %v1971_v6 = vld [vmem:[#allocation5 + $0x18] sm:$0x30]  ;;  %v2051_v40 = vld [vmem:[#allocation5 + $0x18] sm:$0xc0] }
 0x16c   :  { %v2253_v24 = vrot.slane %v4724_v30, 6  ;;  %1826 = vst [vmem:[#allocation6 + $0x10] sm:$0x3] %v1818_v59  ;;  %v2128_v3 = vld [vmem:[#allocation5 + $0x40] sm:$0x3]  ;;  %v2332_v55 = vrot.slane %v4730_v13, 6  ;;  %v1899_v49 = vmul.f32 %v1891_v28, %v4557_v21  ;;  %v1979_v42 = vmul.f32 %v1971_v6, %v4599_v1 }
 0x16d   :  { %v2208_v14 = vld [vmem:[#allocation5 + $0x40] sm:$0xc]  ;;  %v2316_v47 = vld [vmem:[#allocation3 + $0x60] sm:$0xc0]  ;;  %v2239_v16 = vld [vmem:[#allocation3 + $0x78] sm:$0x30] }
 0x16e   :  { %v2277_v12 = vld [vmem:[#allocation4 + $0x68] sm:$0x30]  ;;  %1906 = vst [vmem:[#allocation6 + $0x10] sm:$0xc] %v1898_v18  ;;  %1986 = vst [vmem:[#allocation6 + $0x10] sm:$0x30] %v1978_v4  ;;  %v2269_v11 = vmul.f32 %v2253_v24, %v2237_v50  ;;  %v2059_v50 = vmul.f32 %v2051_v40, %v4624_v31  ;;  %v2348_v62 = vmul.f32 %v2332_v55, %v2316_v47 }
 0x16f   :  { %2066 = vst [vmem:[#allocation6 + $0x10] sm:$0xc0] %v2058_v58  ;;  %v2288_v2 = vld [vmem:[#allocation5 + $0x40] sm:$0x30]  ;;  %v2368_v32 = vld [vmem:[#allocation5 + $0x40] sm:$0xc0]  ;;  %v2136_v18 = vmul.f32 %v2128_v3, %v4630_v29  ;;  %v2216_v21 = vmul.f32 %v2208_v14, %v4653_v23 }
 0x170   :  { %v2130_v63 = vld [vmem:[#allocation5 + $0x50] sm:$0x3]  ;;  %v2318_v46 = vld [vmem:[#allocation3 + $0x70] sm:$0xc0]  ;;  %v2255_v37 = vrot.slane %v4733_v26, 6  ;;  %v2334_v22 = vrot.slane %v4736_v0, 6  ;;  %v4748_v25 = vadd.f32 %v2277_v12, %v2269_v11  ;;  %v2296_v1 = vmul.f32 %v2288_v2, %v4677_v27 }
 0x171   :  { %1825 = vst [vmem:[#allocation6 + $0x8] sm:$0x3] %v1817_v53  ;;  %v2210_v60 = vld [vmem:[#allocation5 + $0x50] sm:$0xc]  ;;  %v2290_v8 = vld [vmem:[#allocation5 + $0x50] sm:$0x30]  ;;  %v2376_v31 = vmul.f32 %v2368_v32, %v4701_v35 }
 0x172   :  { %v2370_v41 = vld [vmem:[#allocation5 + $0x50] sm:$0xc0]  ;;  %v2356_v33 = vld [vmem:[#allocation4 + $0x60] sm:$0xc0]  ;;  %v2279_v5 = vld [vmem:[#allocation4 + $0x78] sm:$0x30]  ;;  %v2271_v44 = vmul.f32 %v2255_v37, %v2239_v16  ;;  %v2138_v16 = vmul.f32 %v2130_v63, %v4632_v19  ;;  %v2218_v2 = vmul.f32 %v2210_v60, %v4656_v39  ;;  %v2298_v32 = vmul.f32 %v2290_v8, %v4680_v10 }
 0x173   :  { %1905 = vst [vmem:[#allocation6 + $0x8] sm:$0xc] %v1897_v48  ;;  %1985 = vst [vmem:[#allocation6 + $0x8] sm:$0x30] %v1977_v17  ;;  %v2129_v7 = vld [vmem:[#allocation5 + $0x48] sm:$0x3]  ;;  %v2350_v48 = vmul.f32 %v2334_v22, %v2318_v46  ;;  %v4754_v47 = vadd.f32 %v2356_v33, %v2348_v62  ;;  %v2378_v46 = vmul.f32 %v2370_v41, %v4704_v51 }
 0x174   :  { %2065 = vst [vmem:[#allocation6 + $0x8] sm:$0xc0] %v2057_v34  ;;  %v2209_v59 = vld [vmem:[#allocation5 + $0x48] sm:$0xc]  ;;  %v2358_v57 = vld [vmem:[#allocation4 + $0x70] sm:$0xc0]  ;;  %v4757_v3 = vadd.f32 %v2279_v5, %v2271_v44 }
 0x175   :  { %1827 = vst [vmem:[#allocation6 + $0x18] sm:$0x3] %v1819_v9  ;;  %v2289_v4 = vld [vmem:[#allocation5 + $0x48] sm:$0x30]  ;;  %v2369_v58 = vld [vmem:[#allocation5 + $0x48] sm:$0xc0]  ;;  %v4760_v27 = vadd.f32 %v2358_v57, %v2350_v48  ;;  %v2137_v9 = vmul.f32 %v2129_v7, %v4640_v36  ;;  %v2217_v33 = vmul.f32 %v2209_v59, %v4664_v45 }
 0x176   :  { %v2131_v24 = vld [vmem:[#allocation5 + $0x58] sm:$0x3]  ;;  %v2317_v53 = vld [vmem:[#allocation3 + $0x68] sm:$0xc0]  ;;  %1907 = vst [vmem:[#allocation6 + $0x18] sm:$0xc] %v1899_v49  ;;  %v2297_v51 = vmul.f32 %v2289_v4, %v4688_v56  ;;  %v2377_v10 = vmul.f32 %v2369_v58, %v4711_v43 }
 0x177   :  { %1987 = vst [vmem:[#allocation6 + $0x18] sm:$0x30] %v1979_v42  ;;  %2067 = vst [vmem:[#allocation6 + $0x18] sm:$0xc0] %v2059_v50  ;;  %v2211_v28 = vld [vmem:[#allocation5 + $0x58] sm:$0xc]  ;;  %v2139_v60 = vmul.f32 %v2131_v24, %v4648_v52 }
 0x178   :  { %v2291_v6 = vld [vmem:[#allocation5 + $0x58] sm:$0x30]  ;;  %v2371_v40 = vld [vmem:[#allocation5 + $0x58] sm:$0xc0]  ;;  %v2333_v29 = vrot.slane %v4748_v25, 6  ;;  %v2335_v37 = vrot.slane %v4757_v3, 6  ;;  %v2219_v8 = vmul.f32 %v2211_v28, %v4672_v38 }
 0x179   :  { %2144 = vst [vmem:[#allocation6 + $0x40] sm:$0x3] %v2136_v18  ;;  %v1812_v12 = vld [vmem:[#allocation5 + $0x20] sm:$0x3]  ;;  %v1892_v17 = vld [vmem:[#allocation5 + $0x20] sm:$0xc]  ;;  %v2299_v62 = vmul.f32 %v2291_v6, %v4696_v61  ;;  %v2379_v57 = vmul.f32 %v2371_v40, %v4719_v20 }
 0x17a   :  { %v1972_v34 = vld [vmem:[#allocation5 + $0x20] sm:$0x30]  ;;  %v2052_v23 = vld [vmem:[#allocation5 + $0x20] sm:$0xc0]  ;;  %v2319_v14 = vld [vmem:[#allocation3 + $0x78] sm:$0xc0]  ;;  %v2349_v63 = vmul.f32 %v2333_v29, %v2317_v53  ;;  %v1820_v38 = vmul.f32 %v1812_v12, %v4582_v15  ;;  %v1900_v4 = vmul.f32 %v1892_v17, %v4610_v54 }
 0x17b   :  { %v2357_v35 = vld [vmem:[#allocation4 + $0x68] sm:$0xc0]  ;;  %2224 = vst [vmem:[#allocation6 + $0x40] sm:$0xc] %v2216_v21  ;;  %2304 = vst [vmem:[#allocation6 + $0x40] sm:$0x30] %v2296_v1  ;;  %v2351_v59 = vmul.f32 %v2335_v37, %v2319_v14 }
 0x17c   :  { %2384 = vst [vmem:[#allocation6 + $0x40] sm:$0xc0] %v2376_v31  ;;  %v1814_v55 = vld [vmem:[#allocation5 + $0x30] sm:$0x3]  ;;  %v1894_v11 = vld [vmem:[#allocation5 + $0x30] sm:$0xc]  ;;  %v4772_v7 = vadd.f32 %v2357_v35, %v2349_v63 }
 0x17d   :  { %v1974_v19 = vld [vmem:[#allocation5 + $0x30] sm:$0x30]  ;;  %2146 = vst [vmem:[#allocation6 + $0x50] sm:$0x3] %v2138_v16  ;;  %v2054_v22 = vld [vmem:[#allocation5 + $0x30] sm:$0xc0] }
 0x17e   :  { %v1813_v5 = vld [vmem:[#allocation5 + $0x28] sm:$0x3]  ;;  %v1893_v49 = vld [vmem:[#allocation5 + $0x28] sm:$0xc]  ;;  %v1973_v42 = vld [vmem:[#allocation5 + $0x28] sm:$0x30] }
 0x17f   :  { %v2359_v39 = vld [vmem:[#allocation4 + $0x78] sm:$0xc0]  ;;  %2226 = vst [vmem:[#allocation6 + $0x50] sm:$0xc] %v2218_v2  ;;  %2306 = vst [vmem:[#allocation6 + $0x50] sm:$0x30] %v2298_v32 }
 0x180   :  { %2386 = vst [vmem:[#allocation6 + $0x50] sm:$0xc0] %v2378_v46  ;;  %v2053_v41 = vld [vmem:[#allocation5 + $0x28] sm:$0xc0]  ;;  %v1815_v36 = vld [vmem:[#allocation5 + $0x38] sm:$0x3]  ;;  %v4780_v1 = vadd.f32 %v2359_v39, %v2351_v59 }
 0x181   :  { %v1895_v50 = vld [vmem:[#allocation5 + $0x38] sm:$0xc]  ;;  %v1975_v45 = vld [vmem:[#allocation5 + $0x38] sm:$0x30]  ;;  %2145 = vst [vmem:[#allocation6 + $0x48] sm:$0x3] %v2137_v9 }
 0x182   :  { %2225 = vst [vmem:[#allocation6 + $0x48] sm:$0xc] %v2217_v33  ;;  %v2055_v56 = vld [vmem:[#allocation5 + $0x38] sm:$0xc0]  ;;  %v2132_v44 = vld [vmem:[#allocation5 + $0x60] sm:$0x3] }
 0x183   :  { %v2212_v43 = vld [vmem:[#allocation5 + $0x60] sm:$0xc]  ;;  %v2292_v18 = vld [vmem:[#allocation5 + $0x60] sm:$0x30]  ;;  %v2439_v52 = vld [vmem:[#allocation6 + $0x8] sm:$0xff] }
 0x184   :  { %2305 = vst [vmem:[#allocation6 + $0x48] sm:$0x30] %v2297_v51  ;;  %2385 = vst [vmem:[#allocation6 + $0x48] sm:$0xc0] %v2377_v10  ;;  %v5123_v58 = vld [vmem:[#allocation29_spill] sm:$0xff]  ;;  %2725 = vmatprep.mubr.f32.mxu0 %v2439_v52  ;;  %v2438_v20 = vld [vmem:[#allocation6] sm:$0xff] }
 0x185   :  { %2147 = vst [vmem:[#allocation6 + $0x58] sm:$0x3] %v2139_v60  ;;  %2227 = vst [vmem:[#allocation6 + $0x58] sm:$0xc] %v2219_v8  ;;  %v1980_v24 = vmul.f32 %v1972_v34, %v5123_v58  ;;  %v5124_v53 = vld [vmem:[#allocation33_spill] sm:$0xff]  ;;  %v5125_v31 = vld [vmem:[#allocation24_spill] sm:$0xff]  ;;  %2726 = vmatmul.mubr.f32.vlgmr.msra.gmra.mrb[32].mxu0 %v2438_v20 }
 0x186   :  { %v2060_v48 = vmul.f32 %v2052_v23, %v5124_v53  ;;  %v2372_v61 = vld [vmem:[#allocation5 + $0x60] sm:$0xc0]  ;;  %v2134_v21 = vld [vmem:[#allocation5 + $0x70] sm:$0x3]  ;;  %2307 = vst [vmem:[#allocation6 + $0x58] sm:$0x30] %v2299_v62  ;;  %v1822_v28 = vmul.f32 %v1814_v55, %v5125_v31 }
 0x187   :  { %2387 = vst [vmem:[#allocation6 + $0x58] sm:$0xc0] %v2379_v57  ;;  %v5126_v6 = vld [vmem:[#allocation27_spill] sm:$0xff]  ;;  %v2214_v16 = vld [vmem:[#allocation5 + $0x70] sm:$0xc]  ;;  %v2441_v12 = vld [vmem:[#allocation6 + $0x18] sm:$0xff]  ;;  %v2380_v53 = vmul.f32 %v2372_v61, %v4754_v47 }
 0x188   :  { %v1902_v40 = vmul.f32 %v1894_v11, %v5126_v6  ;;  %v5127_v29 = vld [vmem:[#allocation31_spill] sm:$0xff]  ;;  %v2294_v54 = vld [vmem:[#allocation5 + $0x70] sm:$0x30]  ;;  %1828 = vst [vmem:[#allocation6 + $0x20] sm:$0x3] %v1820_v38  ;;  %v5130_v35 = vld [vmem:[#allocation28_spill] sm:$0xff]  ;;  %2800 = vmatprep.mubr.f32.mxu1 %v2441_v12 }
 0x189   :  { %v1982_v15 = vmul.f32 %v1974_v19, %v5127_v29  ;;  %1908 = vst [vmem:[#allocation6 + $0x20] sm:$0xc] %v1900_v4  ;;  %1988 = vst [vmem:[#allocation6 + $0x20] sm:$0x30] %v1980_v24  ;;  %v5128_v17 = vld [vmem:[#allocation35_spill] sm:$0xff]  ;;  %v5129_v23 = vld [vmem:[#allocation25_spill] sm:$0xff]  ;;  %v1901_v2 = vmul.f32 %v1893_v49, %v5130_v35 }
 0x18a   :  { %2068 = vst [vmem:[#allocation6 + $0x20] sm:$0xc0] %v2060_v48  ;;  %v2062_v34 = vmul.f32 %v2054_v22, %v5128_v17  ;;  %v1821_v14 = vmul.f32 %v1813_v5, %v5129_v23  ;;  %v5131_v32 = vld [vmem:[#allocation32_spill] sm:$0xff]  ;;  %v2374_v55 = vld [vmem:[#allocation5 + $0x70] sm:$0xc0]  ;;  %v5133_v9 = vld [vmem:[#allocation26_spill] sm:$0xff] }
 0x18b   :  { %v1981_v46 = vmul.f32 %v1973_v42, %v5131_v32  ;;  %v2133_v11 = vld [vmem:[#allocation5 + $0x68] sm:$0x3]  ;;  %v2440_v19 = vld [vmem:[#allocation6 + $0x10] sm:$0xff]  ;;  %1830 = vst [vmem:[#allocation6 + $0x30] sm:$0x3] %v1822_v28  ;;  %v1823_v33 = vmul.f32 %v1815_v36, %v5133_v9  ;;  %v5134_v39 = vld [vmem:[#allocation30_spill] sm:$0xff]  ;;  %v2382_v47 = vmul.f32 %v2374_v55, %v4760_v27 }
 0x18c   :  { %1910 = vst [vmem:[#allocation6 + $0x30] sm:$0xc] %v1902_v40  ;;  %1990 = vst [vmem:[#allocation6 + $0x30] sm:$0x30] %v1982_v15  ;;  %v5132_v63 = vld [vmem:[#allocation36_spill] sm:$0xff]  ;;  %v1903_v51 = vmul.f32 %v1895_v50, %v5134_v39  ;;  %v5135_v22 = vld [vmem:[#allocation34_spill] sm:$0xff]  ;;  %2801 = vmatmul.mubr.f32.vlgmr.msra.gmra.mrb[32].mxu1 %v2440_v19 }
 0x18d   :  { %v2061_v37 = vmul.f32 %v2053_v41, %v5132_v63  ;;  %v1983_v10 = vmul.f32 %v1975_v45, %v5135_v22  ;;  %v2213_v5 = vld [vmem:[#allocation5 + $0x68] sm:$0xc]  ;;  %v2293_v60 = vld [vmem:[#allocation5 + $0x68] sm:$0x30]  ;;  %v2373_v49 = vld [vmem:[#allocation5 + $0x68] sm:$0xc0]  ;;  %v2300_v45 = vmul.f32 %v2292_v18, %v4730_v13 }
 0x18e   :  { %v4796_v42 = vld [vmem:[%s5044_s8 + $0x220] sm:$0xff]  ;;  %2070 = vst [vmem:[#allocation6 + $0x30] sm:$0xc0] %v2062_v34  ;;  %1829 = vst [vmem:[#allocation6 + $0x28] sm:$0x3] %v1821_v14  ;;  %v5136_v8 = vld [vmem:[#allocation37_spill] sm:$0xff]  ;;  %v2301_v29 = vmul.f32 %v2293_v60, %v4748_v25 }
 0x18f   :  { %1909 = vst [vmem:[#allocation6 + $0x28] sm:$0xc] %v1901_v2  ;;  %1989 = vst [vmem:[#allocation6 + $0x28] sm:$0x30] %v1981_v46  ;;  %v2063_v41 = vmul.f32 %v2055_v56, %v5136_v8  ;;  %v5137_v36 = vld [vmem:[#allocation38_spill] sm:$0xff]  ;;  %v5138_v50 = vld [vmem:[#allocation41_spill] sm:$0xff] }
 0x190   :  { %v2140_v59 = vmul.f32 %v2132_v44, %v5137_v36  ;;  %v2220_v62 = vmul.f32 %v2212_v43, %v5138_v50  ;;  %v2135_v57 = vld [vmem:[#allocation5 + $0x78] sm:$0x3]  ;;  %v2215_v52 = vld [vmem:[#allocation5 + $0x78] sm:$0xc]  ;;  %v2295_v38 = vld [vmem:[#allocation5 + $0x78] sm:$0x30]  ;;  %v2302_v43 = vmul.f32 %v2294_v54, %v4736_v0 }
 0x191   :  { %v5139_v4 = vld [vmem:[#allocation9_spill] sm:$0xff]  ;;  %v5140_v58 = vld [vmem:[#allocation8_spill] sm:$0xff]  ;;  %2069 = vst [vmem:[#allocation6 + $0x28] sm:$0xc0] %v2061_v37  ;;  %1831 = vst [vmem:[#allocation6 + $0x38] sm:$0x3] %v1823_v33  ;;  %v2223_v23 = vmul.f32 %v2215_v52, %v4733_v26  ;;  %v2303_v14 = vmul.f32 %v2295_v38, %v4757_v3 }
 0x192   :  { %v5141_v24 = vpack.c.bf16 %v5139_v4, %v5140_v58  ;;  %1911 = vst [vmem:[#allocation6 + $0x38] sm:$0xc] %v1903_v51  ;;  %1991 = vst [vmem:[#allocation6 + $0x38] sm:$0x30] %v1983_v10  ;;  %v5142_v56 = vld [vmem:[#allocation39_spill] sm:$0xff]  ;;  %v5145_v31 = vld [vmem:[#allocation10_spill] sm:$0xff] }
 0x193   :  { %v2142_v48 = vmul.f32 %v2134_v21, %v5142_v56  ;;  %v5143_v44 = vld [vmem:[#allocation43_spill] sm:$0xff]  ;;  %v2375_v13 = vld [vmem:[#allocation5 + $0x78] sm:$0xc0]  ;;  %v2523_v6 = vld [vmem:[%s5044_s8 + $0x228] sm:$0xff]  ;;  %2071 = vst [vmem:[#allocation6 + $0x38] sm:$0xc0] %v2063_v41  ;;  %v2221_v21 = vmul.f32 %v2213_v5, %v4724_v30  ;;  %v2381_v30 = vmul.f32 %v2373_v49, %v4772_v7 }
 0x194   :  { %3430 = vmatpush3.bf16.msra.mxu0 %v5141_v24  ;;  %v2222_v20 = vmul.f32 %v2214_v16, %v5143_v44  ;;  %v5144_v18 = vld [vmem:[#allocation11_spill] sm:$0xff]  ;;  %2148 = vst [vmem:[#allocation6 + $0x60] sm:$0x3] %v2140_v59  ;;  %2228 = vst [vmem:[#allocation6 + $0x60] sm:$0xc] %v2220_v62  ;;  %v5147_v0 = vld [vmem:[#allocation40_spill] sm:$0xff]  ;;  %v2383_v26 = vmul.f32 %v2375_v13, %v4780_v1  ;;  %v3437_v63 = vpack.c.bf16 %v2523_v6, %v4796_v42 }
 0x195   :  { %v5146_v28 = vpack.c.bf16 %v5144_v18, %v5145_v31  ;;  %v2554_v40 = vld [vmem:[%s5044_s8 + $0x320] sm:$0xff]  ;;  %2308 = vst [vmem:[#allocation6 + $0x60] sm:$0x30] %v2300_v45  ;;  %v2141_v61 = vmul.f32 %v2133_v11, %v5147_v0  ;;  %v5148_v15 = vld [vmem:[#allocation13_spill] sm:$0xff]  ;;  %v5149_v16 = vld [vmem:[#allocation12_spill] sm:$0xff] }
 0x196   :  { %v5150_v54 = vpack.c.bf16 %v5148_v15, %v5149_v16  ;;  %v2555_v12 = vld [vmem:[%s5044_s8 + $0x328] sm:$0xff]  ;;  %v2540_v17 = vld [vmem:[%s5044_s8 + $0x2b0] sm:$0xff]  ;;  %v2541_v27 = vld [vmem:[%s5044_s8 + $0x2b8] sm:$0xff]  ;;  %2388 = vst [vmem:[#allocation6 + $0x60] sm:$0xc0] %v2380_v53 }
 0x197   :  { %3462 = vmatpush3.bf16.msra.mxu1 %v5146_v28  ;;  %2150 = vst [vmem:[#allocation6 + $0x70] sm:$0x3] %v2142_v48  ;;  %2230 = vst [vmem:[#allocation6 + $0x70] sm:$0xc] %v2222_v20  ;;  %v5151_v25 = vld [vmem:[#allocation42_spill] sm:$0xff]  ;;  %v5152_v35 = vld [vmem:[#allocation15_spill] sm:$0xff]  ;;  %v3469_v60 = vpack.c.bf16 %v2555_v12, %v2554_v40  ;;  %v3439_v49 = vpack.c.bf16 %v2541_v27, %v2540_v17 }
 0x198   :  { %3432 = vmatprep.subr.bf16.mxu0 %v5150_v54  ;;  %2310 = vst [vmem:[#allocation6 + $0x70] sm:$0x30] %v2302_v43  ;;  %v2143_v34 = vmul.f32 %v2135_v57, %v5151_v25  ;;  %v5153_v2 = vld [vmem:[#allocation14_spill] sm:$0xff]  ;;  %v2572_v46 = vld [vmem:[%s5044_s8 + $0x3b0] sm:$0xff]  ;;  %v2447_v11 = vld [vmem:[#allocation6 + $0x48] sm:$0xff] }
 0x199   :  { %v5154_v32 = vpack.c.bf16 %v5152_v35, %v5153_v2  ;;  %v2573_v55 = vld [vmem:[%s5044_s8 + $0x3b8] sm:$0xff]  ;;  %2390 = vst [vmem:[#allocation6 + $0x70] sm:$0xc0] %v2382_v47  ;;  %2149 = vst [vmem:[#allocation6 + $0x68] sm:$0x3] %v2141_v61  ;;  %v5155_v3 = vld [vmem:[#allocation17_spill] sm:$0xff]  ;;  %2730 = vmatprep.mubr.f32.mxu0 %v2447_v11 }
 0x19a   :  { %2229 = vst [vmem:[#allocation6 + $0x68] sm:$0xc] %v2221_v21  ;;  %2309 = vst [vmem:[#allocation6 + $0x68] sm:$0x30] %v2301_v29  ;;  %v5156_v7 = vld [vmem:[#allocation16_spill] sm:$0xff]  ;;  %v2524_v37 = vld [vmem:[%s5044_s8 + $0x230] sm:$0xff]  ;;  %v3471_v62 = vpack.c.bf16 %v2573_v55, %v2572_v46 }
 0x19b   :  { %3464 = vmatprep.subr.bf16.mxu1 %v5154_v32  ;;  %v5157_v19 = vpack.c.bf16 %v5155_v3, %v5156_v7  ;;  %v2525_v9 = vld [vmem:[%s5044_s8 + $0x238] sm:$0xff]  ;;  %2389 = vst [vmem:[#allocation6 + $0x68] sm:$0xc0] %v2381_v30  ;;  %2151 = vst [vmem:[#allocation6 + $0x78] sm:$0x3] %v2143_v34  ;;  %v5158_v1 = vld [vmem:[#allocation19_spill] sm:$0xff] }
 0x19c   :  { %v2449_v33 = vld [vmem:[#allocation6 + $0x58] sm:$0xff]  ;;  %2231 = vst [vmem:[#allocation6 + $0x78] sm:$0xc] %v2223_v23  ;;  %2311 = vst [vmem:[#allocation6 + $0x78] sm:$0x30] %v2303_v14  ;;  %v5161_v22 = vld [vmem:[#allocation21_spill] sm:$0xff]  ;;  %v3441_v58 = vpack.c.bf16 %v2525_v9, %v2524_v37 }
 0x19d   :  { %3434 = vmatpush3.bf16.msra.mxu0 %v5157_v19  ;;  %v5159_v39 = vld [vmem:[#allocation18_spill] sm:$0xff]  ;;  %v5162_v10 = vld [vmem:[#allocation20_spill] sm:$0xff]  ;;  %v2556_v42 = vld [vmem:[%s5044_s8 + $0x330] sm:$0xff]  ;;  %2391 = vst [vmem:[#allocation6 + $0x78] sm:$0xc0] %v2383_v26  ;;  %2805 = vmatprep.mubr.f32.mxu1 %v2449_v33 }
 0x19e   :  { %v5160_v51 = vpack.c.bf16 %v5158_v1, %v5159_v39  ;;  %v5163_v5 = vpack.c.bf16 %v5161_v22, %v5162_v10  ;;  %v2557_v8 = vld [vmem:[%s5044_s8 + $0x338] sm:$0xff]  ;;  %v2542_v41 = vld [vmem:[%s5044_s8 + $0x2c0] sm:$0xff]  ;;  %v2543_v45 = vld [vmem:[%s5044_s8 + $0x2c8] sm:$0xff] }
 0x19f   :  { %v5164_v36 = vld [vmem:[#allocation23_spill] sm:$0xff]  ;;  %v5165_v59 = vld [vmem:[#allocation22_spill] sm:$0xff]  ;;  %v2448_v52 = vld [vmem:[#allocation6 + $0x50] sm:$0xff]  ;;  %v3473_v56 = vpack.c.bf16 %v2557_v8, %v2556_v42  ;;  %v3443_v48 = vpack.c.bf16 %v2543_v45, %v2542_v41 }
 0x1a0   :  { %3466 = vmatpush3.bf16.msra.mxu1 %v5160_v51  ;;  %3436 = vmatprep.subr.bf16.mxu0 %v5163_v5  ;;  %v5166_v50 = vpack.c.bf16 %v5164_v36, %v5165_v59  ;;  %v2446_v57 = vld [vmem:[#allocation6 + $0x40] sm:$0xff]  ;;  %v2575_v4 = vld [vmem:[%s5044_s8 + $0x3c8] sm:$0xff]  ;;  %v2544_v18 = vld [vmem:[%s5044_s8 + $0x2d0] sm:$0xff] }
 0x1a1   :  { %v2574_v38 = vld [vmem:[%s5044_s8 + $0x3c0] sm:$0xff]  ;;  %2731 = vmatmul.mubr.f32.gmra.mrb[34].mxu0 %v2446_v57  ;;  %2806 = vmatmul.mubr.f32.gmra.mrb[34].mxu1 %v2448_v52  ;;  %v2527_v53 = vld [vmem:[%s5044_s8 + $0x248] sm:$0xff]  ;;  %v2545_v31 = vld [vmem:[%s5044_s8 + $0x2d8] sm:$0xff] }
 0x1a2   :  { %3468 = vmatprep.subr.bf16.mxu1 %v5166_v50  ;;  %3438 = vmatpush3.bf16.msra.mxu0 %v3437_v63  ;;  %v2526_v24 = vld [vmem:[%s5044_s8 + $0x240] sm:$0xff]  ;;  %v2559_v20 = vld [vmem:[%s5044_s8 + $0x348] sm:$0xff]  ;;  %v3475_v13 = vpack.c.bf16 %v2575_v4, %v2574_v38  ;;  %v2445_v28 = vld [vmem:[#allocation6 + $0x38] sm:$0xff]  ;;  %v3447_v61 = vpack.c.bf16 %v2545_v31, %v2544_v18 }
 0x1a3   :  { %3440 = vmatprep.subr.bf16.mxu0 %v3439_v49  ;;  %v2558_v44 = vld [vmem:[%s5044_s8 + $0x340] sm:$0xff]  ;;  %v2443_v43 = vld [vmem:[#allocation6 + $0x28] sm:$0xff]  ;;  %v2576_v6 = vld [vmem:[%s5044_s8 + $0x3d0] sm:$0xff]  ;;  %2950 = vmatprep.mubr.f32.mxu1 %v2445_v28  ;;  %v3445_v47 = vpack.c.bf16 %v2527_v53, %v2526_v24 }
 0x1a4   :  { %3470 = vmatpush3.bf16.msra.mxu1 %v3469_v60  ;;  %2875 = vmatprep.mubr.f32.mxu0 %v2443_v43  ;;  %v2577_v40 = vld [vmem:[%s5044_s8 + $0x3d8] sm:$0xff]  ;;  %v3477_v0 = vpack.c.bf16 %v2559_v20, %v2558_v44  ;;  %v2528_v21 = vld [vmem:[%s5044_s8 + $0x250] sm:$0xff]  ;;  %v2546_v12 = vld [vmem:[%s5044_s8 + $0x2e0] sm:$0xff] }
 0x1a5   :  { %3472 = vmatprep.subr.bf16.mxu1 %v3471_v62  ;;  %v2529_v29 = vld [vmem:[%s5044_s8 + $0x258] sm:$0xff]  ;;  %v2560_v15 = vld [vmem:[%s5044_s8 + $0x350] sm:$0xff]  ;;  %v3479_v16 = vpack.c.bf16 %v2577_v40, %v2576_v6  ;;  %v2547_v17 = vld [vmem:[%s5044_s8 + $0x2e8] sm:$0xff] }
 0x1a6   :  { %3442 = vmatpush3.bf16.msra.mxu0 %v3441_v58  ;;  %v2561_v54 = vld [vmem:[%s5044_s8 + $0x358] sm:$0xff]  ;;  %v2578_v27 = vld [vmem:[%s5044_s8 + $0x3e0] sm:$0xff]  ;;  %v2579_v30 = vld [vmem:[%s5044_s8 + $0x3e8] sm:$0xff]  ;;  %v3449_v25 = vpack.c.bf16 %v2529_v29, %v2528_v21  ;;  %v3451_v23 = vpack.c.bf16 %v2547_v17, %v2546_v12 }
 0x1a7   :  { %3444 = vmatprep.subr.bf16.mxu0 %v3443_v48  ;;  %v3481_v34 = vpack.c.bf16 %v2561_v54, %v2560_v15  ;;  %v2530_v14 = vld [vmem:[%s5044_s8 + $0x260] sm:$0xff]  ;;  %v2531_v35 = vld [vmem:[%s5044_s8 + $0x268] sm:$0xff]  ;;  %v3483_v32 = vpack.c.bf16 %v2579_v30, %v2578_v27  ;;  %v2548_v55 = vld [vmem:[%s5044_s8 + $0x2f0] sm:$0xff] }
 0x1a8   :  { %3474 = vmatpush3.bf16.msra.mxu1 %v3473_v56  ;;  %v2562_v2 = vld [vmem:[%s5044_s8 + $0x360] sm:$0xff]  ;;  %v2563_v46 = vld [vmem:[%s5044_s8 + $0x368] sm:$0xff]  ;;  %v2549_v11 = vld [vmem:[%s5044_s8 + $0x2f8] sm:$0xff]  ;;  %v3453_v7 = vpack.c.bf16 %v2531_v35, %v2530_v14 }
 0x1a9   :  { %3476 = vmatprep.subr.bf16.mxu1 %v3475_v13  ;;  %v2580_v26 = vld [vmem:[%s5044_s8 + $0x3f0] sm:$0xff]  ;;  %v2581_v3 = vld [vmem:[%s5044_s8 + $0x3f8] sm:$0xff]  ;;  %v3485_v19 = vpack.c.bf16 %v2563_v46, %v2562_v2  ;;  %v3455_v63 = vpack.c.bf16 %v2549_v11, %v2548_v55  ;;  %v2451_v10 = vld [vmem:[#allocation6 + $0x68] sm:$0xff] }
 0x1aa   :  { %3446 = vmatpush3.bf16.msra.mxu0 %v3445_v47  ;;  %v2532_v37 = vld [vmem:[%s5044_s8 + $0x270] sm:$0xff]  ;;  %v2533_v9 = vld [vmem:[%s5044_s8 + $0x278] sm:$0xff]  ;;  %v3487_v33 = vpack.c.bf16 %v2581_v3, %v2580_v26  ;;  %v2442_v5 = vld [vmem:[#allocation6 + $0x20] sm:$0xff] }
 0x1ab   :  { %3448 = vmatprep.subr.bf16.mxu0 %v3447_v61  ;;  %v2564_v1 = vld [vmem:[%s5044_s8 + $0x370] sm:$0xff]  ;;  %v2565_v39 = vld [vmem:[%s5044_s8 + $0x378] sm:$0xff]  ;;  %v3457_v51 = vpack.c.bf16 %v2533_v9, %v2532_v37  ;;  %v2450_v42 = vld [vmem:[#allocation6 + $0x60] sm:$0xff] }
 0x1ac   :  { %3478 = vmatpush3.bf16.msra.mxu1 %v3477_v0  ;;  %v3489_v22 = vpack.c.bf16 %v2565_v39, %v2564_v1  ;;  %v2453_v60 = vld [vmem:[#allocation6 + $0x78] sm:$0xff]  ;;  %v2444_v49 = vld [vmem:[#allocation6 + $0x30] sm:$0xff]  ;;  %v3050_v41 = vld [vmem:[%s5046_s5] ss:$0 sm:$0xff] }
 0x1ad   :  { %3480 = vmatprep.subr.bf16.mxu1 %v3479_v16  ;;  %v2452_v8 = vld [vmem:[#allocation6 + $0x70] sm:$0xff]  ;;  %v2588_v36 = vcombine.high %v3050_v41, %v3050_v41  ;;  %v5167_v59 = vld [vmem:[#allocation7_spill] sm:$0xff]  ;;  %v3529_v18 = vld [vmem:[%s5040_s0 + $0x8] sm:$0x3] }
 0x1ae   :  { %3450 = vmatpush3.bf16.msra.mxu0 %v3449_v25  ;;  %v2595_v50 = vrot.slane %v3050_v41, %v5167_v59  ;;  %v3525_v52 = vld [vmem:[%s5040_s0] sm:$0x3]  ;;  %v3526_v4 = vld [vmem:[%s5040_s0 + $0x2] sm:$0x3]  ;;  %v3527_v24 = vld [vmem:[%s5040_s0 + $0x4] sm:$0x3] }
 0x1af   :  { %3452 = vmatprep.subr.bf16.mxu0 %v3451_v23  ;;  %v2602_v62 = vrot.slane %v2588_v36, %v5167_v59  ;;  %v3528_v56 = vld [vmem:[%s5040_s0 + $0x6] sm:$0x3]  ;;  %v3530_v28 = vld [vmem:[%s5040_s0 + $0xa] sm:$0x3]  ;;  %v3531_v40 = vld [vmem:[%s5040_s0 + $0xc] sm:$0x3] }
 0x1b0   :  { %3482 = vmatpush3.bf16.msra.mxu1 %v3481_v34  ;;  %v2603_v45 = vcombine.high %v2595_v50, %v2595_v50  ;;  %v2609_v38 = vmul.f32 %v3525_v52, %v2595_v50  ;;  %v2613_v31 = vmul.f32 %v3529_v18, %v2595_v50  ;;  %v3532_v0 = vld [vmem:[%s5040_s0 + $0xe] sm:$0x3] }
 0x1b1   :  { %3484 = vmatprep.subr.bf16.mxu1 %v3483_v32  ;;  %v2604_v57 = vcombine.high %v2602_v62, %v2602_v62  ;;  %v2611_v53 = vmul.f32 %v3527_v24, %v2602_v62  ;;  %v2615_v47 = vmul.f32 %v3531_v40, %v2602_v62 }
 0x1b2   :  { %3454 = vmatpush3.bf16.msra.mxu0 %v3453_v7  ;;  %v2610_v58 = vmul.f32 %v3526_v4, %v2603_v45  ;;  %v2614_v6 = vmul.f32 %v3530_v28, %v2603_v45 }
 0x1b3   :  { %3456 = vmatprep.subr.bf16.mxu0 %v3455_v63  ;;  %v2612_v48 = vmul.f32 %v3528_v56, %v2604_v57  ;;  %v2616_v61 = vmul.f32 %v3532_v0, %v2604_v57 }
 0x1b4   :  { %3486 = vmatpush3.bf16.msra.mxu1 %v3485_v19  ;;  %v2625_v44 = vcombine.low %v2609_v38, %v2610_v58  ;;  %v2642_v12 = vcombine.low %v2613_v31, %v2614_v6 }
 0x1b5   :  { %3488 = vmatprep.subr.bf16.mxu1 %v3487_v33  ;;  %v2626_v20 = vcombine.low %v2611_v53, %v2612_v48  ;;  %v2643_v17 = vcombine.low %v2615_v47, %v2616_v61 }
 0x1b6   :  { %3458 = vmatpush3.bf16.msra.mxu0 %v3457_v51  ;;  %v2633_v43 = vrot.slane %v2625_v44, %v5167_v59  ;;  %v2650_v23 = vrot.slane %v2642_v12, %v5167_v59 }
 0x1b7   :  { %v2640_v13 = vrot.slane %v2626_v20, %v5167_v59  ;;  %v2657_v14 = vrot.slane %v2643_v17, %v5167_v59 }
 0x1b8   :  { %3490 = vmatpush3.bf16.msra.mxu1 %v3489_v22 }
 0x1b9   :  { %2876 = vmatmul.mubr.f32.vlgmr.msra.gmra.mrb[36].mxu0 %v2442_v5  ;;  %v2641_v29 = vcombine.low %v2633_v43, %v2640_v13  ;;  %v2658_v32 = vcombine.low %v2650_v23, %v2657_v14 }
 0x1ba   :  { %2880 = vmatprep.mubr.f32.mxu0 %v2451_v10 }
 0x1bb   :  { %2951 = vmatmul.mubr.f32.vlgmr.msra.gmra.mrb[36].mxu1 %v2444_v49 }
 0x1bc   :  { %2955 = vmatprep.mubr.f32.mxu1 %v2453_v60 }
 0x1bd   :  { %2881 = vmatmul.mubr.f32.gmra.mrb[38].mxu0 %v2450_v42 }
 0x1bf   :  { %2956 = vmatmul.mubr.f32.gmra.mrb[38].mxu1 %v2452_v8 }
 0x258   :  { %v3083_v21 = vpop.f32.mrb[32].mxu0 }
 0x259   :  { %v3084_v15 = vpop.f32.mrb[33].mxu0 }
 0x25a   :  { %v3085_v54 = vadd.f32 %v3084_v15, %v3083_v21 }
 0x25c   :  { %v2728_v30 = vadd.f32 %v3085_v54, %v2641_v29 }
 0x25f   :  { %v3121_v16 = vpop.f32.mrb[32].mxu1 }
 0x260   :  { %v3122_v27 = vpop.f32.mrb[33].mxu1 }
 0x261   :  { %v3123_v25 = vadd.f32 %v3122_v27, %v3121_v16 }
 0x263   :  { %v2803_v34 = vadd.f32 %v3123_v25, %v2728_v30 }
 0x274   :  { %v3086_v35 = vpop.f32.mrb[34].mxu0  ;;  %v3124_v2 = vpop.f32.mrb[34].mxu1 }
 0x275   :  { %v3087_v46 = vpop.f32.mrb[35].mxu0  ;;  %v3125_v55 = vpop.f32.mrb[35].mxu1 }
 0x276   :  { %v3088_v11 = vadd.f32 %v3087_v46, %v3086_v35  ;;  %v3126_v26 = vadd.f32 %v3125_v55, %v3124_v2 }
 0x278   :  { %v2733_v3 = vadd.f32 %v3088_v11, %v2658_v32 }
 0x27a   :  { %v2808_v7 = vadd.f32 %v3126_v26, %v2733_v3 }
 0x28c   :  { %v3159_v19 = vpop.f32.mrb[36].mxu0 }
 0x28d   :  { %v3160_v37 = vpop.f32.mrb[37].mxu0 }
 0x28e   :  { %v3197_v63 = vpop.f32.mrb[36].mxu1  ;;  %v3161_v9 = vadd.f32 %v3160_v37, %v3159_v19 }
 0x28f   :  { %v3198_v33 = vpop.f32.mrb[37].mxu1 }
 0x290   :  { %v3199_v1 = vadd.f32 %v3198_v33, %v3197_v63  ;;  %v2878_v39 = vadd.f32 %v3161_v9, %v2803_v34  ;;  %v3162_v51 = vpop.f32.mrb[38].mxu0 }
 0x291   :  { %v3163_v10 = vpop.f32.mrb[39].mxu0 }
 0x292   :  { %v3200_v22 = vpop.f32.mrb[38].mxu1  ;;  %v2953_v5 = vadd.f32 %v3199_v1, %v2878_v39  ;;  %v3164_v60 = vadd.f32 %v3163_v10, %v3162_v51 }
 0x293   :  { %v3201_v49 = vpop.f32.mrb[39].mxu1 }
 0x294   :  { %v3202_v42 = vadd.f32 %v3201_v49, %v3200_v22  ;;  %v2963_v8 = vcombine.high %v2953_v5, %v2953_v5  ;;  %v2970_v41 = vrot.slane %v2953_v5, %v5167_v59  ;;  %v2883_v36 = vadd.f32 %v3164_v60, %v2808_v7 }
 0x296   :  { %v2977_v50 = vrot.slane %v2963_v8, %v5167_v59  ;;  %v2978_v62 = vcombine.high %v2970_v41, %v2970_v41  ;;  %3006 = vst.msk [vmem:[%s5047_s9] sm:$0x3] %vm3005_vm2, %v2970_v41  ;;  %v2958_v45 = vadd.f32 %v3202_v42, %v2883_v36 }
 0x298   :  { %v2979_v57 = vcombine.high %v2977_v50, %v2977_v50  ;;  %3007 = vst.msk [vmem:[%s5047_s9 + $0x2] sm:$0x3] %vm3005_vm2, %v2978_v62  ;;  %3008 = vst.msk [vmem:[%s5047_s9 + $0x4] sm:$0x3] %vm3005_vm2, %v2977_v50  ;;  %v2980_v52 = vcombine.high %v2958_v45, %v2958_v45  ;;  %v2987_v38 = vrot.slane %v2958_v45, %v5167_v59 }
 0x29a   :  { %3009 = vst.msk [vmem:[%s5047_s9 + $0x6] sm:$0x3] %vm3005_vm2, %v2979_v57  ;;  %v2994_v4 = vrot.slane %v2980_v52, %v5167_v59  ;;  %v2995_v58 = vcombine.high %v2987_v38, %v2987_v38  ;;  %3010 = vst.msk [vmem:[%s5047_s9 + $0x8] sm:$0x3] %vm3005_vm2, %v2987_v38 }
 0x29c   :  { %v2996_v24 = vcombine.high %v2994_v4, %v2994_v4  ;;  %3011 = vst.msk [vmem:[%s5047_s9 + $0xa] sm:$0x3] %vm3005_vm2, %v2995_v58  ;;  %3012 = vst.msk [vmem:[%s5047_s9 + $0xc] sm:$0x3] %vm3005_vm2, %v2994_v4 }
 0x29e   :  { %3013 = vst.msk [vmem:[%s5047_s9 + $0xe] sm:$0x3] %vm3005_vm2, %v2996_v24 }

// kernel: samba_forward.36
= control target key start
LH: loop header
LB: loop body
LE: loop exit
PB: predicated region body
PF: predicated region fallthrough
CT: control target
= control target key end

     0   :  { %v3681_v3 = vmov 0.0   ;;  %v3682_v17 = vmov 1983009808   ;;  %v249_v19 = vlaneseq  ;;  %vm278_vm0 = vcmask 523264   ;;  %s5087_s6 = inlined_call_operand.vmem [shape: f32[64,1024], index: 6, kind: input, shape index: {}]   ;;  %s5088_s1 = inlined_call_operand.vmem [shape: f32[8,2,64], index: 1, kind: input, shape index: {}]   ;;  %s5089_s0 = inlined_call_operand.vmem [shape: f32[8,2,64], index: 0, kind: input, shape index: {}]   ;;  %s5090_s7 = inlined_call_operand.vmem [shape: f32[16,1024], index: 7, kind: input, shape index: {}]   ;;  %s5091_s2 = inlined_call_operand.vmem [shape: f32[8,2,16], index: 2, kind: input, shape index: {}]   ;;  %s5092_s3 = inlined_call_operand.vmem [shape: f32[8,2,16], index: 3, kind: input, shape index: {}]   ;;  %s5093_s4 = inlined_call_operand.vmem [shape: f32[1,1024], index: 4, kind: input, shape index: {}]   ;;  %s5094_s8 = inlined_call_operand.vmem [shape: f32[1024,64], index: 8, kind: input, shape index: {}]   ;;  %s5095_s5 = inlined_call_operand.vmem [shape: f32[1,64], index: 5, kind: input, shape index: {}]   ;;  %s5096_s9 = inlined_call_operand.vmem [shape: f32[8,2,64], index: 9, kind: output, shape index: {}]  }
   0x1   :  { %v173_v0 = vld [vmem:[%s5087_s6 + $0x8] sm:$0xff]  ;;  %v175_v2 = vld [vmem:[%s5087_s6 + $0x18] sm:$0xff]  ;;  %347 = vmatprep.mubr.f32.mxu0 %v3681_v3  ;;  %424 = vmatprep.mubr.f32.mxu1 %v3681_v3  ;;  %v172_v6 = vld [vmem:[%s5087_s6] sm:$0xff]  ;;  %v247_v18 = vunpack.c.l.s4 %v3682_v17  ;;  %vm1011_vm1 = vcmask 130048   ;;  %vm3107_vm2 = vcmask 517120  }
   0x2   :  { %v181_v1 = vld [vmem:[%s5087_s6 + $0x48] sm:$0xff]  ;;  %v183_v5 = vld [vmem:[%s5087_s6 + $0x58] sm:$0xff]  ;;  %v180_v7 = vld [vmem:[%s5087_s6 + $0x40] sm:$0xff]  ;;  %v3833_v39 = vshrl.u32 %v249_v19, 7 }
   0x3   :  { %v3744_v4 = vpack.c.bf16 %v181_v1, %v173_v0  ;;  %v3755_v8 = vpack.c.bf16 %v183_v5, %v175_v2  ;;  %v3757_v9 = vpack.c.bf16 %v180_v7, %v172_v6  ;;  %v174_v10 = vld [vmem:[%s5087_s6 + $0x10] sm:$0xff]  ;;  %v189_v12 = vld [vmem:[%s5087_s6 + $0x88] sm:$0xff]  ;;  %v191_v15 = vld [vmem:[%s5087_s6 + $0x98] sm:$0xff]  ;;  %v248_v38 = vunpack.c.0.s8 %v247_v18 }
   0x4   :  { %v182_v11 = vld [vmem:[%s5087_s6 + $0x50] sm:$0xff]  ;;  %v197_v14 = vld [vmem:[%s5087_s6 + $0xc8] sm:$0xff]  ;;  %v199_v16 = vld [vmem:[%s5087_s6 + $0xd8] sm:$0xff] }
   0x5   :  { %3352 = vmatprep.subr.bf16.mxu0 %v3744_v4  ;;  %v3769_v13 = vpack.c.bf16 %v182_v11, %v174_v10  ;;  %3368 = vmatprep.subr.bf16.mxu1 %v3755_v8  ;;  %v3782_v20 = vpack.c.bf16 %v197_v14, %v189_v12  ;;  %v3784_v21 = vpack.c.bf16 %v199_v16, %v191_v15  ;;  %v188_v22 = vld [vmem:[%s5087_s6 + $0x80] sm:$0xff]  ;;  %v190_v24 = vld [vmem:[%s5087_s6 + $0x90] sm:$0xff]  ;;  %v205_v27 = vld [vmem:[%s5087_s6 + $0x108] sm:$0xff] }
   0x6   :  { %3354 = vmatpush1.bf16.msra.mxu0 %v3757_v9  ;;  %v196_v23 = vld [vmem:[%s5087_s6 + $0xc0] sm:$0xff]  ;;  %v198_v26 = vld [vmem:[%s5087_s6 + $0xd0] sm:$0xff]  ;;  %v213_v28 = vld [vmem:[%s5087_s6 + $0x148] sm:$0xff]  ;;  %v3872_v52 = vsub.s32 %v248_v38, %v3833_v39 }
   0x7   :  { %3370 = vmatpush1.bf16.msra.mxu1 %v3769_v13  ;;  %v3796_v25 = vpack.c.bf16 %v196_v23, %v188_v22  ;;  %3356 = vmatprep.subr.bf16.mxu0 %v3782_v20  ;;  %v3809_v29 = vpack.c.bf16 %v198_v26, %v190_v24  ;;  %v3811_v30 = vpack.c.bf16 %v213_v28, %v205_v27  ;;  %v207_v31 = vld [vmem:[%s5087_s6 + $0x118] sm:$0xff]  ;;  %v204_v33 = vld [vmem:[%s5087_s6 + $0x100] sm:$0xff]  ;;  %v206_v36 = vld [vmem:[%s5087_s6 + $0x110] sm:$0xff] }
   0x8   :  { %3372 = vmatprep.subr.bf16.mxu1 %v3784_v21  ;;  %v215_v32 = vld [vmem:[%s5087_s6 + $0x158] sm:$0xff]  ;;  %v212_v35 = vld [vmem:[%s5087_s6 + $0x140] sm:$0xff]  ;;  %v214_v37 = vld [vmem:[%s5087_s6 + $0x150] sm:$0xff]  ;;  %5107 = vst [vmem:[#allocation7_spill] sm:$0xff] %v3872_v52 }
   0x9   :  { %v3822_v34 = vpack.c.bf16 %v215_v32, %v207_v31  ;;  %v3836_v40 = vpack.c.bf16 %v212_v35, %v204_v33  ;;  %v221_v41 = vld [vmem:[%s5087_s6 + $0x188] sm:$0xff]  ;;  %v223_v43 = vld [vmem:[%s5087_s6 + $0x198] sm:$0xff]  ;;  %v3849_v44 = vpack.c.bf16 %v214_v37, %v206_v36  ;;  %v220_v47 = vld [vmem:[%s5087_s6 + $0x180] sm:$0xff] }
   0xa   :  { %3358 = vmatpush1.bf16.msra.mxu0 %v3796_v25  ;;  %v229_v42 = vld [vmem:[%s5087_s6 + $0x1c8] sm:$0xff]  ;;  %v231_v46 = vld [vmem:[%s5087_s6 + $0x1d8] sm:$0xff]  ;;  %v228_v48 = vld [vmem:[%s5087_s6 + $0x1c0] sm:$0xff] }
   0xb   :  { %3374 = vmatpush1.bf16.msra.mxu1 %v3809_v29  ;;  %3360 = vmatprep.subr.bf16.mxu0 %v3811_v30  ;;  %v3851_v45 = vpack.c.bf16 %v229_v42, %v221_v41  ;;  %v3863_v49 = vpack.c.bf16 %v231_v46, %v223_v43  ;;  %v222_v50 = vld [vmem:[%s5087_s6 + $0x190] sm:$0xff]  ;;  %v3875_v53 = vpack.c.bf16 %v228_v48, %v220_v47  ;;  %v3880_v54 = vld [vmem:[%s5088_s1] sm:$0x3]  ;;  %v3885_v55 = vld [vmem:[%s5088_s1 + $0x2] sm:$0x3] }
   0xc   :  { %3376 = vmatprep.subr.bf16.mxu1 %v3822_v34  ;;  %v230_v51 = vld [vmem:[%s5087_s6 + $0x1d0] sm:$0xff]  ;;  %v3890_v56 = vld [vmem:[%s5088_s1 + $0x4] sm:$0x3]  ;;  %v3899_v58 = vld [vmem:[%s5088_s1 + $0x6] sm:$0x3]  ;;  %v244_v59 = vcombine.low %v3880_v54, %v3885_v55 }
   0xd   :  { %v3894_v57 = vpack.c.bf16 %v230_v51, %v222_v50  ;;  %v177_v60 = vld [vmem:[%s5087_s6 + $0x28] sm:$0xff]  ;;  %v245_v62 = vcombine.low %v3890_v56, %v3899_v58  ;;  %v179_v0 = vld [vmem:[%s5087_s6 + $0x38] sm:$0xff]  ;;  %v176_v2 = vld [vmem:[%s5087_s6 + $0x20] sm:$0xff] }
   0xe   :  { %3362 = vmatpush1.bf16.msra.mxu0 %v3836_v40  ;;  %v185_v61 = vld [vmem:[%s5087_s6 + $0x68] sm:$0xff]  ;;  %v187_v1 = vld [vmem:[%s5087_s6 + $0x78] sm:$0xff]  ;;  %v252_v5 = vrot.slane %v244_v59, %v3872_v52  ;;  %v184_v7 = vld [vmem:[%s5087_s6 + $0x60] sm:$0xff] }
   0xf   :  { %3378 = vmatpush1.bf16.msra.mxu1 %v3849_v44  ;;  %3364 = vmatprep.subr.bf16.mxu0 %v3851_v45  ;;  %v3912_v63 = vpack.c.bf16 %v185_v61, %v177_v60  ;;  %v3924_v6 = vpack.c.bf16 %v187_v1, %v179_v0  ;;  %v178_v10 = vld [vmem:[%s5087_s6 + $0x30] sm:$0xff]  ;;  %v259_v12 = vrot.slane %v245_v62, %v3872_v52  ;;  %v193_v14 = vld [vmem:[%s5087_s6 + $0xa8] sm:$0xff]  ;;  %v195_v16 = vld [vmem:[%s5087_s6 + $0xb8] sm:$0xff] }
  0x10   :  { %3380 = vmatprep.subr.bf16.mxu1 %v3863_v49  ;;  %v186_v11 = vld [vmem:[%s5087_s6 + $0x70] sm:$0xff]  ;;  %v201_v15 = vld [vmem:[%s5087_s6 + $0xe8] sm:$0xff]  ;;  %v3948_v17 = vpack.c.bf16 %v184_v7, %v176_v2  ;;  %v203_v19 = vld [vmem:[%s5087_s6 + $0xf8] sm:$0xff] }
  0x11   :  { %v3950_v18 = vpack.c.bf16 %v186_v11, %v178_v10  ;;  %v192_v22 = vld [vmem:[%s5087_s6 + $0xa0] sm:$0xff]  ;;  %v3961_v24 = vcombine.low %v252_v5, %v259_v12  ;;  %v3964_v26 = vpack.c.bf16 %v201_v15, %v193_v14  ;;  %v3966_v27 = vpack.c.bf16 %v203_v19, %v195_v16  ;;  %v194_v28 = vld [vmem:[%s5087_s6 + $0xb0] sm:$0xff]  ;;  %v209_v32 = vld [vmem:[%s5087_s6 + $0x128] sm:$0xff] }
  0x12   :  { %3366 = vmatpush1.bf16.msra.mxu0 %v3875_v53  ;;  %v200_v23 = vld [vmem:[%s5087_s6 + $0xe0] sm:$0xff]  ;;  %v202_v31 = vld [vmem:[%s5087_s6 + $0xf0] sm:$0xff]  ;;  %v217_v33 = vld [vmem:[%s5087_s6 + $0x168] sm:$0xff] }
  0x13   :  { %3382 = vmatpush1.bf16.msra.mxu1 %v3894_v57  ;;  %3384 = vmatprep.subr.bf16.mxu0 %v3912_v63  ;;  %v211_v35 = vld [vmem:[%s5087_s6 + $0x138] sm:$0xff]  ;;  %v208_v37 = vld [vmem:[%s5087_s6 + $0x120] sm:$0xff]  ;;  %v3998_v41 = vpack.c.bf16 %v200_v23, %v192_v22  ;;  %v4000_v42 = vpack.c.bf16 %v202_v31, %v194_v28  ;;  %v210_v43 = vld [vmem:[%s5087_s6 + $0x130] sm:$0xff]  ;;  %v4017_v48 = vpack.c.bf16 %v217_v33, %v209_v32 }
  0x14   :  { %3400 = vmatprep.subr.bf16.mxu1 %v3924_v6  ;;  %v219_v36 = vld [vmem:[%s5087_s6 + $0x178] sm:$0xff]  ;;  %v216_v38 = vld [vmem:[%s5087_s6 + $0x160] sm:$0xff]  ;;  %v4008_v46 = vld [vmem:[%s5088_s1 + $0x8] sm:$0x3] }
  0x15   :  { %3166 = vmatmul.mubr.msk.f32.vlgmr.msra.gmra.mrb[0].mxu0 %vm278_vm0, %v3961_v24  ;;  %v4013_v47 = vld [vmem:[%s5088_s1 + $0xa] sm:$0x3]  ;;  %v4019_v50 = vpack.c.bf16 %v219_v36, %v211_v35  ;;  %v218_v51 = vld [vmem:[%s5087_s6 + $0x170] sm:$0xff]  ;;  %v4027_v59 = vld [vmem:[%s5088_s1 + $0xc] sm:$0x3]  ;;  %v4055_v10 = vpack.c.bf16 %v216_v38, %v208_v37 }
  0x16   :  { %3168 = vmatmul.mubr.msk.f32.vlgmr.msra.gmra.mrb[0].mxu1 %vm278_vm0, %v3961_v24  ;;  %3386 = vmatpush1.bf16.msra.mxu0 %v3948_v17  ;;  %v4032_v60 = vld [vmem:[%s5088_s1 + $0xe] sm:$0x3]  ;;  %v261_v61 = vcombine.low %v4008_v46, %v4013_v47  ;;  %v227_v5 = vld [vmem:[%s5087_s6 + $0x1b8] sm:$0xff]  ;;  %v4057_v11 = vpack.c.bf16 %v218_v51, %v210_v43  ;;  %v224_v14 = vld [vmem:[%s5087_s6 + $0x1a0] sm:$0xff] }
  0x17   :  { %3402 = vmatpush1.bf16.msra.mxu1 %v3950_v18  ;;  %3388 = vmatprep.subr.bf16.mxu0 %v3964_v26  ;;  %v262_v62 = vcombine.low %v4027_v59, %v4032_v60  ;;  %v225_v0 = vld [vmem:[%s5087_s6 + $0x1a8] sm:$0xff]  ;;  %v235_v7 = vld [vmem:[%s5087_s6 + $0x1f8] sm:$0xff]  ;;  %v232_v16 = vld [vmem:[%s5087_s6 + $0x1e0] sm:$0xff] }
  0x18   :  { %3404 = vmatprep.subr.bf16.mxu1 %v3966_v27  ;;  %353 = vmatprep.mubr.f32.mxu0 %v3681_v3  ;;  %v233_v1 = vld [vmem:[%s5087_s6 + $0x1e8] sm:$0xff]  ;;  %v269_v2 = vrot.slane %v261_v61, %v3872_v52  ;;  %v226_v19 = vld [vmem:[%s5087_s6 + $0x1b0] sm:$0xff]  ;;  %v4076_v28 = vpack.c.bf16 %v235_v7, %v227_v5  ;;  %v4080_v31 = vpack.c.bf16 %v232_v16, %v224_v14  ;;  %v140_v33 = vld [vmem:[%s5089_s0] sm:$0x3] }
  0x19   :  { %430 = vmatprep.mubr.f32.mxu1 %v3681_v3  ;;  %v276_v12 = vrot.slane %v262_v62, %v3872_v52  ;;  %v4065_v15 = vpack.c.bf16 %v233_v1, %v225_v0  ;;  %v234_v22 = vld [vmem:[%s5087_s6 + $0x1f0] sm:$0xff]  ;;  %v141_v35 = vld [vmem:[%s5089_s0 + $0x2] sm:$0x3]  ;;  %v142_v36 = vld [vmem:[%s5089_s0 + $0x4] sm:$0x3]  ;;  %v591_v38 = vmul.f32 %v3880_v54, %v140_v33 }
  0x1a   :  { %3390 = vmatpush1.bf16.msra.mxu0 %v3998_v41  ;;  %v4082_v32 = vpack.c.bf16 %v234_v22, %v226_v19  ;;  %v143_v37 = vld [vmem:[%s5089_s0 + $0x6] sm:$0x3]  ;;  %v592_v43 = vmul.f32 %v3885_v55, %v141_v35  ;;  %v593_v51 = vmul.f32 %v3890_v56, %v142_v36  ;;  %v146_v54 = vld [vmem:[%s5089_s0 + $0xc] sm:$0x3]  ;;  %v147_v55 = vld [vmem:[%s5089_s0 + $0xe] sm:$0x3] }
  0x1b   :  { %3406 = vmatpush1.bf16.msra.mxu1 %v4000_v42  ;;  %3392 = vmatprep.subr.bf16.mxu0 %v4017_v48  ;;  %v277_v23 = vcombine.low %v269_v2, %v276_v12  ;;  %v594_v61 = vmul.f32 %v3899_v58, %v143_v37  ;;  %v966_v0 = vld [vmem:[%s5090_s7 + $0x68] sm:$0xff]  ;;  %v960_v1 = vld [vmem:[%s5090_s7 + $0x38] sm:$0xff]  ;;  %v967_v33 = vld [vmem:[%s5090_s7 + $0x70] sm:$0xff] }
  0x1c   :  { %3408 = vmatprep.subr.bf16.mxu1 %v4019_v50  ;;  %v607_v56 = vcombine.low %v591_v38, %v592_v43  ;;  %v968_v2 = vld [vmem:[%s5090_s7 + $0x78] sm:$0xff]  ;;  %v161_v7 = vld [vmem:[%s5091_s2 + $0xa] sm:$0x3] }
  0x1d   :  { %3167 = vmatmul.mubr.msk.f32.gmra.mrb[2].mxu0 %vm278_vm0, %v277_v23  ;;  %3169 = vmatmul.mubr.msk.f32.gmra.mrb[2].mxu1 %vm278_vm0, %v277_v23  ;;  %v3491_v16 = vpack.c.bf16 %v968_v2, %v960_v1  ;;  %v2572_v2 = vld [vmem:[%s5094_s8 + $0x80] sm:$0xff] }
  0x1e   :  { %3394 = vmatpush1.bf16.msra.mxu0 %v4055_v10  ;;  %501 = vmatprep.mubr.f32.mxu0 %v3681_v3 }
  0x1f   :  { %3410 = vmatpush1.bf16.msra.mxu1 %v4057_v11  ;;  %3396 = vmatprep.subr.bf16.mxu0 %v4065_v15 }
  0x20   :  { %3412 = vmatprep.subr.bf16.mxu1 %v4076_v28  ;;  %578 = vmatprep.mubr.f32.mxu1 %v3681_v3 }
  0x22   :  { %3398 = vmatpush1.bf16.msra.mxu0 %v4080_v31 }
  0x23   :  { %3414 = vmatpush1.bf16.msra.mxu1 %v4082_v32  ;;  %3416 = vmatprep.subr.bf16.mxu0 %v3744_v4  ;;  %v144_v4 = vld [vmem:[%s5089_s0 + $0x8] sm:$0x3] }
  0x24   :  { %3432 = vmatprep.subr.bf16.mxu1 %v3755_v8  ;;  %v145_v8 = vld [vmem:[%s5089_s0 + $0xa] sm:$0x3] }
  0x25   :  { %3170 = vmatmul.mubr.msk.f32.vlgmr.msra.gmra.mrb[4].mxu0 %vm278_vm0, %v3961_v24  ;;  %v596_v58 = vmul.f32 %v4013_v47, %v145_v8  ;;  %v166_v8 = vld [vmem:[%s5092_s3 + $0x4] sm:$0x3] }
  0x26   :  { %3172 = vmatmul.mubr.msk.f32.vlgmr.msra.gmra.mrb[4].mxu1 %vm278_vm0, %v3961_v24  ;;  %3418 = vmatpush1.bf16.msra.mxu0 %v3757_v9  ;;  %v608_v9 = vcombine.low %v593_v51, %v594_v61  ;;  %v597_v24 = vmul.f32 %v4027_v59, %v146_v54  ;;  %v164_v61 = vld [vmem:[%s5092_s3] sm:$0x3]  ;;  %v167_v54 = vld [vmem:[%s5092_s3 + $0x6] sm:$0x3] }
  0x27   :  { %3434 = vmatpush1.bf16.msra.mxu1 %v3769_v13  ;;  %3420 = vmatprep.subr.bf16.mxu0 %v3782_v20  ;;  %v595_v13 = vmul.f32 %v4008_v46, %v144_v4  ;;  %v598_v20 = vmul.f32 %v4032_v60, %v147_v55  ;;  %v958_v60 = vld [vmem:[%s5090_s7 + $0x28] sm:$0xff]  ;;  %v165_v4 = vld [vmem:[%s5092_s3 + $0x2] sm:$0x3] }
  0x28   :  { %3436 = vmatprep.subr.bf16.mxu1 %v3784_v21  ;;  %507 = vmatprep.mubr.f32.mxu0 %v3681_v3  ;;  %v615_v21 = vrot.slane %v607_v56, %v3872_v52  ;;  %v622_v46 = vrot.slane %v608_v9, %v3872_v52  ;;  %v1332_v55 = vcombine.low %v164_v61, %v165_v4  ;;  %v168_v9 = vld [vmem:[%s5092_s3 + $0x8] sm:$0x3]  ;;  %v2559_v61 = vld [vmem:[%s5094_s8 + $0x18] sm:$0xff] }
  0x29   :  { %584 = vmatprep.mubr.f32.mxu1 %v3681_v3  ;;  %3171 = vmatmul.mubr.msk.f32.gmra.mrb[6].mxu0 %vm278_vm0, %v277_v23  ;;  %v624_v47 = vcombine.low %v595_v13, %v596_v58  ;;  %v625_v59 = vcombine.low %v597_v24, %v598_v20  ;;  %v1333_v56 = vcombine.low %v166_v8, %v167_v54  ;;  %v169_v13 = vld [vmem:[%s5092_s3 + $0xa] sm:$0x3]  ;;  %v170_v58 = vld [vmem:[%s5092_s3 + $0xc] sm:$0x3]  ;;  %v171_v24 = vld [vmem:[%s5092_s3 + $0xe] sm:$0x3] }
  0x2a   :  { %3173 = vmatmul.mubr.msk.f32.gmra.mrb[6].mxu1 %vm278_vm0, %v277_v23  ;;  %3422 = vmatpush1.bf16.msra.mxu0 %v3796_v25  ;;  %v4150_v25 = vcombine.low %v615_v21, %v622_v46  ;;  %v1349_v20 = vcombine.low %v168_v9, %v169_v13  ;;  %v1340_v21 = vrot.slane %v1332_v55, %v3872_v52  ;;  %v2591_v55 = vld [vmem:[%s5094_s8 + $0x118] sm:$0xff] }
  0x2b   :  { %3438 = vmatpush1.bf16.msra.mxu1 %v3809_v29  ;;  %3424 = vmatprep.subr.bf16.mxu0 %v3811_v30  ;;  %v632_v29 = vrot.slane %v624_v47, %v3872_v52  ;;  %v639_v30 = vrot.slane %v625_v59, %v3872_v52  ;;  %v1347_v46 = vrot.slane %v1333_v56, %v3872_v52 }
  0x2c   :  { %3440 = vmatprep.subr.bf16.mxu1 %v3822_v34  ;;  %709 = vmatprep.mubr.f32.mxu0 %v3681_v3  ;;  %v1350_v47 = vcombine.low %v170_v58, %v171_v24 }
  0x2d   :  { %786 = vmatprep.mubr.f32.mxu1 %v3681_v3  ;;  %v4162_v34 = vcombine.low %v632_v29, %v639_v30  ;;  %v1348_v59 = vcombine.low %v1340_v21, %v1347_v46 }
  0x2e   :  { %3426 = vmatpush1.bf16.msra.mxu0 %v3836_v40  ;;  %v954_v40 = vld [vmem:[%s5090_s7 + $0x8] sm:$0xff]  ;;  %v1364_v29 = vrot.slane %v1350_v47, %v3872_v52 }
  0x2f   :  { %3442 = vmatpush1.bf16.msra.mxu1 %v3849_v44  ;;  %3428 = vmatprep.subr.bf16.mxu0 %v3851_v45  ;;  %v962_v44 = vld [vmem:[%s5090_s7 + $0x48] sm:$0xff]  ;;  %v956_v45 = vld [vmem:[%s5090_s7 + $0x18] sm:$0xff] }
  0x30   :  { %3444 = vmatprep.subr.bf16.mxu1 %v3863_v49  ;;  %v964_v49 = vld [vmem:[%s5090_s7 + $0x58] sm:$0xff] }
  0x32   :  { %3430 = vmatpush1.bf16.msra.mxu0 %v3875_v53  ;;  %v156_v53 = vld [vmem:[%s5091_s2] sm:$0x3] }
  0x33   :  { %3446 = vmatpush1.bf16.msra.mxu1 %v3894_v57  ;;  %3448 = vmatprep.subr.bf16.mxu0 %v3912_v63  ;;  %v157_v57 = vld [vmem:[%s5091_s2 + $0x2] sm:$0x3]  ;;  %v158_v63 = vld [vmem:[%s5091_s2 + $0x4] sm:$0x3] }
  0x34   :  { %3464 = vmatprep.subr.bf16.mxu1 %v3924_v6  ;;  %v159_v6 = vld [vmem:[%s5091_s2 + $0x6] sm:$0x3] }
  0x35   :  { %3174 = vmatmul.mubr.msk.f32.vlgmr.msra.gmra.mrb[8].mxu0 %vm278_vm0, %v4150_v25  ;;  %v978_v62 = vcombine.low %v158_v63, %v159_v6 }
  0x36   :  { %3176 = vmatmul.mubr.msk.f32.vlgmr.msra.gmra.mrb[8].mxu1 %vm278_vm0, %v4150_v25  ;;  %3450 = vmatpush1.bf16.msra.mxu0 %v3948_v17  ;;  %v3479_v17 = vpack.c.bf16 %v962_v44, %v954_v40  ;;  %v1690_v40 = vsub.s32 2, %v3833_v39  ;;  %v4341_v44 = vld [vmem:[%s5093_s4] sm:$0xff] }
  0x37   :  { %3466 = vmatpush1.bf16.msra.mxu1 %v3950_v18  ;;  %3452 = vmatprep.subr.bf16.mxu0 %v3964_v26  ;;  %v953_v18 = vld [vmem:[%s5090_s7] sm:$0xff]  ;;  %v992_v19 = vrot.slane %v978_v62, %v3872_v52 }
  0x38   :  { %3468 = vmatprep.subr.bf16.mxu1 %v3966_v27  ;;  %715 = vmatprep.mubr.f32.mxu0 %v3681_v3  ;;  %v961_v26 = vld [vmem:[%s5090_s7 + $0x40] sm:$0xff]  ;;  %v3483_v27 = vpack.c.bf16 %v964_v49, %v956_v45  ;;  %v1686_v45 = vsub.s32 1, %v3833_v39  ;;  %v1694_v49 = vsub.s32 3, %v3833_v39 }
  0x39   :  { %792 = vmatprep.mubr.f32.mxu1 %v3681_v3  ;;  %3175 = vmatmul.mubr.msk.f32.gmra.mrb[10].mxu0 %vm278_vm0, %v4162_v34  ;;  %v4237_v5 = vpack.c.bf16 %v961_v26, %v953_v18 }
  0x3a   :  { %3177 = vmatmul.mubr.msk.f32.gmra.mrb[10].mxu1 %vm278_vm0, %v4162_v34  ;;  %3454 = vmatpush1.bf16.msra.mxu0 %v3998_v41  ;;  %v955_v41 = vld [vmem:[%s5090_s7 + $0x10] sm:$0xff]  ;;  %v1687_v63 = vrot.slane %v4341_v44, %v1686_v45  ;;  %v4349_v6 = vrot.slane %v4341_v44, %v1694_v49 }
  0x3b   :  { %3470 = vmatpush1.bf16.msra.mxu1 %v4000_v42  ;;  %3456 = vmatprep.subr.bf16.mxu0 %v4017_v48  ;;  %v963_v42 = vld [vmem:[%s5090_s7 + $0x50] sm:$0xff]  ;;  %v977_v48 = vcombine.low %v156_v53, %v157_v57  ;;  %v1691_v57 = vrot.slane %v4341_v44, %v1690_v40 }
  0x3c   :  { %3472 = vmatprep.subr.bf16.mxu1 %v4019_v50  ;;  %863 = vmatprep.mubr.f32.mxu0 %v3681_v3  ;;  %v160_v50 = vld [vmem:[%s5091_s2 + $0x8] sm:$0x3]  ;;  %v3485_v12 = vpack.c.bf16 %v963_v42, %v955_v41 }
  0x3d   :  { %940 = vmatprep.mubr.f32.mxu1 %v3681_v3  ;;  %v985_v14 = vrot.slane %v977_v48, %v3872_v52  ;;  %v994_v22 = vcombine.low %v160_v50, %v161_v7 }
  0x3e   :  { %3458 = vmatpush1.bf16.msra.mxu0 %v4055_v10  ;;  %v162_v10 = vld [vmem:[%s5091_s2 + $0xc] sm:$0x3] }
  0x3f   :  { %3474 = vmatpush1.bf16.msra.mxu1 %v4057_v11  ;;  %3460 = vmatprep.subr.bf16.mxu0 %v4065_v15  ;;  %v163_v11 = vld [vmem:[%s5091_s2 + $0xe] sm:$0x3]  ;;  %v3487_v15 = vpack.c.bf16 %v966_v0, %v958_v60  ;;  %v993_v35 = vcombine.low %v985_v14, %v992_v19  ;;  %v1002_v36 = vrot.slane %v994_v22, %v3872_v52  ;;  %v1698_v22 = vsub.s32 4, %v3833_v39 }
  0x40   :  { %3476 = vmatprep.subr.bf16.mxu1 %v4076_v28  ;;  %v995_v23 = vcombine.low %v162_v10, %v163_v11  ;;  %v957_v28 = vld [vmem:[%s5090_s7 + $0x20] sm:$0xff]  ;;  %v2605_v11 = vld [vmem:[%s5094_s8 + $0x188] sm:$0xff] }
  0x41   :  { %v2604_v10 = vld [vmem:[%s5094_s8 + $0x180] sm:$0xff]  ;;  %v2589_v19 = vld [vmem:[%s5094_s8 + $0x108] sm:$0xff]  ;;  %v4405_v58 = vrot.slane %v4341_v44, %v1698_v22 }
  0x42   :  { %3462 = vmatpush1.bf16.msra.mxu0 %v4080_v31  ;;  %v965_v31 = vld [vmem:[%s5090_s7 + $0x60] sm:$0xff]  ;;  %v1009_v37 = vrot.slane %v995_v23, %v3872_v52  ;;  %v3543_v14 = vpack.c.bf16 %v2605_v11, %v2604_v10 }
  0x43   :  { %3478 = vmatpush1.bf16.msra.mxu1 %v4082_v32  ;;  %3480 = vmatprep.subr.bf16.mxu0 %v3479_v17  ;;  %v959_v32 = vld [vmem:[%s5090_s7 + $0x30] sm:$0xff]  ;;  %v3489_v38 = vpack.c.bf16 %v965_v31, %v957_v28  ;;  %v1702_v31 = vsub.s32 5, %v3833_v39 }
  0x44   :  { %3484 = vmatprep.subr.bf16.mxu1 %v3483_v27  ;;  %v3493_v43 = vpack.c.bf16 %v967_v33, %v959_v32  ;;  %v1010_v51 = vcombine.low %v1002_v36, %v1009_v37  ;;  %v1706_v32 = vsub.s32 6, %v3833_v39  ;;  %v2574_v33 = vld [vmem:[%s5094_s8 + $0x90] sm:$0xff]  ;;  %v1710_v37 = vsub.s32 7, %v3833_v39 }
  0x45   :  { %3178 = vmatmul.mubr.msk.f32.vlgmr.msra.gmra.mrb[12].mxu0 %vm278_vm0, %v4150_v25  ;;  %v2606_v36 = vld [vmem:[%s5094_s8 + $0x190] sm:$0xff]  ;;  %v4408_v47 = vrot.slane %v4341_v44, %v1702_v31 }
  0x46   :  { %3180 = vmatmul.mubr.msk.f32.vlgmr.msra.gmra.mrb[12].mxu1 %vm278_vm0, %v4150_v25  ;;  %3482 = vmatpush1.bf16.msra.mxu0 %v4237_v5  ;;  %v1357_v25 = vrot.slane %v1349_v20, %v3872_v52  ;;  %v4424_v45 = vrot.slane %v4341_v44, %v1710_v37 }
  0x47   :  { %869 = vmatprep.mubr.f32.mxu0 %v3681_v3  ;;  %946 = vmatprep.mubr.f32.mxu1 %v3681_v3 }
  0x48   :  { %3486 = vmatpush1.bf16.msra.mxu1 %v3485_v12  ;;  %3488 = vmatprep.subr.bf16.mxu0 %v3487_v15  ;;  %v1365_v30 = vcombine.low %v1357_v25, %v1364_v29  ;;  %v2576_v25 = vld [vmem:[%s5094_s8 + $0xa0] sm:$0xff]  ;;  %v2577_v29 = vld [vmem:[%s5094_s8 + $0xa8] sm:$0xff] }
  0x49   :  { %3492 = vmatprep.subr.bf16.mxu1 %v3491_v16  ;;  %3179 = vmatmul.mubr.msk.f32.gmra.mrb[14].mxu0 %vm278_vm0, %v4162_v34  ;;  %v3519_v49 = vpack.c.bf16 %v2577_v29, %v2576_v25  ;;  %v2597_v25 = vld [vmem:[%s5094_s8 + $0x148] sm:$0xff] }
  0x4a   :  { %3181 = vmatmul.mubr.msk.f32.gmra.mrb[14].mxu1 %vm278_vm0, %v4162_v34  ;;  %1080 = vmatprep.mubr.f32.mxu0 %v3681_v3  ;;  %v1682_v34 = vsub.s32 0, %v3833_v39  ;;  %v2590_v39 = vld [vmem:[%s5094_s8 + $0x110] sm:$0xff] }
  0x4b   :  { %1157 = vmatprep.mubr.f32.mxu1 %v3681_v3  ;;  %v3549_v24 = vpack.c.bf16 %v2591_v55, %v2590_v39 }
  0x4c   :  { %v1683_v53 = vrot.slane %v4341_v44, %v1682_v34 }
  0x4d   :  { %3182 = vmatmul.mubr.msk.f32.vlgmr.msra.gmra.mrb[16].mxu0 %vm1011_vm1, %v993_v35 }
  0x4e   :  { %3184 = vmatmul.mubr.msk.f32.vlgmr.msra.gmra.mrb[16].mxu1 %vm1011_vm1, %v993_v35  ;;  %1086 = vmatprep.mubr.f32.mxu0 %v3681_v3 }
  0x4f   :  { %1163 = vmatprep.mubr.f32.mxu1 %v3681_v3  ;;  %3490 = vmatpush1.bf16.msra.mxu0 %v3489_v38 }
  0x50   :  { %3494 = vmatpush1.bf16.msra.mxu1 %v3493_v43  ;;  %3496 = vmatprep.subr.bf16.mxu0 %v3479_v17 }
  0x51   :  { %3500 = vmatprep.subr.bf16.mxu1 %v3483_v27  ;;  %3183 = vmatmul.mubr.msk.f32.gmra.mrb[18].mxu0 %vm1011_vm1, %v1010_v51 }
  0x52   :  { %3185 = vmatmul.mubr.msk.f32.gmra.mrb[18].mxu1 %vm1011_vm1, %v1010_v51  ;;  %1234 = vmatprep.mubr.f32.mxu0 %v3681_v3 }
  0x53   :  { %1311 = vmatprep.mubr.f32.mxu1 %v3681_v3 }
  0x55   :  { %3186 = vmatmul.mubr.msk.f32.vlgmr.msra.gmra.mrb[20].mxu0 %vm1011_vm1, %v993_v35 }
  0x56   :  { %3188 = vmatmul.mubr.msk.f32.vlgmr.msra.gmra.mrb[20].mxu1 %vm1011_vm1, %v993_v35  ;;  %1240 = vmatprep.mubr.f32.mxu0 %v3681_v3  ;;  %v2575_v35 = vld [vmem:[%s5094_s8 + $0x98] sm:$0xff] }
  0x57   :  { %1317 = vmatprep.mubr.f32.mxu1 %v3681_v3  ;;  %3498 = vmatpush1.bf16.msra.mxu0 %v4237_v5  ;;  %v2573_v5 = vld [vmem:[%s5094_s8 + $0x88] sm:$0xff] }
  0x58   :  { %3502 = vmatpush1.bf16.msra.mxu1 %v3485_v12  ;;  %3504 = vmatprep.subr.bf16.mxu0 %v3487_v15  ;;  %v3511_v7 = vpack.c.bf16 %v2573_v5, %v2572_v2  ;;  %v2556_v12 = vld [vmem:[%s5094_s8] sm:$0xff]  ;;  %v2557_v15 = vld [vmem:[%s5094_s8 + $0x8] sm:$0xff]  ;;  %v2610_v2 = vld [vmem:[%s5094_s8 + $0x1b0] sm:$0xff] }
  0x59   :  { %3508 = vmatprep.subr.bf16.mxu1 %v3491_v16  ;;  %3187 = vmatmul.mubr.msk.f32.gmra.mrb[22].mxu0 %vm1011_vm1, %v1010_v51  ;;  %v2588_v16 = vld [vmem:[%s5094_s8 + $0x100] sm:$0xff]  ;;  %v3513_v23 = vpack.c.bf16 %v2557_v15, %v2556_v12  ;;  %v2611_v15 = vld [vmem:[%s5094_s8 + $0x1b8] sm:$0xff] }
  0x5a   :  { %3189 = vmatmul.mubr.msk.f32.gmra.mrb[22].mxu1 %vm1011_vm1, %v1010_v51  ;;  %1434 = vmatprep.mubr.f32.mxu0 %v3681_v3  ;;  %v3545_v28 = vpack.c.bf16 %v2589_v19, %v2588_v16  ;;  %v2558_v51 = vld [vmem:[%s5094_s8 + $0x10] sm:$0xff]  ;;  %v2563_v19 = vld [vmem:[%s5094_s8 + $0x38] sm:$0xff]  ;;  %v3555_v31 = vpack.c.bf16 %v2611_v15, %v2610_v2 }
  0x5b   :  { %1511 = vmatprep.mubr.f32.mxu1 %v3681_v3  ;;  %v3517_v54 = vpack.c.bf16 %v2559_v61, %v2558_v51  ;;  %v2562_v16 = vld [vmem:[%s5094_s8 + $0x30] sm:$0xff]  ;;  %v2581_v51 = vld [vmem:[%s5094_s8 + $0xc8] sm:$0xff] }
  0x5c   :  { %v3525_v37 = vpack.c.bf16 %v2563_v19, %v2562_v16  ;;  %v2616_v19 = vld [vmem:[%s5094_s8 + $0x1e0] sm:$0xff] }
  0x5d   :  { %3190 = vmatmul.mubr.msk.f32.vlgmr.msra.gmra.mrb[24].mxu0 %vm1011_vm1, %v1348_v59 }
  0x5e   :  { %3192 = vmatmul.mubr.msk.f32.vlgmr.msra.gmra.mrb[24].mxu1 %vm1011_vm1, %v1348_v59  ;;  %1440 = vmatprep.mubr.f32.mxu0 %v3681_v3 }
  0x5f   :  { %1517 = vmatprep.mubr.f32.mxu1 %v3681_v3  ;;  %3506 = vmatpush1.bf16.msra.mxu0 %v3489_v38  ;;  %v3515_v38 = vpack.c.bf16 %v2575_v35, %v2574_v33  ;;  %v2595_v33 = vld [vmem:[%s5094_s8 + $0x138] sm:$0xff] }
  0x60   :  { %3510 = vmatpush1.bf16.msra.mxu1 %v3493_v43  ;;  %3512 = vmatprep.subr.bf16.mxu0 %v3511_v7  ;;  %v2607_v43 = vld [vmem:[%s5094_s8 + $0x198] sm:$0xff] }
  0x61   :  { %3191 = vmatmul.mubr.msk.f32.gmra.mrb[26].mxu0 %vm1011_vm1, %v1365_v30  ;;  %3544 = vmatprep.subr.bf16.mxu1 %v3543_v14  ;;  %v3547_v8 = vpack.c.bf16 %v2607_v43, %v2606_v36  ;;  %v2580_v43 = vld [vmem:[%s5094_s8 + $0xc0] sm:$0xff] }
  0x62   :  { %3193 = vmatmul.mubr.msk.f32.gmra.mrb[26].mxu1 %vm1011_vm1, %v1365_v30  ;;  %1588 = vmatprep.mubr.f32.mxu0 %v3681_v3  ;;  %v3527_v39 = vpack.c.bf16 %v2581_v51, %v2580_v43  ;;  %v2569_v51 = vld [vmem:[%s5094_s8 + $0x68] sm:$0xff] }
  0x63   :  { %1665 = vmatprep.mubr.f32.mxu1 %v3681_v3 }
  0x65   :  { %3194 = vmatmul.mubr.msk.f32.vlgmr.msra.gmra.mrb[28].mxu0 %vm1011_vm1, %v1348_v59 }
  0x66   :  { %3196 = vmatmul.mubr.msk.f32.vlgmr.msra.gmra.mrb[28].mxu1 %vm1011_vm1, %v1348_v59  ;;  %1594 = vmatprep.mubr.f32.mxu0 %v3681_v3  ;;  %v4411_v59 = vrot.slane %v4341_v44, %v1706_v32  ;;  %v2594_v32 = vld [vmem:[%s5094_s8 + $0x130] sm:$0xff] }
  0x67   :  { %1671 = vmatprep.mubr.f32.mxu1 %v3681_v3  ;;  %3514 = vmatpush3.bf16.msra.mxu0 %v3513_v23 }
  0x68   :  { %3546 = vmatpush3.bf16.msra.mxu1 %v3545_v28  ;;  %3516 = vmatprep.subr.bf16.mxu0 %v3515_v38  ;;  %v3557_v38 = vpack.c.bf16 %v2595_v33, %v2594_v32 }
  0x69   :  { %3195 = vmatmul.mubr.msk.f32.gmra.mrb[30].mxu0 %vm1011_vm1, %v1365_v30  ;;  %3548 = vmatprep.subr.bf16.mxu1 %v3547_v8 }
  0x6a   :  { %3197 = vmatmul.mubr.msk.f32.gmra.mrb[30].mxu1 %vm1011_vm1, %v1365_v30  ;;  %v2608_v30 = vld [vmem:[%s5094_s8 + $0x1a0] sm:$0xff] }
  0x6b   :  { %3518 = vmatpush3.bf16.msra.mxu0 %v3517_v54 }
  0x6c   :  { %3550 = vmatpush3.bf16.msra.mxu1 %v3549_v24  ;;  %3520 = vmatprep.subr.bf16.mxu0 %v3519_v49  ;;  %v2564_v24 = vld [vmem:[%s5094_s8 + $0x40] sm:$0xff] }
  0xe8   :  { %v349_v17 = vpop.f32.mrb[0].mxu0 }
  0xe9   :  { %v426_v18 = vpop.f32.mrb[0].mxu1  ;;  %v1720_v26 = vmul.f32 %v1683_v53, %v349_v17  ;;  %v351_v27 = vpop.f32.mrb[1].mxu0 }
  0xea   :  { %v1722_v41 = vmul.f32 %v1691_v57, %v426_v18  ;;  %v428_v42 = vpop.f32.mrb[1].mxu1  ;;  %v1721_v48 = vmul.f32 %v1687_v63, %v351_v27  ;;  %v2593_v27 = vld [vmem:[%s5094_s8 + $0x128] sm:$0xff] }
  0xeb   :  { %v1723_v50 = vmul.f32 %v4349_v6, %v428_v42  ;;  %v1736_v60 = vmul.f32 1.442695, %v1720_v26  ;;  %v2592_v26 = vld [vmem:[%s5094_s8 + $0x120] sm:$0xff] }
  0xec   :  { %v1740_v62 = vmul.f32 1.442695, %v1722_v41  ;;  %v1738_v0 = vmul.f32 1.442695, %v1721_v48  ;;  %v3553_v48 = vpack.c.bf16 %v2593_v27, %v2592_v26  ;;  %v2614_v27 = vld [vmem:[%s5094_s8 + $0x1d0] sm:$0xff] }
  0xed   :  { %v1742_v1 = vmul.f32 1.442695, %v1723_v50  ;;  %3641 = vpow2.f32 %v1736_v60 }
  0xee   :  { %3643 = vpow2.f32 %v1738_v0  ;;  %v2578_v0 = vld [vmem:[%s5094_s8 + $0xb0] sm:$0xff] }
  0xef   :  { %3645 = vpow2.f32 %v1740_v62 }
  0xf0   :  { %3647 = vpow2.f32 %v1742_v1  ;;  %v355_v4 = vpop.f32.mrb[2].mxu0  ;;  %v432_v13 = vpop.f32.mrb[2].mxu1  ;;  %v2579_v1 = vld [vmem:[%s5094_s8 + $0xb8] sm:$0xff] }
  0xf1   :  { %v1728_v56 = vmul.f32 %v1683_v53, %v355_v4  ;;  %v357_v9 = vpop.f32.mrb[3].mxu0  ;;  %v1730_v21 = vmul.f32 %v1691_v57, %v432_v13  ;;  %v434_v46 = vpop.f32.mrb[3].mxu1  ;;  %v2609_v53 = vld [vmem:[%s5094_s8 + $0x1a8] sm:$0xff]  ;;  %v2560_v57 = vld [vmem:[%s5094_s8 + $0x20] sm:$0xff]  ;;  %v3523_v14 = vpack.c.bf16 %v2579_v1, %v2578_v0  ;;  %v2599_v0 = vld [vmem:[%s5094_s8 + $0x158] sm:$0xff] }
  0xf2   :  { %v1729_v20 = vmul.f32 %v1687_v63, %v357_v9  ;;  %v1731_v40 = vmul.f32 %v4349_v6, %v434_v46  ;;  %v2561_v63 = vld [vmem:[%s5094_s8 + $0x28] sm:$0xff]  ;;  %v3551_v18 = vpack.c.bf16 %v2609_v53, %v2608_v30  ;;  %v2612_v9 = vld [vmem:[%s5094_s8 + $0x1c0] sm:$0xff] }
  0xf3   :  { %v1752_v34 = vmul.f32 1.442695, %v1728_v56  ;;  %v1756_v6 = vmul.f32 1.442695, %v1730_v21  ;;  %v3521_v44 = vpack.c.bf16 %v2561_v63, %v2560_v57  ;;  %v2613_v13 = vld [vmem:[%s5094_s8 + $0x1c8] sm:$0xff]  ;;  %v2596_v46 = vld [vmem:[%s5094_s8 + $0x140] sm:$0xff] }
  0xf4   :  { %v1754_v17 = vmul.f32 1.442695, %v1729_v20  ;;  %v1758_v42 = vmul.f32 1.442695, %v1731_v40  ;;  %3552 = vmatprep.subr.bf16.mxu1 %v3551_v18  ;;  %v3559_v20 = vpack.c.bf16 %v2613_v13, %v2612_v9  ;;  %v2565_v21 = vld [vmem:[%s5094_s8 + $0x48] sm:$0xff]  ;;  %v3561_v30 = vpack.c.bf16 %v2597_v25, %v2596_v46  ;;  %v2571_v25 = vld [vmem:[%s5094_s8 + $0x78] sm:$0xff] }
  0xf5   :  { %3649 = vpow2.f32 %v1752_v34  ;;  %3522 = vmatpush3.bf16.msra.mxu0 %v3521_v44  ;;  %3554 = vmatpush3.bf16.msra.mxu1 %v3553_v48  ;;  %v3529_v29 = vpack.c.bf16 %v2565_v21, %v2564_v24  ;;  %v2618_v24 = vld [vmem:[%s5094_s8 + $0x1f0] sm:$0xff] }
  0xf6   :  { %3651 = vpow2.f32 %v1754_v17  ;;  %3524 = vmatprep.subr.bf16.mxu0 %v3523_v14  ;;  %3556 = vmatprep.subr.bf16.mxu1 %v3555_v31  ;;  %v2570_v21 = vld [vmem:[%s5094_s8 + $0x70] sm:$0xff] }
  0xf7   :  { %v3642_v41 = vpop.eup %3641  ;;  %3653 = vpow2.f32 %v1756_v6 }
  0xf8   :  { %v3644_v50 = vpop.eup %3643  ;;  %1768 = vst [vmem:[#allocation3] sm:$0xff] %v3642_v41  ;;  %v503_v60 = vpop.f32.mrb[4].mxu0  ;;  %3655 = vpow2.f32 %v1758_v42  ;;  %v2615_v41 = vld [vmem:[%s5094_s8 + $0x1d8] sm:$0xff]  ;;  %v2566_v42 = vld [vmem:[%s5094_s8 + $0x50] sm:$0xff] }
  0xf9   :  { %v580_v62 = vpop.f32.mrb[4].mxu1  ;;  %v3646_v5 = vpop.eup %3645  ;;  %1769 = vst [vmem:[#allocation3 + $0x8] sm:$0xff] %v3644_v50  ;;  %v1724_v7 = vmul.f32 %v4405_v58, %v503_v60  ;;  %3526 = vmatpush3.bf16.msra.mxu0 %v3525_v37  ;;  %3558 = vmatpush3.bf16.msra.mxu1 %v3557_v38  ;;  %v3563_v50 = vpack.c.bf16 %v2615_v41, %v2614_v27  ;;  %v2567_v60 = vld [vmem:[%s5094_s8 + $0x58] sm:$0xff] }
  0xfa   :  { %v505_v10 = vpop.f32.mrb[5].mxu0  ;;  %v1726_v11 = vmul.f32 %v4411_v59, %v580_v62  ;;  %v582_v12 = vpop.f32.mrb[5].mxu1  ;;  %1770 = vst [vmem:[#allocation3 + $0x10] sm:$0xff] %v3646_v5  ;;  %3528 = vmatprep.subr.bf16.mxu0 %v3527_v39  ;;  %3560 = vmatprep.subr.bf16.mxu1 %v3559_v20  ;;  %v2598_v62 = vld [vmem:[%s5094_s8 + $0x150] sm:$0xff]  ;;  %v2601_v39 = vld [vmem:[%s5094_s8 + $0x168] sm:$0xff]  ;;  %v2619_v20 = vld [vmem:[%s5094_s8 + $0x1f8] sm:$0xff] }
  0xfb   :  { %v3648_v22 = vpop.eup %3647  ;;  %v1725_v23 = vmul.f32 %v4408_v47, %v505_v10  ;;  %v1727_v28 = vmul.f32 %v4424_v45, %v582_v12  ;;  %v1744_v35 = vmul.f32 1.442695, %v1724_v7  ;;  %v3533_v7 = vpack.c.bf16 %v2567_v60, %v2566_v42  ;;  %v2585_v12 = vld [vmem:[%s5094_s8 + $0xe8] sm:$0xff] }
  0xfc   :  { %1771 = vst [vmem:[#allocation3 + $0x18] sm:$0xff] %v3648_v22  ;;  %v1748_v36 = vmul.f32 1.442695, %v1726_v11  ;;  %v509_v8 = vpop.f32.mrb[6].mxu0  ;;  %v3565_v10 = vpack.c.bf16 %v2599_v0, %v2598_v62  ;;  %v2584_v11 = vld [vmem:[%s5094_s8 + $0xe0] sm:$0xff]  ;;  %v3571_v46 = vpack.c.bf16 %v2619_v20, %v2618_v24 }
  0xfd   :  { %v1746_v61 = vmul.f32 1.442695, %v1725_v23  ;;  %v1750_v4 = vmul.f32 1.442695, %v1727_v28  ;;  %v586_v54 = vpop.f32.mrb[6].mxu1  ;;  %3657 = vpow2.f32 %v1744_v35  ;;  %v511_v55 = vpop.f32.mrb[7].mxu0  ;;  %v1732_v34 = vmul.f32 %v4405_v58, %v509_v8  ;;  %3530 = vmatpush3.bf16.msra.mxu0 %v3529_v29  ;;  %3562 = vmatpush3.bf16.msra.mxu1 %v3561_v30 }
  0xfe   :  { %v588_v56 = vpop.f32.mrb[7].mxu1  ;;  %v1733_v40 = vmul.f32 %v4408_v47, %v511_v55  ;;  %v1734_v53 = vmul.f32 %v4411_v59, %v586_v54  ;;  %v2582_v47 = vld [vmem:[%s5094_s8 + $0xd0] sm:$0xff]  ;;  %v2583_v59 = vld [vmem:[%s5094_s8 + $0xd8] sm:$0xff]  ;;  %3564 = vmatprep.subr.bf16.mxu1 %v3563_v50  ;;  %v3535_v15 = vpack.c.bf16 %v2585_v12, %v2584_v11  ;;  %v2617_v28 = vld [vmem:[%s5094_s8 + $0x1e8] sm:$0xff] }
  0xff   :  { %3659 = vpow2.f32 %v1746_v61  ;;  %v3650_v49 = vpop.eup %3649  ;;  %v1735_v57 = vmul.f32 %v4424_v45, %v588_v56  ;;  %v1760_v18 = vmul.f32 1.442695, %v1732_v34  ;;  %v3531_v45 = vpack.c.bf16 %v2583_v59, %v2582_v47  ;;  %v2600_v61 = vld [vmem:[%s5094_s8 + $0x160] sm:$0xff]  ;;  %v2586_v55 = vld [vmem:[%s5094_s8 + $0xf0] sm:$0xff]  ;;  %v2587_v56 = vld [vmem:[%s5094_s8 + $0xf8] sm:$0xff] }
 0x100   :  { %3661 = vpow2.f32 %v1748_v36  ;;  %v3652_v63 = vpop.eup %3651  ;;  %1776 = vst [vmem:[#allocation3 + $0x40] sm:$0xff] %v3650_v49  ;;  %v1762_v44 = vmul.f32 1.442695, %v1733_v40  ;;  %v1764_v58 = vmul.f32 1.442695, %v1734_v53  ;;  %v3567_v31 = vpack.c.bf16 %v2617_v28, %v2616_v19  ;;  %v2568_v36 = vld [vmem:[%s5094_s8 + $0x60] sm:$0xff] }
 0x101   :  { %3663 = vpow2.f32 %v1750_v4  ;;  %v3654_v17 = vpop.eup %3653  ;;  %1777 = vst [vmem:[#allocation3 + $0x48] sm:$0xff] %v3652_v63  ;;  %v1766_v26 = vmul.f32 1.442695, %v1735_v57  ;;  %3532 = vmatprep.subr.bf16.mxu0 %v3531_v45  ;;  %3566 = vmatpush3.bf16.msra.mxu1 %v3565_v10  ;;  %v3537_v54 = vpack.c.bf16 %v2569_v51, %v2568_v36  ;;  %v3569_v9 = vpack.c.bf16 %v2601_v39, %v2600_v61  ;;  %v2602_v29 = vld [vmem:[%s5094_s8 + $0x170] sm:$0xff]  ;;  %v2603_v30 = vld [vmem:[%s5094_s8 + $0x178] sm:$0xff]  ;;  %v2636_v57 = vld [vmem:[%s5094_s8 + $0x280] sm:$0xff] }
 0x102   :  { %v3656_v6 = vpop.eup %3655  ;;  %1778 = vst [vmem:[#allocation3 + $0x50] sm:$0xff] %v3654_v17  ;;  %3665 = vpow2.f32 %v1760_v18  ;;  %3534 = vmatpush3.bf16.msra.mxu0 %v3533_v7  ;;  %3568 = vmatprep.subr.bf16.mxu1 %v3567_v31  ;;  %v3539_v13 = vpack.c.bf16 %v2587_v56, %v2586_v55  ;;  %v3541_v34 = vpack.c.bf16 %v2571_v25, %v2570_v21  ;;  %v2637_v63 = vld [vmem:[%s5094_s8 + $0x288] sm:$0xff] }
 0x103   :  { %1779 = vst [vmem:[#allocation3 + $0x58] sm:$0xff] %v3656_v6  ;;  %3667 = vpow2.f32 %v1762_v44  ;;  %3536 = vmatprep.subr.bf16.mxu0 %v3535_v15  ;;  %v3573_v40 = vpack.c.bf16 %v2603_v30, %v2602_v29  ;;  %v3575_v18 = vpack.c.bf16 %v2637_v63, %v2636_v57  ;;  %v2668_v44 = vld [vmem:[%s5094_s8 + $0x380] sm:$0xff]  ;;  %v1844_v7 = vcombine.low %v3681_v3, %v3681_v3 }
 0x104   :  { %3669 = vpow2.f32 %v1764_v58  ;;  %v2669_v58 = vld [vmem:[%s5094_s8 + $0x388] sm:$0xff] }
 0x105   :  { %3671 = vpow2.f32 %v1766_v26  ;;  %3570 = vmatpush3.bf16.msra.mxu1 %v3569_v9  ;;  %v3607_v59 = vpack.c.bf16 %v2669_v58, %v2668_v44  ;;  %v4604_v19 = vrot.slane %v1844_v7, %v3872_v52 }
 0x106   :  { %3538 = vmatpush3.bf16.msra.mxu0 %v3537_v54  ;;  %3572 = vmatprep.subr.bf16.mxu1 %v3571_v46 }
 0x107   :  { %v3658_v48 = vpop.eup %3657  ;;  %3540 = vmatprep.subr.bf16.mxu0 %v3539_v13  ;;  %v1934_v46 = vld [vmem:[#allocation3 + $0x40] sm:$0x30] }
 0x108   :  { %1772 = vst [vmem:[#allocation3 + $0x20] sm:$0xff] %v3658_v48  ;;  %v4521_v2 = vpop.f32.mrb[8].mxu0  ;;  %v1835_v61 = vld [vmem:[#allocation3 + $0x48] sm:$0xc0] }
 0x109   :  { %v3660_v1 = vpop.eup %3659  ;;  %v4523_v5 = vpop.f32.mrb[8].mxu1  ;;  %3574 = vmatpush3.bf16.msra.mxu1 %v3573_v40  ;;  %v1836_v51 = vld [vmem:[#allocation3 + $0x50] sm:$0xc0]  ;;  %v1887_v13 = vmul.f32 %v4604_v19, %v1835_v61  ;;  %v2016_v7 = vld [vmem:[#allocation3 + $0x50] sm:$0xc] }
 0x10a   :  { %v3662_v14 = vpop.eup %3661  ;;  %1773 = vst [vmem:[#allocation3 + $0x28] sm:$0xff] %v3660_v1  ;;  %v4534_v22 = vpop.f32.mrb[9].mxu0  ;;  %3542 = vmatpush3.bf16.msra.mxu0 %v3541_v34  ;;  %3608 = vmatprep.subr.bf16.mxu1 %v3607_v59  ;;  %v1837_v39 = vld [vmem:[#allocation3 + $0x58] sm:$0xc0]  ;;  %v1935_v59 = vld [vmem:[#allocation3 + $0x48] sm:$0x30] }
 0x10b   :  { %v3664_v16 = vpop.eup %3663  ;;  %1774 = vst [vmem:[#allocation3 + $0x30] sm:$0xff] %v3662_v14  ;;  %v4536_v23 = vpop.f32.mrb[9].mxu1  ;;  %3576 = vmatprep.subr.bf16.mxu0 %v3575_v18 }
 0x10c   :  { %1775 = vst [vmem:[#allocation3 + $0x38] sm:$0xff] %v3664_v16  ;;  %v3666_v32 = vpop.eup %3665  ;;  %v717_v38 = vpop.f32.mrb[10].mxu0 }
 0x10d   :  { %v3668_v33 = vpop.eup %3667  ;;  %1780 = vst [vmem:[#allocation3 + $0x60] sm:$0xff] %v3666_v32  ;;  %v794_v43 = vpop.f32.mrb[10].mxu1 }
 0x10e   :  { %v3670_v35 = vpop.eup %3669  ;;  %1781 = vst [vmem:[#allocation3 + $0x68] sm:$0xff] %v3668_v33  ;;  %v719_v4 = vpop.f32.mrb[11].mxu0 }
 0x10f   :  { %v3672_v37 = vpop.eup %3671  ;;  %1782 = vst [vmem:[#allocation3 + $0x70] sm:$0xff] %v3670_v35  ;;  %v796_v8 = vpop.f32.mrb[11].mxu1 }
 0x110   :  { %1783 = vst [vmem:[#allocation3 + $0x78] sm:$0xff] %v3672_v37 }
 0x118   :  { %v865_v49 = vpop.f32.mrb[12].mxu0 }
 0x119   :  { %v942_v53 = vpop.f32.mrb[12].mxu1  ;;  %v867_v17 = vpop.f32.mrb[13].mxu0 }
 0x11a   :  { %v944_v6 = vpop.f32.mrb[13].mxu1 }
 0x11c   :  { %v4589_v26 = vpop.f32.mrb[14].mxu0 }
 0x11d   :  { %v4591_v47 = vpop.f32.mrb[14].mxu1  ;;  %v4593_v45 = vpop.f32.mrb[15].mxu0 }
 0x11e   :  { %v4595_v27 = vpop.f32.mrb[15].mxu1 }
 0x120   :  { %v1082_v41 = vpop.f32.mrb[16].mxu0 }
 0x121   :  { %v1159_v42 = vpop.f32.mrb[16].mxu1  ;;  %v1784_v48 = vmul.f32 %v1082_v41, %v4521_v2  ;;  %v1084_v60 = vpop.f32.mrb[17].mxu0 }
 0x122   :  { %v1786_v50 = vmul.f32 %v1159_v42, %v4523_v5  ;;  %v1161_v62 = vpop.f32.mrb[17].mxu1  ;;  %v1785_v0 = vmul.f32 %v1084_v60, %v4534_v22  ;;  %v4608_v22 = vrot.slane %v3681_v3, %v3872_v52  ;;  %v1838_v60 = vld [vmem:[#allocation3 + $0x60] sm:$0xc0] }
 0x123   :  { %v1787_v1 = vmul.f32 %v1161_v62, %v4536_v23  ;;  %1800 = vst [vmem:[#allocation4] sm:$0xff] %v1784_v48  ;;  %v2014_v48 = vld [vmem:[#allocation3 + $0x40] sm:$0xc] }
 0x124   :  { %1802 = vst [vmem:[#allocation4 + $0x10] sm:$0xff] %v1786_v50  ;;  %v1088_v10 = vpop.f32.mrb[18].mxu0  ;;  %1801 = vst [vmem:[#allocation4 + $0x8] sm:$0xff] %v1785_v0  ;;  %v4616_v3 = vcombine.low %v4608_v22, %v4608_v22  ;;  %v1889_v30 = vmul.f32 %v4608_v22, %v1837_v39  ;;  %v1937_v50 = vld [vmem:[#allocation3 + $0x58] sm:$0x30] }
 0x125   :  { %v1165_v11 = vpop.f32.mrb[18].mxu1  ;;  %1803 = vst [vmem:[#allocation4 + $0x18] sm:$0xff] %v1787_v1  ;;  %v1792_v12 = vmul.f32 %v1088_v10, %v717_v38  ;;  %v1090_v2 = vpop.f32.mrb[19].mxu0  ;;  %v4612_v38 = vcombine.low %v4604_v19, %v4604_v19  ;;  %v1839_v10 = vld [vmem:[#allocation3 + $0x68] sm:$0xc0] }
 0x126   :  { %v1794_v14 = vmul.f32 %v1165_v11, %v794_v43  ;;  %v1167_v15 = vpop.f32.mrb[19].mxu1  ;;  %v1793_v5 = vmul.f32 %v1090_v2, %v719_v4  ;;  %v1834_v43 = vld [vmem:[#allocation3 + $0x40] sm:$0xc0]  ;;  %v1888_v54 = vmul.f32 %v4616_v3, %v1836_v51  ;;  %v2017_v39 = vld [vmem:[#allocation3 + $0x58] sm:$0xc] }
 0x127   :  { %v1795_v16 = vmul.f32 %v1167_v15, %v796_v8  ;;  %1808 = vst [vmem:[#allocation4 + $0x40] sm:$0xff] %v1792_v12  ;;  %v1886_v4 = vmul.f32 %v4612_v38, %v1834_v43  ;;  %v1840_v15 = vld [vmem:[#allocation3 + $0x70] sm:$0xc0]  ;;  %v1890_v61 = vmul.f32 %v4612_v38, %v1838_v60  ;;  %v1891_v38 = vmul.f32 %v4604_v19, %v1839_v10 }
 0x128   :  { %1810 = vst [vmem:[#allocation4 + $0x50] sm:$0xff] %v1794_v14  ;;  %1809 = vst [vmem:[#allocation4 + $0x48] sm:$0xff] %v1793_v5  ;;  %v1236_v23 = vpop.f32.mrb[20].mxu0  ;;  %v4692_v19 = vld [vmem:[%s5094_s8 + $0x390] sm:$0xff] }
 0x129   :  { %1811 = vst [vmem:[#allocation4 + $0x58] sm:$0xff] %v1795_v16  ;;  %v1313_v28 = vpop.f32.mrb[20].mxu1  ;;  %v1788_v31 = vmul.f32 %v1236_v23, %v865_v49  ;;  %v1238_v33 = vpop.f32.mrb[21].mxu0  ;;  %v1936_v49 = vld [vmem:[#allocation3 + $0x50] sm:$0x30]  ;;  %5114 = vst [vmem:[#allocation14_spill] sm:$0xff] %v4692_v19 }
 0x12a   :  { %v1790_v32 = vmul.f32 %v1313_v28, %v942_v53  ;;  %v1315_v35 = vpop.f32.mrb[21].mxu1  ;;  %v1789_v36 = vmul.f32 %v1238_v33, %v867_v17 }
 0x12b   :  { %v1791_v37 = vmul.f32 %v1315_v35, %v944_v6  ;;  %1804 = vst [vmem:[#allocation4 + $0x20] sm:$0xff] %v1788_v31  ;;  %v2015_v31 = vld [vmem:[#allocation3 + $0x48] sm:$0xc]  ;;  %v4649_v35 = vld [vmem:[%s5094_s8 + $0x200] sm:$0xff] }
 0x12c   :  { %1806 = vst [vmem:[#allocation4 + $0x30] sm:$0xff] %v1790_v32  ;;  %1805 = vst [vmem:[#allocation4 + $0x28] sm:$0xff] %v1789_v36  ;;  %v1242_v21 = vpop.f32.mrb[22].mxu0 }
 0x12d   :  { %1807 = vst [vmem:[#allocation4 + $0x38] sm:$0xff] %v1791_v37  ;;  %v1796_v34 = vmul.f32 %v1242_v21, %v4589_v26  ;;  %v1319_v40 = vpop.f32.mrb[22].mxu1  ;;  %v1244_v58 = vpop.f32.mrb[23].mxu0  ;;  %5108 = vst [vmem:[#allocation8_spill] sm:$0xff] %v4649_v35  ;;  %v4677_v21 = vld [vmem:[%s5094_s8 + $0x290] sm:$0xff] }
 0x12e   :  { %v1894_v8 = vld [vmem:[#allocation4 + $0x40] sm:$0xc0]  ;;  %v1798_v63 = vmul.f32 %v1319_v40, %v4591_v47  ;;  %v1974_v17 = vld [vmem:[#allocation4 + $0x40] sm:$0x30]  ;;  %v1797_v26 = vmul.f32 %v1244_v58, %v4593_v45  ;;  %v1321_v1 = vpop.f32.mrb[23].mxu1  ;;  %5112 = vst [vmem:[#allocation12_spill] sm:$0xff] %v4677_v21 }
 0x12f   :  { %v4620_v55 = vadd.f32 %v1894_v8, %v1886_v4  ;;  %v1896_v56 = vld [vmem:[#allocation4 + $0x50] sm:$0xc0]  ;;  %v1895_v20 = vld [vmem:[#allocation4 + $0x48] sm:$0xc0]  ;;  %1812 = vst [vmem:[#allocation4 + $0x60] sm:$0xff] %v1796_v34  ;;  %v1799_v14 = vmul.f32 %v1321_v1, %v4595_v27  ;;  %v4663_v8 = vld [vmem:[%s5094_s8 + $0x300] sm:$0xff] }
 0x130   :  { %v4622_v9 = vadd.f32 %v1896_v56, %v1888_v54  ;;  %v4627_v29 = vadd.f32 %v1895_v20, %v1887_v13  ;;  %v1897_v57 = vld [vmem:[#allocation4 + $0x58] sm:$0xc0]  ;;  %v1976_v42 = vld [vmem:[#allocation4 + $0x50] sm:$0x30]  ;;  %1814 = vst [vmem:[#allocation4 + $0x70] sm:$0xff] %v1798_v63  ;;  %1813 = vst [vmem:[#allocation4 + $0x68] sm:$0xff] %v1797_v26  ;;  %v1892_v20 = vmul.f32 %v4616_v3, %v1840_v15 }
 0x131   :  { %v1950_v24 = vrot.slane %v4620_v55, 2  ;;  %v4633_v44 = vadd.f32 %v1897_v57, %v1889_v30  ;;  %v1975_v12 = vld [vmem:[#allocation4 + $0x48] sm:$0x30]  ;;  %v1436_v2 = vpop.f32.mrb[24].mxu0  ;;  %v1841_v45 = vld [vmem:[#allocation3 + $0x78] sm:$0xc0] }
 0x132   :  { %v1952_v25 = vrot.slane %v4622_v9, 2  ;;  %v1951_v18 = vrot.slane %v4627_v29, 2  ;;  %1816 = vst [vmem:[#allocation5] sm:$0xff] %v1436_v2  ;;  %v1513_v28 = vpop.f32.mrb[24].mxu1  ;;  %v1977_v33 = vld [vmem:[#allocation4 + $0x58] sm:$0x30] }
 0x133   :  { %v1966_v53 = vmul.f32 %v1950_v24, %v1934_v46  ;;  %v1953_v0 = vrot.slane %v4633_v44, 2  ;;  %1815 = vst [vmem:[#allocation4 + $0x78] sm:$0xff] %v1799_v14  ;;  %1818 = vst [vmem:[#allocation5 + $0x10] sm:$0xff] %v1513_v28  ;;  %v4654_v27 = vld [vmem:[%s5094_s8 + $0x208] sm:$0xff]  ;;  %v2054_v36 = vld [vmem:[#allocation4 + $0x40] sm:$0xc] }
 0x134   :  { %v1968_v6 = vmul.f32 %v1952_v25, %v1936_v49  ;;  %v1967_v47 = vmul.f32 %v1951_v18, %v1935_v59  ;;  %5109 = vst [vmem:[#allocation9_spill] sm:$0xff] %v4654_v27  ;;  %v1438_v4 = vpop.f32.mrb[25].mxu0  ;;  %5110 = vst [vmem:[#allocation10_spill] sm:$0xff] %v4663_v8  ;;  %v4668_v54 = vld [vmem:[%s5094_s8 + $0x308] sm:$0xff]  ;;  %v2056_v13 = vld [vmem:[#allocation4 + $0x50] sm:$0xc] }
 0x135   :  { %v4635_v41 = vadd.f32 %v1974_v17, %v1966_v53  ;;  %v1969_v23 = vmul.f32 %v1953_v0, %v1937_v50  ;;  %5111 = vst [vmem:[#allocation11_spill] sm:$0xff] %v4668_v54  ;;  %1817 = vst [vmem:[#allocation5 + $0x8] sm:$0xff] %v1438_v4  ;;  %v1515_v40 = vpop.f32.mrb[25].mxu1  ;;  %v4687_v3 = vld [vmem:[%s5094_s8 + $0x298] sm:$0xff]  ;;  %v2055_v57 = vld [vmem:[#allocation4 + $0x48] sm:$0xc]  ;;  %v1893_v17 = vmul.f32 %v4608_v22, %v1841_v45 }
 0x136   :  { %v4638_v62 = vadd.f32 %v1976_v42, %v1968_v6  ;;  %v4644_v16 = vadd.f32 %v1975_v12, %v1967_v47  ;;  %v1898_v24 = vld [vmem:[#allocation4 + $0x60] sm:$0xc0]  ;;  %5113 = vst [vmem:[#allocation13_spill] sm:$0xff] %v4687_v3  ;;  %v4697_v49 = vld [vmem:[%s5094_s8 + $0x398] sm:$0xff]  ;;  %1819 = vst [vmem:[#allocation5 + $0x18] sm:$0xff] %v1515_v40  ;;  %v1442_v6 = vpop.f32.mrb[26].mxu0 }
 0x137   :  { %v2030_v11 = vrot.slane %v4635_v41, 2  ;;  %v4657_v51 = vadd.f32 %v1977_v33, %v1969_v23  ;;  %v4682_v34 = vadd.f32 %v1898_v24, %v1890_v61  ;;  %5115 = vst [vmem:[#allocation15_spill] sm:$0xff] %v4697_v49  ;;  %v1900_v63 = vld [vmem:[#allocation4 + $0x70] sm:$0xc0]  ;;  %v2094_v59 = vld [vmem:[#allocation3 + $0x40] sm:$0x3] }
 0x138   :  { %v2032_v5 = vrot.slane %v4638_v62, 2  ;;  %v2031_v43 = vrot.slane %v4644_v16, 2  ;;  %v2096_v42 = vld [vmem:[#allocation3 + $0x50] sm:$0x3]  ;;  %1824 = vst [vmem:[#allocation5 + $0x40] sm:$0xff] %v1442_v6  ;;  %v1519_v28 = vpop.f32.mrb[26].mxu1 }
 0x139   :  { %v2046_v32 = vmul.f32 %v2030_v11, %v2014_v48  ;;  %v2033_v30 = vrot.slane %v4657_v51, 2  ;;  %v1954_v60 = vrot.slane %v4682_v34, 2  ;;  %v2095_v47 = vld [vmem:[#allocation3 + $0x48] sm:$0x3]  ;;  %v1938_v22 = vld [vmem:[#allocation3 + $0x60] sm:$0x30] }
 0x13a   :  { %v2048_v37 = vmul.f32 %v2032_v5, %v2016_v7  ;;  %v2047_v25 = vmul.f32 %v2031_v43, %v2015_v31  ;;  %v2057_v1 = vld [vmem:[#allocation4 + $0x58] sm:$0xc]  ;;  %v4709_v7 = vadd.f32 %v1900_v63, %v1892_v20  ;;  %v1899_v10 = vld [vmem:[#allocation4 + $0x68] sm:$0xc0]  ;;  %v2134_v14 = vld [vmem:[#allocation4 + $0x40] sm:$0x3] }
 0x13b   :  { %v4670_v56 = vadd.f32 %v2054_v36, %v2046_v32  ;;  %v2049_v50 = vmul.f32 %v2033_v30, %v2017_v39  ;;  %v1970_v5 = vmul.f32 %v1954_v60, %v1938_v22  ;;  %v1901_v23 = vld [vmem:[#allocation4 + $0x78] sm:$0xc0]  ;;  %v2097_v31 = vld [vmem:[#allocation3 + $0x58] sm:$0x3]  ;;  %v2136_v33 = vld [vmem:[#allocation4 + $0x50] sm:$0x3]  ;;  %v4721_v43 = vadd.f32 %v1899_v10, %v1891_v38 }
 0x13c   :  { %v4679_v46 = vadd.f32 %v2056_v13, %v2048_v37  ;;  %v4706_v48 = vadd.f32 %v2055_v57, %v2047_v25  ;;  %v1978_v36 = vld [vmem:[#allocation4 + $0x60] sm:$0x30]  ;;  %v1956_v37 = vrot.slane %v4709_v7, 2  ;;  %v4723_v61 = vadd.f32 %v1901_v23, %v1893_v17  ;;  %1826 = vst [vmem:[#allocation5 + $0x50] sm:$0xff] %v1519_v28  ;;  %v1444_v4 = vpop.f32.mrb[27].mxu0  ;;  %v1521_v57 = vpop.f32.mrb[27].mxu1 }
 0x13d   :  { %v2110_v53 = vrot.slane %v4670_v56, 2  ;;  %v4716_v45 = vadd.f32 %v2057_v1, %v2049_v50  ;;  %v2174_v39 = vld [vmem:[#allocation3] sm:$0xc0]  ;;  %v1939_v13 = vld [vmem:[#allocation3 + $0x68] sm:$0x30]  ;;  %1825 = vst [vmem:[#allocation5 + $0x48] sm:$0xff] %v1444_v4 }
 0x13e   :  { %v2112_v26 = vrot.slane %v4679_v46, 2  ;;  %v2111_v15 = vrot.slane %v4706_v48, 2  ;;  %v1940_v24 = vld [vmem:[#allocation3 + $0x70] sm:$0x30]  ;;  %v1941_v20 = vld [vmem:[#allocation3 + $0x78] sm:$0x30] }
 0x13f   :  { %v2126_v0 = vmul.f32 %v2110_v53, %v2094_v59  ;;  %v2113_v40 = vrot.slane %v4716_v45, 2  ;;  %v4728_v53 = vadd.f32 %v1978_v36, %v1970_v5  ;;  %v2176_v63 = vld [vmem:[#allocation3 + $0x10] sm:$0xc0]  ;;  %v2018_v38 = vld [vmem:[#allocation3 + $0x60] sm:$0xc]  ;;  %v1972_v59 = vmul.f32 %v1956_v37, %v1940_v24  ;;  %1827 = vst [vmem:[#allocation5 + $0x58] sm:$0xff] %v1521_v57 }
 0x140   :  { %v2128_v2 = vmul.f32 %v2112_v26, %v2096_v42  ;;  %v2127_v30 = vmul.f32 %v2111_v15, %v2095_v47  ;;  %v2135_v6 = vld [vmem:[#allocation4 + $0x48] sm:$0x3]  ;;  %v1955_v42 = vrot.slane %v4721_v43, 2  ;;  %v1957_v26 = vrot.slane %v4723_v61, 2  ;;  %v1590_v50 = vpop.f32.mrb[28].mxu0  ;;  %v1667_v57 = vpop.f32.mrb[28].mxu1 }
 0x141   :  { %v4718_v32 = vadd.f32 %v2134_v14, %v2126_v0  ;;  %v2214_v60 = vld [vmem:[#allocation4] sm:$0xc0]  ;;  %v2129_v0 = vmul.f32 %v2113_v40, %v2097_v31  ;;  %v2034_v1 = vrot.slane %v4728_v53, 2  ;;  %v1980_v10 = vld [vmem:[#allocation4 + $0x70] sm:$0x30]  ;;  %1820 = vst [vmem:[#allocation5 + $0x20] sm:$0xff] %v1590_v50 }
 0x142   :  { %v4725_v25 = vadd.f32 %v2136_v33, %v2128_v2  ;;  %v4734_v22 = vadd.f32 %v2135_v6, %v2127_v30  ;;  %v2175_v14 = vld [vmem:[#allocation3 + $0x8] sm:$0xc0]  ;;  %v2216_v2 = vld [vmem:[#allocation4 + $0x10] sm:$0xc0]  ;;  %v2137_v15 = vld [vmem:[#allocation4 + $0x58] sm:$0x3]  ;;  %v4737_v5 = vadd.f32 %v1980_v10, %v1972_v59  ;;  %v1971_v23 = vmul.f32 %v1955_v42, %v1939_v13 }
 0x143   :  { %v2190_v17 = vrot.slane %v4718_v32, 2  ;;  %v1979_v28 = vld [vmem:[#allocation4 + $0x68] sm:$0x30]  ;;  %v1973_v33 = vmul.f32 %v1957_v26, %v1941_v20  ;;  %v4740_v4 = vadd.f32 %v2137_v15, %v2129_v0  ;;  %v2050_v24 = vmul.f32 %v2034_v1, %v2018_v38  ;;  %v1981_v30 = vld [vmem:[#allocation4 + $0x78] sm:$0x30]  ;;  %1822 = vst [vmem:[#allocation5 + $0x30] sm:$0xff] %v1667_v57 }
 0x144   :  { %v2192_v47 = vrot.slane %v4725_v25, 2  ;;  %v2191_v37 = vrot.slane %v4734_v22, 2  ;;  %v2230_v31 = vld [vmem:[#allocation5] sm:$0xc0]  ;;  %v2058_v6 = vld [vmem:[#allocation4 + $0x60] sm:$0xc]  ;;  %v4743_v12 = vadd.f32 %v1979_v28, %v1971_v23 }
 0x145   :  { %v2206_v36 = vmul.f32 %v2190_v17, %v2174_v39  ;;  %v2036_v50 = vrot.slane %v4737_v5, 2  ;;  %v4745_v59 = vadd.f32 %v1981_v30, %v1973_v33  ;;  %v2232_v42 = vld [vmem:[#allocation5 + $0x10] sm:$0xc0]  ;;  %v1592_v39 = vpop.f32.mrb[29].mxu0  ;;  %v2019_v20 = vld [vmem:[#allocation3 + $0x68] sm:$0xc]  ;;  %v4748_v0 = vadd.f32 %v2058_v6, %v2050_v24 }
 0x146   :  { %v2208_v40 = vmul.f32 %v2192_v47, %v2176_v63  ;;  %v2020_v17 = vld [vmem:[#allocation3 + $0x70] sm:$0xc]  ;;  %v2021_v26 = vld [vmem:[#allocation3 + $0x78] sm:$0xc]  ;;  %v2193_v38 = vrot.slane %v4740_v4, 2  ;;  %v2207_v47 = vmul.f32 %v2191_v37, %v2175_v14  ;;  %1821 = vst [vmem:[#allocation5 + $0x28] sm:$0xff] %v1592_v39 }
 0x147   :  { %v2222_v13 = vadd.f32 %v2214_v60, %v2206_v36  ;;  %v1669_v1 = vpop.f32.mrb[29].mxu1  ;;  %v2254_v10 = vld [vmem:[#allocation3] sm:$0x30]  ;;  %v2256_v15 = vld [vmem:[#allocation3 + $0x10] sm:$0x30]  ;;  %v2052_v33 = vmul.f32 %v2036_v50, %v2020_v17  ;;  %v2035_v36 = vrot.slane %v4743_v12, 2 }
 0x148   :  { %v2224_v63 = vadd.f32 %v2216_v2, %v2208_v40  ;;  %v2177_v23 = vld [vmem:[#allocation3 + $0x18] sm:$0xc0]  ;;  %v2215_v28 = vld [vmem:[#allocation4 + $0x8] sm:$0xc0]  ;;  %v2060_v60 = vld [vmem:[#allocation4 + $0x70] sm:$0xc] }
 0x149   :  { %v2037_v30 = vrot.slane %v4745_v59, 2  ;;  %v2238_v57 = vmul.f32 %v2230_v31, %v2222_v13  ;;  %1823 = vst [vmem:[#allocation5 + $0x38] sm:$0xff] %v1669_v1  ;;  %v2114_v58 = vrot.slane %v4748_v0, 2  ;;  %v2270_v24 = vrot.slane %v2222_v13, 2  ;;  %v2231_v14 = vld [vmem:[#allocation5 + $0x8] sm:$0xc0] }
 0x14a   :  { %v2240_v6 = vmul.f32 %v2232_v42, %v2224_v63  ;;  %v2272_v2 = vrot.slane %v2224_v63, 2  ;;  %v1596_v37 = vpop.f32.mrb[30].mxu0  ;;  %v2098_v40 = vld [vmem:[#allocation3 + $0x60] sm:$0x3]  ;;  %v2294_v39 = vld [vmem:[#allocation4] sm:$0x30]  ;;  %v4753_v18 = vadd.f32 %v2060_v60, %v2052_v33  ;;  %v2051_v50 = vmul.f32 %v2035_v36, %v2019_v20 }
 0x14b   :  { %v2296_v11 = vld [vmem:[#allocation4 + $0x10] sm:$0x30]  ;;  %v2053_v17 = vmul.f32 %v2037_v30, %v2021_v26  ;;  %2246 = vst [vmem:[#allocation6] sm:$0xc0] %v2238_v57  ;;  %v2223_v52 = vadd.f32 %v2215_v28, %v2207_v47  ;;  %1828 = vst [vmem:[#allocation5 + $0x60] sm:$0xff] %v1596_v37  ;;  %v2130_v19 = vmul.f32 %v2114_v58, %v2098_v40  ;;  %v1673_v60 = vpop.f32.mrb[30].mxu1 }
 0x14c   :  { %v2138_v31 = vld [vmem:[#allocation4 + $0x60] sm:$0x3]  ;;  %v2059_v1 = vld [vmem:[#allocation4 + $0x68] sm:$0xc]  ;;  %v2061_v49 = vld [vmem:[#allocation4 + $0x78] sm:$0xc]  ;;  %v2286_v8 = vmul.f32 %v2270_v24, %v2254_v10  ;;  %v2288_v13 = vmul.f32 %v2272_v2, %v2256_v15  ;;  %v2209_v42 = vmul.f32 %v2193_v38, %v2177_v23 }
 0x14d   :  { %2248 = vst [vmem:[#allocation6 + $0x10] sm:$0xc0] %v2240_v6  ;;  %v2116_v63 = vrot.slane %v4753_v18, 2  ;;  %v4756_v54 = vadd.f32 %v2059_v1, %v2051_v50  ;;  %v4758_v21 = vadd.f32 %v2061_v49, %v2053_v17  ;;  %v2310_v33 = vld [vmem:[#allocation5] sm:$0x30]  ;;  %v2239_v26 = vmul.f32 %v2231_v14, %v2223_v52  ;;  %1830 = vst [vmem:[#allocation5 + $0x70] sm:$0xff] %v1673_v60 }
 0x14e   :  { %v2312_v20 = vld [vmem:[#allocation5 + $0x10] sm:$0x30]  ;;  %v2100_v47 = vld [vmem:[#allocation3 + $0x70] sm:$0x3]  ;;  %v2217_v28 = vld [vmem:[#allocation4 + $0x18] sm:$0xc0]  ;;  %v4760_v58 = vadd.f32 %v2138_v31, %v2130_v19  ;;  %v2302_v36 = vadd.f32 %v2294_v39, %v2286_v8  ;;  %v2304_v30 = vadd.f32 %v2296_v11, %v2288_v13 }
 0x14f   :  { %v2271_v10 = vrot.slane %v2223_v52, 2  ;;  %v1598_v15 = vpop.f32.mrb[31].mxu0  ;;  %v2334_v38 = vld [vmem:[#allocation3] sm:$0xc]  ;;  %v2255_v23 = vld [vmem:[#allocation3 + $0x8] sm:$0x30]  ;;  %v2132_v24 = vmul.f32 %v2116_v63, %v2100_v47  ;;  %v2225_v2 = vadd.f32 %v2217_v28, %v2209_v42 }
 0x150   :  { %v2099_v57 = vld [vmem:[#allocation3 + $0x68] sm:$0x3]  ;;  %v2115_v49 = vrot.slane %v4756_v54, 2  ;;  %v2117_v6 = vrot.slane %v4758_v21, 2  ;;  %2247 = vst [vmem:[#allocation6 + $0x8] sm:$0xc0] %v2239_v26  ;;  %v2318_v52 = vmul.f32 %v2310_v33, %v2302_v36  ;;  %v2320_v39 = vmul.f32 %v2312_v20, %v2304_v30 }
 0x151   :  { %v2233_v14 = vld [vmem:[#allocation5 + $0x18] sm:$0xc0]  ;;  %1829 = vst [vmem:[#allocation5 + $0x68] sm:$0xff] %v1598_v15  ;;  %v2336_v37 = vld [vmem:[#allocation3 + $0x10] sm:$0xc]  ;;  %v2350_v40 = vrot.slane %v2302_v36, 2  ;;  %v2287_v8 = vmul.f32 %v2271_v10, %v2255_v23 }
 0x152   :  { %v2101_v19 = vld [vmem:[#allocation3 + $0x78] sm:$0x3]  ;;  %v2140_v11 = vld [vmem:[#allocation4 + $0x70] sm:$0x3]  ;;  %v2257_v50 = vld [vmem:[#allocation3 + $0x18] sm:$0x30]  ;;  %v2131_v13 = vmul.f32 %v2115_v49, %v2099_v57  ;;  %v2241_v33 = vmul.f32 %v2233_v14, %v2225_v2 }
 0x153   :  { %v2374_v17 = vld [vmem:[#allocation4] sm:$0xc]  ;;  %v2295_v31 = vld [vmem:[#allocation4 + $0x8] sm:$0x30]  ;;  %v4765_v1 = vadd.f32 %v2140_v11, %v2132_v24  ;;  %v2139_v63 = vld [vmem:[#allocation4 + $0x68] sm:$0x3]  ;;  %v2133_v60 = vmul.f32 %v2117_v6, %v2101_v19  ;;  %v2366_v3 = vmul.f32 %v2350_v40, %v2334_v38 }
 0x154   :  { %v2352_v26 = vrot.slane %v2304_v30, 2  ;;  %v1910_v42 = vld [vmem:[#allocation5 + $0x40] sm:$0xc0]  ;;  %v1675_v47 = vpop.f32.mrb[31].mxu1  ;;  %v2376_v28 = vld [vmem:[#allocation4 + $0x10] sm:$0xc]  ;;  %v4768_v24 = vadd.f32 %v2139_v63, %v2131_v13 }
 0x155   :  { %v2141_v15 = vld [vmem:[#allocation4 + $0x78] sm:$0x3]  ;;  %2326 = vst [vmem:[#allocation6] sm:$0x30] %v2318_v52  ;;  %2328 = vst [vmem:[#allocation6 + $0x10] sm:$0x30] %v2320_v39  ;;  %v2382_v11 = vadd.f32 %v2374_v17, %v2366_v3  ;;  %v2303_v52 = vadd.f32 %v2295_v31, %v2287_v8  ;;  %v1918_v10 = vmul.f32 %v1910_v42, %v4620_v55 }
 0x156   :  { %v2273_v36 = vrot.slane %v2225_v2, 2  ;;  %v1990_v20 = vld [vmem:[#allocation5 + $0x40] sm:$0x30]  ;;  %1831 = vst [vmem:[#allocation5 + $0x78] sm:$0xff] %v1675_v47  ;;  %v2196_v35 = vrot.slane %v4765_v1, 2  ;;  %v4770_v57 = vadd.f32 %v2141_v15, %v2133_v60  ;;  %v2368_v30 = vmul.f32 %v2352_v26, %v2336_v37 }
 0x157   :  { %v2390_v49 = vld [vmem:[#allocation5] sm:$0xc]  ;;  %v2311_v6 = vld [vmem:[#allocation5 + $0x8] sm:$0x30]  ;;  %v2297_v19 = vld [vmem:[#allocation4 + $0x18] sm:$0x30]  ;;  %v1998_v63 = vmul.f32 %v1990_v20, %v4635_v41 }
 0x158   :  { %v2392_v27 = vld [vmem:[#allocation5 + $0x10] sm:$0xc]  ;;  %v2289_v38 = vmul.f32 %v2273_v36, %v2257_v50  ;;  %2249 = vst [vmem:[#allocation6 + $0x18] sm:$0xc0] %v2241_v33  ;;  %v2070_v23 = vld [vmem:[#allocation5 + $0x40] sm:$0xc]  ;;  %v2384_v13 = vadd.f32 %v2376_v28, %v2368_v30  ;;  %v2398_v3 = vmul.f32 %v2390_v49, %v2382_v11  ;;  %v2319_v8 = vmul.f32 %v2311_v6, %v2303_v52 }
 0x159   :  { %v2414_v2 = vld [vmem:[#allocation3] sm:$0x3]  ;;  %v2335_v14 = vld [vmem:[#allocation3 + $0x8] sm:$0xc]  ;;  %v1912_v60 = vld [vmem:[#allocation5 + $0x50] sm:$0xc0]  ;;  %v2078_v39 = vmul.f32 %v2070_v23, %v4670_v56 }
 0x15a   :  { %v2150_v37 = vld [vmem:[#allocation5 + $0x40] sm:$0x3]  ;;  %v2416_v26 = vld [vmem:[#allocation3 + $0x10] sm:$0x3]  ;;  %v2430_v17 = vrot.slane %v2382_v11, 2  ;;  %v2351_v50 = vrot.slane %v2303_v52, 2  ;;  %v2400_v15 = vmul.f32 %v2392_v27, %v2384_v13  ;;  %v2305_v36 = vadd.f32 %v2297_v19, %v2289_v38 }
 0x15b   :  { %v2313_v31 = vld [vmem:[#allocation5 + $0x18] sm:$0x30]  ;;  %1926 = vst [vmem:[#allocation6 + $0x40] sm:$0xc0] %v1918_v10  ;;  %v1992_v55 = vld [vmem:[#allocation5 + $0x50] sm:$0x30]  ;;  %v2158_v52 = vmul.f32 %v2150_v37, %v4718_v32  ;;  %v1920_v10 = vmul.f32 %v1912_v60, %v4622_v9 }
 0x15c   :  { %v2454_v42 = vld [vmem:[#allocation4] sm:$0x3]  ;;  %v2375_v47 = vld [vmem:[#allocation4 + $0x8] sm:$0xc]  ;;  %v2432_v33 = vrot.slane %v2384_v13, 2  ;;  %v2446_v49 = vmul.f32 %v2430_v17, %v2414_v2  ;;  %v2367_v6 = vmul.f32 %v2351_v50, %v2335_v14  ;;  %v2321_v56 = vmul.f32 %v2313_v31, %v2305_v36 }
 0x15d   :  { %2006 = vst [vmem:[#allocation6 + $0x40] sm:$0x30] %v1998_v63  ;;  %v2072_v28 = vld [vmem:[#allocation5 + $0x50] sm:$0xc]  ;;  %v2152_v41 = vld [vmem:[#allocation5 + $0x50] sm:$0x3]  ;;  %v2000_v13 = vmul.f32 %v1992_v55, %v4638_v62 }
 0x15e   :  { %v2337_v20 = vld [vmem:[#allocation3 + $0x18] sm:$0xc]  ;;  %v2456_v30 = vld [vmem:[#allocation4 + $0x10] sm:$0x3]  ;;  %2406 = vst [vmem:[#allocation6] sm:$0xc] %v2398_v3  ;;  %v2448_v19 = vmul.f32 %v2432_v33, %v2416_v26  ;;  %v2462_v3 = vadd.f32 %v2454_v42, %v2446_v49  ;;  %v2383_v17 = vadd.f32 %v2375_v47, %v2367_v6  ;;  %v2080_v14 = vmul.f32 %v2072_v28, %v4679_v46 }
 0x15f   :  { %v2470_v11 = vld [vmem:[#allocation5] sm:$0x3]  ;;  %2327 = vst [vmem:[#allocation6 + $0x8] sm:$0x30] %v2319_v8  ;;  %v1911_v40 = vld [vmem:[#allocation5 + $0x48] sm:$0xc0]  ;;  %v2160_v32 = vmul.f32 %v2152_v41, %v4725_v25 }
 0x160   :  { %v1991_v27 = vld [vmem:[#allocation5 + $0x48] sm:$0x30]  ;;  %2408 = vst [vmem:[#allocation6 + $0x10] sm:$0xc] %v2400_v15  ;;  %v2391_v38 = vld [vmem:[#allocation5 + $0x8] sm:$0xc]  ;;  %v2464_v26 = vadd.f32 %v2456_v30, %v2448_v19  ;;  %v2478_v15 = vmul.f32 %v2470_v11, %v2462_v3 }
 0x161   :  { %v2353_v23 = vrot.slane %v2305_v36, 2  ;;  %2086 = vst [vmem:[#allocation6 + $0x40] sm:$0xc] %v2078_v39  ;;  %v2071_v63 = vld [vmem:[#allocation5 + $0x48] sm:$0xc]  ;;  %v1919_v39 = vmul.f32 %v1911_v40, %v4627_v29  ;;  %v1999_v62 = vmul.f32 %v1991_v27, %v4644_v16  ;;  %v2399_v25 = vmul.f32 %v2391_v38, %v2383_v17 }
 0x162   :  { %v2472_v2 = vld [vmem:[#allocation5 + $0x10] sm:$0x3]  ;;  %2166 = vst [vmem:[#allocation6 + $0x40] sm:$0x3] %v2158_v52  ;;  %1928 = vst [vmem:[#allocation6 + $0x50] sm:$0xc0] %v1920_v10  ;;  %v2079_v28 = vmul.f32 %v2071_v63, %v4706_v48 }
 0x163   :  { %v2151_v9 = vld [vmem:[#allocation5 + $0x48] sm:$0x3]  ;;  %v1913_v37 = vld [vmem:[#allocation5 + $0x58] sm:$0xc0]  ;;  %v2369_v8 = vmul.f32 %v2353_v23, %v2337_v20  ;;  %2329 = vst [vmem:[#allocation6 + $0x18] sm:$0x30] %v2321_v56  ;;  %v2480_v29 = vmul.f32 %v2472_v2, %v2464_v26 }
 0x164   :  { %v2415_v60 = vld [vmem:[#allocation3 + $0x8] sm:$0x3]  ;;  %2008 = vst [vmem:[#allocation6 + $0x50] sm:$0x30] %v2000_v13  ;;  %v1993_v50 = vld [vmem:[#allocation5 + $0x58] sm:$0x30]  ;;  %v2159_v16 = vmul.f32 %v2151_v9, %v4734_v22  ;;  %v1921_v49 = vmul.f32 %v1913_v37, %v4633_v44 }
 0x165   :  { %v2073_v31 = vld [vmem:[#allocation5 + $0x58] sm:$0xc]  ;;  %v2153_v55 = vld [vmem:[#allocation5 + $0x58] sm:$0x3]  ;;  %v2178_v42 = vld [vmem:[#allocation3 + $0x20] sm:$0xc0]  ;;  %v2001_v48 = vmul.f32 %v1993_v50, %v4657_v51 }
 0x166   :  { %v2180_v47 = vld [vmem:[#allocation3 + $0x30] sm:$0xc0]  ;;  %v2377_v46 = vld [vmem:[#allocation4 + $0x18] sm:$0xc]  ;;  %v2431_v33 = vrot.slane %v2383_v17, 2  ;;  %v2081_v19 = vmul.f32 %v2073_v31, %v4716_v45  ;;  %v2161_v38 = vmul.f32 %v2153_v55, %v4740_v4  ;;  %v5116_v44 = vrot.slane %v4760_v58, 2 }
 0x167   :  { %v2393_v36 = vld [vmem:[#allocation5 + $0x18] sm:$0xc]  ;;  %2088 = vst [vmem:[#allocation6 + $0x50] sm:$0xc] %v2080_v14  ;;  %2168 = vst [vmem:[#allocation6 + $0x50] sm:$0x3] %v2160_v32  ;;  %v2385_v40 = vadd.f32 %v2377_v46, %v2369_v8  ;;  %v2212_v3 = vmul.f32 %v2196_v35, %v2180_v47 }
 0x168   :  { %v2179_v41 = vld [vmem:[#allocation3 + $0x28] sm:$0xc0]  ;;  %v2181_v20 = vld [vmem:[#allocation3 + $0x38] sm:$0xc0]  ;;  %v2455_v30 = vld [vmem:[#allocation4 + $0x8] sm:$0x3]  ;;  %v2447_v27 = vmul.f32 %v2431_v33, %v2415_v60  ;;  %v2210_v63 = vmul.f32 %v5116_v44, %v2178_v42 }
 0x169   :  { %1927 = vst [vmem:[#allocation6 + $0x48] sm:$0xc0] %v1919_v39  ;;  %2007 = vst [vmem:[#allocation6 + $0x48] sm:$0x30] %v1999_v62  ;;  %v1914_v6 = vld [vmem:[#allocation5 + $0x60] sm:$0xc0]  ;;  %v2401_v23 = vmul.f32 %v2393_v36, %v2385_v40 }
 0x16a   :  { %v2417_v11 = vld [vmem:[#allocation3 + $0x18] sm:$0x3]  ;;  %v2218_v52 = vld [vmem:[#allocation4 + $0x20] sm:$0xc0]  ;;  %v2220_v10 = vld [vmem:[#allocation4 + $0x30] sm:$0xc0]  ;;  %v2463_v51 = vadd.f32 %v2455_v30, %v2447_v27  ;;  %v1922_v60 = vmul.f32 %v1914_v6, %v4682_v34 }
 0x16b   :  { %2486 = vst [vmem:[#allocation6] sm:$0x3] %v2478_v15  ;;  %2407 = vst [vmem:[#allocation6 + $0x8] sm:$0xc] %v2399_v25  ;;  %v1994_v56 = vld [vmem:[#allocation5 + $0x60] sm:$0x30]  ;;  %v2226_v35 = vadd.f32 %v2218_v52, %v2210_v63  ;;  %v2228_v39 = vadd.f32 %v2220_v10, %v2212_v3 }
 0x16c   :  { %2087 = vst [vmem:[#allocation6 + $0x48] sm:$0xc] %v2079_v28  ;;  %2488 = vst [vmem:[#allocation6 + $0x10] sm:$0x3] %v2480_v29  ;;  %v2471_v22 = vld [vmem:[#allocation5 + $0x8] sm:$0x3]  ;;  %v2002_v31 = vmul.f32 %v1994_v56, %v4728_v53 }
 0x16d   :  { %v2433_v13 = vrot.slane %v2385_v40, 2  ;;  %2167 = vst [vmem:[#allocation6 + $0x48] sm:$0x3] %v2159_v16  ;;  %1929 = vst [vmem:[#allocation6 + $0x58] sm:$0xc0] %v1921_v49  ;;  %v5117_v14 = vrot.slane %v4768_v24, 2  ;;  %v2479_v47 = vmul.f32 %v2471_v22, %v2463_v51 }
 0x16e   :  { %v2074_v2 = vld [vmem:[#allocation5 + $0x60] sm:$0xc]  ;;  %v2219_v17 = vld [vmem:[#allocation4 + $0x28] sm:$0xc0]  ;;  %2009 = vst [vmem:[#allocation6 + $0x58] sm:$0x30] %v2001_v48 }
 0x16f   :  { %2089 = vst [vmem:[#allocation6 + $0x58] sm:$0xc] %v2081_v19  ;;  %2169 = vst [vmem:[#allocation6 + $0x58] sm:$0x3] %v2161_v38  ;;  %v2234_v45 = vld [vmem:[#allocation5 + $0x20] sm:$0xc0]  ;;  %v2211_v32 = vmul.f32 %v5117_v14, %v2179_v41  ;;  %v2449_v8 = vmul.f32 %v2433_v13, %v2417_v11  ;;  %v2082_v33 = vmul.f32 %v2074_v2, %v4748_v0 }
 0x170   :  { %v2236_v4 = vld [vmem:[#allocation5 + $0x30] sm:$0xc0]  ;;  %v5118_v9 = vrot.slane %v4770_v57, 2  ;;  %v2221_v26 = vld [vmem:[#allocation4 + $0x38] sm:$0xc0]  ;;  %v2274_v30 = vrot.slane %v2226_v35, 2 }
 0x171   :  { %2409 = vst [vmem:[#allocation6 + $0x18] sm:$0xc] %v2401_v23  ;;  %v2235_v62 = vld [vmem:[#allocation5 + $0x28] sm:$0xc0]  ;;  %v2237_v50 = vld [vmem:[#allocation5 + $0x38] sm:$0xc0]  ;;  %v2227_v15 = vadd.f32 %v2219_v17, %v2211_v32  ;;  %v2244_v29 = vmul.f32 %v2236_v4, %v2228_v39 }
 0x172   :  { %v2213_v37 = vmul.f32 %v5118_v9, %v2181_v20  ;;  %v2258_v55 = vld [vmem:[#allocation3 + $0x20] sm:$0x30]  ;;  %v2457_v42 = vld [vmem:[#allocation4 + $0x18] sm:$0x3]  ;;  %v2154_v36 = vld [vmem:[#allocation5 + $0x60] sm:$0x3]  ;;  %v2242_v20 = vmul.f32 %v2234_v45, %v2226_v35 }
 0x173   :  { %v2473_v46 = vld [vmem:[#allocation5 + $0x18] sm:$0x3]  ;;  %1930 = vst [vmem:[#allocation6 + $0x60] sm:$0xc0] %v1922_v60  ;;  %v2259_v34 = vld [vmem:[#allocation3 + $0x28] sm:$0x30]  ;;  %v2465_v41 = vadd.f32 %v2457_v42, %v2449_v8  ;;  %v2243_v11 = vmul.f32 %v2235_v62, %v2227_v15  ;;  %v2290_v19 = vmul.f32 %v2274_v30, %v2258_v55  ;;  %v2162_v56 = vmul.f32 %v2154_v36, %v4760_v58 }
 0x174   :  { %v2229_v25 = vadd.f32 %v2221_v26, %v2213_v37  ;;  %v2260_v28 = vld [vmem:[#allocation3 + $0x30] sm:$0x30]  ;;  %2010 = vst [vmem:[#allocation6 + $0x60] sm:$0x30] %v2002_v31  ;;  %v1916_v40 = vld [vmem:[#allocation5 + $0x70] sm:$0xc0] }
 0x175   :  { %v1996_v16 = vld [vmem:[#allocation5 + $0x70] sm:$0x30]  ;;  %v2261_v53 = vld [vmem:[#allocation3 + $0x38] sm:$0x30]  ;;  %v2298_v49 = vld [vmem:[#allocation4 + $0x20] sm:$0x30]  ;;  %v2481_v48 = vmul.f32 %v2473_v46, %v2465_v41  ;;  %v1924_v2 = vmul.f32 %v1916_v40, %v4709_v7 }
 0x176   :  { %2487 = vst [vmem:[#allocation6 + $0x8] sm:$0x3] %v2479_v47  ;;  %v2276_v6 = vrot.slane %v2228_v39, 2  ;;  %v2275_v52 = vrot.slane %v2227_v15, 2  ;;  %v2245_v10 = vmul.f32 %v2237_v50, %v2229_v25  ;;  %2090 = vst [vmem:[#allocation6 + $0x60] sm:$0xc] %v2082_v33  ;;  %v2004_v17 = vmul.f32 %v1996_v16, %v4737_v5 }
 0x177   :  { %v2076_v0 = vld [vmem:[#allocation5 + $0x70] sm:$0xc]  ;;  %v2156_v27 = vld [vmem:[#allocation5 + $0x70] sm:$0x3]  ;;  %2250 = vst [vmem:[#allocation6 + $0x20] sm:$0xc0] %v2242_v20  ;;  %v2306_v4 = vadd.f32 %v2298_v49, %v2290_v19 }
 0x178   :  { %2252 = vst [vmem:[#allocation6 + $0x30] sm:$0xc0] %v2244_v29  ;;  %v2277_v38 = vrot.slane %v2229_v25, 2  ;;  %v1915_v22 = vld [vmem:[#allocation5 + $0x68] sm:$0xc0]  ;;  %v2292_v63 = vmul.f32 %v2276_v6, %v2260_v28  ;;  %v2291_v3 = vmul.f32 %v2275_v52, %v2259_v34  ;;  %v2084_v58 = vmul.f32 %v2076_v0, %v4753_v18  ;;  %v4812_v15 = vld [vmem:[%s5094_s8 + $0x210] sm:$0xff] }
 0x179   :  { %v1995_v23 = vld [vmem:[#allocation5 + $0x68] sm:$0x30]  ;;  %v2300_v13 = vld [vmem:[#allocation4 + $0x30] sm:$0x30]  ;;  %v2314_v44 = vld [vmem:[#allocation5 + $0x20] sm:$0x30]  ;;  %v2164_v37 = vmul.f32 %v2156_v27, %v4765_v1  ;;  %v1923_v7 = vmul.f32 %v1915_v22, %v4721_v43 }
 0x17a   :  { %2251 = vst [vmem:[#allocation6 + $0x28] sm:$0xc0] %v2243_v11  ;;  %2253 = vst [vmem:[#allocation6 + $0x38] sm:$0xc0] %v2245_v10  ;;  %v2075_v51 = vld [vmem:[#allocation5 + $0x68] sm:$0xc]  ;;  %v2293_v9 = vmul.f32 %v2277_v38, %v2261_v53  ;;  %v2308_v8 = vadd.f32 %v2300_v13, %v2292_v63  ;;  %v2003_v5 = vmul.f32 %v1995_v23, %v4743_v12 }
 0x17b   :  { %v2299_v45 = vld [vmem:[#allocation4 + $0x28] sm:$0x30]  ;;  %2489 = vst [vmem:[#allocation6 + $0x18] sm:$0x3] %v2481_v48  ;;  %v2316_v14 = vld [vmem:[#allocation5 + $0x30] sm:$0x30]  ;;  %v2322_v55 = vmul.f32 %v2314_v44, %v2306_v4  ;;  %v2083_v18 = vmul.f32 %v2075_v51, %v4756_v54 }
 0x17c   :  { %v2315_v32 = vld [vmem:[#allocation5 + $0x28] sm:$0x30]  ;;  %2170 = vst [vmem:[#allocation6 + $0x60] sm:$0x3] %v2162_v56  ;;  %v2338_v60 = vld [vmem:[#allocation3 + $0x20] sm:$0xc]  ;;  %v2307_v35 = vadd.f32 %v2299_v45, %v2291_v3  ;;  %v2324_v25 = vmul.f32 %v2316_v14, %v2308_v8 }
 0x17d   :  { %v2301_v26 = vld [vmem:[#allocation4 + $0x38] sm:$0x30]  ;;  %1932 = vst [vmem:[#allocation6 + $0x70] sm:$0xc0] %v1924_v2  ;;  %2012 = vst [vmem:[#allocation6 + $0x70] sm:$0x30] %v2004_v17 }
 0x17e   :  { %v2317_v39 = vld [vmem:[#allocation5 + $0x38] sm:$0x30]  ;;  %v2155_v62 = vld [vmem:[#allocation5 + $0x68] sm:$0x3]  ;;  %v2339_v50 = vld [vmem:[#allocation3 + $0x28] sm:$0xc]  ;;  %v2309_v47 = vadd.f32 %v2301_v26, %v2293_v9  ;;  %v2323_v36 = vmul.f32 %v2315_v32, %v2307_v35 }
 0x17f   :  { %v2340_v31 = vld [vmem:[#allocation3 + $0x30] sm:$0xc]  ;;  %v2354_v42 = vrot.slane %v2306_v4, 2  ;;  %2092 = vst [vmem:[#allocation6 + $0x70] sm:$0xc] %v2084_v58  ;;  %v4817_v12 = vld [vmem:[%s5094_s8 + $0x218] sm:$0xff]  ;;  %v2163_v49 = vmul.f32 %v2155_v62, %v4768_v24 }
 0x180   :  { %2172 = vst [vmem:[#allocation6 + $0x70] sm:$0x3] %v2164_v37  ;;  %v1917_v1 = vld [vmem:[#allocation5 + $0x78] sm:$0xc0]  ;;  %v1997_v46 = vld [vmem:[#allocation5 + $0x78] sm:$0x30]  ;;  %v2325_v16 = vmul.f32 %v2317_v39, %v2309_v47  ;;  %v3581_v9 = vpack.c.bf16 %v4817_v12, %v4812_v15 }
 0x181   :  { %v2341_v43 = vld [vmem:[#allocation3 + $0x38] sm:$0xc]  ;;  %v2356_v33 = vrot.slane %v2308_v8, 2  ;;  %v2355_v34 = vrot.slane %v2307_v35, 2  ;;  %1931 = vst [vmem:[#allocation6 + $0x68] sm:$0xc0] %v1923_v7  ;;  %v2370_v40 = vmul.f32 %v2354_v42, %v2338_v60  ;;  %v1925_v27 = vmul.f32 %v1917_v1, %v4723_v61 }
 0x182   :  { %2011 = vst [vmem:[#allocation6 + $0x68] sm:$0x30] %v2003_v5  ;;  %v2077_v54 = vld [vmem:[#allocation5 + $0x78] sm:$0xc]  ;;  %v2157_v28 = vld [vmem:[#allocation5 + $0x78] sm:$0x3]  ;;  %v2005_v48 = vmul.f32 %v1997_v46, %v4745_v59 }
 0x183   :  { %v4822_v41 = vld [vmem:[%s5094_s8 + $0x2a0] sm:$0xff]  ;;  %v4827_v20 = vld [vmem:[%s5094_s8 + $0x2a8] sm:$0xff]  ;;  %v2380_v29 = vld [vmem:[#allocation4 + $0x30] sm:$0xc]  ;;  %2330 = vst [vmem:[#allocation6 + $0x20] sm:$0x30] %v2322_v55  ;;  %v2372_v10 = vmul.f32 %v2356_v33, %v2340_v31  ;;  %v2371_v0 = vmul.f32 %v2355_v34, %v2339_v50  ;;  %v2085_v61 = vmul.f32 %v2077_v54, %v4758_v21  ;;  %v2165_v59 = vmul.f32 %v2157_v28, %v4770_v57 }
 0x184   :  { %v2378_v30 = vld [vmem:[#allocation4 + $0x20] sm:$0xc]  ;;  %v2357_v53 = vrot.slane %v2309_v47, 2  ;;  %2091 = vst [vmem:[#allocation6 + $0x68] sm:$0xc] %v2083_v18  ;;  %v2541_v6 = vld [vmem:[#allocation6 + $0x8] sm:$0xff]  ;;  %v3583_v62 = vpack.c.bf16 %v4827_v20, %v4822_v41 }
 0x185   :  { %v2379_v11 = vld [vmem:[#allocation4 + $0x28] sm:$0xc]  ;;  %v2394_v52 = vld [vmem:[#allocation5 + $0x20] sm:$0xc]  ;;  %2332 = vst [vmem:[#allocation6 + $0x30] sm:$0x30] %v2324_v25  ;;  %2827 = vmatprep.mubr.f32.mxu0 %v2541_v6  ;;  %v2386_v56 = vadd.f32 %v2378_v30, %v2370_v40  ;;  %v2388_v51 = vadd.f32 %v2380_v29, %v2372_v10 }
 0x186   :  { %2331 = vst [vmem:[#allocation6 + $0x28] sm:$0x30] %v2323_v36  ;;  %v2540_v19 = vld [vmem:[#allocation6] sm:$0xff]  ;;  %v4835_v38 = vld [vmem:[%s5094_s8 + $0x310] sm:$0xff]  ;;  %v4840_v24 = vld [vmem:[%s5094_s8 + $0x318] sm:$0xff]  ;;  %v2373_v13 = vmul.f32 %v2357_v53, %v2341_v43  ;;  %v2387_v45 = vadd.f32 %v2379_v11, %v2371_v0 }
 0x187   :  { %v2396_v22 = vld [vmem:[#allocation5 + $0x30] sm:$0xc]  ;;  %v2395_v23 = vld [vmem:[#allocation5 + $0x28] sm:$0xc]  ;;  %2333 = vst [vmem:[#allocation6 + $0x38] sm:$0x30] %v2325_v16  ;;  %2828 = vmatmul.mubr.f32.vlgmr.msra.gmra.mrb[32].mxu0 %v2540_v19  ;;  %v2402_v60 = vmul.f32 %v2394_v52, %v2386_v56  ;;  %v3613_v29 = vpack.c.bf16 %v4840_v24, %v4835_v38 }
 0x188   :  { %2171 = vst [vmem:[#allocation6 + $0x68] sm:$0x3] %v2163_v49  ;;  %v2549_v44 = vld [vmem:[#allocation6 + $0x48] sm:$0xff]  ;;  %v4847_v63 = vld [vmem:[%s5094_s8 + $0x3a0] sm:$0xff]  ;;  %v2381_v17 = vld [vmem:[#allocation4 + $0x38] sm:$0xc]  ;;  %v2404_v42 = vmul.f32 %v2396_v22, %v2388_v51  ;;  %v2403_v18 = vmul.f32 %v2395_v23, %v2387_v45 }
 0x189   :  { %v4852_v3 = vld [vmem:[%s5094_s8 + $0x3a8] sm:$0xff]  ;;  %v2418_v2 = vld [vmem:[#allocation3 + $0x20] sm:$0x3]  ;;  %v2397_v4 = vld [vmem:[#allocation5 + $0x38] sm:$0xc]  ;;  %2832 = vmatprep.mubr.f32.mxu0 %v2549_v44  ;;  %v2434_v26 = vrot.slane %v2386_v56, 2  ;;  %v2389_v8 = vadd.f32 %v2381_v17, %v2373_v13 }
 0x18a   :  { %1933 = vst [vmem:[#allocation6 + $0x78] sm:$0xc0] %v1925_v27  ;;  %2013 = vst [vmem:[#allocation6 + $0x78] sm:$0x30] %v2005_v48  ;;  %v2543_v21 = vld [vmem:[#allocation6 + $0x18] sm:$0xff]  ;;  %v5119_v57 = vld [vmem:[#allocation9_spill] sm:$0xff]  ;;  %v3615_v48 = vpack.c.bf16 %v4852_v3, %v4847_v63 }
 0x18b   :  { %v5120_v14 = vld [vmem:[#allocation8_spill] sm:$0xff]  ;;  %v2420_v37 = vld [vmem:[#allocation3 + $0x30] sm:$0x3]  ;;  %2093 = vst [vmem:[#allocation6 + $0x78] sm:$0xc] %v2085_v61  ;;  %2902 = vmatprep.mubr.f32.mxu1 %v2543_v21  ;;  %v4867_v50 = vld [vmem:[%s5094_s8 + $0x220] sm:$0xff]  ;;  %v2450_v36 = vmul.f32 %v2434_v26, %v2418_v2  ;;  %v2405_v34 = vmul.f32 %v2397_v4, %v2389_v8 }
 0x18c   :  { %v5121_v32 = vpack.c.bf16 %v5119_v57, %v5120_v14  ;;  %v2419_v58 = vld [vmem:[#allocation3 + $0x28] sm:$0x3]  ;;  %2173 = vst [vmem:[#allocation6 + $0x78] sm:$0x3] %v2165_v59  ;;  %v2542_v35 = vld [vmem:[#allocation6 + $0x10] sm:$0xff]  ;;  %v2436_v47 = vrot.slane %v2388_v51, 2 }
 0x18d   :  { %v5122_v39 = vld [vmem:[#allocation13_spill] sm:$0xff]  ;;  %v5123_v7 = vld [vmem:[#allocation12_spill] sm:$0xff]  ;;  %v2421_v55 = vld [vmem:[#allocation3 + $0x38] sm:$0x3]  ;;  %v2435_v1 = vrot.slane %v2387_v45, 2  ;;  %2903 = vmatmul.mubr.f32.vlgmr.msra.gmra.mrb[32].mxu1 %v2542_v35  ;;  %v2437_v54 = vrot.slane %v2389_v8, 2 }
 0x18e   :  { %3578 = vmatpush3.bf16.msra.mxu0 %v5121_v32  ;;  %v5124_v5 = vpack.c.bf16 %v5122_v39, %v5123_v7  ;;  %v4872_v31 = vld [vmem:[%s5094_s8 + $0x228] sm:$0xff]  ;;  %v2551_v46 = vld [vmem:[#allocation6 + $0x58] sm:$0xff]  ;;  %v4877_v15 = vld [vmem:[%s5094_s8 + $0x320] sm:$0xff]  ;;  %2410 = vst [vmem:[#allocation6 + $0x20] sm:$0xc] %v2402_v60  ;;  %v2452_v11 = vmul.f32 %v2436_v47, %v2420_v37 }
 0x18f   :  { %v4882_v12 = vld [vmem:[%s5094_s8 + $0x328] sm:$0xff]  ;;  %v2642_v43 = vld [vmem:[%s5094_s8 + $0x2b0] sm:$0xff]  ;;  %v2643_v25 = vld [vmem:[%s5094_s8 + $0x2b8] sm:$0xff]  ;;  %2907 = vmatprep.mubr.f32.mxu1 %v2551_v46  ;;  %2412 = vst [vmem:[#allocation6 + $0x30] sm:$0xc] %v2404_v42  ;;  %v2451_v52 = vmul.f32 %v2435_v1, %v2419_v58  ;;  %v2453_v22 = vmul.f32 %v2437_v54, %v2421_v55  ;;  %v3585_v13 = vpack.c.bf16 %v4872_v31, %v4867_v50 }
 0x190   :  { %3580 = vmatprep.subr.bf16.mxu0 %v5124_v5  ;;  %v2458_v33 = vld [vmem:[#allocation4 + $0x20] sm:$0x3]  ;;  %v5126_v41 = vld [vmem:[#allocation10_spill] sm:$0xff]  ;;  %v2674_v40 = vld [vmem:[%s5094_s8 + $0x3b0] sm:$0xff]  ;;  %2411 = vst [vmem:[#allocation6 + $0x28] sm:$0xc] %v2403_v18  ;;  %v3587_v63 = vpack.c.bf16 %v2643_v25, %v2642_v43  ;;  %v3617_v45 = vpack.c.bf16 %v4882_v12, %v4877_v15 }
 0x191   :  { %v5125_v28 = vld [vmem:[#allocation11_spill] sm:$0xff]  ;;  %v2675_v16 = vld [vmem:[%s5094_s8 + $0x3b8] sm:$0xff]  ;;  %v2460_v53 = vld [vmem:[#allocation4 + $0x30] sm:$0x3]  ;;  %v2466_v38 = vadd.f32 %v2458_v33, %v2450_v36  ;;  %2413 = vst [vmem:[#allocation6 + $0x38] sm:$0xc] %v2405_v34 }
 0x192   :  { %v5127_v20 = vpack.c.bf16 %v5125_v28, %v5126_v41  ;;  %v2548_v30 = vld [vmem:[#allocation6 + $0x40] sm:$0xff]  ;;  %v2459_v49 = vld [vmem:[#allocation4 + $0x28] sm:$0x3]  ;;  %v5129_v0 = vld [vmem:[#allocation14_spill] sm:$0xff]  ;;  %3582 = vmatpush3.bf16.msra.mxu0 %v3581_v9  ;;  %v2468_v59 = vadd.f32 %v2460_v53, %v2452_v11  ;;  %v3619_v32 = vpack.c.bf16 %v2675_v16, %v2674_v40 }
 0x193   :  { %v2474_v6 = vld [vmem:[#allocation5 + $0x20] sm:$0x3]  ;;  %2833 = vmatmul.mubr.f32.gmra.mrb[34].mxu0 %v2548_v30  ;;  %v2626_v19 = vld [vmem:[%s5094_s8 + $0x230] sm:$0xff]  ;;  %v2475_v56 = vld [vmem:[#allocation5 + $0x28] sm:$0x3]  ;;  %v2467_v44 = vadd.f32 %v2459_v49, %v2451_v52  ;;  %3584 = vmatprep.subr.bf16.mxu0 %v3583_v62 }
 0x194   :  { %3610 = vmatpush3.bf16.msra.mxu1 %v5127_v20  ;;  %v5128_v10 = vld [vmem:[#allocation15_spill] sm:$0xff]  ;;  %v2476_v24 = vld [vmem:[#allocation5 + $0x30] sm:$0x3]  ;;  %v2461_v61 = vld [vmem:[#allocation4 + $0x38] sm:$0x3]  ;;  %v2482_v17 = vmul.f32 %v2474_v6, %v2466_v38 }
 0x195   :  { %v5130_v27 = vpack.c.bf16 %v5128_v10, %v5129_v0  ;;  %v2550_v23 = vld [vmem:[#allocation6 + $0x50] sm:$0xff]  ;;  %v2477_v2 = vld [vmem:[#allocation5 + $0x38] sm:$0x3]  ;;  %v2469_v51 = vadd.f32 %v2461_v61, %v2453_v22  ;;  %v2644_v4 = vld [vmem:[%s5094_s8 + $0x2c0] sm:$0xff]  ;;  %v2484_v57 = vmul.f32 %v2476_v24, %v2468_v59  ;;  %v2483_v14 = vmul.f32 %v2475_v56, %v2467_v44 }
 0x196   :  { %2908 = vmatmul.mubr.f32.gmra.mrb[34].mxu1 %v2550_v23  ;;  %v2627_v3 = vld [vmem:[%s5094_s8 + $0x238] sm:$0xff]  ;;  %v2645_v21 = vld [vmem:[%s5094_s8 + $0x2c8] sm:$0xff]  ;;  %v2658_v9 = vld [vmem:[%s5094_s8 + $0x330] sm:$0xff]  ;;  %2490 = vst [vmem:[#allocation6 + $0x20] sm:$0x3] %v2482_v17  ;;  %3586 = vmatpush3.bf16.msra.mxu0 %v3585_v13 }
 0x197   :  { %3612 = vmatprep.subr.bf16.mxu1 %v5130_v27  ;;  %v2659_v58 = vld [vmem:[%s5094_s8 + $0x338] sm:$0xff]  ;;  %v2485_v37 = vmul.f32 %v2477_v2, %v2469_v51  ;;  %v3589_v60 = vpack.c.bf16 %v2627_v3, %v2626_v19  ;;  %v2676_v26 = vld [vmem:[%s5094_s8 + $0x3c0] sm:$0xff]  ;;  %v2677_v8 = vld [vmem:[%s5094_s8 + $0x3c8] sm:$0xff]  ;;  %2492 = vst [vmem:[#allocation6 + $0x30] sm:$0x3] %v2484_v57  ;;  %3588 = vmatprep.subr.bf16.mxu0 %v3587_v63 }
 0x198   :  { %3614 = vmatpush3.bf16.msra.mxu1 %v3613_v29  ;;  %2491 = vst [vmem:[#allocation6 + $0x28] sm:$0x3] %v2483_v14  ;;  %v3591_v35 = vpack.c.bf16 %v2645_v21, %v2644_v4  ;;  %v2628_v39 = vld [vmem:[%s5094_s8 + $0x240] sm:$0xff]  ;;  %v2629_v7 = vld [vmem:[%s5094_s8 + $0x248] sm:$0xff]  ;;  %v3621_v5 = vpack.c.bf16 %v2659_v58, %v2658_v9  ;;  %v2646_v62 = vld [vmem:[%s5094_s8 + $0x2d0] sm:$0xff]  ;;  %v3623_v31 = vpack.c.bf16 %v2677_v8, %v2676_v26 }
 0x199   :  { %3616 = vmatprep.subr.bf16.mxu1 %v3615_v48  ;;  %2493 = vst [vmem:[#allocation6 + $0x38] sm:$0x3] %v2485_v37  ;;  %v2647_v50 = vld [vmem:[%s5094_s8 + $0x2d8] sm:$0xff]  ;;  %v2660_v55 = vld [vmem:[%s5094_s8 + $0x340] sm:$0xff]  ;;  %v2661_v42 = vld [vmem:[%s5094_s8 + $0x348] sm:$0xff]  ;;  %v3593_v47 = vpack.c.bf16 %v2629_v7, %v2628_v39 }
 0x19a   :  { %3590 = vmatpush3.bf16.msra.mxu0 %v3589_v60  ;;  %v2678_v18 = vld [vmem:[%s5094_s8 + $0x3d0] sm:$0xff]  ;;  %v2679_v1 = vld [vmem:[%s5094_s8 + $0x3d8] sm:$0xff]  ;;  %v3595_v46 = vpack.c.bf16 %v2647_v50, %v2646_v62  ;;  %v3625_v43 = vpack.c.bf16 %v2661_v42, %v2660_v55  ;;  %v2648_v25 = vld [vmem:[%s5094_s8 + $0x2e0] sm:$0xff] }
 0x19b   :  { %3592 = vmatprep.subr.bf16.mxu0 %v3591_v35  ;;  %v2630_v15 = vld [vmem:[%s5094_s8 + $0x250] sm:$0xff]  ;;  %v2631_v12 = vld [vmem:[%s5094_s8 + $0x258] sm:$0xff]  ;;  %v2649_v33 = vld [vmem:[%s5094_s8 + $0x2e8] sm:$0xff]  ;;  %v3627_v36 = vpack.c.bf16 %v2679_v1, %v2678_v18 }
 0x19c   :  { %3618 = vmatpush3.bf16.msra.mxu1 %v3617_v45  ;;  %v2662_v34 = vld [vmem:[%s5094_s8 + $0x350] sm:$0xff]  ;;  %v2663_v54 = vld [vmem:[%s5094_s8 + $0x358] sm:$0xff]  ;;  %v3597_v41 = vpack.c.bf16 %v2631_v12, %v2630_v15  ;;  %v2680_v20 = vld [vmem:[%s5094_s8 + $0x3e0] sm:$0xff]  ;;  %v3599_v40 = vpack.c.bf16 %v2649_v33, %v2648_v25 }
 0x19d   :  { %3620 = vmatprep.subr.bf16.mxu1 %v3619_v32  ;;  %v2681_v30 = vld [vmem:[%s5094_s8 + $0x3e8] sm:$0xff]  ;;  %v2632_v16 = vld [vmem:[%s5094_s8 + $0x260] sm:$0xff]  ;;  %v3629_v49 = vpack.c.bf16 %v2663_v54, %v2662_v34  ;;  %v2650_v6 = vld [vmem:[%s5094_s8 + $0x2f0] sm:$0xff] }
 0x19e   :  { %3594 = vmatpush3.bf16.msra.mxu0 %v3593_v47  ;;  %v2633_v53 = vld [vmem:[%s5094_s8 + $0x268] sm:$0xff]  ;;  %v2651_v11 = vld [vmem:[%s5094_s8 + $0x2f8] sm:$0xff]  ;;  %v3631_v52 = vpack.c.bf16 %v2681_v30, %v2680_v20  ;;  %v2664_v10 = vld [vmem:[%s5094_s8 + $0x360] sm:$0xff] }
 0x19f   :  { %v2545_v28 = vld [vmem:[#allocation6 + $0x28] sm:$0xff]  ;;  %3596 = vmatprep.subr.bf16.mxu0 %v3595_v46  ;;  %v3601_v27 = vpack.c.bf16 %v2633_v53, %v2632_v16  ;;  %v2682_v48 = vld [vmem:[%s5094_s8 + $0x3f0] sm:$0xff]  ;;  %v2683_v19 = vld [vmem:[%s5094_s8 + $0x3f8] sm:$0xff]  ;;  %v3603_v38 = vpack.c.bf16 %v2651_v11, %v2650_v6 }
 0x1a0   :  { %3622 = vmatpush3.bf16.msra.mxu1 %v3621_v5  ;;  %2977 = vmatprep.mubr.f32.mxu0 %v2545_v28  ;;  %v2547_v29 = vld [vmem:[#allocation6 + $0x38] sm:$0xff]  ;;  %v2665_v0 = vld [vmem:[%s5094_s8 + $0x368] sm:$0xff]  ;;  %v2634_v24 = vld [vmem:[%s5094_s8 + $0x270] sm:$0xff]  ;;  %v3635_v23 = vpack.c.bf16 %v2683_v19, %v2682_v48 }
 0x1a1   :  { %3624 = vmatprep.subr.bf16.mxu1 %v3623_v31  ;;  %3052 = vmatprep.mubr.f32.mxu1 %v2547_v29  ;;  %v2635_v56 = vld [vmem:[%s5094_s8 + $0x278] sm:$0xff]  ;;  %v3633_v22 = vpack.c.bf16 %v2665_v0, %v2664_v10  ;;  %v2666_v13 = vld [vmem:[%s5094_s8 + $0x370] sm:$0xff]  ;;  %v2544_v2 = vld [vmem:[#allocation6 + $0x20] sm:$0xff] }
 0x1a2   :  { %3598 = vmatpush3.bf16.msra.mxu0 %v3597_v41  ;;  %v2667_v61 = vld [vmem:[%s5094_s8 + $0x378] sm:$0xff]  ;;  %v3605_v59 = vpack.c.bf16 %v2635_v56, %v2634_v24  ;;  %v2553_v63 = vld [vmem:[#allocation6 + $0x68] sm:$0xff]  ;;  %v2546_v3 = vld [vmem:[#allocation6 + $0x30] sm:$0xff] }
 0x1a3   :  { %3600 = vmatprep.subr.bf16.mxu0 %v3599_v40  ;;  %v3637_v44 = vpack.c.bf16 %v2667_v61, %v2666_v13  ;;  %v2555_v17 = vld [vmem:[#allocation6 + $0x78] sm:$0xff]  ;;  %v2552_v51 = vld [vmem:[#allocation6 + $0x60] sm:$0xff]  ;;  %v2554_v45 = vld [vmem:[#allocation6 + $0x70] sm:$0xff] }
 0x1a4   :  { %3626 = vmatpush3.bf16.msra.mxu1 %v3625_v43  ;;  %v3198_v4 = vld [vmem:[%s5095_s5] ss:$0 sm:$0xff]  ;;  %v3674_v26 = vld [vmem:[%s5089_s0 + $0x2] sm:$0x3]  ;;  %v3675_v35 = vld [vmem:[%s5089_s0 + $0x4] sm:$0x3] }
 0x1a5   :  { %3628 = vmatprep.subr.bf16.mxu1 %v3627_v36  ;;  %v2690_v21 = vcombine.high %v3198_v4, %v3198_v4  ;;  %v5131_v57 = vld [vmem:[#allocation7_spill] sm:$0xff]  ;;  %v3677_v31 = vld [vmem:[%s5089_s0 + $0x8] sm:$0x3]  ;;  %v3678_v42 = vld [vmem:[%s5089_s0 + $0xa] sm:$0x3] }
 0x1a6   :  { %3602 = vmatpush3.bf16.msra.mxu0 %v3601_v27  ;;  %v2697_v14 = vrot.slane %v3198_v4, %v5131_v57  ;;  %v3673_v37 = vld [vmem:[%s5089_s0] sm:$0x3]  ;;  %v3676_v7 = vld [vmem:[%s5089_s0 + $0x6] sm:$0x3]  ;;  %v3679_v18 = vld [vmem:[%s5089_s0 + $0xc] sm:$0x3] }
 0x1a7   :  { %3604 = vmatprep.subr.bf16.mxu0 %v3603_v38  ;;  %v2704_v32 = vrot.slane %v2690_v21, %v5131_v57  ;;  %v3680_v46 = vld [vmem:[%s5089_s0 + $0xe] sm:$0x3] }
 0x1a8   :  { %3630 = vmatpush3.bf16.msra.mxu1 %v3629_v49  ;;  %v2705_v9 = vcombine.high %v2697_v14, %v2697_v14  ;;  %v2711_v60 = vmul.f32 %v3673_v37, %v2697_v14  ;;  %v2715_v55 = vmul.f32 %v3677_v31, %v2697_v14 }
 0x1a9   :  { %3632 = vmatprep.subr.bf16.mxu1 %v3631_v52  ;;  %v2706_v58 = vcombine.high %v2704_v32, %v2704_v32  ;;  %v2713_v39 = vmul.f32 %v3675_v35, %v2704_v32  ;;  %v2717_v1 = vmul.f32 %v3679_v18, %v2704_v32 }
 0x1aa   :  { %3606 = vmatpush3.bf16.msra.mxu0 %v3605_v59  ;;  %v2712_v8 = vmul.f32 %v3674_v26, %v2705_v9  ;;  %v2716_v47 = vmul.f32 %v3678_v42, %v2705_v9 }
 0x1ab   :  { %v2714_v5 = vmul.f32 %v3676_v7, %v2706_v58  ;;  %v2718_v15 = vmul.f32 %v3680_v46, %v2706_v58 }
 0x1ac   :  { %3634 = vmatpush3.bf16.msra.mxu1 %v3633_v22  ;;  %v2727_v62 = vcombine.low %v2711_v60, %v2712_v8  ;;  %v2744_v25 = vcombine.low %v2715_v55, %v2716_v47 }
 0x1ad   :  { %3636 = vmatprep.subr.bf16.mxu1 %v3635_v23  ;;  %2978 = vmatmul.mubr.f32.vlgmr.msra.gmra.mrb[36].mxu0 %v2544_v2  ;;  %v2728_v50 = vcombine.low %v2713_v39, %v2714_v5  ;;  %v2745_v33 = vcombine.low %v2717_v1, %v2718_v15 }
 0x1ae   :  { %2982 = vmatprep.mubr.f32.mxu0 %v2553_v63  ;;  %v2735_v12 = vrot.slane %v2727_v62, %v5131_v57  ;;  %v2752_v28 = vrot.slane %v2744_v25, %v5131_v57 }
 0x1af   :  { %v2742_v43 = vrot.slane %v2728_v50, %v5131_v57  ;;  %v2759_v41 = vrot.slane %v2745_v33, %v5131_v57 }
 0x1b0   :  { %3638 = vmatpush3.bf16.msra.mxu1 %v3637_v44 }
 0x1b1   :  { %2983 = vmatmul.mubr.f32.gmra.mrb[38].mxu0 %v2552_v51  ;;  %v2743_v34 = vcombine.low %v2735_v12, %v2742_v43  ;;  %v2760_v49 = vcombine.low %v2752_v28, %v2759_v41 }
 0x1b3   :  { %3053 = vmatmul.mubr.f32.vlgmr.msra.gmra.mrb[36].mxu1 %v2546_v3 }
 0x1b4   :  { %3057 = vmatprep.mubr.f32.mxu1 %v2555_v17 }
 0x1b7   :  { %3058 = vmatmul.mubr.f32.gmra.mrb[38].mxu1 %v2554_v45 }
 0x25a   :  { %v3231_v36 = vpop.f32.mrb[32].mxu0 }
 0x25b   :  { %v3232_v54 = vpop.f32.mrb[33].mxu0 }
 0x25c   :  { %v3233_v20 = vadd.f32 %v3232_v54, %v3231_v36 }
 0x25e   :  { %v2830_v29 = vadd.f32 %v3233_v20, %v2743_v34 }
 0x260   :  { %v3269_v30 = vpop.f32.mrb[32].mxu1 }
 0x261   :  { %v3270_v40 = vpop.f32.mrb[33].mxu1 }
 0x262   :  { %v3271_v16 = vadd.f32 %v3270_v40, %v3269_v30 }
 0x264   :  { %v2905_v11 = vadd.f32 %v3271_v16, %v2830_v29 }
 0x266   :  { %v3234_v53 = vpop.f32.mrb[34].mxu0 }
 0x267   :  { %v3235_v6 = vpop.f32.mrb[35].mxu0 }
 0x268   :  { %v3236_v10 = vadd.f32 %v3235_v6, %v3234_v53 }
 0x269   :  { %v3272_v52 = vpop.f32.mrb[34].mxu1 }
 0x26a   :  { %v3273_v0 = vpop.f32.mrb[35].mxu1  ;;  %v2835_v27 = vadd.f32 %v3236_v10, %v2760_v49 }
 0x26b   :  { %v3274_v48 = vadd.f32 %v3273_v0, %v3272_v52 }
 0x26d   :  { %v2910_v19 = vadd.f32 %v3274_v48, %v2835_v27 }
 0x280   :  { %v3307_v38 = vpop.f32.mrb[36].mxu0 }
 0x281   :  { %v3308_v24 = vpop.f32.mrb[37].mxu0 }
 0x282   :  { %v3309_v22 = vadd.f32 %v3308_v24, %v3307_v38 }
 0x284   :  { %v2980_v13 = vadd.f32 %v3309_v22, %v2905_v11  ;;  %v3310_v59 = vpop.f32.mrb[38].mxu0 }
 0x285   :  { %v3311_v44 = vpop.f32.mrb[39].mxu0 }
 0x286   :  { %v3345_v56 = vpop.f32.mrb[36].mxu1  ;;  %v3312_v3 = vadd.f32 %v3311_v44, %v3310_v59 }
 0x287   :  { %v3346_v23 = vpop.f32.mrb[37].mxu1 }
 0x288   :  { %v3347_v61 = vadd.f32 %v3346_v23, %v3345_v56  ;;  %v2985_v4 = vadd.f32 %v3312_v3, %v2910_v19 }
 0x28a   :  { %v3055_v2 = vadd.f32 %v3347_v61, %v2980_v13  ;;  %v3348_v63 = vpop.f32.mrb[38].mxu1 }
 0x28b   :  { %v3349_v17 = vpop.f32.mrb[39].mxu1 }
 0x28c   :  { %v3065_v51 = vcombine.high %v3055_v2, %v3055_v2  ;;  %v3072_v45 = vrot.slane %v3055_v2, %v5131_v57  ;;  %v3350_v21 = vadd.f32 %v3349_v17, %v3348_v63 }
 0x28e   :  { %v3079_v14 = vrot.slane %v3065_v51, %v5131_v57  ;;  %v3080_v32 = vcombine.high %v3072_v45, %v3072_v45  ;;  %3108 = vst.msk [vmem:[%s5096_s9] sm:$0x3] %vm3107_vm2, %v3072_v45  ;;  %v3060_v9 = vadd.f32 %v3350_v21, %v2985_v4 }
 0x290   :  { %v3081_v58 = vcombine.high %v3079_v14, %v3079_v14  ;;  %3109 = vst.msk [vmem:[%s5096_s9 + $0x2] sm:$0x3] %vm3107_vm2, %v3080_v32  ;;  %3110 = vst.msk [vmem:[%s5096_s9 + $0x4] sm:$0x3] %vm3107_vm2, %v3079_v14  ;;  %v3082_v37 = vcombine.high %v3060_v9, %v3060_v9  ;;  %v3089_v60 = vrot.slane %v3060_v9, %v5131_v57 }
 0x292   :  { %3111 = vst.msk [vmem:[%s5096_s9 + $0x6] sm:$0x3] %vm3107_vm2, %v3081_v58  ;;  %v3096_v26 = vrot.slane %v3082_v37, %v5131_v57  ;;  %v3097_v8 = vcombine.high %v3089_v60, %v3089_v60  ;;  %3112 = vst.msk [vmem:[%s5096_s9 + $0x8] sm:$0x3] %vm3107_vm2, %v3089_v60 }
 0x294   :  { %v3098_v35 = vcombine.high %v3096_v26, %v3096_v26  ;;  %3113 = vst.msk [vmem:[%s5096_s9 + $0xa] sm:$0x3] %vm3107_vm2, %v3097_v8  ;;  %3114 = vst.msk [vmem:[%s5096_s9 + $0xc] sm:$0x3] %vm3107_vm2, %v3096_v26 }
 0x296   :  { %3115 = vst.msk [vmem:[%s5096_s9 + $0xe] sm:$0x3] %vm3107_vm2, %v3098_v35 }

// kernel: samba_forward.49
= control target key start
LH: loop header
LB: loop body
LE: loop exit
PB: predicated region body
PF: predicated region fallthrough
CT: control target
= control target key end

     0   :  { %v39_v0 = vlaneseq  ;;  %v606_v4 = vmov 1983009808   ;;  %v607_v6 = vmov 1934713408   ;;  %vm89_vm0 = vcmask 261120   ;;  %s822_s0 = inlined_call_operand.vmem [shape: f32[8,2,32], index: 0, kind: input, shape index: {}]   ;;  %s823_s2 = inlined_call_operand.vmem [shape: f32[1,8], index: 2, kind: input, shape index: {}]   ;;  %s824_s3 = inlined_call_operand.vmem [shape: bf16[8,32], index: 3, kind: input, shape index: {}]   ;;  %s825_s1 = inlined_call_operand.vmem [shape: f32[1,8], index: 1, kind: input, shape index: {}]   ;;  %s826_s5 = inlined_call_operand.vmem [shape: bf16[32,8], index: 5, kind: input, shape index: {}]   ;;  %s827_s4 = inlined_call_operand.vmem [shape: f32[1,32], index: 4, kind: input, shape index: {}]   ;;  %s828_s6 = inlined_call_operand.vmem [shape: f32[1,8], index: 6, kind: input, shape index: {}]   ;;  %s829_s7 = inlined_call_operand.vmem [shape: f32[8,2,32], index: 7, kind: output, shape index: {}]  }
   0x1   :  { %v654_v1 = vld [vmem:[%s822_s0] sm:$0x3]  ;;  %v659_v2 = vld [vmem:[%s822_s0 + $0x2] sm:$0x3]  ;;  %v664_v3 = vld [vmem:[%s822_s0 + $0x4] sm:$0x3]  ;;  %v37_v5 = vunpack.c.l.s4 %v606_v4  ;;  %v69_v7 = vunpack.c.l.s4 %v607_v6 }
   0x2   :  { %v669_v8 = vld [vmem:[%s822_s0 + $0x6] sm:$0x3]  ;;  %v674_v9 = vld [vmem:[%s822_s0 + $0x8] sm:$0x3]  ;;  %v679_v10 = vld [vmem:[%s822_s0 + $0xa] sm:$0x3]  ;;  %v35_v11 = vcombine.low %v654_v1, %v664_v3 }
   0x3   :  { %v686_v12 = vld [vmem:[%s822_s0 + $0xc] sm:$0x3]  ;;  %v691_v13 = vld [vmem:[%s822_s0 + $0xe] sm:$0x3]  ;;  %v38_v14 = vunpack.c.0.s8 %v37_v5  ;;  %v40_v15 = vshrl.u32 %v39_v0, 7  ;;  %v43_v16 = vcombine.low %v659_v2, %v669_v8  ;;  %v70_v17 = vunpack.c.0.s8 %v69_v7  ;;  %s608_s0 = smov 32  }
   0x4   :  { %v51_v18 = vcombine.low %v674_v9, %v686_v12  ;;  %v59_v19 = vcombine.low %v679_v10, %v691_v13  ;;  %vm131_vm1 = vcmask 64512   ;;  %v208_v58 = vld [vmem:[%s824_s3] sm:$0xf]  ;;  %vm228_vm2 = vcmask 1043456  }
   0x5   :  { %v699_v20 = vsub.s32 %v38_v14, %v40_v15  ;;  %v701_v21 = vsub.s32 %v70_v17, %v40_v15  ;;  %578 = vmatprep.subr.msk.bf16.mxu0 %vm228_vm2, %v208_v58  ;;  %v230_v59 = vsel %vm228_vm2, %v208_v58, 0  ;;  %vm519_vm3 = vcmask 254976  }
   0x6   :  { %557 = vmatpush3.bf16.msra.mxu0 %v230_v59 }
   0x7   :  { %v42_v22 = vrot.slane %v35_v11, %v699_v20  ;;  %v50_v23 = vrot.slane %v43_v16, %v699_v20  ;;  %v58_v24 = vrot.slane %v51_v18, %v699_v20  ;;  %v66_v25 = vrot.slane %v59_v19, %v699_v20 }
   0x9   :  { %v67_v26 = vcombine.low %v42_v22, %v50_v23  ;;  %v75_v27 = vcombine.low %v58_v24, %v66_v25  ;;  %v532_v24 = vld [vmem:[%s825_s1] ss:$0 sm:$0xff] }
   0xb   :  { %v74_v28 = vrot.slane %v67_v26, %v701_v21  ;;  %v82_v29 = vrot.slane %v75_v27, %v701_v21 }
   0xd   :  { %v84_v30 = vcombine.high %v74_v28, %v82_v29  ;;  %v83_v31 = vcombine.low %v74_v28, %v82_v29 }
   0xf   :  { %86 = vrot.lane.b32.xlu0 %v84_v30, %s608_s0 }
  0x81   :  { %v87_v32 = vpop.permute.xlu0 %86 }
  0x82   :  { %v90_v33 = vsel %vm89_vm0, %v83_v31, %v87_v32 }
  0x83   :  { %91 = vxpose.xlu0.b32.start.end [1/1] (short) (narrow) %v90_v33, 64 }
 0x103   :  { %v107_v34 = vpop.trf.xlu0 }
 0x104   :  { %v123_v35 = vmul.f32 %v107_v34, %v107_v34 }
 0x106   :  { %v132_v36 = vsel %vm131_vm1, %v123_v35, 0.0 }
 0x107   :  { %133 = vadd.xlane.f32.xlu1 %v132_v36  ;;  %v108_v37 = vpop.trf.xlu0 }
 0x108   :  { %v124_v38 = vmul.f32 %v108_v37, %v108_v37 }
 0x10a   :  { %v135_v39 = vsel %vm131_vm1, %v124_v38, 0.0 }
 0x10b   :  { %136 = vadd.xlane.f32.xlu1 %v135_v39  ;;  %v712_v40 = vpop.trf.xlu0 }
 0x10c   :  { %v125_v41 = vmul.f32 %v712_v40, %v712_v40 }
 0x10e   :  { %v138_v42 = vsel %vm131_vm1, %v125_v41, 0.0 }
 0x10f   :  { %139 = vadd.xlane.f32.xlu1 %v138_v42  ;;  %v717_v43 = vpop.trf.xlu0 }
 0x110   :  { %v126_v44 = vmul.f32 %v717_v43, %v717_v43 }
 0x112   :  { %v141_v45 = vsel %vm131_vm1, %v126_v44, 0.0 }
 0x113   :  { %142 = vadd.xlane.f32.xlu1 %v141_v45  ;;  %v722_v46 = vpop.trf.xlu0 }
 0x114   :  { %v127_v47 = vmul.f32 %v722_v46, %v722_v46 }
 0x116   :  { %v144_v48 = vsel %vm131_vm1, %v127_v47, 0.0 }
 0x117   :  { %145 = vadd.xlane.f32.xlu1 %v144_v48  ;;  %v727_v49 = vpop.trf.xlu0 }
 0x118   :  { %v128_v50 = vmul.f32 %v727_v49, %v727_v49 }
 0x11a   :  { %v147_v51 = vsel %vm131_vm1, %v128_v50, 0.0 }
 0x11b   :  { %148 = vadd.xlane.f32.xlu1 %v147_v51  ;;  %v732_v52 = vpop.trf.xlu0 }
 0x11c   :  { %v129_v53 = vmul.f32 %v732_v52, %v732_v52 }
 0x11e   :  { %v150_v54 = vsel %vm131_vm1, %v129_v53, 0.0 }
 0x11f   :  { %151 = vadd.xlane.f32.xlu1 %v150_v54  ;;  %v737_v55 = vpop.trf.xlu0 }
 0x120   :  { %v130_v56 = vmul.f32 %v737_v55, %v737_v55 }
 0x122   :  { %v153_v57 = vsel %vm131_vm1, %v130_v56, 0.0 }
 0x123   :  { %154 = vadd.xlane.f32.xlu1 %v153_v57 }
 0x194   :  { %v134_v60 = vpop.xlane.xlu1 %133 }
 0x195   :  { %v157_v61 = vmul.f32 0.125, %v134_v60 }
 0x197   :  { %v165_v62 = vadd.f32 1e-05, %v157_v61 }
 0x198   :  { %v137_v63 = vpop.xlane.xlu1 %136 }
 0x199   :  { %590 = vrsqrt.f32 %v165_v62  ;;  %v158_v0 = vmul.f32 0.125, %v137_v63 }
 0x19b   :  { %v166_v4 = vadd.f32 1e-05, %v158_v0 }
 0x19c   :  { %v140_v5 = vpop.xlane.xlu1 %139 }
 0x19d   :  { %592 = vrsqrt.f32 %v166_v4  ;;  %v159_v6 = vmul.f32 0.125, %v140_v5 }
 0x19f   :  { %v167_v7 = vadd.f32 1e-05, %v159_v6 }
 0x1a0   :  { %v143_v11 = vpop.xlane.xlu1 %142 }
 0x1a1   :  { %594 = vrsqrt.f32 %v167_v7  ;;  %v160_v14 = vmul.f32 0.125, %v143_v11 }
 0x1a3   :  { %v591_v15 = vpop.eup %590  ;;  %v168_v16 = vadd.f32 1e-05, %v160_v14 }
 0x1a4   :  { %v146_v17 = vpop.xlane.xlu1 %145  ;;  %v181_v19 = vmul.f32 %v591_v15, %v107_v34 }
 0x1a5   :  { %596 = vrsqrt.f32 %v168_v16  ;;  %v161_v18 = vmul.f32 0.125, %v146_v17 }
 0x1a6   :  { %v196_v28 = vmul.f32 %v532_v24, %v181_v19 }
 0x1a7   :  { %v593_v22 = vpop.eup %592  ;;  %v169_v23 = vadd.f32 1e-05, %v161_v18 }
 0x1a8   :  { %v149_v25 = vpop.xlane.xlu1 %148  ;;  %v182_v26 = vmul.f32 %v593_v22, %v108_v37 }
 0x1a9   :  { %598 = vrsqrt.f32 %v169_v23  ;;  %v162_v27 = vmul.f32 0.125, %v149_v25 }
 0x1aa   :  { %v197_v29 = vmul.f32 %v532_v24, %v182_v26 }
 0x1ab   :  { %v595_v30 = vpop.eup %594  ;;  %v170_v31 = vadd.f32 1e-05, %v162_v27 }
 0x1ac   :  { %v152_v32 = vpop.xlane.xlu1 %151  ;;  %v204_v33 = vpack.c.bf16 %v197_v29, %v196_v28  ;;  %v183_v34 = vmul.f32 %v595_v30, %v712_v40 }
 0x1ad   :  { %600 = vrsqrt.f32 %v170_v31  ;;  %v163_v35 = vmul.f32 0.125, %v152_v32 }
 0x1ae   :  { %558 = vmatprep.mubr.msk.bf16.mxu0 %vm131_vm1, %v204_v33  ;;  %v198_v42 = vmul.f32 %v532_v24, %v183_v34 }
 0x1af   :  { %v597_v36 = vpop.eup %596  ;;  %v171_v38 = vadd.f32 1e-05, %v163_v35 }
 0x1b0   :  { %v155_v39 = vpop.xlane.xlu1 %154  ;;  %v184_v41 = vmul.f32 %v597_v36, %v717_v43  ;;  %v538_v36 = vld [vmem:[%s828_s6] ss:$0 sm:$0xff]  ;;  %s609_s6 = smov 96  }
 0x1b1   :  { %602 = vrsqrt.f32 %v171_v38  ;;  %v164_v37 = vmul.f32 0.125, %v155_v39 }
 0x1b2   :  { %v199_v44 = vmul.f32 %v532_v24, %v184_v41 }
 0x1b3   :  { %v599_v45 = vpop.eup %598  ;;  %v172_v47 = vadd.f32 1e-05, %v164_v37 }
 0x1b4   :  { %v205_v48 = vpack.c.bf16 %v199_v44, %v198_v42  ;;  %v185_v50 = vmul.f32 %v599_v45, %v722_v46  ;;  %v588_v46 = vld [vmem:[%s826_s5] sm:$0xff]  }
 0x1b5   :  { %604 = vrsqrt.f32 %v172_v47  ;;  %566 = vmatprep.subr.bf16.mxu1 %v588_v46 }
 0x1b6   :  { %559 = vmatmul.mubr.msk.bf16.vlgmr.msra.gmra.mrb[0].mxu0 %vm131_vm1, %v205_v48  ;;  %v200_v53 = vmul.f32 %v532_v24, %v185_v50  ;;  %567 = vmatpush3.bf16.msra.mxu1 %v588_v46 }
 0x1b7   :  { %v601_v51 = vpop.eup %600 }
 0x1b8   :  { %v186_v40 = vmul.f32 %v601_v51, %v727_v49  ;;  %v589_v49 = vld [vmem:[%s826_s5 + $0x8] sm:$0xff]  }
 0x1b9   :  { %568 = vmatprep.subr.bf16.mxu1 %v589_v49 }
 0x1ba   :  { %v201_v54 = vmul.f32 %v532_v24, %v186_v40  ;;  %569 = vmatpush3.bf16.msra.mxu1 %v589_v49 }
 0x1bb   :  { %v603_v56 = vpop.eup %602 }
 0x1bc   :  { %v206_v57 = vpack.c.bf16 %v201_v54, %v200_v53  ;;  %v187_v43 = vmul.f32 %v603_v56, %v732_v52  ;;  %v533_v52 = vld [vmem:[%s827_s4] ss:$0 sm:$0xff] }
 0x1be   :  { %562 = vmatprep.mubr.msk.bf16.mxu0 %vm131_vm1, %v206_v57  ;;  %v202_v60 = vmul.f32 %v532_v24, %v187_v43 }
 0x1bf   :  { %v605_v58 = vpop.eup %604 }
 0x1c0   :  { %v188_v59 = vmul.f32 %v605_v58, %v737_v55  ;;  %v610_v58 = vmov 0.0  }
 0x1c2   :  { %v203_v61 = vmul.f32 %v532_v24, %v188_v59 }
 0x1c4   :  { %v207_v62 = vpack.c.bf16 %v203_v61, %v202_v60 }
 0x1c6   :  { %563 = vmatmul.mubr.msk.bf16.gmra.mrb[4].mxu0 %vm131_vm1, %v207_v62 }
 0x289   :  { %v560_v55 = vpop.f32.mrb[0].mxu0 }
 0x28a   :  { %v275_v63 = vadd.f32 %v560_v55, %v533_v52  ;;  %v266_v0 = vpop.f32.mrb[1].mxu0 }
 0x28b   :  { %v267_v4 = vadd.f32 %v533_v52, %v266_v0  ;;  %v561_v5 = vpop.f32.mrb[2].mxu0 }
 0x28c   :  { %v278_v6 = vadd.f32 %v561_v5, %v533_v52  ;;  %v269_v7 = vpop.f32.mrb[3].mxu0  ;;  %v299_v14 = vmax.f32 %v275_v63, 0.0 }
 0x28d   :  { %v270_v11 = vadd.f32 %v533_v52, %v269_v7  ;;  %v297_v16 = vmax.f32 %v267_v4, 0.0 }
 0x28e   :  { %v300_v15 = vmax.f32 %v278_v6, 0.0 }
 0x28f   :  { %v298_v17 = vmax.f32 %v270_v11, 0.0 }
 0x290   :  { %v306_v18 = vpack.c.bf16 %v300_v15, %v299_v14 }
 0x291   :  { %v305_v19 = vpack.c.bf16 %v298_v17, %v297_v16 }
 0x293   :  { %570 = vmatprep.mubr.msk.bf16.mxu1 %vm89_vm0, %v305_v19 }
 0x294   :  { %571 = vmatmul.mubr.msk.bf16.vlgmr.msra.gmra.mrb[0].mxu1 %vm89_vm0, %v306_v18 }
 0x299   :  { %v564_v22 = vpop.f32.mrb[4].mxu0 }
 0x29a   :  { %v291_v23 = vadd.f32 %v564_v22, %v533_v52  ;;  %v282_v24 = vpop.f32.mrb[5].mxu0 }
 0x29b   :  { %v283_v25 = vadd.f32 %v533_v52, %v282_v24  ;;  %v565_v26 = vpop.f32.mrb[6].mxu0 }
 0x29c   :  { %v294_v27 = vadd.f32 %v565_v26, %v533_v52  ;;  %v285_v28 = vpop.f32.mrb[7].mxu0  ;;  %v303_v30 = vmax.f32 %v291_v23, 0.0 }
 0x29d   :  { %v286_v29 = vadd.f32 %v533_v52, %v285_v28  ;;  %v301_v32 = vmax.f32 %v283_v25, 0.0 }
 0x29e   :  { %v304_v31 = vmax.f32 %v294_v27, 0.0 }
 0x29f   :  { %v302_v33 = vmax.f32 %v286_v29, 0.0 }
 0x2a0   :  { %v308_v35 = vpack.c.bf16 %v304_v31, %v303_v30 }
 0x2a1   :  { %v307_v34 = vpack.c.bf16 %v302_v33, %v301_v32 }
 0x2a3   :  { %574 = vmatprep.mubr.msk.bf16.mxu1 %vm89_vm0, %v307_v34 }
 0x2a4   :  { %575 = vmatmul.mubr.msk.bf16.gmra.mrb[4].mxu1 %vm89_vm0, %v308_v35 }
 0x367   :  { %v572_v38 = vpop.f32.mrb[0].mxu1 }
 0x368   :  { %v378_v39 = vpop.f32.mrb[1].mxu1  ;;  %v387_v45 = vadd.f32 %v572_v38, %v538_v36 }
 0x369   :  { %v379_v41 = vadd.f32 %v538_v36, %v378_v39  ;;  %v573_v37 = vpop.f32.mrb[2].mxu1 }
 0x36a   :  { %v381_v42 = vpop.f32.mrb[3].mxu1  ;;  %v390_v47 = vadd.f32 %v573_v37, %v538_v36 }
 0x36b   :  { %409 = vxpose.xlu1.b32.start [1/8] (short) (narrow) %v379_v41, 8  ;;  %v382_v44 = vadd.f32 %v538_v36, %v381_v42 }
 0x36f   :  { %410 = vxpose.xlu1.b32.cont [2/8] (short) (narrow) %v382_v44, 8 }
 0x373   :  { %411 = vxpose.xlu1.b32.cont [3/8] (short) (narrow) %v387_v45, 8 }
 0x377   :  { %412 = vxpose.xlu1.b32.cont [4/8] (short) (narrow) %v390_v47, 8  ;;  %v576_v48 = vpop.f32.mrb[4].mxu1 }
 0x378   :  { %v394_v50 = vpop.f32.mrb[5].mxu1  ;;  %v403_v56 = vadd.f32 %v576_v48, %v538_v36 }
 0x379   :  { %v395_v51 = vadd.f32 %v538_v36, %v394_v50  ;;  %v577_v40 = vpop.f32.mrb[6].mxu1 }
 0x37a   :  { %v397_v53 = vpop.f32.mrb[7].mxu1  ;;  %v406_v57 = vadd.f32 %v577_v40, %v538_v36 }
 0x37b   :  { %413 = vxpose.xlu1.b32.cont [5/8] (short) (narrow) %v395_v51, 8  ;;  %v398_v54 = vadd.f32 %v538_v36, %v397_v53 }
 0x37f   :  { %414 = vxpose.xlu1.b32.cont [6/8] (short) (narrow) %v398_v54, 8 }
 0x383   :  { %415 = vxpose.xlu1.b32.cont [7/8] (short) (narrow) %v403_v56, 8 }
 0x387   :  { %416 = vxpose.xlu1.b32.end [8/8] (short) (narrow) %v406_v57, 8 }
 0x3eb   :  { %v425_v43 = vpop.trf.xlu1 }
 0x3ec   :  { %442 = vrot.lane.b32.xlu0 %v425_v43, %s609_s6  ;;  %v445_v59 = vcombine.high %v425_v43, %v610_v58  ;;  %v452_v61 = vrot.slane %v425_v43, %v699_v20 }
 0x3ee   :  { %v459_v49 = vrot.slane %v445_v59, %v699_v20 }
 0x45e   :  { %v443_v60 = vpop.permute.xlu0 %442 }
 0x45f   :  { %v460_v62 = vcombine.high %v443_v60, %v610_v58  ;;  %v467_v46 = vrot.slane %v443_v60, %v699_v20 }
 0x461   :  { %v474_v52 = vrot.slane %v460_v62, %v699_v20  ;;  %v475_v55 = vcombine.low %v452_v61, %v467_v46  ;;  %v476_v63 = vcombine.high %v452_v61, %v467_v46 }
 0x463   :  { %v483_v0 = vrot.slane %v475_v55, %v701_v21  ;;  %v490_v4 = vrot.slane %v476_v63, %v701_v21  ;;  %v491_v5 = vcombine.low %v459_v49, %v474_v52  ;;  %v492_v6 = vcombine.high %v459_v49, %v474_v52 }
 0x465   :  { %v499_v7 = vrot.slane %v491_v5, %v701_v21  ;;  %v506_v11 = vrot.slane %v492_v6, %v701_v21  ;;  %v507_v14 = vcombine.high %v483_v0, %v610_v58  ;;  %v508_v15 = vcombine.high %v490_v4, %v610_v58 }
 0x466   :  { %v511_v16 = vadd.f32 %v483_v0, %v654_v1  ;;  %v513_v17 = vadd.f32 %v490_v4, %v664_v3 }
 0x467   :  { %v509_v20 = vcombine.high %v499_v7, %v610_v58  ;;  %v510_v18 = vcombine.high %v506_v11, %v610_v58  ;;  %v512_v19 = vadd.f32 %v507_v14, %v659_v2  ;;  %v514_v22 = vadd.f32 %v508_v15, %v669_v8 }
 0x468   :  { %v515_v23 = vadd.f32 %v499_v7, %v674_v9  ;;  %v517_v24 = vadd.f32 %v506_v11, %v686_v12  ;;  %520 = vst.msk [vmem:[%s829_s7] sm:$0x3] %vm519_vm3, %v511_v16  ;;  %522 = vst.msk [vmem:[%s829_s7 + $0x4] sm:$0x3] %vm519_vm3, %v513_v17 }
 0x469   :  { %v516_v1 = vadd.f32 %v509_v20, %v679_v10  ;;  %v518_v2 = vadd.f32 %v510_v18, %v691_v13  ;;  %521 = vst.msk [vmem:[%s829_s7 + $0x2] sm:$0x3] %vm519_vm3, %v512_v19  ;;  %523 = vst.msk [vmem:[%s829_s7 + $0x6] sm:$0x3] %vm519_vm3, %v514_v22 }
 0x46a   :  { %524 = vst.msk [vmem:[%s829_s7 + $0x8] sm:$0x3] %vm519_vm3, %v515_v23  ;;  %526 = vst.msk [vmem:[%s829_s7 + $0xc] sm:$0x3] %vm519_vm3, %v517_v24 }
 0x46b   :  { %525 = vst.msk [vmem:[%s829_s7 + $0xa] sm:$0x3] %vm519_vm3, %v516_v1  ;;  %527 = vst.msk [vmem:[%s829_s7 + $0xe] sm:$0x3] %vm519_vm3, %v518_v2 }

// kernel: samba_forward.53
= control target key start
LH: loop header
LB: loop body
LE: loop exit
PB: predicated region body
PF: predicated region fallthrough
CT: control target
= control target key end

     0   :  { %v180_v0 = vmov 0.0   ;;  %vm181_vm0 = vmmov 0   ;;  %s235_s1 = inlined_call_operand.vmem [shape: bf16[128,128], index: 1, kind: input, shape index: {}]   ;;  %s236_s0 = inlined_call_operand.vmem [shape: bf16[8,128], index: 0, kind: input, shape index: {}]   ;;  %s237_s2 = inlined_call_operand.vmem [shape: f32[1,128], index: 2, kind: input, shape index: {}]   ;;  %s238_s3 = inlined_call_operand.vmem [shape: f32[8,128], index: 3, kind: output, shape index: {}]  }
   0x1   :  { %150 = vmatprep.subr.bf16.mxu0 %v180_v0  ;;  %v172_v1 = vld [vmem:[%s235_s1] sm:$0xff]   ;;  %166 = vmatprep.mubr.msk.bf16.mxu0 %vm181_vm0, %v180_v0  ;;  %v173_v2 = vld [vmem:[%s235_s1 + $0x8] sm:$0xff]   ;;  %v174_v3 = vld [vmem:[%s235_s1 + $0x10] sm:$0xff]  }
   0x2   :  { %151 = vmatpush3.bf16.msra.mxu0 %v172_v1  ;;  %v175_v4 = vld [vmem:[%s235_s1 + $0x18] sm:$0xff]   ;;  %v176_v5 = vld [vmem:[%s235_s1 + $0x20] sm:$0xff]   ;;  %v177_v6 = vld [vmem:[%s235_s1 + $0x28] sm:$0xff]  }
   0x3   :  { %152 = vmatprep.subr.bf16.mxu0 %v180_v0  ;;  %v178_v7 = vld [vmem:[%s235_s1 + $0x30] sm:$0xff]   ;;  %v179_v8 = vld [vmem:[%s235_s1 + $0x38] sm:$0xff]   ;;  %v15_v9 = vld [vmem:[%s236_s0] sm:$0xf] }
   0x4   :  { %v132_v10 = vld [vmem:[%s237_s2] ss:$0 sm:$0xff] }
   0x6   :  { %153 = vmatpush3.bf16.msra.mxu0 %v173_v2 }
   0x7   :  { %154 = vmatprep.subr.bf16.mxu0 %v180_v0 }
   0xa   :  { %155 = vmatpush3.bf16.msra.mxu0 %v174_v3 }
   0xb   :  { %156 = vmatprep.subr.bf16.mxu0 %v180_v0 }
   0xe   :  { %157 = vmatpush3.bf16.msra.mxu0 %v175_v4 }
   0xf   :  { %158 = vmatprep.subr.bf16.mxu0 %v180_v0 }
  0x12   :  { %159 = vmatpush3.bf16.msra.mxu0 %v176_v5 }
  0x13   :  { %160 = vmatprep.subr.bf16.mxu0 %v180_v0 }
  0x16   :  { %161 = vmatpush3.bf16.msra.mxu0 %v177_v6 }
  0x17   :  { %162 = vmatprep.subr.bf16.mxu0 %v180_v0 }
  0x1a   :  { %163 = vmatpush3.bf16.msra.mxu0 %v178_v7 }
  0x1b   :  { %164 = vmatprep.subr.bf16.mxu0 %v180_v0 }
  0x1e   :  { %165 = vmatpush3.bf16.msra.mxu0 %v179_v8 }
  0x21   :  { %167 = vmatmul.mubr.bf16.vlgmr.msra.gmra.mrb[0].mxu0 %v15_v9 }
  0xf4   :  { %v121_v11 = vpop.f32.mrb[0].mxu0 }
  0xf5   :  { %v122_v12 = vadd.f32 %v132_v10, %v121_v11  ;;  %v168_v13 = vpop.f32.mrb[1].mxu0 }
  0xf6   :  { %v124_v14 = vpop.f32.mrb[2].mxu0 }
  0xf7   :  { %127 = vst [vmem:[%s238_s3] sm:$0xff] %v122_v12  ;;  %v169_v15 = vpop.f32.mrb[3].mxu0 }

</bundles_post_ra>
